<compile_context>
chip_gen: v7x
topology: tpu7x:2x2x1
jax: 0.10.0
libtpu: 0.0.40
codegen_flags: <defaults>
</compile_context>

<pallas_src>
import numpy as np

import jax
import jax.numpy as jnp
from jax import lax
from jax.experimental import pallas as pl
from jax.experimental.pallas import tpu as pltpu


C_HID = 32


def _round_up(x: int, m: int) -> int:
    return ((x + m - 1) // m) * m


# ---------------------------------------------------------------------------
# Fused encoder kernel: conv1..conv5 + Linear for ONE image per grid step.
# ---------------------------------------------------------------------------
def _encoder_kernel(p1_ref, w1_ref, b1_ref, w2_ref, b2_ref, w3_ref, b3_ref,
                    w4_ref, b4_ref, w5_ref, b5_ref, d3_ref, d5_ref,
                    wl_ref, bl_ref, o_ref, pad2, pad3, pad4, pad5):
    f32 = jnp.float32

    def taps_matmul(pad_ref, w_ref, hw, cin, cout):
        """Sum of 9 tap GEMMs over a zero-padded [hw+2, hw+2, cin] slab."""
        n = hw * hw
        acc = jnp.zeros((n, cout), f32)
        for kh in range(3):
            for kw in range(3):
                tap = pad_ref[kh:kh + hw, kw:kw + hw, :].reshape(n, cin)
                acc = acc + jnp.dot(tap.astype(w_ref.dtype),
                                    w_ref[3 * kh + kw],
                                    preferred_element_type=f32)
        return acc

    # ---- conv1: [256, 9] @ [9, 32]  (im2col rows built in the wrapper) ----
    a1 = jnp.dot(p1_ref[0], w1_ref[...], preferred_element_type=f32)
    a1 = jnp.maximum(a1 + b1_ref[...], 0.0)                        # [256, 32]

    # ---- conv2: stride 1, 32 -> 32 on the 16x16 grid ----
    pad2[...] = jnp.zeros(pad2.shape, f32)
    pad2[1:17, 1:17, :] = a1.reshape(16, 16, 32)
    a2 = taps_matmul(pad2, w2_ref, 16, 32, 32)
    a2 = jnp.maximum(a2 + b2_ref[...], 0.0)                        # [256, 32]

    # ---- conv3: stride 2, 32 -> 64 (stride-1 compute + row selection) ----
    pad3[...] = jnp.zeros(pad3.shape, f32)
    pad3[1:17, 1:17, :] = a2.reshape(16, 16, 32)
    y3 = taps_matmul(pad3, w3_ref, 16, 32, 64)                     # [256, 64]
    a3 = jnp.maximum(jnp.dot(d3_ref[...], y3, preferred_element_type=f32)
                     + b3_ref[...], 0.0)                           # [64, 64]

    # ---- conv4: stride 1, 64 -> 64 on the 8x8 grid ----
    pad4[...] = jnp.zeros(pad4.shape, f32)
    pad4[1:9, 1:9, :] = a3.reshape(8, 8, 64)
    a4 = taps_matmul(pad4, w4_ref, 8, 64, 64)
    a4 = jnp.maximum(a4 + b4_ref[...], 0.0)                        # [64, 64]

    # ---- conv5: stride 2, 64 -> 64 (stride-1 compute + row selection) ----
    pad5[...] = jnp.zeros(pad5.shape, f32)
    pad5[1:9, 1:9, :] = a4.reshape(8, 8, 64)
    y5 = taps_matmul(pad5, w5_ref, 8, 64, 64)                      # [64, 64]
    a5 = jnp.maximum(jnp.dot(d5_ref[...], y5, preferred_element_type=f32)
                     + b5_ref[...], 0.0)                           # [16, 64]

    # ---- Linear(1024 -> z), flatten order (h, w, c): 16 per-position GEMMs --
    z = bl_ref[...].astype(f32)                                    # [1, Zp]
    for p in range(16):
        z = z + jnp.dot(a5[p:p + 1, :].astype(wl_ref.dtype), wl_ref[p],
                        preferred_element_type=f32)
    o_ref[...] = z.reshape(1, 1, -1).astype(o_ref.dtype)


# ---------------------------------------------------------------------------
# Wrapper: layout plumbing only (conv1 im2col, weight reshapes, z padding).
# ---------------------------------------------------------------------------
def _downsample_matrix(h: int, w: int) -> jnp.ndarray:
    """0/1 matrix selecting rows (2i, 2j) from a flat [h*w] spatial grid."""
    ho, wo = h // 2, w // 2
    rows = np.arange(ho * wo)
    src = (2 * (rows // wo)) * w + 2 * (rows % wo)
    d = np.zeros((ho * wo, h * w), np.float32)
    d[rows, src] = 1.0
    return jnp.asarray(d)


# TODO(synk): conv1's 9-wide patch rows (Cin=1, ~9 KB/image) are built in the
# wrapper; they could be folded in-kernel as a parity-block VPU stencil.
def _conv1_im2col(x):
    """x: [B, 32, 32] -> [B, 256, 9] stride-2 3x3 patch rows (tap-major)."""
    b = x.shape[0]
    xp = jnp.pad(x, ((0, 0), (1, 1), (1, 1)))
    cols = [xp[:, kh:kh + 31:2, kw:kw + 31:2]
            for kh in range(3) for kw in range(3)]
    return jnp.stack(cols, axis=-1).reshape(b, 256, 9)


def conv_encoder_forward(x_nchw, params, *, compute_dtype=jnp.float32):
    """x: [B,1,32,32] float32 -> z: [B, z_dim] float32."""
    (w1, b1), (w2, b2), (w3, b3), (w4, b4), (w5, b5), (wl, bl) = params
    B = x_nchw.shape[0]
    assert x_nchw.shape[1:] == (1, 32, 32), x_nchw.shape
    z_dim = wl.shape[1]
    zp = _round_up(z_dim, 128)                     # lane-dense output store

    p1 = _conv1_im2col(x_nchw[:, 0, :, :]).astype(compute_dtype)   # [B,256,9]
    w1k = w1.reshape(9, C_HID).astype(compute_dtype)
    w2k = w2.reshape(9, C_HID, C_HID).astype(compute_dtype)
    w3k = w3.reshape(9, C_HID, 2 * C_HID).astype(compute_dtype)
    w4k = w4.reshape(9, 2 * C_HID, 2 * C_HID).astype(compute_dtype)
    w5k = w5.reshape(9, 2 * C_HID, 2 * C_HID).astype(compute_dtype)
    wlk = jnp.pad(wl, ((0, 0), (0, zp - z_dim)))
    wlk = wlk.reshape(16, 2 * C_HID, zp).astype(compute_dtype)
    blp = jnp.pad(bl, ((0, 0), (0, zp - z_dim))).astype(jnp.float32)
    d3 = _downsample_matrix(16, 16)                # [64, 256]
    d5 = _downsample_matrix(8, 8)                  # [16, 64]

    consts = [w1k, b1, w2k, b2, w3k, b3, w4k, b4, w5k, b5, d3, d5, wlk, blp]

    def const_spec(a):
        nd = a.ndim
        return pl.BlockSpec(a.shape, lambda i, nd=nd: (0,) * nd)

    flops_per_img = 2 * (256 * 9 * 32 + 9 * 256 * 32 * 32 + 9 * 256 * 32 * 64
                         + 64 * 256 * 64 + 2 * 9 * 64 * 64 * 64
                         + 16 * 64 * 64 + 16 * 64 * zp)
    const_bytes = sum(int(np.prod(a.shape)) * a.dtype.itemsize for a in consts)
    cost = pl.CostEstimate(
        flops=B * flops_per_img, transcendentals=0,
        bytes_accessed=int(p1.size * p1.dtype.itemsize + B * zp * 4
                           + const_bytes))

    out = pl.pallas_call(
        _encoder_kernel,
        out_shape=jax.ShapeDtypeStruct((B, 1, zp), jnp.float32),
        grid=(B,),
        in_specs=[pl.BlockSpec((1, 256, 9), lambda i: (i, 0, 0))]
                 + [const_spec(a) for a in consts],
        out_specs=pl.BlockSpec((1, 1, zp), lambda i: (i, 0, 0)),
        scratch_shapes=[
            pltpu.VMEM((18, 18, C_HID), jnp.float32),       # pad2
            pltpu.VMEM((18, 18, C_HID), jnp.float32),       # pad3
            pltpu.VMEM((10, 10, 2 * C_HID), jnp.float32),   # pad4
            pltpu.VMEM((10, 10, 2 * C_HID), jnp.float32),   # pad5
        ],
        compiler_params=pltpu.CompilerParams(
            dimension_semantics=("parallel",)),
        cost_estimate=cost,
    )(p1, *consts)

    return out.reshape(B, zp)[:, :z_dim]


# ---------------------------------------------------------------------------
# Params (PyTorch-style uniform(-1/sqrt(fan_in), 1/sqrt(fan_in)) init)
# ---------------------------------------------------------------------------
def init_params(key, z_dim, c_hid=C_HID):
    keys = jax.random.split(key, 12)

    def uni(k, shape, fan_in):
        bound = 1.0 / jnp.sqrt(float(fan_in))
        return jax.random.uniform(k, shape, jnp.float32, -bound, bound)

    def conv_p(kw_, kb_, cin, cout):
        fan_in = cin * 9
        return (uni(kw_, (3, 3, cin, cout), fan_in),   # HWIO
                uni(kb_, (1, cout), fan_in))

    p1 = conv_p(keys[0], keys[1], 1, c_hid)
    p2 = conv_p(keys[2], keys[3], c_hid, c_hid)
    p3 = conv_p(keys[4], keys[5], c_hid, 2 * c_hid)
    p4 = conv_p(keys[6], keys[7], 2 * c_hid, 2 * c_hid)
    p5 = conv_p(keys[8], keys[9], 2 * c_hid, 2 * c_hid)
    d_in = 2 * 16 * c_hid                              # 1024 for 32x32 input
    p_lin = (uni(keys[10], (d_in, z_dim), d_in),
             uni(keys[11], (1, z_dim), d_in))
    return (p1, p2, p3, p4, p5, p_lin)


# ---------------------------------------------------------------------------
# Pure-JAX reference (real convolutions) for correctness checking
# ---------------------------------------------------------------------------
def reference_forward(x_nchw, params):
    x = jnp.transpose(x_nchw, (0, 2, 3, 1))
    strides = (2, 1, 2, 1, 2)
    for (w, b), s in zip(params[:-1], strides):
        x = lax.conv_general_dilated(
            x, w, window_strides=(s, s), padding=((1, 1), (1, 1)),
            dimension_numbers=("NHWC", "HWIO", "NHWC"),
            precision=lax.Precision.HIGHEST)
        x = jnp.maximum(x + b.reshape(1, 1, 1, -1), 0.0)
    wl, bl = params[-1]
    h = x.reshape(x.shape[0], -1)                      # (h, w, c) flatten order
    return jnp.dot(h, wl, precision=lax.Precision.HIGHEST) + bl


if __name__ == "__main__":
    key = jax.random.PRNGKey(0)
    k_params, k_x = jax.random.split(key)

    B, z_dim = 2, 20
    params = init_params(k_params, z_dim)
    x = jax.random.normal(k_x, (B, 1, 32, 32), jnp.float32)

    forward = jax.jit(conv_encoder_forward)
    z = forward(x, params)
    jax.block_until_ready(z)
    assert z.shape == (B, z_dim), z.shape

    ref = reference_forward(x, params)
    rel_err = float(jnp.max(jnp.abs(z - ref)) /
                    (jnp.max(jnp.abs(ref)) + 1e-8))
    assert rel_err < 5e-2, f"relative error too large: {rel_err}"

    print("KERNEL_OK")
</pallas_src>

<mosaic_0001>
module attributes {stable_mosaic.version = 11 : i64} {
  func.func @_encoder_kernel(%arg0: i32, %arg1: memref<1x256x9xf32, #tpu.memory_space<vmem>>, %arg2: memref<9x32xf32, #tpu.memory_space<vmem>>, %arg3: memref<1x32xf32, #tpu.memory_space<vmem>>, %arg4: memref<9x32x32xf32, #tpu.memory_space<vmem>>, %arg5: memref<1x32xf32, #tpu.memory_space<vmem>>, %arg6: memref<9x32x64xf32, #tpu.memory_space<vmem>>, %arg7: memref<1x64xf32, #tpu.memory_space<vmem>>, %arg8: memref<9x64x64xf32, #tpu.memory_space<vmem>>, %arg9: memref<1x64xf32, #tpu.memory_space<vmem>>, %arg10: memref<9x64x64xf32, #tpu.memory_space<vmem>>, %arg11: memref<1x64xf32, #tpu.memory_space<vmem>>, %arg12: memref<64x256xf32, #tpu.memory_space<vmem>>, %arg13: memref<16x64xf32, #tpu.memory_space<vmem>>, %arg14: memref<16x64x128xf32, #tpu.memory_space<vmem>>, %arg15: memref<1x128xf32, #tpu.memory_space<vmem>>, %arg16: memref<1x1x128xf32, #tpu.memory_space<vmem>>, %arg17: memref<18x18x32xf32, #tpu.memory_space<vmem>>, %arg18: memref<18x18x32xf32, #tpu.memory_space<vmem>>, %arg19: memref<10x10x64xf32, #tpu.memory_space<vmem>>, %arg20: memref<10x10x64xf32, #tpu.memory_space<vmem>>) attributes {dimension_semantics = [#tpu.dimension_semantics<parallel>], iteration_bounds = array<i64: 2>, scalar_prefetch = 0 : i64, scratch_operands = 4 : i64, tpu.core_type = #tpu.core_type<tc>, window_params = [{transform_indices = @transform_0, window_bounds = array<i64: 1, 256, 9>}, {pipeline_mode = #tpu.pipeline_mode<synchronous>, transform_indices = @transform_1, window_bounds = array<i64: 9, 32>}, {pipeline_mode = #tpu.pipeline_mode<synchronous>, transform_indices = @transform_2, window_bounds = array<i64: 1, 32>}, {pipeline_mode = #tpu.pipeline_mode<synchronous>, transform_indices = @transform_3, window_bounds = array<i64: 9, 32, 32>}, {pipeline_mode = #tpu.pipeline_mode<synchronous>, transform_indices = @transform_4, window_bounds = array<i64: 1, 32>}, {pipeline_mode = #tpu.pipeline_mode<synchronous>, transform_indices = @transform_5, window_bounds = array<i64: 9, 32, 64>}, {pipeline_mode = #tpu.pipeline_mode<synchronous>, transform_indices = @transform_6, window_bounds = array<i64: 1, 64>}, {pipeline_mode = #tpu.pipeline_mode<synchronous>, transform_indices = @transform_7, window_bounds = array<i64: 9, 64, 64>}, {pipeline_mode = #tpu.pipeline_mode<synchronous>, transform_indices = @transform_8, window_bounds = array<i64: 1, 64>}, {pipeline_mode = #tpu.pipeline_mode<synchronous>, transform_indices = @transform_9, window_bounds = array<i64: 9, 64, 64>}, {pipeline_mode = #tpu.pipeline_mode<synchronous>, transform_indices = @transform_10, window_bounds = array<i64: 1, 64>}, {pipeline_mode = #tpu.pipeline_mode<synchronous>, transform_indices = @transform_11, window_bounds = array<i64: 64, 256>}, {pipeline_mode = #tpu.pipeline_mode<synchronous>, transform_indices = @transform_12, window_bounds = array<i64: 16, 64>}, {pipeline_mode = #tpu.pipeline_mode<synchronous>, transform_indices = @transform_13, window_bounds = array<i64: 16, 64, 128>}, {pipeline_mode = #tpu.pipeline_mode<synchronous>, transform_indices = @transform_14, window_bounds = array<i64: 1, 128>}, {transform_indices = @transform_15, window_bounds = array<i64: 1, 1, 128>}]} {
    %c0 = arith.constant 0 : index
    %c0_0 = arith.constant 0 : index
    %c0_1 = arith.constant 0 : index
    %0 = vector.load %arg1[%c0, %c0_0, %c0_1] : memref<1x256x9xf32, #tpu.memory_space<vmem>>, vector<1x256x9xf32>
    %1 = vector.shape_cast %0 : vector<1x256x9xf32> to vector<256x9xf32>
    %c0_2 = arith.constant 0 : index
    %c0_3 = arith.constant 0 : index
    %2 = vector.load %arg2[%c0_2, %c0_3] : memref<9x32xf32, #tpu.memory_space<vmem>>, vector<9x32xf32>
    %cst = arith.constant dense<0.000000e+00> : vector<256x32xf32>
    %3 = tpu.matmul %1, %2, %cst {dimension_numbers = #tpu.dot_dimension_numbers<[1], [0], [0], [1], [0, 0, 1, 1], [], []>} : vector<256x9xf32>, vector<9x32xf32>, vector<256x32xf32> -> vector<256x32xf32>
    %c0_4 = arith.constant 0 : index
    %c0_5 = arith.constant 0 : index
    %4 = vector.load %arg3[%c0_4, %c0_5] : memref<1x32xf32, #tpu.memory_space<vmem>>, vector<1x32xf32>
    %5 = vector.broadcast %4 : vector<1x32xf32> to vector<256x32xf32>
    %6 = arith.addf %3, %5 : vector<256x32xf32>
    %cst_6 = arith.constant 0.000000e+00 : f32
    %7 = vector.broadcast %cst_6 : f32 to vector<256x32xf32>
    %8 = arith.maximumf %6, %7 : vector<256x32xf32>
    %cst_7 = arith.constant 0.000000e+00 : f32
    %9 = vector.broadcast %cst_7 : f32 to vector<18x18x32xf32>
    %c0_8 = arith.constant 0 : index
    %c0_9 = arith.constant 0 : index
    %c0_10 = arith.constant 0 : index
    %10 = vector.load %arg17[%c0_8, %c0_9, %c0_10] : memref<18x18x32xf32, #tpu.memory_space<vmem>>, vector<18x18x32xf32>
    tpu.vector_store %arg17[%c0_8, %c0_9, %c0_10], %9 {strides = array<i32>} : memref<18x18x32xf32, #tpu.memory_space<vmem>>, vector<18x18x32xf32>,
    %11 = vector.shape_cast %8 : vector<256x32xf32> to vector<16x16x32xf32>
    %c1 = arith.constant 1 : index
    %c1_11 = arith.constant 1 : index
    %c0_12 = arith.constant 0 : index
    %12 = vector.load %arg17[%c1, %c1_11, %c0_12] : memref<18x18x32xf32, #tpu.memory_space<vmem>>, vector<16x16x32xf32>
    tpu.vector_store %arg17[%c1, %c1_11, %c0_12], %11 {strides = array<i32>} : memref<18x18x32xf32, #tpu.memory_space<vmem>>, vector<16x16x32xf32>,
    %cst_13 = arith.constant 0.000000e+00 : f32
    %13 = vector.broadcast %cst_13 : f32 to vector<256x32xf32>
    %c0_14 = arith.constant 0 : index
    %c0_15 = arith.constant 0 : index
    %c0_16 = arith.constant 0 : index
    %14 = vector.load %arg17[%c0_14, %c0_15, %c0_16] : memref<18x18x32xf32, #tpu.memory_space<vmem>>, vector<16x16x32xf32>
    %15 = vector.shape_cast %14 : vector<16x16x32xf32> to vector<256x32xf32>
    %c0_17 = arith.constant 0 : index
    %c0_18 = arith.constant 0 : index
    %c0_19 = arith.constant 0 : index
    %16 = vector.load %arg4[%c0_17, %c0_18, %c0_19] : memref<9x32x32xf32, #tpu.memory_space<vmem>>, vector<1x32x32xf32>
    %17 = vector.shape_cast %16 : vector<1x32x32xf32> to vector<32x32xf32>
    %cst_20 = arith.constant dense<0.000000e+00> : vector<256x32xf32>
    %18 = tpu.matmul %15, %17, %cst_20 {dimension_numbers = #tpu.dot_dimension_numbers<[1], [0], [0], [1], [0, 0, 1, 1], [], []>} : vector<256x32xf32>, vector<32x32xf32>, vector<256x32xf32> -> vector<256x32xf32>
    %19 = arith.addf %13, %18 : vector<256x32xf32>
    %c0_21 = arith.constant 0 : index
    %c1_22 = arith.constant 1 : index
    %c0_23 = arith.constant 0 : index
    %20 = vector.load %arg17[%c0_21, %c1_22, %c0_23] : memref<18x18x32xf32, #tpu.memory_space<vmem>>, vector<16x16x32xf32>
    %21 = vector.shape_cast %20 : vector<16x16x32xf32> to vector<256x32xf32>
    %c1_24 = arith.constant 1 : index
    %c0_25 = arith.constant 0 : index
    %c0_26 = arith.constant 0 : index
    %22 = vector.load %arg4[%c1_24, %c0_25, %c0_26] : memref<9x32x32xf32, #tpu.memory_space<vmem>>, vector<1x32x32xf32>
    %23 = vector.shape_cast %22 : vector<1x32x32xf32> to vector<32x32xf32>
    %cst_27 = arith.constant dense<0.000000e+00> : vector<256x32xf32>
    %24 = tpu.matmul %21, %23, %cst_27 {dimension_numbers = #tpu.dot_dimension_numbers<[1], [0], [0], [1], [0, 0, 1, 1], [], []>} : vector<256x32xf32>, vector<32x32xf32>, vector<256x32xf32> -> vector<256x32xf32>
    %25 = arith.addf %19, %24 : vector<256x32xf32>
    %c0_28 = arith.constant 0 : index
    %c2 = arith.constant 2 : index
    %c0_29 = arith.constant 0 : index
    %26 = vector.load %arg17[%c0_28, %c2, %c0_29] : memref<18x18x32xf32, #tpu.memory_space<vmem>>, vector<16x16x32xf32>
    %27 = vector.shape_cast %26 : vector<16x16x32xf32> to vector<256x32xf32>
    %c2_30 = arith.constant 2 : index
    %c0_31 = arith.constant 0 : index
    %c0_32 = arith.constant 0 : index
    %28 = vector.load %arg4[%c2_30, %c0_31, %c0_32] : memref<9x32x32xf32, #tpu.memory_space<vmem>>, vector<1x32x32xf32>
    %29 = vector.shape_cast %28 : vector<1x32x32xf32> to vector<32x32xf32>
    %cst_33 = arith.constant dense<0.000000e+00> : vector<256x32xf32>
    %30 = tpu.matmul %27, %29, %cst_33 {dimension_numbers = #tpu.dot_dimension_numbers<[1], [0], [0], [1], [0, 0, 1, 1], [], []>} : vector<256x32xf32>, vector<32x32xf32>, vector<256x32xf32> -> vector<256x32xf32>
    %31 = arith.addf %25, %30 : vector<256x32xf32>
    %c1_34 = arith.constant 1 : index
    %c0_35 = arith.constant 0 : index
    %c0_36 = arith.constant 0 : index
    %32 = vector.load %arg17[%c1_34, %c0_35, %c0_36] : memref<18x18x32xf32, #tpu.memory_space<vmem>>, vector<16x16x32xf32>
    %33 = vector.shape_cast %32 : vector<16x16x32xf32> to vector<256x32xf32>
    %c3 = arith.constant 3 : index
    %c0_37 = arith.constant 0 : index
    %c0_38 = arith.constant 0 : index
    %34 = vector.load %arg4[%c3, %c0_37, %c0_38] : memref<9x32x32xf32, #tpu.memory_space<vmem>>, vector<1x32x32xf32>
    %35 = vector.shape_cast %34 : vector<1x32x32xf32> to vector<32x32xf32>
    %cst_39 = arith.constant dense<0.000000e+00> : vector<256x32xf32>
    %36 = tpu.matmul %33, %35, %cst_39 {dimension_numbers = #tpu.dot_dimension_numbers<[1], [0], [0], [1], [0, 0, 1, 1], [], []>} : vector<256x32xf32>, vector<32x32xf32>, vector<256x32xf32> -> vector<256x32xf32>
    %37 = arith.addf %31, %36 : vector<256x32xf32>
    %c1_40 = arith.constant 1 : index
    %c1_41 = arith.constant 1 : index
    %c0_42 = arith.constant 0 : index
    %38 = vector.load %arg17[%c1_40, %c1_41, %c0_42] : memref<18x18x32xf32, #tpu.memory_space<vmem>>, vector<16x16x32xf32>
    %39 = vector.shape_cast %38 : vector<16x16x32xf32> to vector<256x32xf32>
    %c4 = arith.constant 4 : index
    %c0_43 = arith.constant 0 : index
    %c0_44 = arith.constant 0 : index
    %40 = vector.load %arg4[%c4, %c0_43, %c0_44] : memref<9x32x32xf32, #tpu.memory_space<vmem>>, vector<1x32x32xf32>
    %41 = vector.shape_cast %40 : vector<1x32x32xf32> to vector<32x32xf32>
    %cst_45 = arith.constant dense<0.000000e+00> : vector<256x32xf32>
    %42 = tpu.matmul %39, %41, %cst_45 {dimension_numbers = #tpu.dot_dimension_numbers<[1], [0], [0], [1], [0, 0, 1, 1], [], []>} : vector<256x32xf32>, vector<32x32xf32>, vector<256x32xf32> -> vector<256x32xf32>
    %43 = arith.addf %37, %42 : vector<256x32xf32>
    %c1_46 = arith.constant 1 : index
    %c2_47 = arith.constant 2 : index
    %c0_48 = arith.constant 0 : index
    %44 = vector.load %arg17[%c1_46, %c2_47, %c0_48] : memref<18x18x32xf32, #tpu.memory_space<vmem>>, vector<16x16x32xf32>
    %45 = vector.shape_cast %44 : vector<16x16x32xf32> to vector<256x32xf32>
    %c5 = arith.constant 5 : index
    %c0_49 = arith.constant 0 : index
    %c0_50 = arith.constant 0 : index
    %46 = vector.load %arg4[%c5, %c0_49, %c0_50] : memref<9x32x32xf32, #tpu.memory_space<vmem>>, vector<1x32x32xf32>
    %47 = vector.shape_cast %46 : vector<1x32x32xf32> to vector<32x32xf32>
    %cst_51 = arith.constant dense<0.000000e+00> : vector<256x32xf32>
    %48 = tpu.matmul %45, %47, %cst_51 {dimension_numbers = #tpu.dot_dimension_numbers<[1], [0], [0], [1], [0, 0, 1, 1], [], []>} : vector<256x32xf32>, vector<32x32xf32>, vector<256x32xf32> -> vector<256x32xf32>
    %49 = arith.addf %43, %48 : vector<256x32xf32>
    %c2_52 = arith.constant 2 : index
    %c0_53 = arith.constant 0 : index
    %c0_54 = arith.constant 0 : index
    %50 = vector.load %arg17[%c2_52, %c0_53, %c0_54] : memref<18x18x32xf32, #tpu.memory_space<vmem>>, vector<16x16x32xf32>
    %51 = vector.shape_cast %50 : vector<16x16x32xf32> to vector<256x32xf32>
    %c6 = arith.constant 6 : index
    %c0_55 = arith.constant 0 : index
    %c0_56 = arith.constant 0 : index
    %52 = vector.load %arg4[%c6, %c0_55, %c0_56] : memref<9x32x32xf32, #tpu.memory_space<vmem>>, vector<1x32x32xf32>
    %53 = vector.shape_cast %52 : vector<1x32x32xf32> to vector<32x32xf32>
    %cst_57 = arith.constant dense<0.000000e+00> : vector<256x32xf32>
    %54 = tpu.matmul %51, %53, %cst_57 {dimension_numbers = #tpu.dot_dimension_numbers<[1], [0], [0], [1], [0, 0, 1, 1], [], []>} : vector<256x32xf32>, vector<32x32xf32>, vector<256x32xf32> -> vector<256x32xf32>
    %55 = arith.addf %49, %54 : vector<256x32xf32>
    %c2_58 = arith.constant 2 : index
    %c1_59 = arith.constant 1 : index
    %c0_60 = arith.constant 0 : index
    %56 = vector.load %arg17[%c2_58, %c1_59, %c0_60] : memref<18x18x32xf32, #tpu.memory_space<vmem>>, vector<16x16x32xf32>
    %57 = vector.shape_cast %56 : vector<16x16x32xf32> to vector<256x32xf32>
    %c7 = arith.constant 7 : index
    %c0_61 = arith.constant 0 : index
    %c0_62 = arith.constant 0 : index
    %58 = vector.load %arg4[%c7, %c0_61, %c0_62] : memref<9x32x32xf32, #tpu.memory_space<vmem>>, vector<1x32x32xf32>
    %59 = vector.shape_cast %58 : vector<1x32x32xf32> to vector<32x32xf32>
    %cst_63 = arith.constant dense<0.000000e+00> : vector<256x32xf32>
    %60 = tpu.matmul %57, %59, %cst_63 {dimension_numbers = #tpu.dot_dimension_numbers<[1], [0], [0], [1], [0, 0, 1, 1], [], []>} : vector<256x32xf32>, vector<32x32xf32>, vector<256x32xf32> -> vector<256x32xf32>
    %61 = arith.addf %55, %60 : vector<256x32xf32>
    %c2_64 = arith.constant 2 : index
    %c2_65 = arith.constant 2 : index
    %c0_66 = arith.constant 0 : index
    %62 = vector.load %arg17[%c2_64, %c2_65, %c0_66] : memref<18x18x32xf32, #tpu.memory_space<vmem>>, vector<16x16x32xf32>
    %63 = vector.shape_cast %62 : vector<16x16x32xf32> to vector<256x32xf32>
    %c8 = arith.constant 8 : index
    %c0_67 = arith.constant 0 : index
    %c0_68 = arith.constant 0 : index
    %64 = vector.load %arg4[%c8, %c0_67, %c0_68] : memref<9x32x32xf32, #tpu.memory_space<vmem>>, vector<1x32x32xf32>
    %65 = vector.shape_cast %64 : vector<1x32x32xf32> to vector<32x32xf32>
    %cst_69 = arith.constant dense<0.000000e+00> : vector<256x32xf32>
    %66 = tpu.matmul %63, %65, %cst_69 {dimension_numbers = #tpu.dot_dimension_numbers<[1], [0], [0], [1], [0, 0, 1, 1], [], []>} : vector<256x32xf32>, vector<32x32xf32>, vector<256x32xf32> -> vector<256x32xf32>
    %67 = arith.addf %61, %66 : vector<256x32xf32>
    %c0_70 = arith.constant 0 : index
    %c0_71 = arith.constant 0 : index
    %68 = vector.load %arg5[%c0_70, %c0_71] : memref<1x32xf32, #tpu.memory_space<vmem>>, vector<1x32xf32>
    %69 = vector.broadcast %68 : vector<1x32xf32> to vector<256x32xf32>
    %70 = arith.addf %67, %69 : vector<256x32xf32>
    %cst_72 = arith.constant 0.000000e+00 : f32
    %71 = vector.broadcast %cst_72 : f32 to vector<256x32xf32>
    %72 = arith.maximumf %70, %71 : vector<256x32xf32>
    %cst_73 = arith.constant 0.000000e+00 : f32
    %73 = vector.broadcast %cst_73 : f32 to vector<18x18x32xf32>
    %c0_74 = arith.constant 0 : index
    %c0_75 = arith.constant 0 : index
    %c0_76 = arith.constant 0 : index
    %74 = vector.load %arg18[%c0_74, %c0_75, %c0_76] : memref<18x18x32xf32, #tpu.memory_space<vmem>>, vector<18x18x32xf32>
    tpu.vector_store %arg18[%c0_74, %c0_75, %c0_76], %73 {strides = array<i32>} : memref<18x18x32xf32, #tpu.memory_space<vmem>>, vector<18x18x32xf32>,
    %75 = vector.shape_cast %72 : vector<256x32xf32> to vector<16x16x32xf32>
    %c1_77 = arith.constant 1 : index
    %c1_78 = arith.constant 1 : index
    %c0_79 = arith.constant 0 : index
    %76 = vector.load %arg18[%c1_77, %c1_78, %c0_79] : memref<18x18x32xf32, #tpu.memory_space<vmem>>, vector<16x16x32xf32>
    tpu.vector_store %arg18[%c1_77, %c1_78, %c0_79], %75 {strides = array<i32>} : memref<18x18x32xf32, #tpu.memory_space<vmem>>, vector<16x16x32xf32>,
    %cst_80 = arith.constant 0.000000e+00 : f32
    %77 = vector.broadcast %cst_80 : f32 to vector<256x64xf32>
    %c0_81 = arith.constant 0 : index
    %c0_82 = arith.constant 0 : index
    %c0_83 = arith.constant 0 : index
    %78 = vector.load %arg18[%c0_81, %c0_82, %c0_83] : memref<18x18x32xf32, #tpu.memory_space<vmem>>, vector<16x16x32xf32>
    %79 = vector.shape_cast %78 : vector<16x16x32xf32> to vector<256x32xf32>
    %c0_84 = arith.constant 0 : index
    %c0_85 = arith.constant 0 : index
    %c0_86 = arith.constant 0 : index
    %80 = vector.load %arg6[%c0_84, %c0_85, %c0_86] : memref<9x32x64xf32, #tpu.memory_space<vmem>>, vector<1x32x64xf32>
    %81 = vector.shape_cast %80 : vector<1x32x64xf32> to vector<32x64xf32>
    %cst_87 = arith.constant dense<0.000000e+00> : vector<256x64xf32>
    %82 = tpu.matmul %79, %81, %cst_87 {dimension_numbers = #tpu.dot_dimension_numbers<[1], [0], [0], [1], [0, 0, 1, 1], [], []>} : vector<256x32xf32>, vector<32x64xf32>, vector<256x64xf32> -> vector<256x64xf32>
    %83 = arith.addf %77, %82 : vector<256x64xf32>
    %c0_88 = arith.constant 0 : index
    %c1_89 = arith.constant 1 : index
    %c0_90 = arith.constant 0 : index
    %84 = vector.load %arg18[%c0_88, %c1_89, %c0_90] : memref<18x18x32xf32, #tpu.memory_space<vmem>>, vector<16x16x32xf32>
    %85 = vector.shape_cast %84 : vector<16x16x32xf32> to vector<256x32xf32>
    %c1_91 = arith.constant 1 : index
    %c0_92 = arith.constant 0 : index
    %c0_93 = arith.constant 0 : index
    %86 = vector.load %arg6[%c1_91, %c0_92, %c0_93] : memref<9x32x64xf32, #tpu.memory_space<vmem>>, vector<1x32x64xf32>
    %87 = vector.shape_cast %86 : vector<1x32x64xf32> to vector<32x64xf32>
    %cst_94 = arith.constant dense<0.000000e+00> : vector<256x64xf32>
    %88 = tpu.matmul %85, %87, %cst_94 {dimension_numbers = #tpu.dot_dimension_numbers<[1], [0], [0], [1], [0, 0, 1, 1], [], []>} : vector<256x32xf32>, vector<32x64xf32>, vector<256x64xf32> -> vector<256x64xf32>
    %89 = arith.addf %83, %88 : vector<256x64xf32>
    %c0_95 = arith.constant 0 : index
    %c2_96 = arith.constant 2 : index
    %c0_97 = arith.constant 0 : index
    %90 = vector.load %arg18[%c0_95, %c2_96, %c0_97] : memref<18x18x32xf32, #tpu.memory_space<vmem>>, vector<16x16x32xf32>
    %91 = vector.shape_cast %90 : vector<16x16x32xf32> to vector<256x32xf32>
    %c2_98 = arith.constant 2 : index
    %c0_99 = arith.constant 0 : index
    %c0_100 = arith.constant 0 : index
    %92 = vector.load %arg6[%c2_98, %c0_99, %c0_100] : memref<9x32x64xf32, #tpu.memory_space<vmem>>, vector<1x32x64xf32>
    %93 = vector.shape_cast %92 : vector<1x32x64xf32> to vector<32x64xf32>
    %cst_101 = arith.constant dense<0.000000e+00> : vector<256x64xf32>
    %94 = tpu.matmul %91, %93, %cst_101 {dimension_numbers = #tpu.dot_dimension_numbers<[1], [0], [0], [1], [0, 0, 1, 1], [], []>} : vector<256x32xf32>, vector<32x64xf32>, vector<256x64xf32> -> vector<256x64xf32>
    %95 = arith.addf %89, %94 : vector<256x64xf32>
    %c1_102 = arith.constant 1 : index
    %c0_103 = arith.constant 0 : index
    %c0_104 = arith.constant 0 : index
    %96 = vector.load %arg18[%c1_102, %c0_103, %c0_104] : memref<18x18x32xf32, #tpu.memory_space<vmem>>, vector<16x16x32xf32>
    %97 = vector.shape_cast %96 : vector<16x16x32xf32> to vector<256x32xf32>
    %c3_105 = arith.constant 3 : index
    %c0_106 = arith.constant 0 : index
    %c0_107 = arith.constant 0 : index
    %98 = vector.load %arg6[%c3_105, %c0_106, %c0_107] : memref<9x32x64xf32, #tpu.memory_space<vmem>>, vector<1x32x64xf32>
    %99 = vector.shape_cast %98 : vector<1x32x64xf32> to vector<32x64xf32>
    %cst_108 = arith.constant dense<0.000000e+00> : vector<256x64xf32>
    %100 = tpu.matmul %97, %99, %cst_108 {dimension_numbers = #tpu.dot_dimension_numbers<[1], [0], [0], [1], [0, 0, 1, 1], [], []>} : vector<256x32xf32>, vector<32x64xf32>, vector<256x64xf32> -> vector<256x64xf32>
    %101 = arith.addf %95, %100 : vector<256x64xf32>
    %c1_109 = arith.constant 1 : index
    %c1_110 = arith.constant 1 : index
    %c0_111 = arith.constant 0 : index
    %102 = vector.load %arg18[%c1_109, %c1_110, %c0_111] : memref<18x18x32xf32, #tpu.memory_space<vmem>>, vector<16x16x32xf32>
    %103 = vector.shape_cast %102 : vector<16x16x32xf32> to vector<256x32xf32>
    %c4_112 = arith.constant 4 : index
    %c0_113 = arith.constant 0 : index
    %c0_114 = arith.constant 0 : index
    %104 = vector.load %arg6[%c4_112, %c0_113, %c0_114] : memref<9x32x64xf32, #tpu.memory_space<vmem>>, vector<1x32x64xf32>
    %105 = vector.shape_cast %104 : vector<1x32x64xf32> to vector<32x64xf32>
    %cst_115 = arith.constant dense<0.000000e+00> : vector<256x64xf32>
    %106 = tpu.matmul %103, %105, %cst_115 {dimension_numbers = #tpu.dot_dimension_numbers<[1], [0], [0], [1], [0, 0, 1, 1], [], []>} : vector<256x32xf32>, vector<32x64xf32>, vector<256x64xf32> -> vector<256x64xf32>
    %107 = arith.addf %101, %106 : vector<256x64xf32>
    %c1_116 = arith.constant 1 : index
    %c2_117 = arith.constant 2 : index
    %c0_118 = arith.constant 0 : index
    %108 = vector.load %arg18[%c1_116, %c2_117, %c0_118] : memref<18x18x32xf32, #tpu.memory_space<vmem>>, vector<16x16x32xf32>
    %109 = vector.shape_cast %108 : vector<16x16x32xf32> to vector<256x32xf32>
    %c5_119 = arith.constant 5 : index
    %c0_120 = arith.constant 0 : index
    %c0_121 = arith.constant 0 : index
    %110 = vector.load %arg6[%c5_119, %c0_120, %c0_121] : memref<9x32x64xf32, #tpu.memory_space<vmem>>, vector<1x32x64xf32>
    %111 = vector.shape_cast %110 : vector<1x32x64xf32> to vector<32x64xf32>
    %cst_122 = arith.constant dense<0.000000e+00> : vector<256x64xf32>
    %112 = tpu.matmul %109, %111, %cst_122 {dimension_numbers = #tpu.dot_dimension_numbers<[1], [0], [0], [1], [0, 0, 1, 1], [], []>} : vector<256x32xf32>, vector<32x64xf32>, vector<256x64xf32> -> vector<256x64xf32>
    %113 = arith.addf %107, %112 : vector<256x64xf32>
    %c2_123 = arith.constant 2 : index
    %c0_124 = arith.constant 0 : index
    %c0_125 = arith.constant 0 : index
    %114 = vector.load %arg18[%c2_123, %c0_124, %c0_125] : memref<18x18x32xf32, #tpu.memory_space<vmem>>, vector<16x16x32xf32>
    %115 = vector.shape_cast %114 : vector<16x16x32xf32> to vector<256x32xf32>
    %c6_126 = arith.constant 6 : index
    %c0_127 = arith.constant 0 : index
    %c0_128 = arith.constant 0 : index
    %116 = vector.load %arg6[%c6_126, %c0_127, %c0_128] : memref<9x32x64xf32, #tpu.memory_space<vmem>>, vector<1x32x64xf32>
    %117 = vector.shape_cast %116 : vector<1x32x64xf32> to vector<32x64xf32>
    %cst_129 = arith.constant dense<0.000000e+00> : vector<256x64xf32>
    %118 = tpu.matmul %115, %117, %cst_129 {dimension_numbers = #tpu.dot_dimension_numbers<[1], [0], [0], [1], [0, 0, 1, 1], [], []>} : vector<256x32xf32>, vector<32x64xf32>, vector<256x64xf32> -> vector<256x64xf32>
    %119 = arith.addf %113, %118 : vector<256x64xf32>
    %c2_130 = arith.constant 2 : index
    %c1_131 = arith.constant 1 : index
    %c0_132 = arith.constant 0 : index
    %120 = vector.load %arg18[%c2_130, %c1_131, %c0_132] : memref<18x18x32xf32, #tpu.memory_space<vmem>>, vector<16x16x32xf32>
    %121 = vector.shape_cast %120 : vector<16x16x32xf32> to vector<256x32xf32>
    %c7_133 = arith.constant 7 : index
    %c0_134 = arith.constant 0 : index
    %c0_135 = arith.constant 0 : index
    %122 = vector.load %arg6[%c7_133, %c0_134, %c0_135] : memref<9x32x64xf32, #tpu.memory_space<vmem>>, vector<1x32x64xf32>
    %123 = vector.shape_cast %122 : vector<1x32x64xf32> to vector<32x64xf32>
    %cst_136 = arith.constant dense<0.000000e+00> : vector<256x64xf32>
    %124 = tpu.matmul %121, %123, %cst_136 {dimension_numbers = #tpu.dot_dimension_numbers<[1], [0], [0], [1], [0, 0, 1, 1], [], []>} : vector<256x32xf32>, vector<32x64xf32>, vector<256x64xf32> -> vector<256x64xf32>
    %125 = arith.addf %119, %124 : vector<256x64xf32>
    %c2_137 = arith.constant 2 : index
    %c2_138 = arith.constant 2 : index
    %c0_139 = arith.constant 0 : index
    %126 = vector.load %arg18[%c2_137, %c2_138, %c0_139] : memref<18x18x32xf32, #tpu.memory_space<vmem>>, vector<16x16x32xf32>
    %127 = vector.shape_cast %126 : vector<16x16x32xf32> to vector<256x32xf32>
    %c8_140 = arith.constant 8 : index
    %c0_141 = arith.constant 0 : index
    %c0_142 = arith.constant 0 : index
    %128 = vector.load %arg6[%c8_140, %c0_141, %c0_142] : memref<9x32x64xf32, #tpu.memory_space<vmem>>, vector<1x32x64xf32>
    %129 = vector.shape_cast %128 : vector<1x32x64xf32> to vector<32x64xf32>
    %cst_143 = arith.constant dense<0.000000e+00> : vector<256x64xf32>
    %130 = tpu.matmul %127, %129, %cst_143 {dimension_numbers = #tpu.dot_dimension_numbers<[1], [0], [0], [1], [0, 0, 1, 1], [], []>} : vector<256x32xf32>, vector<32x64xf32>, vector<256x64xf32> -> vector<256x64xf32>
    %131 = arith.addf %125, %130 : vector<256x64xf32>
    %c0_144 = arith.constant 0 : index
    %c0_145 = arith.constant 0 : index
    %132 = vector.load %arg12[%c0_144, %c0_145] : memref<64x256xf32, #tpu.memory_space<vmem>>, vector<64x256xf32>
    %cst_146 = arith.constant dense<0.000000e+00> : vector<64x64xf32>
    %133 = tpu.matmul %132, %131, %cst_146 {dimension_numbers = #tpu.dot_dimension_numbers<[1], [0], [0], [1], [0, 0, 1, 1], [], []>} : vector<64x256xf32>, vector<256x64xf32>, vector<64x64xf32> -> vector<64x64xf32>
    %c0_147 = arith.constant 0 : index
    %c0_148 = arith.constant 0 : index
    %134 = vector.load %arg7[%c0_147, %c0_148] : memref<1x64xf32, #tpu.memory_space<vmem>>, vector<1x64xf32>
    %135 = vector.broadcast %134 : vector<1x64xf32> to vector<64x64xf32>
    %136 = arith.addf %133, %135 : vector<64x64xf32>
    %cst_149 = arith.constant 0.000000e+00 : f32
    %137 = vector.broadcast %cst_149 : f32 to vector<64x64xf32>
    %138 = arith.maximumf %136, %137 : vector<64x64xf32>
    %cst_150 = arith.constant 0.000000e+00 : f32
    %139 = vector.broadcast %cst_150 : f32 to vector<10x10x64xf32>
    %c0_151 = arith.constant 0 : index
    %c0_152 = arith.constant 0 : index
    %c0_153 = arith.constant 0 : index
    %140 = vector.load %arg19[%c0_151, %c0_152, %c0_153] : memref<10x10x64xf32, #tpu.memory_space<vmem>>, vector<10x10x64xf32>
    tpu.vector_store %arg19[%c0_151, %c0_152, %c0_153], %139 {strides = array<i32>} : memref<10x10x64xf32, #tpu.memory_space<vmem>>, vector<10x10x64xf32>,
    %141 = vector.shape_cast %138 : vector<64x64xf32> to vector<8x8x64xf32>
    %c1_154 = arith.constant 1 : index
    %c1_155 = arith.constant 1 : index
    %c0_156 = arith.constant 0 : index
    %142 = vector.load %arg19[%c1_154, %c1_155, %c0_156] : memref<10x10x64xf32, #tpu.memory_space<vmem>>, vector<8x8x64xf32>
    tpu.vector_store %arg19[%c1_154, %c1_155, %c0_156], %141 {strides = array<i32>} : memref<10x10x64xf32, #tpu.memory_space<vmem>>, vector<8x8x64xf32>,
    %cst_157 = arith.constant 0.000000e+00 : f32
    %143 = vector.broadcast %cst_157 : f32 to vector<64x64xf32>
    %c0_158 = arith.constant 0 : index
    %c0_159 = arith.constant 0 : index
    %c0_160 = arith.constant 0 : index
    %144 = vector.load %arg19[%c0_158, %c0_159, %c0_160] : memref<10x10x64xf32, #tpu.memory_space<vmem>>, vector<8x8x64xf32>
    %145 = vector.shape_cast %144 : vector<8x8x64xf32> to vector<64x64xf32>
    %c0_161 = arith.constant 0 : index
    %c0_162 = arith.constant 0 : index
    %c0_163 = arith.constant 0 : index
    %146 = vector.load %arg8[%c0_161, %c0_162, %c0_163] : memref<9x64x64xf32, #tpu.memory_space<vmem>>, vector<1x64x64xf32>
    %147 = vector.shape_cast %146 : vector<1x64x64xf32> to vector<64x64xf32>
    %cst_164 = arith.constant dense<0.000000e+00> : vector<64x64xf32>
    %148 = tpu.matmul %145, %147, %cst_164 {dimension_numbers = #tpu.dot_dimension_numbers<[1], [0], [0], [1], [0, 0, 1, 1], [], []>} : vector<64x64xf32>, vector<64x64xf32>, vector<64x64xf32> -> vector<64x64xf32>
    %149 = arith.addf %143, %148 : vector<64x64xf32>
    %c0_165 = arith.constant 0 : index
    %c1_166 = arith.constant 1 : index
    %c0_167 = arith.constant 0 : index
    %150 = vector.load %arg19[%c0_165, %c1_166, %c0_167] : memref<10x10x64xf32, #tpu.memory_space<vmem>>, vector<8x8x64xf32>
    %151 = vector.shape_cast %150 : vector<8x8x64xf32> to vector<64x64xf32>
    %c1_168 = arith.constant 1 : index
    %c0_169 = arith.constant 0 : index
    %c0_170 = arith.constant 0 : index
    %152 = vector.load %arg8[%c1_168, %c0_169, %c0_170] : memref<9x64x64xf32, #tpu.memory_space<vmem>>, vector<1x64x64xf32>
    %153 = vector.shape_cast %152 : vector<1x64x64xf32> to vector<64x64xf32>
    %cst_171 = arith.constant dense<0.000000e+00> : vector<64x64xf32>
    %154 = tpu.matmul %151, %153, %cst_171 {dimension_numbers = #tpu.dot_dimension_numbers<[1], [0], [0], [1], [0, 0, 1, 1], [], []>} : vector<64x64xf32>, vector<64x64xf32>, vector<64x64xf32> -> vector<64x64xf32>
    %155 = arith.addf %149, %154 : vector<64x64xf32>
    %c0_172 = arith.constant 0 : index
    %c2_173 = arith.constant 2 : index
    %c0_174 = arith.constant 0 : index
    %156 = vector.load %arg19[%c0_172, %c2_173, %c0_174] : memref<10x10x64xf32, #tpu.memory_space<vmem>>, vector<8x8x64xf32>
    %157 = vector.shape_cast %156 : vector<8x8x64xf32> to vector<64x64xf32>
    %c2_175 = arith.constant 2 : index
    %c0_176 = arith.constant 0 : index
    %c0_177 = arith.constant 0 : index
    %158 = vector.load %arg8[%c2_175, %c0_176, %c0_177] : memref<9x64x64xf32, #tpu.memory_space<vmem>>, vector<1x64x64xf32>
    %159 = vector.shape_cast %158 : vector<1x64x64xf32> to vector<64x64xf32>
    %cst_178 = arith.constant dense<0.000000e+00> : vector<64x64xf32>
    %160 = tpu.matmul %157, %159, %cst_178 {dimension_numbers = #tpu.dot_dimension_numbers<[1], [0], [0], [1], [0, 0, 1, 1], [], []>} : vector<64x64xf32>, vector<64x64xf32>, vector<64x64xf32> -> vector<64x64xf32>
    %161 = arith.addf %155, %160 : vector<64x64xf32>
    %c1_179 = arith.constant 1 : index
    %c0_180 = arith.constant 0 : index
    %c0_181 = arith.constant 0 : index
    %162 = vector.load %arg19[%c1_179, %c0_180, %c0_181] : memref<10x10x64xf32, #tpu.memory_space<vmem>>, vector<8x8x64xf32>
    %163 = vector.shape_cast %162 : vector<8x8x64xf32> to vector<64x64xf32>
    %c3_182 = arith.constant 3 : index
    %c0_183 = arith.constant 0 : index
    %c0_184 = arith.constant 0 : index
    %164 = vector.load %arg8[%c3_182, %c0_183, %c0_184] : memref<9x64x64xf32, #tpu.memory_space<vmem>>, vector<1x64x64xf32>
    %165 = vector.shape_cast %164 : vector<1x64x64xf32> to vector<64x64xf32>
    %cst_185 = arith.constant dense<0.000000e+00> : vector<64x64xf32>
    %166 = tpu.matmul %163, %165, %cst_185 {dimension_numbers = #tpu.dot_dimension_numbers<[1], [0], [0], [1], [0, 0, 1, 1], [], []>} : vector<64x64xf32>, vector<64x64xf32>, vector<64x64xf32> -> vector<64x64xf32>
    %167 = arith.addf %161, %166 : vector<64x64xf32>
    %c1_186 = arith.constant 1 : index
    %c1_187 = arith.constant 1 : index
    %c0_188 = arith.constant 0 : index
    %168 = vector.load %arg19[%c1_186, %c1_187, %c0_188] : memref<10x10x64xf32, #tpu.memory_space<vmem>>, vector<8x8x64xf32>
    %169 = vector.shape_cast %168 : vector<8x8x64xf32> to vector<64x64xf32>
    %c4_189 = arith.constant 4 : index
    %c0_190 = arith.constant 0 : index
    %c0_191 = arith.constant 0 : index
    %170 = vector.load %arg8[%c4_189, %c0_190, %c0_191] : memref<9x64x64xf32, #tpu.memory_space<vmem>>, vector<1x64x64xf32>
    %171 = vector.shape_cast %170 : vector<1x64x64xf32> to vector<64x64xf32>
    %cst_192 = arith.constant dense<0.000000e+00> : vector<64x64xf32>
    %172 = tpu.matmul %169, %171, %cst_192 {dimension_numbers = #tpu.dot_dimension_numbers<[1], [0], [0], [1], [0, 0, 1, 1], [], []>} : vector<64x64xf32>, vector<64x64xf32>, vector<64x64xf32> -> vector<64x64xf32>
    %173 = arith.addf %167, %172 : vector<64x64xf32>
    %c1_193 = arith.constant 1 : index
    %c2_194 = arith.constant 2 : index
    %c0_195 = arith.constant 0 : index
    %174 = vector.load %arg19[%c1_193, %c2_194, %c0_195] : memref<10x10x64xf32, #tpu.memory_space<vmem>>, vector<8x8x64xf32>
    %175 = vector.shape_cast %174 : vector<8x8x64xf32> to vector<64x64xf32>
    %c5_196 = arith.constant 5 : index
    %c0_197 = arith.constant 0 : index
    %c0_198 = arith.constant 0 : index
    %176 = vector.load %arg8[%c5_196, %c0_197, %c0_198] : memref<9x64x64xf32, #tpu.memory_space<vmem>>, vector<1x64x64xf32>
    %177 = vector.shape_cast %176 : vector<1x64x64xf32> to vector<64x64xf32>
    %cst_199 = arith.constant dense<0.000000e+00> : vector<64x64xf32>
    %178 = tpu.matmul %175, %177, %cst_199 {dimension_numbers = #tpu.dot_dimension_numbers<[1], [0], [0], [1], [0, 0, 1, 1], [], []>} : vector<64x64xf32>, vector<64x64xf32>, vector<64x64xf32> -> vector<64x64xf32>
    %179 = arith.addf %173, %178 : vector<64x64xf32>
    %c2_200 = arith.constant 2 : index
    %c0_201 = arith.constant 0 : index
    %c0_202 = arith.constant 0 : index
    %180 = vector.load %arg19[%c2_200, %c0_201, %c0_202] : memref<10x10x64xf32, #tpu.memory_space<vmem>>, vector<8x8x64xf32>
    %181 = vector.shape_cast %180 : vector<8x8x64xf32> to vector<64x64xf32>
    %c6_203 = arith.constant 6 : index
    %c0_204 = arith.constant 0 : index
    %c0_205 = arith.constant 0 : index
    %182 = vector.load %arg8[%c6_203, %c0_204, %c0_205] : memref<9x64x64xf32, #tpu.memory_space<vmem>>, vector<1x64x64xf32>
    %183 = vector.shape_cast %182 : vector<1x64x64xf32> to vector<64x64xf32>
    %cst_206 = arith.constant dense<0.000000e+00> : vector<64x64xf32>
    %184 = tpu.matmul %181, %183, %cst_206 {dimension_numbers = #tpu.dot_dimension_numbers<[1], [0], [0], [1], [0, 0, 1, 1], [], []>} : vector<64x64xf32>, vector<64x64xf32>, vector<64x64xf32> -> vector<64x64xf32>
    %185 = arith.addf %179, %184 : vector<64x64xf32>
    %c2_207 = arith.constant 2 : index
    %c1_208 = arith.constant 1 : index
    %c0_209 = arith.constant 0 : index
    %186 = vector.load %arg19[%c2_207, %c1_208, %c0_209] : memref<10x10x64xf32, #tpu.memory_space<vmem>>, vector<8x8x64xf32>
    %187 = vector.shape_cast %186 : vector<8x8x64xf32> to vector<64x64xf32>
    %c7_210 = arith.constant 7 : index
    %c0_211 = arith.constant 0 : index
    %c0_212 = arith.constant 0 : index
    %188 = vector.load %arg8[%c7_210, %c0_211, %c0_212] : memref<9x64x64xf32, #tpu.memory_space<vmem>>, vector<1x64x64xf32>
    %189 = vector.shape_cast %188 : vector<1x64x64xf32> to vector<64x64xf32>
    %cst_213 = arith.constant dense<0.000000e+00> : vector<64x64xf32>
    %190 = tpu.matmul %187, %189, %cst_213 {dimension_numbers = #tpu.dot_dimension_numbers<[1], [0], [0], [1], [0, 0, 1, 1], [], []>} : vector<64x64xf32>, vector<64x64xf32>, vector<64x64xf32> -> vector<64x64xf32>
    %191 = arith.addf %185, %190 : vector<64x64xf32>
    %c2_214 = arith.constant 2 : index
    %c2_215 = arith.constant 2 : index
    %c0_216 = arith.constant 0 : index
    %192 = vector.load %arg19[%c2_214, %c2_215, %c0_216] : memref<10x10x64xf32, #tpu.memory_space<vmem>>, vector<8x8x64xf32>
    %193 = vector.shape_cast %192 : vector<8x8x64xf32> to vector<64x64xf32>
    %c8_217 = arith.constant 8 : index
    %c0_218 = arith.constant 0 : index
    %c0_219 = arith.constant 0 : index
    %194 = vector.load %arg8[%c8_217, %c0_218, %c0_219] : memref<9x64x64xf32, #tpu.memory_space<vmem>>, vector<1x64x64xf32>
    %195 = vector.shape_cast %194 : vector<1x64x64xf32> to vector<64x64xf32>
    %cst_220 = arith.constant dense<0.000000e+00> : vector<64x64xf32>
    %196 = tpu.matmul %193, %195, %cst_220 {dimension_numbers = #tpu.dot_dimension_numbers<[1], [0], [0], [1], [0, 0, 1, 1], [], []>} : vector<64x64xf32>, vector<64x64xf32>, vector<64x64xf32> -> vector<64x64xf32>
    %197 = arith.addf %191, %196 : vector<64x64xf32>
    %c0_221 = arith.constant 0 : index
    %c0_222 = arith.constant 0 : index
    %198 = vector.load %arg9[%c0_221, %c0_222] : memref<1x64xf32, #tpu.memory_space<vmem>>, vector<1x64xf32>
    %199 = vector.broadcast %198 : vector<1x64xf32> to vector<64x64xf32>
    %200 = arith.addf %197, %199 : vector<64x64xf32>
    %cst_223 = arith.constant 0.000000e+00 : f32
    %201 = vector.broadcast %cst_223 : f32 to vector<64x64xf32>
    %202 = arith.maximumf %200, %201 : vector<64x64xf32>
    %cst_224 = arith.constant 0.000000e+00 : f32
    %203 = vector.broadcast %cst_224 : f32 to vector<10x10x64xf32>
    %c0_225 = arith.constant 0 : index
    %c0_226 = arith.constant 0 : index
    %c0_227 = arith.constant 0 : index
    %204 = vector.load %arg20[%c0_225, %c0_226, %c0_227] : memref<10x10x64xf32, #tpu.memory_space<vmem>>, vector<10x10x64xf32>
    tpu.vector_store %arg20[%c0_225, %c0_226, %c0_227], %203 {strides = array<i32>} : memref<10x10x64xf32, #tpu.memory_space<vmem>>, vector<10x10x64xf32>,
    %205 = vector.shape_cast %202 : vector<64x64xf32> to vector<8x8x64xf32>
    %c1_228 = arith.constant 1 : index
    %c1_229 = arith.constant 1 : index
    %c0_230 = arith.constant 0 : index
    %206 = vector.load %arg20[%c1_228, %c1_229, %c0_230] : memref<10x10x64xf32, #tpu.memory_space<vmem>>, vector<8x8x64xf32>
    tpu.vector_store %arg20[%c1_228, %c1_229, %c0_230], %205 {strides = array<i32>} : memref<10x10x64xf32, #tpu.memory_space<vmem>>, vector<8x8x64xf32>,
    %cst_231 = arith.constant 0.000000e+00 : f32
    %207 = vector.broadcast %cst_231 : f32 to vector<64x64xf32>
    %c0_232 = arith.constant 0 : index
    %c0_233 = arith.constant 0 : index
    %c0_234 = arith.constant 0 : index
    %208 = vector.load %arg20[%c0_232, %c0_233, %c0_234] : memref<10x10x64xf32, #tpu.memory_space<vmem>>, vector<8x8x64xf32>
    %209 = vector.shape_cast %208 : vector<8x8x64xf32> to vector<64x64xf32>
    %c0_235 = arith.constant 0 : index
    %c0_236 = arith.constant 0 : index
    %c0_237 = arith.constant 0 : index
    %210 = vector.load %arg10[%c0_235, %c0_236, %c0_237] : memref<9x64x64xf32, #tpu.memory_space<vmem>>, vector<1x64x64xf32>
    %211 = vector.shape_cast %210 : vector<1x64x64xf32> to vector<64x64xf32>
    %cst_238 = arith.constant dense<0.000000e+00> : vector<64x64xf32>
    %212 = tpu.matmul %209, %211, %cst_238 {dimension_numbers = #tpu.dot_dimension_numbers<[1], [0], [0], [1], [0, 0, 1, 1], [], []>} : vector<64x64xf32>, vector<64x64xf32>, vector<64x64xf32> -> vector<64x64xf32>
    %213 = arith.addf %207, %212 : vector<64x64xf32>
    %c0_239 = arith.constant 0 : index
    %c1_240 = arith.constant 1 : index
    %c0_241 = arith.constant 0 : index
    %214 = vector.load %arg20[%c0_239, %c1_240, %c0_241] : memref<10x10x64xf32, #tpu.memory_space<vmem>>, vector<8x8x64xf32>
    %215 = vector.shape_cast %214 : vector<8x8x64xf32> to vector<64x64xf32>
    %c1_242 = arith.constant 1 : index
    %c0_243 = arith.constant 0 : index
    %c0_244 = arith.constant 0 : index
    %216 = vector.load %arg10[%c1_242, %c0_243, %c0_244] : memref<9x64x64xf32, #tpu.memory_space<vmem>>, vector<1x64x64xf32>
    %217 = vector.shape_cast %216 : vector<1x64x64xf32> to vector<64x64xf32>
    %cst_245 = arith.constant dense<0.000000e+00> : vector<64x64xf32>
    %218 = tpu.matmul %215, %217, %cst_245 {dimension_numbers = #tpu.dot_dimension_numbers<[1], [0], [0], [1], [0, 0, 1, 1], [], []>} : vector<64x64xf32>, vector<64x64xf32>, vector<64x64xf32> -> vector<64x64xf32>
    %219 = arith.addf %213, %218 : vector<64x64xf32>
    %c0_246 = arith.constant 0 : index
    %c2_247 = arith.constant 2 : index
    %c0_248 = arith.constant 0 : index
    %220 = vector.load %arg20[%c0_246, %c2_247, %c0_248] : memref<10x10x64xf32, #tpu.memory_space<vmem>>, vector<8x8x64xf32>
    %221 = vector.shape_cast %220 : vector<8x8x64xf32> to vector<64x64xf32>
    %c2_249 = arith.constant 2 : index
    %c0_250 = arith.constant 0 : index
    %c0_251 = arith.constant 0 : index
    %222 = vector.load %arg10[%c2_249, %c0_250, %c0_251] : memref<9x64x64xf32, #tpu.memory_space<vmem>>, vector<1x64x64xf32>
    %223 = vector.shape_cast %222 : vector<1x64x64xf32> to vector<64x64xf32>
    %cst_252 = arith.constant dense<0.000000e+00> : vector<64x64xf32>
    %224 = tpu.matmul %221, %223, %cst_252 {dimension_numbers = #tpu.dot_dimension_numbers<[1], [0], [0], [1], [0, 0, 1, 1], [], []>} : vector<64x64xf32>, vector<64x64xf32>, vector<64x64xf32> -> vector<64x64xf32>
    %225 = arith.addf %219, %224 : vector<64x64xf32>
    %c1_253 = arith.constant 1 : index
    %c0_254 = arith.constant 0 : index
    %c0_255 = arith.constant 0 : index
    %226 = vector.load %arg20[%c1_253, %c0_254, %c0_255] : memref<10x10x64xf32, #tpu.memory_space<vmem>>, vector<8x8x64xf32>
    %227 = vector.shape_cast %226 : vector<8x8x64xf32> to vector<64x64xf32>
    %c3_256 = arith.constant 3 : index
    %c0_257 = arith.constant 0 : index
    %c0_258 = arith.constant 0 : index
    %228 = vector.load %arg10[%c3_256, %c0_257, %c0_258] : memref<9x64x64xf32, #tpu.memory_space<vmem>>, vector<1x64x64xf32>
    %229 = vector.shape_cast %228 : vector<1x64x64xf32> to vector<64x64xf32>
    %cst_259 = arith.constant dense<0.000000e+00> : vector<64x64xf32>
    %230 = tpu.matmul %227, %229, %cst_259 {dimension_numbers = #tpu.dot_dimension_numbers<[1], [0], [0], [1], [0, 0, 1, 1], [], []>} : vector<64x64xf32>, vector<64x64xf32>, vector<64x64xf32> -> vector<64x64xf32>
    %231 = arith.addf %225, %230 : vector<64x64xf32>
    %c1_260 = arith.constant 1 : index
    %c1_261 = arith.constant 1 : index
    %c0_262 = arith.constant 0 : index
    %232 = vector.load %arg20[%c1_260, %c1_261, %c0_262] : memref<10x10x64xf32, #tpu.memory_space<vmem>>, vector<8x8x64xf32>
    %233 = vector.shape_cast %232 : vector<8x8x64xf32> to vector<64x64xf32>
    %c4_263 = arith.constant 4 : index
    %c0_264 = arith.constant 0 : index
    %c0_265 = arith.constant 0 : index
    %234 = vector.load %arg10[%c4_263, %c0_264, %c0_265] : memref<9x64x64xf32, #tpu.memory_space<vmem>>, vector<1x64x64xf32>
    %235 = vector.shape_cast %234 : vector<1x64x64xf32> to vector<64x64xf32>
    %cst_266 = arith.constant dense<0.000000e+00> : vector<64x64xf32>
    %236 = tpu.matmul %233, %235, %cst_266 {dimension_numbers = #tpu.dot_dimension_numbers<[1], [0], [0], [1], [0, 0, 1, 1], [], []>} : vector<64x64xf32>, vector<64x64xf32>, vector<64x64xf32> -> vector<64x64xf32>
    %237 = arith.addf %231, %236 : vector<64x64xf32>
    %c1_267 = arith.constant 1 : index
    %c2_268 = arith.constant 2 : index
    %c0_269 = arith.constant 0 : index
    %238 = vector.load %arg20[%c1_267, %c2_268, %c0_269] : memref<10x10x64xf32, #tpu.memory_space<vmem>>, vector<8x8x64xf32>
    %239 = vector.shape_cast %238 : vector<8x8x64xf32> to vector<64x64xf32>
    %c5_270 = arith.constant 5 : index
    %c0_271 = arith.constant 0 : index
    %c0_272 = arith.constant 0 : index
    %240 = vector.load %arg10[%c5_270, %c0_271, %c0_272] : memref<9x64x64xf32, #tpu.memory_space<vmem>>, vector<1x64x64xf32>
    %241 = vector.shape_cast %240 : vector<1x64x64xf32> to vector<64x64xf32>
    %cst_273 = arith.constant dense<0.000000e+00> : vector<64x64xf32>
    %242 = tpu.matmul %239, %241, %cst_273 {dimension_numbers = #tpu.dot_dimension_numbers<[1], [0], [0], [1], [0, 0, 1, 1], [], []>} : vector<64x64xf32>, vector<64x64xf32>, vector<64x64xf32> -> vector<64x64xf32>
    %243 = arith.addf %237, %242 : vector<64x64xf32>
    %c2_274 = arith.constant 2 : index
    %c0_275 = arith.constant 0 : index
    %c0_276 = arith.constant 0 : index
    %244 = vector.load %arg20[%c2_274, %c0_275, %c0_276] : memref<10x10x64xf32, #tpu.memory_space<vmem>>, vector<8x8x64xf32>
    %245 = vector.shape_cast %244 : vector<8x8x64xf32> to vector<64x64xf32>
    %c6_277 = arith.constant 6 : index
    %c0_278 = arith.constant 0 : index
    %c0_279 = arith.constant 0 : index
    %246 = vector.load %arg10[%c6_277, %c0_278, %c0_279] : memref<9x64x64xf32, #tpu.memory_space<vmem>>, vector<1x64x64xf32>
    %247 = vector.shape_cast %246 : vector<1x64x64xf32> to vector<64x64xf32>
    %cst_280 = arith.constant dense<0.000000e+00> : vector<64x64xf32>
    %248 = tpu.matmul %245, %247, %cst_280 {dimension_numbers = #tpu.dot_dimension_numbers<[1], [0], [0], [1], [0, 0, 1, 1], [], []>} : vector<64x64xf32>, vector<64x64xf32>, vector<64x64xf32> -> vector<64x64xf32>
    %249 = arith.addf %243, %248 : vector<64x64xf32>
    %c2_281 = arith.constant 2 : index
    %c1_282 = arith.constant 1 : index
    %c0_283 = arith.constant 0 : index
    %250 = vector.load %arg20[%c2_281, %c1_282, %c0_283] : memref<10x10x64xf32, #tpu.memory_space<vmem>>, vector<8x8x64xf32>
    %251 = vector.shape_cast %250 : vector<8x8x64xf32> to vector<64x64xf32>
    %c7_284 = arith.constant 7 : index
    %c0_285 = arith.constant 0 : index
    %c0_286 = arith.constant 0 : index
    %252 = vector.load %arg10[%c7_284, %c0_285, %c0_286] : memref<9x64x64xf32, #tpu.memory_space<vmem>>, vector<1x64x64xf32>
    %253 = vector.shape_cast %252 : vector<1x64x64xf32> to vector<64x64xf32>
    %cst_287 = arith.constant dense<0.000000e+00> : vector<64x64xf32>
    %254 = tpu.matmul %251, %253, %cst_287 {dimension_numbers = #tpu.dot_dimension_numbers<[1], [0], [0], [1], [0, 0, 1, 1], [], []>} : vector<64x64xf32>, vector<64x64xf32>, vector<64x64xf32> -> vector<64x64xf32>
    %255 = arith.addf %249, %254 : vector<64x64xf32>
    %c2_288 = arith.constant 2 : index
    %c2_289 = arith.constant 2 : index
    %c0_290 = arith.constant 0 : index
    %256 = vector.load %arg20[%c2_288, %c2_289, %c0_290] : memref<10x10x64xf32, #tpu.memory_space<vmem>>, vector<8x8x64xf32>
    %257 = vector.shape_cast %256 : vector<8x8x64xf32> to vector<64x64xf32>
    %c8_291 = arith.constant 8 : index
    %c0_292 = arith.constant 0 : index
    %c0_293 = arith.constant 0 : index
    %258 = vector.load %arg10[%c8_291, %c0_292, %c0_293] : memref<9x64x64xf32, #tpu.memory_space<vmem>>, vector<1x64x64xf32>
    %259 = vector.shape_cast %258 : vector<1x64x64xf32> to vector<64x64xf32>
    %cst_294 = arith.constant dense<0.000000e+00> : vector<64x64xf32>
    %260 = tpu.matmul %257, %259, %cst_294 {dimension_numbers = #tpu.dot_dimension_numbers<[1], [0], [0], [1], [0, 0, 1, 1], [], []>} : vector<64x64xf32>, vector<64x64xf32>, vector<64x64xf32> -> vector<64x64xf32>
    %261 = arith.addf %255, %260 : vector<64x64xf32>
    %c0_295 = arith.constant 0 : index
    %c0_296 = arith.constant 0 : index
    %262 = vector.load %arg13[%c0_295, %c0_296] : memref<16x64xf32, #tpu.memory_space<vmem>>, vector<16x64xf32>
    %cst_297 = arith.constant dense<0.000000e+00> : vector<16x64xf32>
    %263 = tpu.matmul %262, %261, %cst_297 {dimension_numbers = #tpu.dot_dimension_numbers<[1], [0], [0], [1], [0, 0, 1, 1], [], []>} : vector<16x64xf32>, vector<64x64xf32>, vector<16x64xf32> -> vector<16x64xf32>
    %c0_298 = arith.constant 0 : index
    %c0_299 = arith.constant 0 : index
    %264 = vector.load %arg11[%c0_298, %c0_299] : memref<1x64xf32, #tpu.memory_space<vmem>>, vector<1x64xf32>
    %265 = vector.broadcast %264 : vector<1x64xf32> to vector<16x64xf32>
    %266 = arith.addf %263, %265 : vector<16x64xf32>
    %cst_300 = arith.constant 0.000000e+00 : f32
    %267 = vector.broadcast %cst_300 : f32 to vector<16x64xf32>
    %268 = arith.maximumf %266, %267 : vector<16x64xf32>
    %c0_301 = arith.constant 0 : index
    %c0_302 = arith.constant 0 : index
    %269 = vector.load %arg15[%c0_301, %c0_302] : memref<1x128xf32, #tpu.memory_space<vmem>>, vector<1x128xf32>
    %270 = vector.extract_strided_slice %268 {offsets = [0, 0], sizes = [1, 64], strides = [1, 1]} : vector<16x64xf32> to vector<1x64xf32>
    %c0_303 = arith.constant 0 : index
    %c0_304 = arith.constant 0 : index
    %c0_305 = arith.constant 0 : index
    %271 = vector.load %arg14[%c0_303, %c0_304, %c0_305] : memref<16x64x128xf32, #tpu.memory_space<vmem>>, vector<1x64x128xf32>
    %272 = vector.shape_cast %271 : vector<1x64x128xf32> to vector<64x128xf32>
    %cst_306 = arith.constant dense<0.000000e+00> : vector<1x128xf32>
    %273 = tpu.matmul %270, %272, %cst_306 {dimension_numbers = #tpu.dot_dimension_numbers<[1], [0], [0], [1], [0, 0, 1, 1], [], []>} : vector<1x64xf32>, vector<64x128xf32>, vector<1x128xf32> -> vector<1x128xf32>
    %274 = arith.addf %269, %273 : vector<1x128xf32>
    %275 = vector.extract_strided_slice %268 {offsets = [1, 0], sizes = [1, 64], strides = [1, 1]} : vector<16x64xf32> to vector<1x64xf32>
    %c1_307 = arith.constant 1 : index
    %c0_308 = arith.constant 0 : index
    %c0_309 = arith.constant 0 : index
    %276 = vector.load %arg14[%c1_307, %c0_308, %c0_309] : memref<16x64x128xf32, #tpu.memory_space<vmem>>, vector<1x64x128xf32>
    %277 = vector.shape_cast %276 : vector<1x64x128xf32> to vector<64x128xf32>
    %cst_310 = arith.constant dense<0.000000e+00> : vector<1x128xf32>
    %278 = tpu.matmul %275, %277, %cst_310 {dimension_numbers = #tpu.dot_dimension_numbers<[1], [0], [0], [1], [0, 0, 1, 1], [], []>} : vector<1x64xf32>, vector<64x128xf32>, vector<1x128xf32> -> vector<1x128xf32>
    %279 = arith.addf %274, %278 : vector<1x128xf32>
    %280 = vector.extract_strided_slice %268 {offsets = [2, 0], sizes = [1, 64], strides = [1, 1]} : vector<16x64xf32> to vector<1x64xf32>
    %c2_311 = arith.constant 2 : index
    %c0_312 = arith.constant 0 : index
    %c0_313 = arith.constant 0 : index
    %281 = vector.load %arg14[%c2_311, %c0_312, %c0_313] : memref<16x64x128xf32, #tpu.memory_space<vmem>>, vector<1x64x128xf32>
    %282 = vector.shape_cast %281 : vector<1x64x128xf32> to vector<64x128xf32>
    %cst_314 = arith.constant dense<0.000000e+00> : vector<1x128xf32>
    %283 = tpu.matmul %280, %282, %cst_314 {dimension_numbers = #tpu.dot_dimension_numbers<[1], [0], [0], [1], [0, 0, 1, 1], [], []>} : vector<1x64xf32>, vector<64x128xf32>, vector<1x128xf32> -> vector<1x128xf32>
    %284 = arith.addf %279, %283 : vector<1x128xf32>
    %285 = vector.extract_strided_slice %268 {offsets = [3, 0], sizes = [1, 64], strides = [1, 1]} : vector<16x64xf32> to vector<1x64xf32>
    %c3_315 = arith.constant 3 : index
    %c0_316 = arith.constant 0 : index
    %c0_317 = arith.constant 0 : index
    %286 = vector.load %arg14[%c3_315, %c0_316, %c0_317] : memref<16x64x128xf32, #tpu.memory_space<vmem>>, vector<1x64x128xf32>
    %287 = vector.shape_cast %286 : vector<1x64x128xf32> to vector<64x128xf32>
    %cst_318 = arith.constant dense<0.000000e+00> : vector<1x128xf32>
    %288 = tpu.matmul %285, %287, %cst_318 {dimension_numbers = #tpu.dot_dimension_numbers<[1], [0], [0], [1], [0, 0, 1, 1], [], []>} : vector<1x64xf32>, vector<64x128xf32>, vector<1x128xf32> -> vector<1x128xf32>
    %289 = arith.addf %284, %288 : vector<1x128xf32>
    %290 = vector.extract_strided_slice %268 {offsets = [4, 0], sizes = [1, 64], strides = [1, 1]} : vector<16x64xf32> to vector<1x64xf32>
    %c4_319 = arith.constant 4 : index
    %c0_320 = arith.constant 0 : index
    %c0_321 = arith.constant 0 : index
    %291 = vector.load %arg14[%c4_319, %c0_320, %c0_321] : memref<16x64x128xf32, #tpu.memory_space<vmem>>, vector<1x64x128xf32>
    %292 = vector.shape_cast %291 : vector<1x64x128xf32> to vector<64x128xf32>
    %cst_322 = arith.constant dense<0.000000e+00> : vector<1x128xf32>
    %293 = tpu.matmul %290, %292, %cst_322 {dimension_numbers = #tpu.dot_dimension_numbers<[1], [0], [0], [1], [0, 0, 1, 1], [], []>} : vector<1x64xf32>, vector<64x128xf32>, vector<1x128xf32> -> vector<1x128xf32>
    %294 = arith.addf %289, %293 : vector<1x128xf32>
    %295 = vector.extract_strided_slice %268 {offsets = [5, 0], sizes = [1, 64], strides = [1, 1]} : vector<16x64xf32> to vector<1x64xf32>
    %c5_323 = arith.constant 5 : index
    %c0_324 = arith.constant 0 : index
    %c0_325 = arith.constant 0 : index
    %296 = vector.load %arg14[%c5_323, %c0_324, %c0_325] : memref<16x64x128xf32, #tpu.memory_space<vmem>>, vector<1x64x128xf32>
    %297 = vector.shape_cast %296 : vector<1x64x128xf32> to vector<64x128xf32>
    %cst_326 = arith.constant dense<0.000000e+00> : vector<1x128xf32>
    %298 = tpu.matmul %295, %297, %cst_326 {dimension_numbers = #tpu.dot_dimension_numbers<[1], [0], [0], [1], [0, 0, 1, 1], [], []>} : vector<1x64xf32>, vector<64x128xf32>, vector<1x128xf32> -> vector<1x128xf32>
    %299 = arith.addf %294, %298 : vector<1x128xf32>
    %300 = vector.extract_strided_slice %268 {offsets = [6, 0], sizes = [1, 64], strides = [1, 1]} : vector<16x64xf32> to vector<1x64xf32>
    %c6_327 = arith.constant 6 : index
    %c0_328 = arith.constant 0 : index
    %c0_329 = arith.constant 0 : index
    %301 = vector.load %arg14[%c6_327, %c0_328, %c0_329] : memref<16x64x128xf32, #tpu.memory_space<vmem>>, vector<1x64x128xf32>
    %302 = vector.shape_cast %301 : vector<1x64x128xf32> to vector<64x128xf32>
    %cst_330 = arith.constant dense<0.000000e+00> : vector<1x128xf32>
    %303 = tpu.matmul %300, %302, %cst_330 {dimension_numbers = #tpu.dot_dimension_numbers<[1], [0], [0], [1], [0, 0, 1, 1], [], []>} : vector<1x64xf32>, vector<64x128xf32>, vector<1x128xf32> -> vector<1x128xf32>
    %304 = arith.addf %299, %303 : vector<1x128xf32>
    %305 = vector.extract_strided_slice %268 {offsets = [7, 0], sizes = [1, 64], strides = [1, 1]} : vector<16x64xf32> to vector<1x64xf32>
    %c7_331 = arith.constant 7 : index
    %c0_332 = arith.constant 0 : index
    %c0_333 = arith.constant 0 : index
    %306 = vector.load %arg14[%c7_331, %c0_332, %c0_333] : memref<16x64x128xf32, #tpu.memory_space<vmem>>, vector<1x64x128xf32>
    %307 = vector.shape_cast %306 : vector<1x64x128xf32> to vector<64x128xf32>
    %cst_334 = arith.constant dense<0.000000e+00> : vector<1x128xf32>
    %308 = tpu.matmul %305, %307, %cst_334 {dimension_numbers = #tpu.dot_dimension_numbers<[1], [0], [0], [1], [0, 0, 1, 1], [], []>} : vector<1x64xf32>, vector<64x128xf32>, vector<1x128xf32> -> vector<1x128xf32>
    %309 = arith.addf %304, %308 : vector<1x128xf32>
    %310 = vector.extract_strided_slice %268 {offsets = [8, 0], sizes = [1, 64], strides = [1, 1]} : vector<16x64xf32> to vector<1x64xf32>
    %c8_335 = arith.constant 8 : index
    %c0_336 = arith.constant 0 : index
    %c0_337 = arith.constant 0 : index
    %311 = vector.load %arg14[%c8_335, %c0_336, %c0_337] : memref<16x64x128xf32, #tpu.memory_space<vmem>>, vector<1x64x128xf32>
    %312 = vector.shape_cast %311 : vector<1x64x128xf32> to vector<64x128xf32>
    %cst_338 = arith.constant dense<0.000000e+00> : vector<1x128xf32>
    %313 = tpu.matmul %310, %312, %cst_338 {dimension_numbers = #tpu.dot_dimension_numbers<[1], [0], [0], [1], [0, 0, 1, 1], [], []>} : vector<1x64xf32>, vector<64x128xf32>, vector<1x128xf32> -> vector<1x128xf32>
    %314 = arith.addf %309, %313 : vector<1x128xf32>
    %315 = vector.extract_strided_slice %268 {offsets = [9, 0], sizes = [1, 64], strides = [1, 1]} : vector<16x64xf32> to vector<1x64xf32>
    %c9 = arith.constant 9 : index
    %c0_339 = arith.constant 0 : index
    %c0_340 = arith.constant 0 : index
    %316 = vector.load %arg14[%c9, %c0_339, %c0_340] : memref<16x64x128xf32, #tpu.memory_space<vmem>>, vector<1x64x128xf32>
    %317 = vector.shape_cast %316 : vector<1x64x128xf32> to vector<64x128xf32>
    %cst_341 = arith.constant dense<0.000000e+00> : vector<1x128xf32>
    %318 = tpu.matmul %315, %317, %cst_341 {dimension_numbers = #tpu.dot_dimension_numbers<[1], [0], [0], [1], [0, 0, 1, 1], [], []>} : vector<1x64xf32>, vector<64x128xf32>, vector<1x128xf32> -> vector<1x128xf32>
    %319 = arith.addf %314, %318 : vector<1x128xf32>
    %320 = vector.extract_strided_slice %268 {offsets = [10, 0], sizes = [1, 64], strides = [1, 1]} : vector<16x64xf32> to vector<1x64xf32>
    %c10 = arith.constant 10 : index
    %c0_342 = arith.constant 0 : index
    %c0_343 = arith.constant 0 : index
    %321 = vector.load %arg14[%c10, %c0_342, %c0_343] : memref<16x64x128xf32, #tpu.memory_space<vmem>>, vector<1x64x128xf32>
    %322 = vector.shape_cast %321 : vector<1x64x128xf32> to vector<64x128xf32>
    %cst_344 = arith.constant dense<0.000000e+00> : vector<1x128xf32>
    %323 = tpu.matmul %320, %322, %cst_344 {dimension_numbers = #tpu.dot_dimension_numbers<[1], [0], [0], [1], [0, 0, 1, 1], [], []>} : vector<1x64xf32>, vector<64x128xf32>, vector<1x128xf32> -> vector<1x128xf32>
    %324 = arith.addf %319, %323 : vector<1x128xf32>
    %325 = vector.extract_strided_slice %268 {offsets = [11, 0], sizes = [1, 64], strides = [1, 1]} : vector<16x64xf32> to vector<1x64xf32>
    %c11 = arith.constant 11 : index
    %c0_345 = arith.constant 0 : index
    %c0_346 = arith.constant 0 : index
    %326 = vector.load %arg14[%c11, %c0_345, %c0_346] : memref<16x64x128xf32, #tpu.memory_space<vmem>>, vector<1x64x128xf32>
    %327 = vector.shape_cast %326 : vector<1x64x128xf32> to vector<64x128xf32>
    %cst_347 = arith.constant dense<0.000000e+00> : vector<1x128xf32>
    %328 = tpu.matmul %325, %327, %cst_347 {dimension_numbers = #tpu.dot_dimension_numbers<[1], [0], [0], [1], [0, 0, 1, 1], [], []>} : vector<1x64xf32>, vector<64x128xf32>, vector<1x128xf32> -> vector<1x128xf32>
    %329 = arith.addf %324, %328 : vector<1x128xf32>
    %330 = vector.extract_strided_slice %268 {offsets = [12, 0], sizes = [1, 64], strides = [1, 1]} : vector<16x64xf32> to vector<1x64xf32>
    %c12 = arith.constant 12 : index
    %c0_348 = arith.constant 0 : index
    %c0_349 = arith.constant 0 : index
    %331 = vector.load %arg14[%c12, %c0_348, %c0_349] : memref<16x64x128xf32, #tpu.memory_space<vmem>>, vector<1x64x128xf32>
    %332 = vector.shape_cast %331 : vector<1x64x128xf32> to vector<64x128xf32>
    %cst_350 = arith.constant dense<0.000000e+00> : vector<1x128xf32>
    %333 = tpu.matmul %330, %332, %cst_350 {dimension_numbers = #tpu.dot_dimension_numbers<[1], [0], [0], [1], [0, 0, 1, 1], [], []>} : vector<1x64xf32>, vector<64x128xf32>, vector<1x128xf32> -> vector<1x128xf32>
    %334 = arith.addf %329, %333 : vector<1x128xf32>
    %335 = vector.extract_strided_slice %268 {offsets = [13, 0], sizes = [1, 64], strides = [1, 1]} : vector<16x64xf32> to vector<1x64xf32>
    %c13 = arith.constant 13 : index
    %c0_351 = arith.constant 0 : index
    %c0_352 = arith.constant 0 : index
    %336 = vector.load %arg14[%c13, %c0_351, %c0_352] : memref<16x64x128xf32, #tpu.memory_space<vmem>>, vector<1x64x128xf32>
    %337 = vector.shape_cast %336 : vector<1x64x128xf32> to vector<64x128xf32>
    %cst_353 = arith.constant dense<0.000000e+00> : vector<1x128xf32>
    %338 = tpu.matmul %335, %337, %cst_353 {dimension_numbers = #tpu.dot_dimension_numbers<[1], [0], [0], [1], [0, 0, 1, 1], [], []>} : vector<1x64xf32>, vector<64x128xf32>, vector<1x128xf32> -> vector<1x128xf32>
    %339 = arith.addf %334, %338 : vector<1x128xf32>
    %340 = vector.extract_strided_slice %268 {offsets = [14, 0], sizes = [1, 64], strides = [1, 1]} : vector<16x64xf32> to vector<1x64xf32>
    %c14 = arith.constant 14 : index
    %c0_354 = arith.constant 0 : index
    %c0_355 = arith.constant 0 : index
    %341 = vector.load %arg14[%c14, %c0_354, %c0_355] : memref<16x64x128xf32, #tpu.memory_space<vmem>>, vector<1x64x128xf32>
    %342 = vector.shape_cast %341 : vector<1x64x128xf32> to vector<64x128xf32>
    %cst_356 = arith.constant dense<0.000000e+00> : vector<1x128xf32>
    %343 = tpu.matmul %340, %342, %cst_356 {dimension_numbers = #tpu.dot_dimension_numbers<[1], [0], [0], [1], [0, 0, 1, 1], [], []>} : vector<1x64xf32>, vector<64x128xf32>, vector<1x128xf32> -> vector<1x128xf32>
    %344 = arith.addf %339, %343 : vector<1x128xf32>
    %345 = vector.extract_strided_slice %268 {offsets = [15, 0], sizes = [1, 64], strides = [1, 1]} : vector<16x64xf32> to vector<1x64xf32>
    %c15 = arith.constant 15 : index
    %c0_357 = arith.constant 0 : index
    %c0_358 = arith.constant 0 : index
    %346 = vector.load %arg14[%c15, %c0_357, %c0_358] : memref<16x64x128xf32, #tpu.memory_space<vmem>>, vector<1x64x128xf32>
    %347 = vector.shape_cast %346 : vector<1x64x128xf32> to vector<64x128xf32>
    %cst_359 = arith.constant dense<0.000000e+00> : vector<1x128xf32>
    %348 = tpu.matmul %345, %347, %cst_359 {dimension_numbers = #tpu.dot_dimension_numbers<[1], [0], [0], [1], [0, 0, 1, 1], [], []>} : vector<1x64xf32>, vector<64x128xf32>, vector<1x128xf32> -> vector<1x128xf32>
    %349 = arith.addf %344, %348 : vector<1x128xf32>
    %350 = vector.shape_cast %349 : vector<1x128xf32> to vector<1x1x128xf32>
    %c0_360 = arith.constant 0 : index
    %c0_361 = arith.constant 0 : index
    %c0_362 = arith.constant 0 : index
    %351 = vector.load %arg16[%c0_360, %c0_361, %c0_362] : memref<1x1x128xf32, #tpu.memory_space<vmem>>, vector<1x1x128xf32>
    tpu.vector_store %arg16[%c0_360, %c0_361, %c0_362], %350 {strides = array<i32>} : memref<1x1x128xf32, #tpu.memory_space<vmem>>, vector<1x1x128xf32>,
    return
  }
  func.func @transform_0(%arg0: i32) -> (i32, i32, i32) {
    %c0_i32 = arith.constant 0 : i32
    %c0_i32_0 = arith.constant 0 : i32
    %c0_i32_1 = arith.constant 0 : i32
    return %arg0, %c0_i32, %c0_i32_0 : i32, i32, i32
  }
  func.func @transform_1(%arg0: i32) -> (i32, i32) {
    %c0_i32 = arith.constant 0 : i32
    %c0_i32_0 = arith.constant 0 : i32
    %c0_i32_1 = arith.constant 0 : i32
    return %c0_i32, %c0_i32_0 : i32, i32
  }
  func.func @transform_2(%arg0: i32) -> (i32, i32) {
    %c0_i32 = arith.constant 0 : i32
    %c0_i32_0 = arith.constant 0 : i32
    %c0_i32_1 = arith.constant 0 : i32
    return %c0_i32, %c0_i32_0 : i32, i32
  }
  func.func @transform_3(%arg0: i32) -> (i32, i32, i32) {
    %c0_i32 = arith.constant 0 : i32
    %c0_i32_0 = arith.constant 0 : i32
    %c0_i32_1 = arith.constant 0 : i32
    %c0_i32_2 = arith.constant 0 : i32
    return %c0_i32, %c0_i32_0, %c0_i32_1 : i32, i32, i32
  }
  func.func @transform_4(%arg0: i32) -> (i32, i32) {
    %c0_i32 = arith.constant 0 : i32
    %c0_i32_0 = arith.constant 0 : i32
    %c0_i32_1 = arith.constant 0 : i32
    return %c0_i32, %c0_i32_0 : i32, i32
  }
  func.func @transform_5(%arg0: i32) -> (i32, i32, i32) {
    %c0_i32 = arith.constant 0 : i32
    %c0_i32_0 = arith.constant 0 : i32
    %c0_i32_1 = arith.constant 0 : i32
    %c0_i32_2 = arith.constant 0 : i32
    return %c0_i32, %c0_i32_0, %c0_i32_1 : i32, i32, i32
  }
  func.func @transform_6(%arg0: i32) -> (i32, i32) {
    %c0_i32 = arith.constant 0 : i32
    %c0_i32_0 = arith.constant 0 : i32
    %c0_i32_1 = arith.constant 0 : i32
    return %c0_i32, %c0_i32_0 : i32, i32
  }
  func.func @transform_7(%arg0: i32) -> (i32, i32, i32) {
    %c0_i32 = arith.constant 0 : i32
    %c0_i32_0 = arith.constant 0 : i32
    %c0_i32_1 = arith.constant 0 : i32
    %c0_i32_2 = arith.constant 0 : i32
    return %c0_i32, %c0_i32_0, %c0_i32_1 : i32, i32, i32
  }
  func.func @transform_8(%arg0: i32) -> (i32, i32) {
    %c0_i32 = arith.constant 0 : i32
    %c0_i32_0 = arith.constant 0 : i32
    %c0_i32_1 = arith.constant 0 : i32
    return %c0_i32, %c0_i32_0 : i32, i32
  }
  func.func @transform_9(%arg0: i32) -> (i32, i32, i32) {
    %c0_i32 = arith.constant 0 : i32
    %c0_i32_0 = arith.constant 0 : i32
    %c0_i32_1 = arith.constant 0 : i32
    %c0_i32_2 = arith.constant 0 : i32
    return %c0_i32, %c0_i32_0, %c0_i32_1 : i32, i32, i32
  }
  func.func @transform_10(%arg0: i32) -> (i32, i32) {
    %c0_i32 = arith.constant 0 : i32
    %c0_i32_0 = arith.constant 0 : i32
    %c0_i32_1 = arith.constant 0 : i32
    return %c0_i32, %c0_i32_0 : i32, i32
  }
  func.func @transform_11(%arg0: i32) -> (i32, i32) {
    %c0_i32 = arith.constant 0 : i32
    %c0_i32_0 = arith.constant 0 : i32
    %c0_i32_1 = arith.constant 0 : i32
    return %c0_i32, %c0_i32_0 : i32, i32
  }
  func.func @transform_12(%arg0: i32) -> (i32, i32) {
    %c0_i32 = arith.constant 0 : i32
    %c0_i32_0 = arith.constant 0 : i32
    %c0_i32_1 = arith.constant 0 : i32
    return %c0_i32, %c0_i32_0 : i32, i32
  }
  func.func @transform_13(%arg0: i32) -> (i32, i32, i32) {
    %c0_i32 = arith.constant 0 : i32
    %c0_i32_0 = arith.constant 0 : i32
    %c0_i32_1 = arith.constant 0 : i32
    %c0_i32_2 = arith.constant 0 : i32
    return %c0_i32, %c0_i32_0, %c0_i32_1 : i32, i32, i32
  }
  func.func @transform_14(%arg0: i32) -> (i32, i32) {
    %c0_i32 = arith.constant 0 : i32
    %c0_i32_0 = arith.constant 0 : i32
    %c0_i32_1 = arith.constant 0 : i32
    return %c0_i32, %c0_i32_0 : i32, i32
  }
  func.func @transform_15(%arg0: i32) -> (i32, i32, i32) {
    %c0_i32 = arith.constant 0 : i32
    %c0_i32_0 = arith.constant 0 : i32
    %c0_i32_1 = arith.constant 0 : i32
    return %arg0, %c0_i32, %c0_i32_0 : i32, i32, i32
  }
}

</mosaic_0001>

<bundles_post_ra>
// kernel: conv_encoder_forward.1
= control target key start
LH: loop header
LB: loop body
LE: loop exit
PB: predicated region body
PF: predicated region fallthrough
CT: control target
= control target key end

     0   :  { %s22011_s0 = inlined_call_operand.vmem [shape: f32[2,256,9], index: 0, kind: input, shape index: {}]   ;;  %s22012_s1 = inlined_call_operand.vmem [shape: f32[9,32], index: 1, kind: input, shape index: {}]   ;;  %s22013_s2 = inlined_call_operand.vmem [shape: f32[1,32], index: 2, kind: input, shape index: {}]   ;;  %s22014_s3 = inlined_call_operand.vmem [shape: f32[9,32,32], index: 3, kind: input, shape index: {}]   ;;  %s22015_s4 = inlined_call_operand.vmem [shape: f32[1,32], index: 4, kind: input, shape index: {}]   ;;  %s22016_s5 = inlined_call_operand.vmem [shape: f32[9,32,64], index: 5, kind: input, shape index: {}]   ;;  %s22017_s6 = inlined_call_operand.vmem [shape: f32[1,64], index: 6, kind: input, shape index: {}]   ;;  %s22018_s7 = inlined_call_operand.vmem [shape: f32[9,64,64], index: 7, kind: input, shape index: {}]   ;;  %s22019_s8 = inlined_call_operand.vmem [shape: f32[1,64], index: 8, kind: input, shape index: {}]   ;;  %s22020_s9 = inlined_call_operand.vmem [shape: f32[9,64,64], index: 9, kind: input, shape index: {}]   ;;  %s22021_s10 = inlined_call_operand.vmem [shape: f32[1,64], index: 10, kind: input, shape index: {}]   ;;  %s22022_s11 = inlined_call_operand.vmem [shape: f32[64,256], index: 11, kind: input, shape index: {}]   ;;  %s22023_s12 = inlined_call_operand.vmem [shape: f32[16,64], index: 12, kind: input, shape index: {}]   ;;  %s22024_s13 = inlined_call_operand.vmem [shape: f32[16,64,128], index: 13, kind: input, shape index: {}]   ;;  %s22025_s14 = inlined_call_operand.vmem [shape: f32[1,128], index: 14, kind: input, shape index: {}]   ;;  %s22026_s15 = inlined_call_operand.hbm [shape: f32[2,1,128], index: 15, kind: output, shape index: {}]  }
   0x1   :  { %22157 = sst [smem:[#allocation44_spill]] %s22011_s0 }
   0x2   :  { %22158 = sst [smem:[#allocation45_spill]] %s22012_s1 }
   0x3   :  { %22159 = sst [smem:[#allocation46_spill]] %s22013_s2 }
   0x4   :  { %20 = vsyncpa [#allocation7], 0 }
   0x5   :  { %22 = vsyncpa [#allocation7 + $0x1], 0  ;;  %s18188_s18 = smov 0   ;;  %s18190_s19 = smov 0  }
   0x6   :  { %s18192_s20 = smov 0   ;;  %s18194_s21 = smov 0  }
   0x7 LB: > { %22160 = sst [smem:[#allocation9_spill]] %s18097_s20  ;;  %s18209_s22 = sadd.s32 4294967295, %s18101_s21   ;;  %s18101_s21 = sphi %s18194_s21, %s22377_s21   ;;  %s18097_s20 = sphi %s18192_s20, %s22374_s20   ;;  %s18093_s19 = sphi %s18190_s19, %s22376_s19   ;;  %s18089_s18 = sphi %s18188_s18, %s22375_s18  }
   0x8   : > { %s12478_s23 = sadd.s32 4294967294, %s18101_s21   ;;  %s18213_s24 = sadd.s32 1, %s18101_s21  }
   0x9   : > { %s355_s25 = sadd.s32 1, %s18097_s20  ;;  %s352_s26 = ssub.s32 %s18101_s21, %s18213_s24 }
   0xa   : > { %p365_p0 = scmp.ne.s32.totalorder %s18097_s20, %s18093_s19  ;;  %p353_p1 = scmp.eq.s32.totalorder %s352_s26, 0 }
   0xb   : > { %p366_p2 = scmp.eq.s32.totalorder %s18209_s22, 1  ;;  %p371_p3 = scmp.ne.s32.totalorder %s18093_s19, %s18089_s18 }
   0xc   : > { %p372_p4 = scmp.eq.s32.totalorder %s12478_s23, 1  ;;  %p12481_p7 = scmp.ge.s32.totalorder %s18101_s21, 1 }
   0xd   : > { %s18224_s27 = scalar_select %p353_p1, %s18097_s20, %s355_s25  }
   0xe   : > { %p18226_p5 = por %p366_p2, %p365_p0  ;;  %p18230_p6 = por %p372_p4, %p371_p3 }
   0xf   : > { %22161 = sst [smem:[#allocation10_spill]] %s18224_s27  ;;  %p440_p8 = scmp.lt.s32.totalorder %s18101_s21, 3 }
  0x11   : > { %p441_p9 = pnand %p12481_p7, %p440_p8 }
  0x13   : > { %444 = sbr.rel (%p441_p9) target bundleno = 3361 (0xd21), region = 80 }
  0x1a   : > { %s22164_s1 = sld [smem:[#allocation45_spill]]  ;;  %vm630_vm0 = vcmask 1040384   ;;  %p487_p10 = scmp.lt.s32.totalorder %s18209_s22, 1  ;;  %vm18103_vm1 = vmmov 1   ;;  %vm533_vm3 = vcmask 72704   ;;  %v12518_v35 = vld [vmem:[%s22014_s3 + $0x20] sm:$0xff] }
  0x1b   : > { %vm16644_vm2 = vmpackc.low %vm630_vm0, %vm18103_vm1  ;;  %s22165_s0 = sld [smem:[#allocation44_spill]]  ;;  %v12519_v36 = vld [vmem:[%s22014_s3 + $0x28] sm:$0xff]  ;;  %vm891_vm4 = vcmask 261120   ;;  %vm894_vm5 = vcmask 254976   ;;  %v22028_v38 = vmov 0.0   ;;  %v12520_v39 = vld [vmem:[%s22014_s3 + $0x30] sm:$0xff] }
  0x1c   : > { %s488_s25 = scalar_select %p487_p10, %s18209_s22, 1  ;;  %v18319_v37 = vpack.c.bf16 %v12519_v36, %v12518_v35  ;;  %897 = vst.msk [vmem:[#allocation2 + $0x20] sm:$0xff] %vm891_vm4, %v22028_v38  ;;  %892 = vst.msk [vmem:[#allocation2] sm:$0xff] %vm891_vm4, %v22028_v38  ;;  %v12521_v40 = vld [vmem:[%s22014_s3 + $0x38] sm:$0xff]  ;;  %v1012_v44 = vld [vmem:[%s22014_s3] sm:$0xff]  ;;  %vm8166_vm6 = vcmask 523264  }
  0x1d   : > { %893 = vst.msk [vmem:[#allocation2 + $0x8] sm:$0xff] %vm891_vm4, %v22028_v38  ;;  %896 = vst.msk [vmem:[#allocation2 + $0x18] sm:$0xff] %vm891_vm4, %v22028_v38  ;;  %v16653_v41 = vpack.c.bf16 %v12521_v40, %v12520_v39  ;;  %v1013_v45 = vld [vmem:[%s22014_s3 + $0x8] sm:$0xff]  ;;  %v1014_v47 = vld [vmem:[%s22014_s3 + $0x10] sm:$0xff]  ;;  %s22166_s2 = sld [smem:[#allocation46_spill]]  ;;  %vm8168_vm7 = vcmask 517120  }
  0x1e   : > { %s13575_s26 = sshll.u32 %s488_s25, 8  ;;  %899 = vst.msk [vmem:[#allocation2 + $0x30] sm:$0xff] %vm891_vm4, %v22028_v38  ;;  %900 = vst.msk [vmem:[#allocation2 + $0x38] sm:$0xff] %vm891_vm4, %v22028_v38  ;;  %v16657_v46 = vpack.c.bf16 %v1013_v45, %v1012_v44  ;;  %v1015_v48 = vld [vmem:[%s22014_s3 + $0x18] sm:$0xff]  ;;  %v12586_v50 = vld [vmem:[%s22014_s3 + $0x40] sm:$0xff]  ;;  %vm18106_vm8 = vmmov 0  }
  0x1f   : > { %902 = vst.msk [vmem:[#allocation2 + $0x48] sm:$0xff] %vm891_vm4, %v22028_v38  ;;  %903 = vst.msk [vmem:[#allocation2 + $0x50] sm:$0xff] %vm891_vm4, %v22028_v38  ;;  %v16661_v49 = vpack.c.bf16 %v1015_v48, %v1014_v47  ;;  %v12587_v51 = vld [vmem:[%s22014_s3 + $0x48] sm:$0xff]  ;;  %s485_s16 = sand.u32 1, %s18093_s19   ;;  %s13572_s25 = sshll.u32 %s18209_s22, 4 }
  0x20   : > { %v524_v0 = vld [vmem:[%s22164_s1] sm:$0xff]  ;;  %v525_v1 = vld [vmem:[%s22164_s1 + $0x8] sm:$0x1]  ;;  %905 = vst.msk [vmem:[#allocation2 + $0x60] sm:$0xff] %vm891_vm4, %v22028_v38  ;;  %906 = vst.msk [vmem:[#allocation2 + $0x68] sm:$0xff] %vm891_vm4, %v22028_v38  ;;  %17321 = vmatprep.subr.bf16.mxu1 %v16657_v46  ;;  %v18565_v52 = vpack.c.bf16 %v12587_v51, %v12586_v50  ;;  %s21969_s20 = scalar_lea.hbm %s22026_s15, %s13572_s25  ;;  %s12411_s27 = scalar_lea.sflag [#allocation7], %s485_s16 }
  0x21   : > { %v16643_v2 = vpack.c.bf16 %v525_v1, %v524_v0  ;;  %s18247_s30 = scalar_lea.vmem %s22165_s0, %s13575_s26  ;;  %908 = vst.msk [vmem:[#allocation2 + $0x78] sm:$0xff] %vm891_vm4, %v22028_v38  ;;  %909 = vst.msk [vmem:[#allocation2 + $0x80] sm:$0xff] %vm891_vm4, %v22028_v38  ;;  %17323 = vmatpush3.bf16.msra.mxu1 %v16657_v46  ;;  %s486_s0 = scalar_lea.vmem [#allocation6], %s485_s16 }
  0x22   : > { %v492_v3 = vld [vmem:[%s18247_s30] sm:$0xff]  ;;  %v493_v4 = vld [vmem:[%s18247_s30 + $0x8] sm:$0xff]  ;;  %v494_v5 = vld [vmem:[%s18247_s30 + $0x10] sm:$0xff]  ;;  %911 = vst.msk [vmem:[#allocation2 + $0x90] sm:$0xff] %vm891_vm4, %v22028_v38  ;;  %17322 = vmatprep.subr.bf16.mxu1 %v16661_v49  ;;  %s12423_s1 = sshll.u32 %s486_s0, 4  ;;  %s18107_s22 = smov [#allocation6]   ;;  %s21971_s1 = int_to_ptr.vmem [resolvable:$true] %s12423_s1 }
  0x23   : > { %16645 = vmatprep.subr.msk.bf16.mxu0 %vm16644_vm2, %v16643_v2  ;;  %14760 = vmatprep.mubr.msk.f32.mxu0 %vm533_vm3, %v492_v3  ;;  %v495_v6 = vld [vmem:[%s18247_s30 + $0x18] sm:$0xff]  ;;  %v496_v7 = vld [vmem:[%s18247_s30 + $0x20] sm:$0xff]  ;;  %v497_v8 = vld [vmem:[%s18247_s30 + $0x28] sm:$0xff]  ;;  %912 = vst.msk [vmem:[#allocation2 + $0x98] sm:$0xff] %vm891_vm4, %v22028_v38  ;;  %s18039_s17 = scalar_lea.vmem %s21971_s1, 16  ;;  %s18043_s23 = sshll.u32 %s18107_s22, 4  ;;  %s18044_s23 = int_to_ptr.vmem [resolvable:$false] %s18043_s23 }
  0x24   : > { %16648 = vmatpush3.bf16.msk.msra.mxu0 %vm16644_vm2, %v16643_v2  ;;  %v498_v9 = vld [vmem:[%s18247_s30 + $0x30] sm:$0xff]  ;;  %v499_v10 = vld [vmem:[%s18247_s30 + $0x38] sm:$0xff]  ;;  %v500_v11 = vld [vmem:[%s18247_s30 + $0x40] sm:$0xff]  ;;  %914 = vst.msk [vmem:[#allocation2 + $0xa8] sm:$0xff] %vm891_vm4, %v22028_v38  ;;  %p18040_p11 = scmp.ne.s32.totalorder %s21971_s1, %s18039_s17  ;;  %p18046_p0 = scmp.lt.s32.totalorder %s21971_s1, %s18044_s23 }
  0x25   : > { %v501_v12 = vld [vmem:[%s18247_s30 + $0x48] sm:$0xff]  ;;  %v502_v13 = vld [vmem:[%s18247_s30 + $0x50] sm:$0xff]  ;;  %v503_v14 = vld [vmem:[%s18247_s30 + $0x58] sm:$0xff]  ;;  %915 = vst.msk [vmem:[#allocation2 + $0xb0] sm:$0xff] %vm891_vm4, %v22028_v38  ;;  %16650 = vmatprep.subr.bf16.mxu0 %v18319_v37  ;;  %17324 = vmatpush3.bf16.msra.mxu1 %v16661_v49 }
  0x26   : > { %v504_v15 = vld [vmem:[%s18247_s30 + $0x60] sm:$0xff]  ;;  %v505_v16 = vld [vmem:[%s18247_s30 + $0x68] sm:$0xff]  ;;  %v506_v17 = vld [vmem:[%s18247_s30 + $0x70] sm:$0xff]  ;;  %917 = vst.msk [vmem:[#allocation2 + $0xc0] sm:$0xff] %vm891_vm4, %v22028_v38  ;;  %16666 = vmatprep.subr.bf16.mxu1 %v18565_v52  ;;  %p18041_p12 = pnand %p18040_p11, %p18226_p5 }
  0x27   : > { %14761 = vmatmul.mubr.msk.f32.vlgmr.msra.gmra.mrb[0].mxu0 %vm533_vm3, %v493_v4  ;;  %v507_v18 = vld [vmem:[%s18247_s30 + $0x78] sm:$0xff]  ;;  %v508_v19 = vld [vmem:[%s18247_s30 + $0x80] sm:$0xff]  ;;  %v509_v20 = vld [vmem:[%s18247_s30 + $0x88] sm:$0xff]  ;;  %918 = vst.msk [vmem:[#allocation2 + $0xc8] sm:$0xff] %vm891_vm4, %v22028_v38 }
  0x28   : > { %14763 = vmatprep.mubr.msk.f32.mxu0 %vm533_vm3, %v494_v5  ;;  %v510_v21 = vld [vmem:[%s18247_s30 + $0x90] sm:$0xff]  ;;  %v511_v22 = vld [vmem:[%s18247_s30 + $0x98] sm:$0xff]  ;;  %v512_v23 = vld [vmem:[%s18247_s30 + $0xa0] sm:$0xff]  ;;  %920 = vst.msk [vmem:[#allocation2 + $0xd8] sm:$0xff] %vm891_vm4, %v22028_v38  ;;  %16652 = vmatpush3.bf16.msra.mxu0 %v18319_v37  ;;  %p18042_p13 = pneg %p18041_p12 }
  0x29   : > { %v513_v24 = vld [vmem:[%s18247_s30 + $0xa8] sm:$0xff]  ;;  %v514_v25 = vld [vmem:[%s18247_s30 + $0xb0] sm:$0xff]  ;;  %v515_v26 = vld [vmem:[%s18247_s30 + $0xb8] sm:$0xff]  ;;  %921 = vst.msk [vmem:[#allocation2 + $0xe0] sm:$0xff] %vm891_vm4, %v22028_v38  ;;  %16654 = vmatprep.subr.bf16.mxu0 %v16653_v41 }
  0x2a   : > { %v516_v27 = vld [vmem:[%s18247_s30 + $0xc0] sm:$0xff]  ;;  %v517_v28 = vld [vmem:[%s18247_s30 + $0xc8] sm:$0xff]  ;;  %v518_v29 = vld [vmem:[%s18247_s30 + $0xd0] sm:$0xff]  ;;  %923 = vst.msk [vmem:[#allocation2 + $0xf0] sm:$0xff] %vm891_vm4, %v22028_v38 }
  0x2b   : > { %14764 = vmatmul.mubr.msk.f32.gmra.mrb[2].mxu0 %vm533_vm3, %v495_v6  ;;  %v519_v30 = vld [vmem:[%s18247_s30 + $0xd8] sm:$0xff]  ;;  %v520_v31 = vld [vmem:[%s18247_s30 + $0xe0] sm:$0xff]  ;;  %v521_v32 = vld [vmem:[%s18247_s30 + $0xe8] sm:$0xff]  ;;  %924 = vst.msk [vmem:[#allocation2 + $0xf8] sm:$0xff] %vm891_vm4, %v22028_v38 }
  0x2c   : > { %14766 = vmatprep.mubr.msk.f32.mxu0 %vm533_vm3, %v496_v7  ;;  %v522_v33 = vld [vmem:[%s18247_s30 + $0xf0] sm:$0xff]  ;;  %v523_v34 = vld [vmem:[%s18247_s30 + $0xf8] sm:$0xff]  ;;  %926 = vst.msk [vmem:[#allocation2 + $0x108] sm:$0xff] %vm891_vm4, %v22028_v38  ;;  %927 = vst.msk [vmem:[#allocation2 + $0x110] sm:$0xff] %vm891_vm4, %v22028_v38  ;;  %16656 = vmatpush3.bf16.msra.mxu0 %v16653_v41 }
  0x2d   : > { %929 = vst.msk [vmem:[#allocation2 + $0x120] sm:$0xff] %vm891_vm4, %v22028_v38  ;;  %930 = vst.msk [vmem:[#allocation2 + $0x128] sm:$0xff] %vm891_vm4, %v22028_v38  ;;  %v1016_v42 = vld [vmem:[#allocation2 + $0x1] sm:$0xff]  ;;  %16658 = vmatprep.subr.bf16.mxu0 %v16657_v46  ;;  %v18571_v53 = vld [vmem:[%s22166_s2] ss:$0 sm:$0xff]  ;;  %s18045_s2 = scalar_lea.vmem %s18044_s23, 32 }
  0x2e   : > { %932 = vst.msk [vmem:[#allocation2 + $0x138] sm:$0xff] %vm891_vm4, %v22028_v38  ;;  %933 = vst.msk [vmem:[#allocation2 + $0x140] sm:$0xff] %vm891_vm4, %v22028_v38  ;;  %p18047_p1 = scmp.lt.s32.totalorder %s18045_s2, %s18039_s17 }
  0x2f   : > { %14767 = vmatmul.mubr.msk.f32.gmra.mrb[4].mxu0 %vm533_vm3, %v497_v8  ;;  %935 = vst.msk [vmem:[#allocation2 + $0x150] sm:$0xff] %vm891_vm4, %v22028_v38  ;;  %936 = vst.msk [vmem:[#allocation2 + $0x158] sm:$0xff] %vm891_vm4, %v22028_v38 }
  0x30   : > { %14769 = vmatprep.mubr.msk.f32.mxu0 %vm533_vm3, %v498_v9  ;;  %938 = vst.msk [vmem:[#allocation2 + $0x168] sm:$0xff] %vm891_vm4, %v22028_v38  ;;  %939 = vst.msk [vmem:[#allocation2 + $0x170] sm:$0xff] %vm891_vm4, %v22028_v38  ;;  %p18048_p2 = por %p18047_p1, %p18046_p0 }
  0x31   : > { %941 = vst.msk [vmem:[#allocation2 + $0x180] sm:$0xff] %vm891_vm4, %v22028_v38  ;;  %942 = vst.msk [vmem:[#allocation2 + $0x188] sm:$0xff] %vm891_vm4, %v22028_v38 }
  0x32   : > { %944 = vst.msk [vmem:[#allocation2 + $0x198] sm:$0xff] %vm891_vm4, %v22028_v38  ;;  %945 = vst.msk [vmem:[#allocation2 + $0x1a0] sm:$0xff] %vm891_vm4, %v22028_v38  ;;  %p18049_p3 = pnand %p18048_p2, %p18042_p13 }
  0x33   : > { %14770 = vmatmul.mubr.msk.f32.gmra.mrb[6].mxu0 %vm533_vm3, %v499_v10  ;;  %4497 = vst.msk [vmem:[#allocation3] sm:$0xff] %vm891_vm4, %v22028_v38  ;;  %4498 = vst.msk [vmem:[#allocation3 + $0x8] sm:$0xff] %vm891_vm4, %v22028_v38 }
  0x34   : > { %14772 = vmatprep.mubr.msk.f32.mxu0 %vm533_vm3, %v500_v11  ;;  %4500 = vst.msk [vmem:[#allocation3 + $0x18] sm:$0xff] %vm891_vm4, %v22028_v38  ;;  %4501 = vst.msk [vmem:[#allocation3 + $0x20] sm:$0xff] %vm891_vm4, %v22028_v38 }
  0x35   : > { %4503 = vst.msk [vmem:[#allocation3 + $0x30] sm:$0xff] %vm891_vm4, %v22028_v38  ;;  %4504 = vst.msk [vmem:[#allocation3 + $0x38] sm:$0xff] %vm891_vm4, %v22028_v38 }
  0x36   : > { %4506 = vst.msk [vmem:[#allocation3 + $0x48] sm:$0xff] %vm891_vm4, %v22028_v38  ;;  %4507 = vst.msk [vmem:[#allocation3 + $0x50] sm:$0xff] %vm891_vm4, %v22028_v38 }
  0x37   : > { %14773 = vmatmul.mubr.msk.f32.gmra.mrb[8].mxu0 %vm533_vm3, %v501_v12  ;;  %4509 = vst.msk [vmem:[#allocation3 + $0x60] sm:$0xff] %vm891_vm4, %v22028_v38  ;;  %4510 = vst.msk [vmem:[#allocation3 + $0x68] sm:$0xff] %vm891_vm4, %v22028_v38 }
  0x38   : > { %14775 = vmatprep.mubr.msk.f32.mxu0 %vm533_vm3, %v502_v13  ;;  %4512 = vst.msk [vmem:[#allocation3 + $0x78] sm:$0xff] %vm891_vm4, %v22028_v38  ;;  %4513 = vst.msk [vmem:[#allocation3 + $0x80] sm:$0xff] %vm891_vm4, %v22028_v38 }
  0x39   : > { %4515 = vst.msk [vmem:[#allocation3 + $0x90] sm:$0xff] %vm891_vm4, %v22028_v38  ;;  %4516 = vst.msk [vmem:[#allocation3 + $0x98] sm:$0xff] %vm891_vm4, %v22028_v38 }
  0x3a   : > { %4518 = vst.msk [vmem:[#allocation3 + $0xa8] sm:$0xff] %vm891_vm4, %v22028_v38  ;;  %4519 = vst.msk [vmem:[#allocation3 + $0xb0] sm:$0xff] %vm891_vm4, %v22028_v38 }
  0x3b   : > { %14776 = vmatmul.mubr.msk.f32.gmra.mrb[10].mxu0 %vm533_vm3, %v503_v14  ;;  %4521 = vst.msk [vmem:[#allocation3 + $0xc0] sm:$0xff] %vm891_vm4, %v22028_v38  ;;  %4522 = vst.msk [vmem:[#allocation3 + $0xc8] sm:$0xff] %vm891_vm4, %v22028_v38 }
  0x3c   : > { %14778 = vmatprep.mubr.msk.f32.mxu0 %vm533_vm3, %v504_v15  ;;  %4524 = vst.msk [vmem:[#allocation3 + $0xd8] sm:$0xff] %vm891_vm4, %v22028_v38  ;;  %4525 = vst.msk [vmem:[#allocation3 + $0xe0] sm:$0xff] %vm891_vm4, %v22028_v38 }
  0x3d   : > { %4527 = vst.msk [vmem:[#allocation3 + $0xf0] sm:$0xff] %vm891_vm4, %v22028_v38  ;;  %4528 = vst.msk [vmem:[#allocation3 + $0xf8] sm:$0xff] %vm891_vm4, %v22028_v38 }
  0x3e   : > { %4530 = vst.msk [vmem:[#allocation3 + $0x108] sm:$0xff] %vm891_vm4, %v22028_v38  ;;  %4531 = vst.msk [vmem:[#allocation3 + $0x110] sm:$0xff] %vm891_vm4, %v22028_v38 }
  0x3f   : > { %14779 = vmatmul.mubr.msk.f32.gmra.mrb[12].mxu0 %vm533_vm3, %v505_v16  ;;  %4533 = vst.msk [vmem:[#allocation3 + $0x120] sm:$0xff] %vm891_vm4, %v22028_v38  ;;  %4534 = vst.msk [vmem:[#allocation3 + $0x128] sm:$0xff] %vm891_vm4, %v22028_v38 }
  0x40   : > { %14781 = vmatprep.mubr.msk.f32.mxu0 %vm533_vm3, %v506_v17  ;;  %4536 = vst.msk [vmem:[#allocation3 + $0x138] sm:$0xff] %vm891_vm4, %v22028_v38  ;;  %4537 = vst.msk [vmem:[#allocation3 + $0x140] sm:$0xff] %vm891_vm4, %v22028_v38 }
  0x41   : > { %4539 = vst.msk [vmem:[#allocation3 + $0x150] sm:$0xff] %vm891_vm4, %v22028_v38  ;;  %4540 = vst.msk [vmem:[#allocation3 + $0x158] sm:$0xff] %vm891_vm4, %v22028_v38 }
  0x42   : > { %4542 = vst.msk [vmem:[#allocation3 + $0x168] sm:$0xff] %vm891_vm4, %v22028_v38  ;;  %4543 = vst.msk [vmem:[#allocation3 + $0x170] sm:$0xff] %vm891_vm4, %v22028_v38 }
  0x43   : > { %14782 = vmatmul.mubr.msk.f32.gmra.mrb[14].mxu0 %vm533_vm3, %v507_v18  ;;  %4545 = vst.msk [vmem:[#allocation3 + $0x180] sm:$0xff] %vm891_vm4, %v22028_v38  ;;  %4546 = vst.msk [vmem:[#allocation3 + $0x188] sm:$0xff] %vm891_vm4, %v22028_v38 }
  0x44   : > { %14784 = vmatprep.mubr.msk.f32.mxu0 %vm533_vm3, %v508_v19  ;;  %4548 = vst.msk [vmem:[#allocation3 + $0x198] sm:$0xff] %vm891_vm4, %v22028_v38  ;;  %4549 = vst.msk [vmem:[#allocation3 + $0x1a0] sm:$0xff] %vm891_vm4, %v22028_v38 }
  0x45   : > { %898 = vst.msk [vmem:[#allocation2 + $0x28] sm:$0x3] %vm894_vm5, %v22028_v38  ;;  %895 = vst.msk [vmem:[#allocation2 + $0x10] sm:$0x3] %vm894_vm5, %v22028_v38 }
  0x46   : > { %901 = vst.msk [vmem:[#allocation2 + $0x40] sm:$0x3] %vm894_vm5, %v22028_v38  ;;  %904 = vst.msk [vmem:[#allocation2 + $0x58] sm:$0x3] %vm894_vm5, %v22028_v38 }
  0x47   : > { %14785 = vmatmul.mubr.msk.f32.gmra.mrb[16].mxu0 %vm533_vm3, %v509_v20  ;;  %907 = vst.msk [vmem:[#allocation2 + $0x70] sm:$0x3] %vm894_vm5, %v22028_v38  ;;  %910 = vst.msk [vmem:[#allocation2 + $0x88] sm:$0x3] %vm894_vm5, %v22028_v38 }
  0x48   : > { %14787 = vmatprep.mubr.msk.f32.mxu0 %vm533_vm3, %v510_v21  ;;  %913 = vst.msk [vmem:[#allocation2 + $0xa0] sm:$0x3] %vm894_vm5, %v22028_v38  ;;  %916 = vst.msk [vmem:[#allocation2 + $0xb8] sm:$0x3] %vm894_vm5, %v22028_v38 }
  0x49   : > { %919 = vst.msk [vmem:[#allocation2 + $0xd0] sm:$0x3] %vm894_vm5, %v22028_v38  ;;  %922 = vst.msk [vmem:[#allocation2 + $0xe8] sm:$0x3] %vm894_vm5, %v22028_v38 }
  0x4a   : > { %925 = vst.msk [vmem:[#allocation2 + $0x100] sm:$0x3] %vm894_vm5, %v22028_v38  ;;  %928 = vst.msk [vmem:[#allocation2 + $0x118] sm:$0x3] %vm894_vm5, %v22028_v38 }
  0x4b   : > { %14788 = vmatmul.mubr.msk.f32.gmra.mrb[18].mxu0 %vm533_vm3, %v511_v22  ;;  %931 = vst.msk [vmem:[#allocation2 + $0x130] sm:$0x3] %vm894_vm5, %v22028_v38  ;;  %934 = vst.msk [vmem:[#allocation2 + $0x148] sm:$0x3] %vm894_vm5, %v22028_v38 }
  0x4c   : > { %14790 = vmatprep.mubr.msk.f32.mxu0 %vm533_vm3, %v512_v23  ;;  %937 = vst.msk [vmem:[#allocation2 + $0x160] sm:$0x3] %vm894_vm5, %v22028_v38  ;;  %940 = vst.msk [vmem:[#allocation2 + $0x178] sm:$0x3] %vm894_vm5, %v22028_v38  ;;  %v1017_v43 = vld [vmem:[#allocation2 + $0x9] sm:$0xff] }
  0x4d   : > { %943 = vst.msk [vmem:[#allocation2 + $0x190] sm:$0x3] %vm894_vm5, %v22028_v38  ;;  %946 = vst.msk [vmem:[#allocation2 + $0x1a8] sm:$0x3] %vm894_vm5, %v22028_v38 }
  0x4e   : > { %4499 = vst.msk [vmem:[#allocation3 + $0x10] sm:$0x3] %vm894_vm5, %v22028_v38  ;;  %4502 = vst.msk [vmem:[#allocation3 + $0x28] sm:$0x3] %vm894_vm5, %v22028_v38 }
  0x4f   : > { %14791 = vmatmul.mubr.msk.f32.gmra.mrb[20].mxu0 %vm533_vm3, %v513_v24  ;;  %4505 = vst.msk [vmem:[#allocation3 + $0x40] sm:$0x3] %vm894_vm5, %v22028_v38  ;;  %4508 = vst.msk [vmem:[#allocation3 + $0x58] sm:$0x3] %vm894_vm5, %v22028_v38 }
  0x50   : > { %14793 = vmatprep.mubr.msk.f32.mxu0 %vm533_vm3, %v514_v25  ;;  %4511 = vst.msk [vmem:[#allocation3 + $0x70] sm:$0x3] %vm894_vm5, %v22028_v38  ;;  %4514 = vst.msk [vmem:[#allocation3 + $0x88] sm:$0x3] %vm894_vm5, %v22028_v38 }
  0x51   : > { %4517 = vst.msk [vmem:[#allocation3 + $0xa0] sm:$0x3] %vm894_vm5, %v22028_v38  ;;  %4520 = vst.msk [vmem:[#allocation3 + $0xb8] sm:$0x3] %vm894_vm5, %v22028_v38 }
  0x52   : > { %4523 = vst.msk [vmem:[#allocation3 + $0xd0] sm:$0x3] %vm894_vm5, %v22028_v38  ;;  %4526 = vst.msk [vmem:[#allocation3 + $0xe8] sm:$0x3] %vm894_vm5, %v22028_v38 }
  0x53   : > { %14794 = vmatmul.mubr.msk.f32.gmra.mrb[22].mxu0 %vm533_vm3, %v515_v26  ;;  %4529 = vst.msk [vmem:[#allocation3 + $0x100] sm:$0x3] %vm894_vm5, %v22028_v38  ;;  %4532 = vst.msk [vmem:[#allocation3 + $0x118] sm:$0x3] %vm894_vm5, %v22028_v38 }
  0x54   : > { %14796 = vmatprep.mubr.msk.f32.mxu0 %vm533_vm3, %v516_v27  ;;  %4535 = vst.msk [vmem:[#allocation3 + $0x130] sm:$0x3] %vm894_vm5, %v22028_v38  ;;  %4538 = vst.msk [vmem:[#allocation3 + $0x148] sm:$0x3] %vm894_vm5, %v22028_v38 }
  0x55   : > { %4541 = vst.msk [vmem:[#allocation3 + $0x160] sm:$0x3] %vm894_vm5, %v22028_v38  ;;  %4544 = vst.msk [vmem:[#allocation3 + $0x178] sm:$0x3] %vm894_vm5, %v22028_v38 }
  0x56   : > { %4547 = vst.msk [vmem:[#allocation3 + $0x190] sm:$0x3] %vm894_vm5, %v22028_v38  ;;  %4550 = vst.msk [vmem:[#allocation3 + $0x1a8] sm:$0x3] %vm894_vm5, %v22028_v38 }
  0x57   : > { %14797 = vmatmul.mubr.msk.f32.gmra.mrb[24].mxu0 %vm533_vm3, %v517_v28 }
  0x58   : > { %14799 = vmatprep.mubr.msk.f32.mxu0 %vm533_vm3, %v518_v29 }
  0x5b   : > { %14800 = vmatmul.mubr.msk.f32.gmra.mrb[26].mxu0 %vm533_vm3, %v519_v30 }
  0x5c   : > { %14802 = vmatprep.mubr.msk.f32.mxu0 %vm533_vm3, %v520_v31 }
  0x5f   : > { %14803 = vmatmul.mubr.msk.f32.gmra.mrb[28].mxu0 %vm533_vm3, %v521_v32 }
  0x60   : > { %14805 = vmatprep.mubr.msk.f32.mxu0 %vm533_vm3, %v522_v33 }
  0x63   : > { %14806 = vmatmul.mubr.msk.f32.gmra.mrb[30].mxu0 %vm533_vm3, %v523_v34 }
  0x64   : > { %14816 = vmatprep.mubr.msk.f32.mxu0 %vm891_vm4, %v1016_v42 }
  0x67   : > { %14817 = vmatmul.mubr.msk.f32.vlgmr.msra.gmra.mrb[32].mxu0 %vm891_vm4, %v1017_v43 }
  0x68   : > { %16660 = vmatpush3.bf16.msra.mxu0 %v16657_v46 }
  0x69   : > { %16662 = vmatprep.subr.bf16.mxu0 %v16661_v49 }
  0x6c   : > { %16664 = vmatpush3.bf16.msra.mxu0 %v16661_v49 }
  0xfa   : > { %v14762_v54 = vpop.f32.mrb[0].mxu0 }
  0xfb   : > { %v706_v55 = vadd.f32 %v14762_v54, %v18571_v53  ;;  %v700_v56 = vpop.f32.mrb[1].mxu0 }
  0xfc   : > { %v701_v57 = vadd.f32 %v18571_v53, %v700_v56 }
  0xfd   : > { %v860_v58 = vmax.f32 %v706_v55, 0.0 }
  0xfe   : > { %v859_v59 = vmax.f32 %v701_v57, 0.0  ;;  %v14765_v60 = vpop.f32.mrb[2].mxu0 }
  0xff   : > { %949 = vst.msk [vmem:[#allocation2 + $0x21] sm:$0xff] %vm891_vm4, %v860_v58  ;;  %v716_v61 = vadd.f32 %v14765_v60, %v18571_v53  ;;  %v710_v62 = vpop.f32.mrb[3].mxu0 }
 0x100   : > { %948 = vst.msk [vmem:[#allocation2 + $0x19] sm:$0xff] %vm891_vm4, %v859_v59  ;;  %v711_v63 = vadd.f32 %v18571_v53, %v710_v62 }
 0x101   : > { %v862_v0 = vmax.f32 %v716_v61, 0.0 }
 0x102   : > { %v861_v1 = vmax.f32 %v711_v63, 0.0  ;;  %v14768_v2 = vpop.f32.mrb[4].mxu0 }
 0x103   : > { %951 = vst.msk [vmem:[#allocation2 + $0x39] sm:$0xff] %vm891_vm4, %v862_v0  ;;  %v726_v3 = vadd.f32 %v14768_v2, %v18571_v53  ;;  %v720_v4 = vpop.f32.mrb[5].mxu0 }
 0x104   : > { %950 = vst.msk [vmem:[#allocation2 + $0x31] sm:$0xff] %vm891_vm4, %v861_v1  ;;  %v721_v5 = vadd.f32 %v18571_v53, %v720_v4 }
 0x105   : > { %v864_v6 = vmax.f32 %v726_v3, 0.0 }
 0x106   : > { %v863_v7 = vmax.f32 %v721_v5, 0.0  ;;  %v14771_v8 = vpop.f32.mrb[6].mxu0  ;;  %v18591_v13 = vld [vmem:[#allocation2 + $0x21] sm:$0xff] }
 0x107   : > { %953 = vst.msk [vmem:[#allocation2 + $0x51] sm:$0xff] %vm891_vm4, %v864_v6  ;;  %v736_v9 = vadd.f32 %v14771_v8, %v18571_v53  ;;  %v730_v10 = vpop.f32.mrb[7].mxu0  ;;  %v18585_v11 = vld [vmem:[#allocation2 + $0x19] sm:$0xff] }
 0x108   : > { %952 = vst.msk [vmem:[#allocation2 + $0x49] sm:$0xff] %vm891_vm4, %v863_v7  ;;  %v731_v12 = vadd.f32 %v18571_v53, %v730_v10  ;;  %14819 = vmatprep.mubr.msk.f32.mxu0 %vm891_vm4, %v18585_v11 }
 0x109   : > { %v866_v14 = vmax.f32 %v736_v9, 0.0  ;;  %14820 = vmatmul.mubr.msk.f32.gmra.mrb[34].mxu0 %vm891_vm4, %v18591_v13 }
 0x10a   : > { %v865_v15 = vmax.f32 %v731_v12, 0.0  ;;  %v14774_v16 = vpop.f32.mrb[8].mxu0  ;;  %v18603_v21 = vld [vmem:[#allocation2 + $0x39] sm:$0xff] }
 0x10b   : > { %955 = vst.msk [vmem:[#allocation2 + $0x69] sm:$0xff] %vm891_vm4, %v866_v14  ;;  %v746_v17 = vadd.f32 %v14774_v16, %v18571_v53  ;;  %v740_v18 = vpop.f32.mrb[9].mxu0  ;;  %v18597_v19 = vld [vmem:[#allocation2 + $0x31] sm:$0xff] }
 0x10c   : > { %954 = vst.msk [vmem:[#allocation2 + $0x61] sm:$0xff] %vm891_vm4, %v865_v15  ;;  %v741_v20 = vadd.f32 %v18571_v53, %v740_v18  ;;  %14822 = vmatprep.mubr.msk.f32.mxu0 %vm891_vm4, %v18597_v19 }
 0x10d   : > { %v868_v22 = vmax.f32 %v746_v17, 0.0  ;;  %14823 = vmatmul.mubr.msk.f32.gmra.mrb[36].mxu0 %vm891_vm4, %v18603_v21 }
 0x10e   : > { %v867_v23 = vmax.f32 %v741_v20, 0.0  ;;  %v14777_v24 = vpop.f32.mrb[10].mxu0  ;;  %v18615_v29 = vld [vmem:[#allocation2 + $0x51] sm:$0xff] }
 0x10f   : > { %957 = vst.msk [vmem:[#allocation2 + $0x81] sm:$0xff] %vm891_vm4, %v868_v22  ;;  %v756_v25 = vadd.f32 %v14777_v24, %v18571_v53  ;;  %v750_v26 = vpop.f32.mrb[11].mxu0  ;;  %v18609_v27 = vld [vmem:[#allocation2 + $0x49] sm:$0xff] }
 0x110   : > { %956 = vst.msk [vmem:[#allocation2 + $0x79] sm:$0xff] %vm891_vm4, %v867_v23  ;;  %v751_v28 = vadd.f32 %v18571_v53, %v750_v26  ;;  %14825 = vmatprep.mubr.msk.f32.mxu0 %vm891_vm4, %v18609_v27 }
 0x111   : > { %v870_v30 = vmax.f32 %v756_v25, 0.0  ;;  %14826 = vmatmul.mubr.msk.f32.gmra.mrb[38].mxu0 %vm891_vm4, %v18615_v29 }
 0x112   : > { %v869_v31 = vmax.f32 %v751_v28, 0.0  ;;  %v14780_v32 = vpop.f32.mrb[12].mxu0  ;;  %v18627_v37 = vld [vmem:[#allocation2 + $0x69] sm:$0xff] }
 0x113   : > { %959 = vst.msk [vmem:[#allocation2 + $0x99] sm:$0xff] %vm891_vm4, %v870_v30  ;;  %v766_v33 = vadd.f32 %v14780_v32, %v18571_v53  ;;  %v760_v34 = vpop.f32.mrb[13].mxu0  ;;  %v18621_v35 = vld [vmem:[#allocation2 + $0x61] sm:$0xff] }
 0x114   : > { %958 = vst.msk [vmem:[#allocation2 + $0x91] sm:$0xff] %vm891_vm4, %v869_v31  ;;  %v761_v36 = vadd.f32 %v18571_v53, %v760_v34  ;;  %14828 = vmatprep.mubr.msk.f32.mxu0 %vm891_vm4, %v18621_v35 }
 0x115   : > { %v872_v39 = vmax.f32 %v766_v33, 0.0  ;;  %14829 = vmatmul.mubr.msk.f32.gmra.mrb[40].mxu0 %vm891_vm4, %v18627_v37 }
 0x116   : > { %v871_v40 = vmax.f32 %v761_v36, 0.0  ;;  %v14783_v41 = vpop.f32.mrb[14].mxu0  ;;  %v18639_v46 = vld [vmem:[#allocation2 + $0x81] sm:$0xff] }
 0x117   : > { %961 = vst.msk [vmem:[#allocation2 + $0xb1] sm:$0xff] %vm891_vm4, %v872_v39  ;;  %v776_v42 = vadd.f32 %v14783_v41, %v18571_v53  ;;  %v770_v43 = vpop.f32.mrb[15].mxu0  ;;  %v18633_v44 = vld [vmem:[#allocation2 + $0x79] sm:$0xff] }
 0x118   : > { %960 = vst.msk [vmem:[#allocation2 + $0xa9] sm:$0xff] %vm891_vm4, %v871_v40  ;;  %v771_v45 = vadd.f32 %v18571_v53, %v770_v43  ;;  %14831 = vmatprep.mubr.msk.f32.mxu0 %vm891_vm4, %v18633_v44 }
 0x119   : > { %v874_v47 = vmax.f32 %v776_v42, 0.0  ;;  %14832 = vmatmul.mubr.msk.f32.gmra.mrb[42].mxu0 %vm891_vm4, %v18639_v46 }
 0x11a   : > { %v873_v48 = vmax.f32 %v771_v45, 0.0  ;;  %v14786_v49 = vpop.f32.mrb[16].mxu0  ;;  %v18651_v56 = vld [vmem:[#allocation2 + $0x99] sm:$0xff] }
 0x11b   : > { %963 = vst.msk [vmem:[#allocation2 + $0xc9] sm:$0xff] %vm891_vm4, %v874_v47  ;;  %v786_v50 = vadd.f32 %v14786_v49, %v18571_v53  ;;  %v780_v51 = vpop.f32.mrb[17].mxu0  ;;  %v18645_v54 = vld [vmem:[#allocation2 + $0x91] sm:$0xff] }
 0x11c   : > { %962 = vst.msk [vmem:[#allocation2 + $0xc1] sm:$0xff] %vm891_vm4, %v873_v48  ;;  %v781_v55 = vadd.f32 %v18571_v53, %v780_v51  ;;  %14834 = vmatprep.mubr.msk.f32.mxu0 %vm891_vm4, %v18645_v54 }
 0x11d   : > { %v876_v57 = vmax.f32 %v786_v50, 0.0  ;;  %14835 = vmatmul.mubr.msk.f32.gmra.mrb[44].mxu0 %vm891_vm4, %v18651_v56 }
 0x11e   : > { %v875_v58 = vmax.f32 %v781_v55, 0.0  ;;  %v14789_v59 = vpop.f32.mrb[18].mxu0  ;;  %v18663_v0 = vld [vmem:[#allocation2 + $0xb1] sm:$0xff] }
 0x11f   : > { %965 = vst.msk [vmem:[#allocation2 + $0xe1] sm:$0xff] %vm891_vm4, %v876_v57  ;;  %v796_v60 = vadd.f32 %v14789_v59, %v18571_v53  ;;  %v790_v61 = vpop.f32.mrb[19].mxu0  ;;  %v18657_v62 = vld [vmem:[#allocation2 + $0xa9] sm:$0xff]  ;;  %v12589_v57 = vld [vmem:[%s22014_s3 + $0x58] sm:$0xff] }
 0x120   : > { %964 = vst.msk [vmem:[#allocation2 + $0xd9] sm:$0xff] %vm891_vm4, %v875_v58  ;;  %v791_v63 = vadd.f32 %v18571_v53, %v790_v61  ;;  %14837 = vmatprep.mubr.msk.f32.mxu0 %vm891_vm4, %v18657_v62  ;;  %v12588_v55 = vld [vmem:[%s22014_s3 + $0x50] sm:$0xff] }
 0x121   : > { %v878_v1 = vmax.f32 %v796_v60, 0.0  ;;  %14838 = vmatmul.mubr.msk.f32.gmra.mrb[46].mxu0 %vm891_vm4, %v18663_v0  ;;  %v18917_v38 = vld [vmem:[#allocation2 + $0xb0] sm:$0xff] }
 0x122   : > { %v877_v2 = vmax.f32 %v791_v63, 0.0  ;;  %v14792_v3 = vpop.f32.mrb[20].mxu0  ;;  %v18675_v8 = vld [vmem:[#allocation2 + $0xc9] sm:$0xff] }
 0x123   : > { %967 = vst.msk [vmem:[#allocation2 + $0xf9] sm:$0xff] %vm891_vm4, %v878_v1  ;;  %v806_v4 = vadd.f32 %v14792_v3, %v18571_v53  ;;  %v800_v5 = vpop.f32.mrb[21].mxu0  ;;  %v18669_v6 = vld [vmem:[#allocation2 + $0xc1] sm:$0xff] }
 0x124   : > { %966 = vst.msk [vmem:[#allocation2 + $0xf1] sm:$0xff] %vm891_vm4, %v877_v2  ;;  %v801_v7 = vadd.f32 %v18571_v53, %v800_v5  ;;  %14840 = vmatprep.mubr.msk.f32.mxu0 %vm891_vm4, %v18669_v6  ;;  %v16669_v2 = vpack.c.bf16 %v12589_v57, %v12588_v55  ;;  %v18828_v57 = vld [vmem:[#allocation2 + $0x30] sm:$0xff] }
 0x125   : > { %v880_v9 = vmax.f32 %v806_v4, 0.0  ;;  %14841 = vmatmul.mubr.msk.f32.gmra.mrb[48].mxu0 %vm891_vm4, %v18675_v8 }
 0x126   : > { %v879_v10 = vmax.f32 %v801_v7, 0.0  ;;  %v14795_v12 = vpop.f32.mrb[22].mxu0  ;;  %v18687_v18 = vld [vmem:[#allocation2 + $0xe1] sm:$0xff] }
 0x127   : > { %969 = vst.msk [vmem:[#allocation2 + $0x111] sm:$0xff] %vm891_vm4, %v880_v9  ;;  %v816_v14 = vadd.f32 %v14795_v12, %v18571_v53  ;;  %v810_v15 = vpop.f32.mrb[23].mxu0  ;;  %v18681_v16 = vld [vmem:[#allocation2 + $0xd9] sm:$0xff]  ;;  %v12623_v9 = vld [vmem:[%s22014_s3 + $0x68] sm:$0xff] }
 0x128   : > { %968 = vst.msk [vmem:[#allocation2 + $0x109] sm:$0xff] %vm891_vm4, %v879_v10  ;;  %v811_v17 = vadd.f32 %v18571_v53, %v810_v15  ;;  %14843 = vmatprep.mubr.msk.f32.mxu0 %vm891_vm4, %v18681_v16  ;;  %v12622_v7 = vld [vmem:[%s22014_s3 + $0x60] sm:$0xff] }
 0x129   : > { %v882_v20 = vmax.f32 %v816_v14, 0.0  ;;  %14844 = vmatmul.mubr.msk.f32.gmra.mrb[50].mxu0 %vm891_vm4, %v18687_v18 }
 0x12a   : > { %v881_v22 = vmax.f32 %v811_v17, 0.0  ;;  %v14798_v23 = vpop.f32.mrb[24].mxu0  ;;  %v18699_v30 = vld [vmem:[#allocation2 + $0xf9] sm:$0xff] }
 0x12b   : > { %971 = vst.msk [vmem:[#allocation2 + $0x129] sm:$0xff] %vm891_vm4, %v882_v20  ;;  %v826_v24 = vadd.f32 %v14798_v23, %v18571_v53  ;;  %v820_v25 = vpop.f32.mrb[25].mxu0  ;;  %v18693_v26 = vld [vmem:[#allocation2 + $0xf1] sm:$0xff]  ;;  %v1695_v23 = vld [vmem:[#allocation2 + $0x2] sm:$0xff] }
 0x12c   : > { %970 = vst.msk [vmem:[#allocation2 + $0x121] sm:$0xff] %vm891_vm4, %v881_v22  ;;  %v821_v28 = vadd.f32 %v18571_v53, %v820_v25  ;;  %14846 = vmatprep.mubr.msk.f32.mxu0 %vm891_vm4, %v18693_v26  ;;  %v16673_v22 = vpack.c.bf16 %v12623_v9, %v12622_v7  ;;  %v18855_v7 = vld [vmem:[#allocation2 + $0x52] sm:$0xff]  ;;  %v18861_v9 = vld [vmem:[#allocation2 + $0x60] sm:$0xff] }
 0x12d   : > { %v884_v31 = vmax.f32 %v826_v24, 0.0  ;;  %14847 = vmatmul.mubr.msk.f32.gmra.mrb[52].mxu0 %vm891_vm4, %v18699_v30  ;;  %22175 = vst [vmem:[#allocation19_spill] sm:$0xff] %v18855_v7 }
 0x12e   : > { %v883_v32 = vmax.f32 %v821_v28, 0.0  ;;  %v14801_v33 = vpop.f32.mrb[26].mxu0  ;;  %v18711_v41 = vld [vmem:[#allocation2 + $0x111] sm:$0xff] }
 0x12f   : > { %973 = vst.msk [vmem:[#allocation2 + $0x141] sm:$0xff] %vm891_vm4, %v884_v31  ;;  %v836_v34 = vadd.f32 %v14801_v33, %v18571_v53  ;;  %v830_v36 = vpop.f32.mrb[27].mxu0  ;;  %v18705_v39 = vld [vmem:[#allocation2 + $0x109] sm:$0xff]  ;;  %v12625_v33 = vld [vmem:[%s22014_s3 + $0x78] sm:$0xff] }
 0x130   : > { %972 = vst.msk [vmem:[#allocation2 + $0x139] sm:$0xff] %vm891_vm4, %v883_v32  ;;  %v831_v40 = vadd.f32 %v18571_v53, %v830_v36  ;;  %14849 = vmatprep.mubr.msk.f32.mxu0 %vm891_vm4, %v18705_v39  ;;  %v12624_v32 = vld [vmem:[%s22014_s3 + $0x70] sm:$0xff] }
 0x131   : > { %v886_v42 = vmax.f32 %v836_v34, 0.0  ;;  %14850 = vmatmul.mubr.msk.f32.gmra.mrb[54].mxu0 %vm891_vm4, %v18711_v41  ;;  %v981_v34 = vld [vmem:[#allocation2 + $0x8] sm:$0xff] }
 0x132   : > { %v885_v43 = vmax.f32 %v831_v40, 0.0  ;;  %v14804_v45 = vpop.f32.mrb[28].mxu0  ;;  %v18723_v51 = vld [vmem:[#allocation2 + $0x129] sm:$0xff]  ;;  %v18802_v40 = vld [vmem:[#allocation2 + $0x18] sm:$0xff] }
 0x133   : > { %975 = vst.msk [vmem:[#allocation2 + $0x159] sm:$0xff] %vm891_vm4, %v886_v42  ;;  %v846_v47 = vadd.f32 %v14804_v45, %v18571_v53  ;;  %v840_v48 = vpop.f32.mrb[29].mxu0  ;;  %v18717_v49 = vld [vmem:[#allocation2 + $0x121] sm:$0xff]  ;;  %v1696_v36 = vld [vmem:[#allocation2 + $0xa] sm:$0xff]  ;;  %v16677_v42 = vpack.c.bf16 %v12625_v33, %v12624_v32 }
 0x134   : > { %974 = vst.msk [vmem:[#allocation2 + $0x151] sm:$0xff] %vm891_vm4, %v885_v43  ;;  %v841_v50 = vadd.f32 %v18571_v53, %v840_v48  ;;  %14852 = vmatprep.mubr.msk.f32.mxu0 %vm891_vm4, %v18717_v49  ;;  %v18806_v43 = vld [vmem:[#allocation2 + $0x1a] sm:$0xff]  ;;  %v18887_v32 = vld [vmem:[#allocation2 + $0x82] sm:$0xff]  ;;  %v18893_v33 = vld [vmem:[#allocation2 + $0x90] sm:$0xff] }
 0x135   : > { %v888_v58 = vmax.f32 %v846_v47, 0.0  ;;  %14853 = vmatmul.mubr.msk.f32.gmra.mrb[56].mxu0 %vm891_vm4, %v18723_v51  ;;  %22170 = vst [vmem:[#allocation14_spill] sm:$0xff] %v18806_v43  ;;  %v12658_v45 = vld [vmem:[%s22014_s3 + $0x80] sm:$0xff]  ;;  %v12659_v47 = vld [vmem:[%s22014_s3 + $0x88] sm:$0xff]  ;;  %22179 = vst [vmem:[#allocation23_spill] sm:$0xff] %v18887_v32 }
 0x136   : > { %v887_v59 = vmax.f32 %v841_v50, 0.0  ;;  %v14807_v60 = vpop.f32.mrb[30].mxu0  ;;  %v18746_v5 = vld [vmem:[#allocation2 + $0x141] sm:$0xff]  ;;  %v18822_v55 = vpack.c.bf16 %v12659_v47, %v12658_v45  ;;  %v18911_v47 = vld [vmem:[#allocation2 + $0xaa] sm:$0xff] }
 0x137   : > { %977 = vst.msk [vmem:[#allocation2 + $0x171] sm:$0xff] %vm891_vm4, %v888_v58  ;;  %v18734_v61 = vld [vmem:[#allocation2 + $0x139] sm:$0xff]  ;;  %v856_v3 = vadd.f32 %v14807_v60, %v18571_v53  ;;  %v850_v4 = vpop.f32.mrb[31].mxu0  ;;  %v18820_v50 = vld [vmem:[#allocation2 + $0x22] sm:$0xff]  ;;  %22182 = vst [vmem:[#allocation26_spill] sm:$0xff] %v18911_v47 }
 0x138   : > { %v18736_v63 = vld [vmem:[#allocation2 + $0x138] sm:$0xff]  ;;  %v18738_v1 = vld [vmem:[#allocation2 + $0x140] sm:$0xff]  ;;  %976 = vst.msk [vmem:[#allocation2 + $0x169] sm:$0xff] %vm891_vm4, %v887_v59  ;;  %14855 = vmatprep.mubr.msk.f32.mxu0 %vm891_vm4, %v18734_v61  ;;  %v851_v10 = vadd.f32 %v18571_v53, %v850_v4  ;;  %22171 = vst [vmem:[#allocation15_spill] sm:$0xff] %v18820_v50 }
 0x139   : > { %14911 = vmatprep.mubr.msk.f32.mxu1 %vm891_vm4, %v18736_v63  ;;  %14856 = vmatmul.mubr.msk.f32.gmra.mrb[58].mxu0 %vm891_vm4, %v18746_v5  ;;  %v890_v12 = vmax.f32 %v856_v3, 0.0  ;;  %v18818_v48 = vld [vmem:[#allocation2 + $0x20] sm:$0xff]  ;;  %v18830_v58 = vld [vmem:[#allocation2 + $0x32] sm:$0xff]  ;;  %v18847_v3 = vld [vmem:[#allocation2 + $0x4a] sm:$0xff] }
 0x13a   : > { %14912 = vmatmul.mubr.msk.f32.vlgmr.msra.gmra.mrb[0].mxu1 %vm891_vm4, %v18738_v1  ;;  %v889_v14 = vmax.f32 %v851_v10, 0.0  ;;  %v18771_v53 = vld [vmem:[#allocation2 + $0x159] sm:$0xff]  ;;  %22172 = vst [vmem:[#allocation16_spill] sm:$0xff] %v18830_v58  ;;  %22174 = vst [vmem:[#allocation18_spill] sm:$0xff] %v18847_v3  ;;  %v18853_v4 = vld [vmem:[#allocation2 + $0x50] sm:$0xff] }
 0x13b   : > { %16668 = vmatpush3.bf16.msra.mxu1 %v18565_v52  ;;  %v18760_v15 = vld [vmem:[#allocation2 + $0x151] sm:$0xff]  ;;  %979 = vst.msk [vmem:[#allocation2 + $0x189] sm:$0xff] %vm891_vm4, %v890_v12  ;;  %22167 = vst [vmem:[#allocation11_spill] sm:$0xff] %v18771_v53  ;;  %v980_v52 = vld [vmem:[#allocation2] sm:$0xff] }
 0x13c   : > { %v18762_v17 = vld [vmem:[#allocation2 + $0x150] sm:$0xff]  ;;  %v18764_v20 = vld [vmem:[#allocation2 + $0x158] sm:$0xff]  ;;  %16670 = vmatprep.subr.bf16.mxu1 %v16669_v2  ;;  %14858 = vmatprep.mubr.msk.f32.mxu0 %vm891_vm4, %v18760_v15  ;;  %978 = vst.msk [vmem:[#allocation2 + $0x181] sm:$0xff] %vm891_vm4, %v889_v14  ;;  %v18863_v10 = vld [vmem:[#allocation2 + $0x62] sm:$0xff] }
 0x13d   : > { %14914 = vmatprep.mubr.msk.f32.mxu1 %vm891_vm4, %v18762_v17  ;;  %14859 = vmatmul.mubr.msk.f32.gmra.mrb[60].mxu0 %vm891_vm4, %v18771_v53  ;;  %v18836_v59 = vld [vmem:[#allocation2 + $0x38] sm:$0xff]  ;;  %22176 = vst [vmem:[#allocation20_spill] sm:$0xff] %v18863_v10  ;;  %v18869_v12 = vld [vmem:[#allocation2 + $0x68] sm:$0xff] }
 0x13e   : > { %14915 = vmatmul.mubr.msk.f32.gmra.mrb[2].mxu1 %vm891_vm4, %v18764_v20  ;;  %v18788_v31 = vld [vmem:[#allocation2 + $0x171] sm:$0xff]  ;;  %v18838_v60 = vld [vmem:[#allocation2 + $0x3a] sm:$0xff]  ;;  %v18909_v45 = vld [vmem:[#allocation2 + $0xa8] sm:$0xff] }
 0x13f   : > { %16672 = vmatpush3.bf16.msra.mxu1 %v16669_v2  ;;  %v18778_v24 = vld [vmem:[#allocation2 + $0x169] sm:$0xff]  ;;  %22169 = vst [vmem:[#allocation13_spill] sm:$0xff] %v18788_v31  ;;  %22173 = vst [vmem:[#allocation17_spill] sm:$0xff] %v18838_v60 }
 0x140   : > { %22168 = vst [vmem:[#allocation12_spill] sm:$0xff] %v18778_v24  ;;  %v18780_v25 = vld [vmem:[#allocation2 + $0x168] sm:$0xff]  ;;  %v18782_v28 = vld [vmem:[#allocation2 + $0x170] sm:$0xff]  ;;  %16674 = vmatprep.subr.bf16.mxu1 %v16673_v22  ;;  %14861 = vmatprep.mubr.msk.f32.mxu0 %vm891_vm4, %v18778_v24  ;;  %v19017_v24 = vld [vmem:[#allocation2 + $0x15a] sm:$0xff] }
 0x141   : > { %14917 = vmatprep.mubr.msk.f32.mxu1 %vm891_vm4, %v18780_v25  ;;  %14862 = vmatmul.mubr.msk.f32.gmra.mrb[62].mxu0 %vm891_vm4, %v18788_v31  ;;  %v18845_v2 = vld [vmem:[#allocation2 + $0x48] sm:$0xff]  ;;  %22197 = vst [vmem:[#allocation41_spill] sm:$0xff] %v19017_v24 }
 0x142   : > { %14918 = vmatmul.mubr.msk.f32.gmra.mrb[4].mxu1 %vm891_vm4, %v18782_v28  ;;  %14872 = vmatprep.mubr.msk.f32.mxu0 %vm891_vm4, %v980_v52  ;;  %v18871_v14 = vld [vmem:[#allocation2 + $0x6a] sm:$0xff]  ;;  %v18879_v52 = vld [vmem:[#allocation2 + $0x7a] sm:$0xff]  ;;  %v19009_v31 = vld [vmem:[#allocation2 + $0x142] sm:$0xff] }
 0x143   : > { %14928 = vmatprep.mubr.msk.f32.mxu1 %vm891_vm4, %v1695_v23  ;;  %22177 = vst [vmem:[#allocation21_spill] sm:$0xff] %v18871_v14  ;;  %22178 = vst [vmem:[#allocation22_spill] sm:$0xff] %v18879_v52  ;;  %v18885_v23 = vld [vmem:[#allocation2 + $0x80] sm:$0xff]  ;;  %v12695_v53 = vld [vmem:[%s22014_s3 + $0xa8] sm:$0xff] }
 0x144   : > { %22195 = vst [vmem:[#allocation39_spill] sm:$0xff] %v19009_v31 }
 0x145   : > { %14873 = vmatmul.mubr.msk.f32.vlgmr.msra.gmra.mrb[32].mxu0 %vm891_vm4, %v981_v34  ;;  %v18895_v34 = vld [vmem:[#allocation2 + $0x92] sm:$0xff] }
 0x146   : > { %14929 = vmatmul.mubr.msk.f32.vlgmr.msra.gmra.mrb[6].mxu1 %vm891_vm4, %v1696_v36  ;;  %14875 = vmatprep.mubr.msk.f32.mxu0 %vm891_vm4, %v18802_v40  ;;  %22180 = vst [vmem:[#allocation24_spill] sm:$0xff] %v18895_v34  ;;  %v18901_v36 = vld [vmem:[#allocation2 + $0x98] sm:$0xff] }
 0x147   : > { %14931 = vmatprep.mubr.msk.f32.mxu1 %vm891_vm4, %v18806_v43  ;;  %16676 = vmatpush3.bf16.msra.mxu1 %v16673_v22  ;;  %v18877_v22 = vld [vmem:[#allocation2 + $0x78] sm:$0xff]  ;;  %v18999_v43 = vld [vmem:[#allocation2 + $0x12a] sm:$0xff] }
 0x148   : > { %16678 = vmatprep.subr.bf16.mxu1 %v16677_v42  ;;  %22193 = vst [vmem:[#allocation37_spill] sm:$0xff] %v18999_v43 }
 0x149   : > { %14876 = vmatmul.mubr.msk.f32.gmra.mrb[34].mxu0 %vm891_vm4, %v18818_v48 }
 0x14a   : > { %14932 = vmatmul.mubr.msk.f32.gmra.mrb[8].mxu1 %vm891_vm4, %v18820_v50  ;;  %14878 = vmatprep.mubr.msk.f32.mxu0 %vm891_vm4, %v18828_v57  ;;  %v18991_v50 = vld [vmem:[#allocation2 + $0x122] sm:$0xff] }
 0x14b   : > { %14934 = vmatprep.mubr.msk.f32.mxu1 %vm891_vm4, %v18830_v58  ;;  %16680 = vmatpush3.bf16.msra.mxu1 %v16677_v42  ;;  %v18903_v42 = vld [vmem:[#allocation2 + $0x9a] sm:$0xff]  ;;  %v18983_v58 = vld [vmem:[#allocation2 + $0x112] sm:$0xff]  ;;  %22192 = vst [vmem:[#allocation36_spill] sm:$0xff] %v18991_v50 }
 0x14c   : > { %16682 = vmatprep.subr.bf16.mxu1 %v18822_v55  ;;  %22181 = vst [vmem:[#allocation25_spill] sm:$0xff] %v18903_v42  ;;  %22191 = vst [vmem:[#allocation35_spill] sm:$0xff] %v18983_v58 }
 0x14d   : > { %14879 = vmatmul.mubr.msk.f32.gmra.mrb[36].mxu0 %vm891_vm4, %v18836_v59 }
 0x14e   : > { %14935 = vmatmul.mubr.msk.f32.gmra.mrb[10].mxu1 %vm891_vm4, %v18838_v60  ;;  %14881 = vmatprep.mubr.msk.f32.mxu0 %vm891_vm4, %v18845_v2  ;;  %v18975_v60 = vld [vmem:[#allocation2 + $0x10a] sm:$0xff] }
 0x14f   : > { %14937 = vmatprep.mubr.msk.f32.mxu1 %vm891_vm4, %v18847_v3  ;;  %v18967_v3 = vld [vmem:[#allocation2 + $0xfa] sm:$0xff]  ;;  %22190 = vst [vmem:[#allocation34_spill] sm:$0xff] %v18975_v60 }
 0x150   : > { %22189 = vst [vmem:[#allocation33_spill] sm:$0xff] %v18967_v3 }
 0x151   : > { %14882 = vmatmul.mubr.msk.f32.gmra.mrb[38].mxu0 %vm891_vm4, %v18853_v4 }
 0x152   : > { %14938 = vmatmul.mubr.msk.f32.gmra.mrb[12].mxu1 %vm891_vm4, %v18855_v7  ;;  %14884 = vmatprep.mubr.msk.f32.mxu0 %vm891_vm4, %v18861_v9  ;;  %v18959_v7 = vld [vmem:[#allocation2 + $0xf2] sm:$0xff] }
 0x153   : > { %14940 = vmatprep.mubr.msk.f32.mxu1 %vm891_vm4, %v18863_v10  ;;  %v18951_v10 = vld [vmem:[#allocation2 + $0xe2] sm:$0xff]  ;;  %22188 = vst [vmem:[#allocation32_spill] sm:$0xff] %v18959_v7 }
 0x154   : > { %22187 = vst [vmem:[#allocation31_spill] sm:$0xff] %v18951_v10 }
 0x155   : > { %14885 = vmatmul.mubr.msk.f32.gmra.mrb[40].mxu0 %vm891_vm4, %v18869_v12 }
 0x156   : > { %14941 = vmatmul.mubr.msk.f32.gmra.mrb[14].mxu1 %vm891_vm4, %v18871_v14  ;;  %14887 = vmatprep.mubr.msk.f32.mxu0 %vm891_vm4, %v18877_v22  ;;  %v18943_v14 = vld [vmem:[#allocation2 + $0xda] sm:$0xff] }
 0x157   : > { %14943 = vmatprep.mubr.msk.f32.mxu1 %vm891_vm4, %v18879_v52  ;;  %v18935_v52 = vld [vmem:[#allocation2 + $0xca] sm:$0xff]  ;;  %22186 = vst [vmem:[#allocation30_spill] sm:$0xff] %v18943_v14 }
 0x158   : > { %22185 = vst [vmem:[#allocation29_spill] sm:$0xff] %v18935_v52 }
 0x159   : > { %14888 = vmatmul.mubr.msk.f32.gmra.mrb[42].mxu0 %vm891_vm4, %v18885_v23 }
 0x15a   : > { %14944 = vmatmul.mubr.msk.f32.gmra.mrb[16].mxu1 %vm891_vm4, %v18887_v32  ;;  %14890 = vmatprep.mubr.msk.f32.mxu0 %vm891_vm4, %v18893_v33  ;;  %v18927_v32 = vld [vmem:[#allocation2 + $0xc2] sm:$0xff] }
 0x15b   : > { %14946 = vmatprep.mubr.msk.f32.mxu1 %vm891_vm4, %v18895_v34  ;;  %v18919_v34 = vld [vmem:[#allocation2 + $0xb2] sm:$0xff]  ;;  %22184 = vst [vmem:[#allocation28_spill] sm:$0xff] %v18927_v32 }
 0x15c   : > { %22183 = vst [vmem:[#allocation27_spill] sm:$0xff] %v18919_v34 }
 0x15d   : > { %14891 = vmatmul.mubr.msk.f32.gmra.mrb[44].mxu0 %vm891_vm4, %v18901_v36 }
 0x15e   : > { %14947 = vmatmul.mubr.msk.f32.gmra.mrb[18].mxu1 %vm891_vm4, %v18903_v42  ;;  %14893 = vmatprep.mubr.msk.f32.mxu0 %vm891_vm4, %v18909_v45  ;;  %v18925_v42 = vld [vmem:[#allocation2 + $0xc0] sm:$0xff] }
 0x15f   : > { %14949 = vmatprep.mubr.msk.f32.mxu1 %vm891_vm4, %v18911_v47  ;;  %v18933_v47 = vld [vmem:[#allocation2 + $0xc8] sm:$0xff] }
 0x161   : > { %14894 = vmatmul.mubr.msk.f32.gmra.mrb[46].mxu0 %vm891_vm4, %v18917_v38 }
 0x162   : > { %14950 = vmatmul.mubr.msk.f32.gmra.mrb[20].mxu1 %vm891_vm4, %v18919_v34  ;;  %14896 = vmatprep.mubr.msk.f32.mxu0 %vm891_vm4, %v18925_v42  ;;  %v18941_v34 = vld [vmem:[#allocation2 + $0xd8] sm:$0xff] }
 0x163   : > { %14952 = vmatprep.mubr.msk.f32.mxu1 %vm891_vm4, %v18927_v32  ;;  %v18949_v32 = vld [vmem:[#allocation2 + $0xe0] sm:$0xff] }
 0x165   : > { %14897 = vmatmul.mubr.msk.f32.gmra.mrb[48].mxu0 %vm891_vm4, %v18933_v47 }
 0x166   : > { %14953 = vmatmul.mubr.msk.f32.gmra.mrb[22].mxu1 %vm891_vm4, %v18935_v52  ;;  %14899 = vmatprep.mubr.msk.f32.mxu0 %vm891_vm4, %v18941_v34  ;;  %v18957_v52 = vld [vmem:[#allocation2 + $0xf0] sm:$0xff] }
 0x167   : > { %14955 = vmatprep.mubr.msk.f32.mxu1 %vm891_vm4, %v18943_v14  ;;  %v18965_v14 = vld [vmem:[#allocation2 + $0xf8] sm:$0xff] }
 0x169   : > { %14900 = vmatmul.mubr.msk.f32.gmra.mrb[50].mxu0 %vm891_vm4, %v18949_v32 }
 0x16a   : > { %14956 = vmatmul.mubr.msk.f32.gmra.mrb[24].mxu1 %vm891_vm4, %v18951_v10  ;;  %14902 = vmatprep.mubr.msk.f32.mxu0 %vm891_vm4, %v18957_v52  ;;  %v18973_v10 = vld [vmem:[#allocation2 + $0x108] sm:$0xff] }
 0x16b   : > { %14958 = vmatprep.mubr.msk.f32.mxu1 %vm891_vm4, %v18959_v7  ;;  %v18981_v7 = vld [vmem:[#allocation2 + $0x110] sm:$0xff] }
 0x16d   : > { %14903 = vmatmul.mubr.msk.f32.gmra.mrb[52].mxu0 %vm891_vm4, %v18965_v14 }
 0x16e   : > { %14959 = vmatmul.mubr.msk.f32.gmra.mrb[26].mxu1 %vm891_vm4, %v18967_v3  ;;  %14905 = vmatprep.mubr.msk.f32.mxu0 %vm891_vm4, %v18973_v10  ;;  %v18989_v3 = vld [vmem:[#allocation2 + $0x120] sm:$0xff] }
 0x16f   : > { %14961 = vmatprep.mubr.msk.f32.mxu1 %vm891_vm4, %v18975_v60  ;;  %v18997_v60 = vld [vmem:[#allocation2 + $0x128] sm:$0xff] }
 0x171   : > { %14906 = vmatmul.mubr.msk.f32.gmra.mrb[54].mxu0 %vm891_vm4, %v18981_v7 }
 0x172   : > { %14962 = vmatmul.mubr.msk.f32.gmra.mrb[28].mxu1 %vm891_vm4, %v18983_v58  ;;  %14908 = vmatprep.mubr.msk.f32.mxu0 %vm891_vm4, %v18989_v3  ;;  %v19005_v58 = vld [vmem:[#allocation2 + $0x13a] sm:$0xff] }
 0x173   : > { %14964 = vmatprep.mubr.msk.f32.mxu1 %vm891_vm4, %v18991_v50  ;;  %22194 = vst [vmem:[#allocation38_spill] sm:$0xff] %v19005_v58  ;;  %v19013_v50 = vld [vmem:[#allocation2 + $0x152] sm:$0xff] }
 0x174   : > { %22196 = vst [vmem:[#allocation40_spill] sm:$0xff] %v19013_v50 }
 0x175   : > { %14909 = vmatmul.mubr.msk.f32.gmra.mrb[56].mxu0 %vm891_vm4, %v18997_v60 }
 0x176   : > { %14965 = vmatmul.mubr.msk.f32.gmra.mrb[30].mxu1 %vm891_vm4, %v18999_v43  ;;  %v19021_v43 = vld [vmem:[#allocation2 + $0x16a] sm:$0xff] }
 0x177   : > { %14967 = vmatprep.mubr.msk.f32.mxu1 %vm891_vm4, %v19005_v58  ;;  %22198 = vst [vmem:[#allocation42_spill] sm:$0xff] %v19021_v43  ;;  %v19025_v58 = vld [vmem:[#allocation2 + $0x172] sm:$0xff] }
 0x178   : > { %22199 = vst [vmem:[#allocation43_spill] sm:$0xff] %v19025_v58 }
 0x17a   : > { %14968 = vmatmul.mubr.msk.f32.gmra.mrb[0].mxu1 %vm891_vm4, %v19009_v31  ;;  %v12660_v31 = vld [vmem:[%s22014_s3 + $0x90] sm:$0xff] }
 0x17b   : > { %14970 = vmatprep.mubr.msk.f32.mxu1 %vm891_vm4, %v19013_v50  ;;  %v12661_v50 = vld [vmem:[%s22014_s3 + $0x98] sm:$0xff] }
 0x17e   : > { %14971 = vmatmul.mubr.msk.f32.gmra.mrb[2].mxu1 %vm891_vm4, %v19017_v24  ;;  %v16685_v24 = vpack.c.bf16 %v12661_v50, %v12660_v31  ;;  %v12696_v31 = vld [vmem:[%s22014_s3 + $0xb0] sm:$0xff]  ;;  %v12731_v50 = vld [vmem:[%s22014_s3 + $0xc8] sm:$0xff] }
 0x17f   : > { %14973 = vmatprep.mubr.msk.f32.mxu1 %vm891_vm4, %v19021_v43  ;;  %v12694_v43 = vld [vmem:[%s22014_s3 + $0xa0] sm:$0xff] }
 0x182   : > { %14974 = vmatmul.mubr.msk.f32.gmra.mrb[4].mxu1 %vm891_vm4, %v19025_v58  ;;  %v16689_v58 = vpack.c.bf16 %v12695_v53, %v12694_v43  ;;  %v19100_v53 = vld [vmem:[#allocation2 + $0x180] sm:$0xff] }
 0x183   : > { %14984 = vmatprep.mubr.msk.f32.mxu1 %vm891_vm4, %v18802_v40  ;;  %v12697_v40 = vld [vmem:[%s22014_s3 + $0xb8] sm:$0xff] }
 0x184   : > { %v16693_v43 = vpack.c.bf16 %v12697_v40, %v12696_v31  ;;  %v22221_v40 = vld [vmem:[#allocation25_spill] sm:$0xff] }
 0x186   : > { %14985 = vmatmul.mubr.msk.f32.vlgmr.msra.gmra.mrb[6].mxu1 %vm891_vm4, %v18818_v48  ;;  %v12730_v48 = vld [vmem:[%s22014_s3 + $0xc0] sm:$0xff] }
 0x187   : > { %14987 = vmatprep.mubr.msk.f32.mxu1 %vm891_vm4, %v18828_v57  ;;  %16684 = vmatpush3.bf16.msra.mxu1 %v18822_v55  ;;  %v16697_v55 = vpack.c.bf16 %v12731_v50, %v12730_v48  ;;  %v22223_v48 = vld [vmem:[#allocation26_spill] sm:$0xff] }
 0x188   : > { %16686 = vmatprep.subr.bf16.mxu1 %v16685_v24 }
 0x18a   : > { %14988 = vmatmul.mubr.msk.f32.gmra.mrb[8].mxu1 %vm891_vm4, %v18836_v59 }
 0x18b   : > { %14990 = vmatprep.mubr.msk.f32.mxu1 %vm891_vm4, %v18845_v2  ;;  %16688 = vmatpush3.bf16.msra.mxu1 %v16685_v24  ;;  %v19106_v24 = vld [vmem:[#allocation2 + $0x188] sm:$0xff] }
 0x18c   : > { %16690 = vmatprep.subr.bf16.mxu1 %v16689_v58 }
 0x18e   : > { %14991 = vmatmul.mubr.msk.f32.gmra.mrb[10].mxu1 %vm891_vm4, %v18853_v4 }
 0x18f   : > { %14993 = vmatprep.mubr.msk.f32.mxu1 %vm891_vm4, %v18861_v9 }
 0x192   : > { %14994 = vmatmul.mubr.msk.f32.gmra.mrb[12].mxu1 %vm891_vm4, %v18869_v12 }
 0x193   : > { %14996 = vmatprep.mubr.msk.f32.mxu1 %vm891_vm4, %v18877_v22 }
 0x196   : > { %14997 = vmatmul.mubr.msk.f32.gmra.mrb[14].mxu1 %vm891_vm4, %v18885_v23 }
 0x197   : > { %14999 = vmatprep.mubr.msk.f32.mxu1 %vm891_vm4, %v18893_v33 }
 0x19a   : > { %15000 = vmatmul.mubr.msk.f32.gmra.mrb[16].mxu1 %vm891_vm4, %v18901_v36 }
 0x19b   : > { %15002 = vmatprep.mubr.msk.f32.mxu1 %vm891_vm4, %v18909_v45 }
 0x19e   : > { %15003 = vmatmul.mubr.msk.f32.gmra.mrb[18].mxu1 %vm891_vm4, %v18917_v38 }
 0x19f   : > { %15005 = vmatprep.mubr.msk.f32.mxu1 %vm891_vm4, %v18925_v42 }
 0x1a2   : > { %15006 = vmatmul.mubr.msk.f32.gmra.mrb[20].mxu1 %vm891_vm4, %v18933_v47 }
 0x1a3   : > { %15008 = vmatprep.mubr.msk.f32.mxu1 %vm891_vm4, %v18941_v34 }
 0x1a6   : > { %15009 = vmatmul.mubr.msk.f32.gmra.mrb[22].mxu1 %vm891_vm4, %v18949_v32 }
 0x1a7   : > { %15011 = vmatprep.mubr.msk.f32.mxu1 %vm891_vm4, %v18957_v52 }
 0x1aa   : > { %15012 = vmatmul.mubr.msk.f32.gmra.mrb[24].mxu1 %vm891_vm4, %v18965_v14 }
 0x1ab   : > { %15014 = vmatprep.mubr.msk.f32.mxu1 %vm891_vm4, %v18973_v10 }
 0x1ae   : > { %15015 = vmatmul.mubr.msk.f32.gmra.mrb[26].mxu1 %vm891_vm4, %v18981_v7 }
 0x1af   : > { %15017 = vmatprep.mubr.msk.f32.mxu1 %vm891_vm4, %v18989_v3 }
 0x1b2   : > { %15018 = vmatmul.mubr.msk.f32.gmra.mrb[28].mxu1 %vm891_vm4, %v18997_v60 }
 0x1b3   : > { %15020 = vmatprep.mubr.msk.f32.mxu1 %vm891_vm4, %v18736_v63 }
 0x1b6   : > { %15021 = vmatmul.mubr.msk.f32.gmra.mrb[30].mxu1 %vm891_vm4, %v18738_v1 }
 0x1b7   : > { %15023 = vmatprep.mubr.msk.f32.mxu1 %vm891_vm4, %v18762_v17 }
 0x1ba   : > { %15024 = vmatmul.mubr.msk.f32.gmra.mrb[0].mxu1 %vm891_vm4, %v18764_v20 }
 0x1bb   : > { %15026 = vmatprep.mubr.msk.f32.mxu1 %vm891_vm4, %v18780_v25 }
 0x1be   : > { %15027 = vmatmul.mubr.msk.f32.gmra.mrb[2].mxu1 %vm891_vm4, %v18782_v28 }
 0x1bf   : > { %15029 = vmatprep.mubr.msk.f32.mxu1 %vm891_vm4, %v19100_v53 }
 0x1c2   : > { %15030 = vmatmul.mubr.msk.f32.gmra.mrb[4].mxu1 %vm891_vm4, %v19106_v24 }
 0x1c3   : > { %15040 = vmatprep.mubr.msk.f32.mxu1 %vm891_vm4, %v18585_v11  ;;  %v22200_v11 = vld [vmem:[#allocation11_spill] sm:$0xff] }
 0x1c6   : > { %15041 = vmatmul.mubr.msk.f32.vlgmr.msra.gmra.mrb[6].mxu1 %vm891_vm4, %v18591_v13  ;;  %v22201_v13 = vld [vmem:[#allocation12_spill] sm:$0xff] }
 0x1c7   : > { %15043 = vmatprep.mubr.msk.f32.mxu1 %vm891_vm4, %v18597_v19  ;;  %16692 = vmatpush3.bf16.msra.mxu1 %v16689_v58  ;;  %v22202_v19 = vld [vmem:[#allocation13_spill] sm:$0xff]  ;;  %v22219_v58 = vld [vmem:[#allocation24_spill] sm:$0xff] }
 0x1c8   : > { %16694 = vmatprep.subr.bf16.mxu1 %v16693_v43 }
 0x1ca   : > { %15044 = vmatmul.mubr.msk.f32.gmra.mrb[8].mxu1 %vm891_vm4, %v18603_v21  ;;  %v19182_v21 = vld [vmem:[#allocation2 + $0x181] sm:$0xff] }
 0x1cb   : > { %15046 = vmatprep.mubr.msk.f32.mxu1 %vm891_vm4, %v18609_v27  ;;  %16696 = vmatpush3.bf16.msra.mxu1 %v16693_v43  ;;  %v19186_v27 = vld [vmem:[#allocation2 + $0x189] sm:$0xff] }
 0x1cc   : > { %16698 = vmatprep.subr.bf16.mxu1 %v16697_v55 }
 0x1ce   : > { %15047 = vmatmul.mubr.msk.f32.gmra.mrb[10].mxu1 %vm891_vm4, %v18615_v29  ;;  %v12732_v29 = vld [vmem:[%s22014_s3 + $0xd0] sm:$0xff] }
 0x1cf   : > { %15049 = vmatprep.mubr.msk.f32.mxu1 %vm891_vm4, %v18621_v35  ;;  %v12733_v35 = vld [vmem:[%s22014_s3 + $0xd8] sm:$0xff] }
 0x1d2   : > { %15050 = vmatmul.mubr.msk.f32.gmra.mrb[12].mxu1 %vm891_vm4, %v18627_v37  ;;  %v22203_v37 = vld [vmem:[#allocation14_spill] sm:$0xff] }
 0x1d3   : > { %15052 = vmatprep.mubr.msk.f32.mxu1 %vm891_vm4, %v18633_v44  ;;  %v16701_v44 = vpack.c.bf16 %v12733_v35, %v12732_v29  ;;  %v22230_v35 = vld [vmem:[#allocation29_spill] sm:$0xff] }
 0x1d6   : > { %15053 = vmatmul.mubr.msk.f32.gmra.mrb[14].mxu1 %vm891_vm4, %v18639_v46  ;;  %v12766_v46 = vld [vmem:[%s22014_s3 + $0xe0] sm:$0xff] }
 0x1d7   : > { %15055 = vmatprep.mubr.msk.f32.mxu1 %vm891_vm4, %v18645_v54  ;;  %v12767_v54 = vld [vmem:[%s22014_s3 + $0xe8] sm:$0xff] }
 0x1da   : > { %15056 = vmatmul.mubr.msk.f32.gmra.mrb[16].mxu1 %vm891_vm4, %v18651_v56  ;;  %v22204_v56 = vld [vmem:[#allocation15_spill] sm:$0xff] }
 0x1db   : > { %15058 = vmatprep.mubr.msk.f32.mxu1 %vm891_vm4, %v18657_v62  ;;  %v22205_v62 = vld [vmem:[#allocation16_spill] sm:$0xff] }
 0x1de   : > { %15059 = vmatmul.mubr.msk.f32.gmra.mrb[18].mxu1 %vm891_vm4, %v18663_v0  ;;  %v19208_v0 = vpack.c.bf16 %v12767_v54, %v12766_v46  ;;  %v22234_v54 = vld [vmem:[#allocation31_spill] sm:$0xff] }
 0x1df   : > { %15061 = vmatprep.mubr.msk.f32.mxu1 %vm891_vm4, %v18669_v6  ;;  %v22206_v6 = vld [vmem:[#allocation17_spill] sm:$0xff] }
 0x1e2   : > { %15062 = vmatmul.mubr.msk.f32.gmra.mrb[20].mxu1 %vm891_vm4, %v18675_v8  ;;  %v22207_v8 = vld [vmem:[#allocation18_spill] sm:$0xff] }
 0x1e3   : > { %15064 = vmatprep.mubr.msk.f32.mxu1 %vm891_vm4, %v18681_v16 }
 0x1e6   : > { %15065 = vmatmul.mubr.msk.f32.gmra.mrb[22].mxu1 %vm891_vm4, %v18687_v18 }
 0x1e7   : > { %15067 = vmatprep.mubr.msk.f32.mxu1 %vm891_vm4, %v18693_v26  ;;  %v22210_v26 = vld [vmem:[#allocation19_spill] sm:$0xff] }
 0x1ea   : > { %15068 = vmatmul.mubr.msk.f32.gmra.mrb[24].mxu1 %vm891_vm4, %v18699_v30  ;;  %v22211_v30 = vld [vmem:[#allocation20_spill] sm:$0xff] }
 0x1eb   : > { %15070 = vmatprep.mubr.msk.f32.mxu1 %vm891_vm4, %v18705_v39 }
 0x1ee   : > { %15071 = vmatmul.mubr.msk.f32.gmra.mrb[26].mxu1 %vm891_vm4, %v18711_v41 }
 0x1ef   : > { %15073 = vmatprep.mubr.msk.f32.mxu1 %vm891_vm4, %v18717_v49  ;;  %v22214_v49 = vld [vmem:[#allocation21_spill] sm:$0xff] }
 0x1f2   : > { %15074 = vmatmul.mubr.msk.f32.gmra.mrb[28].mxu1 %vm891_vm4, %v18723_v51  ;;  %v22215_v51 = vld [vmem:[#allocation22_spill] sm:$0xff] }
 0x1f3   : > { %15076 = vmatprep.mubr.msk.f32.mxu1 %vm891_vm4, %v18734_v61 }
 0x1f6   : > { %15077 = vmatmul.mubr.msk.f32.gmra.mrb[30].mxu1 %vm891_vm4, %v18746_v5 }
 0x1f7   : > { %15079 = vmatprep.mubr.msk.f32.mxu1 %vm891_vm4, %v18760_v15  ;;  %v22218_v15 = vld [vmem:[#allocation23_spill] sm:$0xff] }
 0x1fa   : > { %15080 = vmatmul.mubr.msk.f32.gmra.mrb[0].mxu1 %vm891_vm4, %v22200_v11  ;;  %v22226_v11 = vld [vmem:[#allocation27_spill] sm:$0xff] }
 0x1fb   : > { %15082 = vmatprep.mubr.msk.f32.mxu1 %vm891_vm4, %v22201_v13  ;;  %v22227_v13 = vld [vmem:[#allocation28_spill] sm:$0xff] }
 0x1fe   : > { %15083 = vmatmul.mubr.msk.f32.gmra.mrb[2].mxu1 %vm891_vm4, %v22202_v19 }
 0x1ff   : > { %15085 = vmatprep.mubr.msk.f32.mxu1 %vm891_vm4, %v19182_v21 }
 0x202   : > { %15086 = vmatmul.mubr.msk.f32.gmra.mrb[4].mxu1 %vm891_vm4, %v19186_v27 }
 0x203   : > { %15096 = vmatprep.mubr.msk.f32.mxu1 %vm891_vm4, %v22203_v37  ;;  %v22231_v37 = vld [vmem:[#allocation30_spill] sm:$0xff] }
 0x206   : > { %15097 = vmatmul.mubr.msk.f32.vlgmr.msra.gmra.mrb[6].mxu1 %vm891_vm4, %v22204_v56  ;;  %v22235_v56 = vld [vmem:[#allocation32_spill] sm:$0xff] }
 0x207   : > { %15099 = vmatprep.mubr.msk.f32.mxu1 %vm891_vm4, %v22205_v62  ;;  %16700 = vmatpush3.bf16.msra.mxu1 %v16697_v55 }
 0x208   : > { %16702 = vmatprep.subr.bf16.mxu1 %v16701_v44 }
 0x20a   : > { %15100 = vmatmul.mubr.msk.f32.gmra.mrb[8].mxu1 %vm891_vm4, %v22206_v6 }
 0x20b   : > { %15102 = vmatprep.mubr.msk.f32.mxu1 %vm891_vm4, %v22207_v8  ;;  %16704 = vmatpush3.bf16.msra.mxu1 %v16701_v44  ;;  %v22238_v8 = vld [vmem:[#allocation33_spill] sm:$0xff] }
 0x20c   : > { %16706 = vmatprep.subr.bf16.mxu1 %v19208_v0  ;;  %v19215_v16 = vpop.f32.mrb[58].mxu0 }
 0x20d   : > { %22208 = vst [vmem:[#allocation11_spill] sm:$0xff] %v19215_v16  ;;  %v19217_v18 = vpop.f32.mrb[59].mxu0 }
 0x20e   : > { %22209 = vst [vmem:[#allocation12_spill] sm:$0xff] %v19217_v18  ;;  %15103 = vmatmul.mubr.msk.f32.gmra.mrb[10].mxu1 %vm891_vm4, %v22210_v26  ;;  %v22243_v18 = vld [vmem:[#allocation36_spill] sm:$0xff] }
 0x20f   : > { %15105 = vmatprep.mubr.msk.f32.mxu1 %vm891_vm4, %v22211_v30 }
 0x210   : > { %v19223_v39 = vpop.f32.mrb[60].mxu0 }
 0x211   : > { %22212 = vst [vmem:[#allocation13_spill] sm:$0xff] %v19223_v39  ;;  %v19225_v41 = vpop.f32.mrb[61].mxu0  ;;  %v22242_v39 = vld [vmem:[#allocation35_spill] sm:$0xff] }
 0x212   : > { %22213 = vst [vmem:[#allocation14_spill] sm:$0xff] %v19225_v41  ;;  %15106 = vmatmul.mubr.msk.f32.gmra.mrb[12].mxu1 %vm891_vm4, %v22214_v49 }
 0x213   : > { %15108 = vmatprep.mubr.msk.f32.mxu1 %vm891_vm4, %v22215_v51 }
 0x214   : > { %v19231_v61 = vpop.f32.mrb[62].mxu0 }
 0x215   : > { %22216 = vst [vmem:[#allocation15_spill] sm:$0xff] %v19231_v61  ;;  %v19233_v5 = vpop.f32.mrb[63].mxu0 }
 0x216   : > { %22217 = vst [vmem:[#allocation16_spill] sm:$0xff] %v19233_v5  ;;  %15109 = vmatmul.mubr.msk.f32.gmra.mrb[14].mxu1 %vm891_vm4, %v22218_v15  ;;  %v22239_v5 = vld [vmem:[#allocation34_spill] sm:$0xff] }
 0x217   : > { %15111 = vmatprep.mubr.msk.f32.mxu1 %vm891_vm4, %v22219_v58 }
 0x218   : > { %v19239_v31 = vpop.f32.mrb[32].mxu0 }
 0x219   : > { %22220 = vst [vmem:[#allocation17_spill] sm:$0xff] %v19239_v31  ;;  %v19243_v43 = vpop.f32.mrb[33].mxu0  ;;  %v12768_v31 = vld [vmem:[%s22014_s3 + $0xf0] sm:$0xff] }
 0x21a   : > { %15112 = vmatmul.mubr.msk.f32.gmra.mrb[16].mxu1 %vm891_vm4, %v22221_v40  ;;  %22222 = vst [vmem:[#allocation18_spill] sm:$0xff] %v19243_v43  ;;  %v19317_v43 = vld [vmem:[#allocation2 + $0x182] sm:$0xff] }
 0x21b   : > { %15114 = vmatprep.mubr.msk.f32.mxu1 %vm891_vm4, %v22223_v48 }
 0x21c   : > { %v19247_v50 = vpop.f32.mrb[34].mxu0 }
 0x21d   : > { %22224 = vst [vmem:[#allocation19_spill] sm:$0xff] %v19247_v50  ;;  %v19249_v55 = vpop.f32.mrb[35].mxu0 }
 0x21e   : > { %22225 = vst [vmem:[#allocation20_spill] sm:$0xff] %v19249_v55  ;;  %15115 = vmatmul.mubr.msk.f32.gmra.mrb[18].mxu1 %vm891_vm4, %v22226_v11  ;;  %v22255_v55 = vld [vmem:[#allocation42_spill] sm:$0xff] }
 0x21f   : > { %15117 = vmatprep.mubr.msk.f32.mxu1 %vm891_vm4, %v22227_v13 }
 0x220   : > { %v19255_v19 = vpop.f32.mrb[36].mxu0 }
 0x221   : > { %22228 = vst [vmem:[#allocation21_spill] sm:$0xff] %v19255_v19  ;;  %v19257_v29 = vpop.f32.mrb[37].mxu0 }
 0x222   : > { %22229 = vst [vmem:[#allocation22_spill] sm:$0xff] %v19257_v29  ;;  %15118 = vmatmul.mubr.msk.f32.gmra.mrb[20].mxu1 %vm891_vm4, %v22230_v35  ;;  %v22251_v29 = vld [vmem:[#allocation40_spill] sm:$0xff] }
 0x223   : > { %15120 = vmatprep.mubr.msk.f32.mxu1 %vm891_vm4, %v22231_v37 }
 0x224   : > { %v19263_v44 = vpop.f32.mrb[38].mxu0 }
 0x225   : > { %22232 = vst [vmem:[#allocation23_spill] sm:$0xff] %v19263_v44  ;;  %v19265_v46 = vpop.f32.mrb[39].mxu0 }
 0x226   : > { %22233 = vst [vmem:[#allocation24_spill] sm:$0xff] %v19265_v46  ;;  %15121 = vmatmul.mubr.msk.f32.gmra.mrb[22].mxu1 %vm891_vm4, %v22234_v54  ;;  %v22247_v46 = vld [vmem:[#allocation38_spill] sm:$0xff] }
 0x227   : > { %15123 = vmatprep.mubr.msk.f32.mxu1 %vm891_vm4, %v22235_v56 }
 0x228   : > { %v19271_v62 = vpop.f32.mrb[40].mxu0 }
 0x229   : > { %22236 = vst [vmem:[#allocation25_spill] sm:$0xff] %v19271_v62  ;;  %v19273_v6 = vpop.f32.mrb[41].mxu0 }
 0x22a   : > { %22237 = vst [vmem:[#allocation26_spill] sm:$0xff] %v19273_v6  ;;  %15124 = vmatmul.mubr.msk.f32.gmra.mrb[24].mxu1 %vm891_vm4, %v22238_v8  ;;  %v22246_v6 = vld [vmem:[#allocation37_spill] sm:$0xff] }
 0x22b   : > { %15126 = vmatprep.mubr.msk.f32.mxu1 %vm891_vm4, %v22239_v5  ;;  %22259 = vst [vmem:[#allocation37_spill] sm:$0xff] %v19317_v43 }
 0x22c   : > { %v19279_v61 = vpop.f32.mrb[42].mxu0 }
 0x22d   : > { %22240 = vst [vmem:[#allocation27_spill] sm:$0xff] %v19279_v61  ;;  %v19281_v41 = vpop.f32.mrb[43].mxu0 }
 0x22e   : > { %22241 = vst [vmem:[#allocation28_spill] sm:$0xff] %v19281_v41  ;;  %15127 = vmatmul.mubr.msk.f32.gmra.mrb[26].mxu1 %vm891_vm4, %v22242_v39  ;;  %v22250_v41 = vld [vmem:[#allocation39_spill] sm:$0xff] }
 0x22f   : > { %15129 = vmatprep.mubr.msk.f32.mxu1 %vm891_vm4, %v22243_v18 }
 0x230   : > { %v19287_v16 = vpop.f32.mrb[44].mxu0 }
 0x231   : > { %22244 = vst [vmem:[#allocation29_spill] sm:$0xff] %v19287_v16  ;;  %v19289_v62 = vpop.f32.mrb[45].mxu0 }
 0x232   : > { %22245 = vst [vmem:[#allocation30_spill] sm:$0xff] %v19289_v62  ;;  %15130 = vmatmul.mubr.msk.f32.gmra.mrb[28].mxu1 %vm891_vm4, %v22246_v6  ;;  %v22254_v62 = vld [vmem:[#allocation41_spill] sm:$0xff] }
 0x233   : > { %15132 = vmatprep.mubr.msk.f32.mxu1 %vm891_vm4, %v22247_v46 }
 0x234   : > { %v19295_v44 = vpop.f32.mrb[46].mxu0 }
 0x235   : > { %22248 = vst [vmem:[#allocation31_spill] sm:$0xff] %v19295_v44  ;;  %v19297_v61 = vpop.f32.mrb[47].mxu0 }
 0x236   : > { %22249 = vst [vmem:[#allocation32_spill] sm:$0xff] %v19297_v61  ;;  %15133 = vmatmul.mubr.msk.f32.gmra.mrb[30].mxu1 %vm891_vm4, %v22250_v41  ;;  %v22258_v61 = vld [vmem:[#allocation43_spill] sm:$0xff] }
 0x237   : > { %15135 = vmatprep.mubr.msk.f32.mxu1 %vm891_vm4, %v22251_v29 }
 0x238   : > { %v19303_v19 = vpop.f32.mrb[48].mxu0 }
 0x239   : > { %22252 = vst [vmem:[#allocation33_spill] sm:$0xff] %v19303_v19  ;;  %v19305_v16 = vpop.f32.mrb[49].mxu0 }
 0x23a   : > { %22253 = vst [vmem:[#allocation34_spill] sm:$0xff] %v19305_v16  ;;  %15136 = vmatmul.mubr.msk.f32.gmra.mrb[0].mxu1 %vm891_vm4, %v22254_v62  ;;  %v19323_v16 = vld [vmem:[#allocation2 + $0x18a] sm:$0xff] }
 0x23b   : > { %15138 = vmatprep.mubr.msk.f32.mxu1 %vm891_vm4, %v22255_v55  ;;  %v12803_v55 = vld [vmem:[%s22014_s3 + $0x108] sm:$0xff] }
 0x23c   : > { %v19311_v50 = vpop.f32.mrb[50].mxu0 }
 0x23d   : > { %22256 = vst [vmem:[#allocation35_spill] sm:$0xff] %v19311_v50  ;;  %v19313_v44 = vpop.f32.mrb[51].mxu0 }
 0x23e   : > { %22257 = vst [vmem:[#allocation36_spill] sm:$0xff] %v19313_v44  ;;  %15139 = vmatmul.mubr.msk.f32.gmra.mrb[2].mxu1 %vm891_vm4, %v22258_v61  ;;  %v12769_v44 = vld [vmem:[%s22014_s3 + $0xf8] sm:$0xff]  ;;  %v12802_v61 = vld [vmem:[%s22014_s3 + $0x100] sm:$0xff] }
 0x23f   : > { %15141 = vmatprep.mubr.msk.f32.mxu1 %vm891_vm4, %v19317_v43  ;;  %v16709_v43 = vpack.c.bf16 %v12769_v44, %v12768_v31 }
 0x240   : > { %v19321_v19 = vpop.f32.mrb[52].mxu0 }
 0x241   : > { %22260 = vst [vmem:[#allocation38_spill] sm:$0xff] %v19321_v19  ;;  %v19331_v50 = vpop.f32.mrb[53].mxu0 }
 0x242   : > { %15142 = vmatmul.mubr.msk.f32.gmra.mrb[4].mxu1 %vm891_vm4, %v19323_v16 }
 0x243   : > { %15152 = vmatprep.mubr.msk.f32.mxu1 %vm891_vm4, %v18828_v57  ;;  %v16713_v57 = vpack.c.bf16 %v12803_v55, %v12802_v61  ;;  %v3668_v61 = vld [vmem:[#allocation2 + $0x139] sm:$0xff]  ;;  %v3670_v55 = vld [vmem:[#allocation2 + $0x151] sm:$0xff] }
 0x244   : > { %v19337_v19 = vpop.f32.mrb[54].mxu0 }
 0x245   : > { %v19345_v62 = vpop.f32.mrb[55].mxu0 }
 0x246   : > { %15153 = vmatmul.mubr.msk.f32.vlgmr.msra.gmra.mrb[6].mxu1 %vm891_vm4, %v18836_v59 }
 0x247   : > { %15155 = vmatprep.mubr.msk.f32.mxu1 %vm891_vm4, %v18845_v2  ;;  %16708 = vmatpush3.bf16.msra.mxu1 %v19208_v0  ;;  %v3647_v2 = vld [vmem:[#allocation2 + $0x39] sm:$0xff]  ;;  %v3667_v0 = vld [vmem:[#allocation2 + $0x129] sm:$0xff] }
 0x248   : > { %16710 = vmatprep.subr.bf16.mxu1 %v16709_v43  ;;  %v19352_v31 = vpop.f32.mrb[56].mxu0 }
 0x249   : > { %v19354_v44 = vpop.f32.mrb[57].mxu0 }
 0x24a   : > { %15156 = vmatmul.mubr.msk.f32.gmra.mrb[8].mxu1 %vm891_vm4, %v18853_v4  ;;  %v3649_v4 = vld [vmem:[#allocation2 + $0x51] sm:$0xff] }
 0x24b   : > { %15158 = vmatprep.mubr.msk.f32.mxu1 %vm891_vm4, %v18861_v9  ;;  %16712 = vmatpush3.bf16.msra.mxu1 %v16709_v43  ;;  %v3651_v9 = vld [vmem:[#allocation2 + $0x69] sm:$0xff]  ;;  %v3669_v43 = vld [vmem:[#allocation2 + $0x141] sm:$0xff] }
 0x24c   : > { %16714 = vmatprep.subr.bf16.mxu1 %v16713_v57 }
 0x24e   : > { %15159 = vmatmul.mubr.msk.f32.gmra.mrb[10].mxu1 %vm891_vm4, %v18869_v12  ;;  %v3653_v12 = vld [vmem:[#allocation2 + $0x81] sm:$0xff] }
 0x24f   : > { %15161 = vmatprep.mubr.msk.f32.mxu1 %vm891_vm4, %v18877_v22  ;;  %v3655_v22 = vld [vmem:[#allocation2 + $0x99] sm:$0xff] }
 0x252   : > { %15162 = vmatmul.mubr.msk.f32.gmra.mrb[12].mxu1 %vm891_vm4, %v18885_v23  ;;  %v3657_v23 = vld [vmem:[#allocation2 + $0xb1] sm:$0xff] }
 0x253   : > { %15164 = vmatprep.mubr.msk.f32.mxu1 %vm891_vm4, %v18893_v33  ;;  %v3659_v33 = vld [vmem:[#allocation2 + $0xc9] sm:$0xff] }
 0x256   : > { %15165 = vmatmul.mubr.msk.f32.gmra.mrb[14].mxu1 %vm891_vm4, %v18901_v36  ;;  %v3661_v36 = vld [vmem:[#allocation2 + $0xe1] sm:$0xff] }
 0x257   : > { %15167 = vmatprep.mubr.msk.f32.mxu1 %vm891_vm4, %v18909_v45  ;;  %v3663_v45 = vld [vmem:[#allocation2 + $0xf9] sm:$0xff] }
 0x25a   : > { %15168 = vmatmul.mubr.msk.f32.gmra.mrb[16].mxu1 %vm891_vm4, %v18917_v38  ;;  %v3286_v38 = vld [vmem:[#allocation2 + $0x198] sm:$0xff] }
 0x25b   : > { %15170 = vmatprep.mubr.msk.f32.mxu1 %vm891_vm4, %v18925_v42  ;;  %v3662_v42 = vld [vmem:[#allocation2 + $0xf1] sm:$0xff] }
 0x25e   : > { %15171 = vmatmul.mubr.msk.f32.gmra.mrb[18].mxu1 %vm891_vm4, %v18933_v47  ;;  %v3664_v47 = vld [vmem:[#allocation2 + $0x109] sm:$0xff] }
 0x25f   : > { %15173 = vmatprep.mubr.msk.f32.mxu1 %vm891_vm4, %v18941_v34  ;;  %v3660_v34 = vld [vmem:[#allocation2 + $0xd9] sm:$0xff] }
 0x262   : > { %15174 = vmatmul.mubr.msk.f32.gmra.mrb[20].mxu1 %vm891_vm4, %v18949_v32  ;;  %v3658_v32 = vld [vmem:[#allocation2 + $0xc1] sm:$0xff] }
 0x263   : > { %15176 = vmatprep.mubr.msk.f32.mxu1 %vm891_vm4, %v18957_v52  ;;  %v3656_v52 = vld [vmem:[#allocation2 + $0xa9] sm:$0xff] }
 0x266   : > { %15177 = vmatmul.mubr.msk.f32.gmra.mrb[22].mxu1 %vm891_vm4, %v18965_v14  ;;  %v3654_v14 = vld [vmem:[#allocation2 + $0x91] sm:$0xff] }
 0x267   : > { %15179 = vmatprep.mubr.msk.f32.mxu1 %vm891_vm4, %v18973_v10  ;;  %v3652_v10 = vld [vmem:[#allocation2 + $0x79] sm:$0xff] }
 0x26a   : > { %15180 = vmatmul.mubr.msk.f32.gmra.mrb[24].mxu1 %vm891_vm4, %v18981_v7  ;;  %v3650_v7 = vld [vmem:[#allocation2 + $0x61] sm:$0xff] }
 0x26b   : > { %15182 = vmatprep.mubr.msk.f32.mxu1 %vm891_vm4, %v18989_v3  ;;  %v3648_v3 = vld [vmem:[#allocation2 + $0x49] sm:$0xff] }
 0x26e   : > { %15183 = vmatmul.mubr.msk.f32.gmra.mrb[26].mxu1 %vm891_vm4, %v18997_v60 }
 0x26f   : > { %15185 = vmatprep.mubr.msk.f32.mxu1 %vm891_vm4, %v18736_v63  ;;  %v3287_v63 = vld [vmem:[#allocation2 + $0x1a0] sm:$0xff] }
 0x272   : > { %15186 = vmatmul.mubr.msk.f32.gmra.mrb[28].mxu1 %vm891_vm4, %v18738_v1  ;;  %v12804_v1 = vld [vmem:[%s22014_s3 + $0x110] sm:$0xff] }
 0x273   : > { %15188 = vmatprep.mubr.msk.f32.mxu1 %vm891_vm4, %v18762_v17  ;;  %v12805_v17 = vld [vmem:[%s22014_s3 + $0x118] sm:$0xff] }
 0x274   : > { %v16717_v60 = vpack.c.bf16 %v12805_v17, %v12804_v1  ;;  %v3676_v1 = vld [vmem:[#allocation2 + $0x199] sm:$0xff]  ;;  %v3677_v17 = vld [vmem:[#allocation2 + $0x1a1] sm:$0xff] }
 0x276   : > { %15189 = vmatmul.mubr.msk.f32.gmra.mrb[30].mxu1 %vm891_vm4, %v18764_v20  ;;  %v3646_v20 = vld [vmem:[#allocation2 + $0x31] sm:$0xff] }
 0x277   : > { %15191 = vmatprep.mubr.msk.f32.mxu1 %vm891_vm4, %v18780_v25  ;;  %v12839_v25 = vld [vmem:[%s22016_s5 + $0x20] sm:$0xff] }
 0x27a   : > { %15192 = vmatmul.mubr.msk.f32.gmra.mrb[0].mxu1 %vm891_vm4, %v18782_v28  ;;  %v12840_v28 = vld [vmem:[%s22016_s5 + $0x28] sm:$0xff] }
 0x27b   : > { %15194 = vmatprep.mubr.msk.f32.mxu1 %vm891_vm4, %v19100_v53  ;;  %v16721_v59 = vpack.c.bf16 %v12840_v28, %v12839_v25  ;;  %v3665_v53 = vld [vmem:[#allocation2 + $0x111] sm:$0xff]  ;;  %v4037_v25 = vld [vmem:[#allocation2 + $0x3a] sm:$0xff] }
 0x27c   : > { %v4038_v28 = vld [vmem:[#allocation2 + $0x4a] sm:$0xff] }
 0x27d   : > { %16722 = vmatprep.subr.bf16.mxu0 %v16721_v59 }
 0x27e   : > { %15195 = vmatmul.mubr.msk.f32.gmra.mrb[2].mxu1 %vm891_vm4, %v19106_v24  ;;  %16724 = vmatpush3.bf16.msra.mxu0 %v16721_v59  ;;  %v3666_v24 = vld [vmem:[#allocation2 + $0x121] sm:$0xff] }
 0x27f   : > { %15197 = vmatprep.mubr.msk.f32.mxu1 %vm891_vm4, %v3286_v38  ;;  %v3672_v38 = vld [vmem:[#allocation2 + $0x169] sm:$0xff]  ;;  %v22266_v59 = vld [vmem:[#allocation18_spill] sm:$0xff] }
 0x282   : > { %15198 = vmatmul.mubr.msk.f32.gmra.mrb[4].mxu1 %vm891_vm4, %v3287_v63  ;;  %v3673_v63 = vld [vmem:[#allocation2 + $0x171] sm:$0xff] }
 0x283   : > { %15208 = vmatprep.mubr.msk.f32.mxu1 %vm891_vm4, %v3646_v20  ;;  %v4036_v20 = vld [vmem:[#allocation2 + $0x32] sm:$0xff] }
 0x286   : > { %15209 = vmatmul.mubr.msk.f32.vlgmr.msra.gmra.mrb[6].mxu1 %vm891_vm4, %v3647_v2 }
 0x287   : > { %15211 = vmatprep.mubr.msk.f32.mxu1 %vm891_vm4, %v3648_v3  ;;  %16716 = vmatpush3.bf16.msra.mxu1 %v16713_v57  ;;  %v3671_v57 = vld [vmem:[#allocation2 + $0x159] sm:$0xff] }
 0x288   : > { %16718 = vmatprep.subr.bf16.mxu1 %v16717_v60 }
 0x28a   : > { %15212 = vmatmul.mubr.msk.f32.gmra.mrb[8].mxu1 %vm891_vm4, %v3649_v4 }
 0x28b   : > { %15214 = vmatprep.mubr.msk.f32.mxu1 %vm891_vm4, %v3650_v7  ;;  %16720 = vmatpush3.bf16.msra.mxu1 %v16717_v60 }
 0x28e   : > { %15215 = vmatmul.mubr.msk.f32.gmra.mrb[10].mxu1 %vm891_vm4, %v3651_v9  ;;  %v22267_v9 = vld [vmem:[#allocation19_spill] sm:$0xff] }
 0x28f   : > { %15217 = vmatprep.mubr.msk.f32.mxu1 %vm891_vm4, %v3652_v10 }
 0x292   : > { %15218 = vmatmul.mubr.msk.f32.gmra.mrb[12].mxu1 %vm891_vm4, %v3653_v12 }
 0x293   : > { %15220 = vmatprep.mubr.msk.f32.mxu1 %vm891_vm4, %v3654_v14 }
 0x296   : > { %15221 = vmatmul.mubr.msk.f32.gmra.mrb[14].mxu1 %vm891_vm4, %v3655_v22  ;;  %v22268_v22 = vld [vmem:[#allocation20_spill] sm:$0xff] }
 0x297   : > { %15223 = vmatprep.mubr.msk.f32.mxu1 %vm891_vm4, %v3656_v52 }
 0x29a   : > { %15224 = vmatmul.mubr.msk.f32.gmra.mrb[16].mxu1 %vm891_vm4, %v3657_v23 }
 0x29b   : > { %15226 = vmatprep.mubr.msk.f32.mxu1 %vm891_vm4, %v3658_v32 }
 0x29e   : > { %15227 = vmatmul.mubr.msk.f32.gmra.mrb[18].mxu1 %vm891_vm4, %v3659_v33 }
 0x29f   : > { %15229 = vmatprep.mubr.msk.f32.mxu1 %vm891_vm4, %v3660_v34 }
 0x2a2   : > { %15230 = vmatmul.mubr.msk.f32.gmra.mrb[20].mxu1 %vm891_vm4, %v3661_v36  ;;  %v22269_v36 = vld [vmem:[#allocation21_spill] sm:$0xff] }
 0x2a3   : > { %15232 = vmatprep.mubr.msk.f32.mxu1 %vm891_vm4, %v3662_v42 }
 0x2a6   : > { %15233 = vmatmul.mubr.msk.f32.gmra.mrb[22].mxu1 %vm891_vm4, %v3663_v45 }
 0x2a7   : > { %15235 = vmatprep.mubr.msk.f32.mxu1 %vm891_vm4, %v3664_v47 }
 0x2aa   : > { %15236 = vmatmul.mubr.msk.f32.gmra.mrb[24].mxu1 %vm891_vm4, %v3665_v53  ;;  %v22270_v53 = vld [vmem:[#allocation22_spill] sm:$0xff] }
 0x2ab   : > { %15238 = vmatprep.mubr.msk.f32.mxu1 %vm891_vm4, %v3666_v24 }
 0x2ae   : > { %15239 = vmatmul.mubr.msk.f32.gmra.mrb[26].mxu1 %vm891_vm4, %v3667_v0 }
 0x2af   : > { %15241 = vmatprep.mubr.msk.f32.mxu1 %vm891_vm4, %v3668_v61 }
 0x2b2   : > { %15242 = vmatmul.mubr.msk.f32.gmra.mrb[28].mxu1 %vm891_vm4, %v3669_v43 }
 0x2b3   : > { %15244 = vmatprep.mubr.msk.f32.mxu1 %vm891_vm4, %v3670_v55 }
 0x2b6   : > { %15245 = vmatmul.mubr.msk.f32.gmra.mrb[30].mxu1 %vm891_vm4, %v3671_v57  ;;  %v22271_v57 = vld [vmem:[#allocation23_spill] sm:$0xff] }
 0x2b7   : > { %15247 = vmatprep.mubr.msk.f32.mxu1 %vm891_vm4, %v3672_v38 }
 0x2ba   : > { %15248 = vmatmul.mubr.msk.f32.gmra.mrb[0].mxu1 %vm891_vm4, %v3673_v63 }
 0x2bb   : > { %15250 = vmatprep.mubr.msk.f32.mxu1 %vm891_vm4, %v19182_v21  ;;  %v22261_v21 = vld [vmem:[#allocation41_spill] sm:$0xff] }
 0x2be   : > { %15251 = vmatmul.mubr.msk.f32.gmra.mrb[2].mxu1 %vm891_vm4, %v19186_v27  ;;  %v22262_v27 = vld [vmem:[#allocation42_spill] sm:$0xff] }
 0x2bf   : > { %15253 = vmatprep.mubr.msk.f32.mxu1 %vm891_vm4, %v3676_v1 }
 0x2c2   : > { %15254 = vmatmul.mubr.msk.f32.gmra.mrb[4].mxu1 %vm891_vm4, %v3677_v17  ;;  %v22272_v17 = vld [vmem:[#allocation24_spill] sm:$0xff] }
 0x2c3   : > { %15264 = vmatprep.mubr.msk.f32.mxu1 %vm891_vm4, %v4036_v20 }
 0x2c6   : > { %15265 = vmatmul.mubr.msk.f32.vlgmr.msra.gmra.mrb[6].mxu1 %vm891_vm4, %v4037_v25 }
 0x2c7   : > { %15267 = vmatprep.mubr.msk.f32.mxu1 %vm891_vm4, %v4038_v28 }
 0x2ca   : > { %15268 = vmatmul.mubr.msk.f32.gmra.mrb[8].mxu1 %vm891_vm4, %v22210_v26  ;;  %v22263_v26 = vld [vmem:[#allocation43_spill] sm:$0xff] }
 0x2cb   : > { %15270 = vmatprep.mubr.msk.f32.mxu1 %vm891_vm4, %v22211_v30  ;;  %v4066_v30 = vld [vmem:[#allocation2 + $0x19a] sm:$0xff] }
 0x2ce   : > { %15271 = vmatmul.mubr.msk.f32.gmra.mrb[10].mxu1 %vm891_vm4, %v22214_v49  ;;  %v12842_v49 = vld [vmem:[%s22016_s5 + $0x38] sm:$0xff] }
 0x2cf   : > { %15273 = vmatprep.mubr.msk.f32.mxu1 %vm891_vm4, %v22215_v51 }
 0x2d2   : > { %15274 = vmatmul.mubr.msk.f32.gmra.mrb[12].mxu1 %vm891_vm4, %v22218_v15  ;;  %v4616_v15 = vld [vmem:[%s22016_s5] sm:$0xff] }
 0x2d3   : > { %15276 = vmatprep.mubr.msk.f32.mxu1 %vm891_vm4, %v22219_v58  ;;  %v4617_v58 = vld [vmem:[%s22016_s5 + $0x8] sm:$0xff] }
 0x2d6   : > { %15277 = vmatmul.mubr.msk.f32.gmra.mrb[14].mxu1 %vm891_vm4, %v22221_v40  ;;  %v16729_v40 = vpack.c.bf16 %v4617_v58, %v4616_v15 }
 0x2d7   : > { %15279 = vmatprep.mubr.msk.f32.mxu1 %vm891_vm4, %v22223_v48  ;;  %v4618_v48 = vld [vmem:[%s22016_s5 + $0x10] sm:$0xff] }
 0x2da   : > { %15280 = vmatmul.mubr.msk.f32.gmra.mrb[16].mxu1 %vm891_vm4, %v22226_v11  ;;  %v4619_v11 = vld [vmem:[%s22016_s5 + $0x18] sm:$0xff] }
 0x2db   : > { %15282 = vmatprep.mubr.msk.f32.mxu1 %vm891_vm4, %v22227_v13  ;;  %v16733_v13 = vpack.c.bf16 %v4619_v11, %v4618_v48 }
 0x2de   : > { %15283 = vmatmul.mubr.msk.f32.gmra.mrb[18].mxu1 %vm891_vm4, %v22230_v35  ;;  %v12908_v35 = vld [vmem:[%s22016_s5 + $0x48] sm:$0xff] }
 0x2df   : > { %15285 = vmatprep.mubr.msk.f32.mxu1 %vm891_vm4, %v22231_v37 }
 0x2e2   : > { %15286 = vmatmul.mubr.msk.f32.gmra.mrb[20].mxu1 %vm891_vm4, %v22234_v54  ;;  %v19549_v54 = vld [vmem:[%s22015_s4] ss:$0 sm:$0xff] }
 0x2e3   : > { %15288 = vmatprep.mubr.msk.f32.mxu1 %vm891_vm4, %v22235_v56  ;;  %v22265_v56 = vld [vmem:[#allocation17_spill] sm:$0xff] }
 0x2e6   : > { %15289 = vmatmul.mubr.msk.f32.gmra.mrb[22].mxu1 %vm891_vm4, %v22238_v8 }
 0x2e7   : > { %15291 = vmatprep.mubr.msk.f32.mxu1 %vm891_vm4, %v22239_v5  ;;  %v4620_v5 = vld [vmem:[#allocation3 + $0x1] sm:$0xff] }
 0x2e8   : > { %15320 = vmatprep.mubr.msk.f32.mxu0 %vm891_vm4, %v4620_v5 }
 0x2ea   : > { %15292 = vmatmul.mubr.msk.f32.gmra.mrb[24].mxu1 %vm891_vm4, %v22242_v39  ;;  %v4067_v39 = vld [vmem:[#allocation2 + $0x1a2] sm:$0xff] }
 0x2eb   : > { %15294 = vmatprep.mubr.msk.f32.mxu1 %vm891_vm4, %v22243_v18  ;;  %v22264_v18 = vld [vmem:[#allocation37_spill] sm:$0xff] }
 0x2ee   : > { %15295 = vmatmul.mubr.msk.f32.gmra.mrb[26].mxu1 %vm891_vm4, %v22246_v6 }
 0x2ef   : > { %15297 = vmatprep.mubr.msk.f32.mxu1 %vm891_vm4, %v22247_v46 }
 0x2f2   : > { %15298 = vmatmul.mubr.msk.f32.gmra.mrb[28].mxu1 %vm891_vm4, %v22250_v41  ;;  %v12841_v41 = vld [vmem:[%s22016_s5 + $0x30] sm:$0xff] }
 0x2f3   : > { %15300 = vmatprep.mubr.msk.f32.mxu1 %vm891_vm4, %v22251_v29  ;;  %v16725_v51 = vpack.c.bf16 %v12842_v49, %v12841_v41  ;;  %v12907_v29 = vld [vmem:[%s22016_s5 + $0x40] sm:$0xff] }
 0x2f4   : > { %v19543_v37 = vpack.c.bf16 %v12908_v35, %v12907_v29 }
 0x2f5   : > { %16726 = vmatprep.subr.bf16.mxu0 %v16725_v51 }
 0x2f6   : > { %15301 = vmatmul.mubr.msk.f32.gmra.mrb[30].mxu1 %vm891_vm4, %v22261_v21  ;;  %16728 = vmatpush3.bf16.msra.mxu0 %v16725_v51  ;;  %v22274_v51 = vld [vmem:[#allocation26_spill] sm:$0xff] }
 0x2f7   : > { %15303 = vmatprep.mubr.msk.f32.mxu1 %vm891_vm4, %v22262_v27  ;;  %16730 = vmatprep.subr.bf16.mxu0 %v16729_v40 }
 0x2fa   : > { %15304 = vmatmul.mubr.msk.f32.gmra.mrb[0].mxu1 %vm891_vm4, %v22263_v26 }
 0x2fb   : > { %15306 = vmatprep.mubr.msk.f32.mxu1 %vm891_vm4, %v22264_v18 }
 0x2fe   : > { %15307 = vmatmul.mubr.msk.f32.gmra.mrb[2].mxu1 %vm891_vm4, %v19323_v16  ;;  %v4621_v16 = vld [vmem:[#allocation3 + $0x9] sm:$0xff] }
 0x2ff   : > { %15309 = vmatprep.mubr.msk.f32.mxu1 %vm891_vm4, %v4066_v30  ;;  %15321 = vmatmul.mubr.msk.f32.vlgmr.msra.gmra.mrb[64].mxu0 %vm891_vm4, %v4621_v16  ;;  %v22273_v30 = vld [vmem:[#allocation25_spill] sm:$0xff] }
 0x300   : > { %16732 = vmatpush3.bf16.msra.mxu0 %v16729_v40 }
 0x301   : > { %16734 = vmatprep.subr.bf16.mxu0 %v16733_v13 }
 0x302   : > { %15310 = vmatmul.mubr.msk.f32.gmra.mrb[4].mxu1 %vm891_vm4, %v4067_v39 }
 0x304   : > { %16736 = vmatpush3.bf16.msra.mxu0 %v16733_v13  ;;  %v22275_v13 = vld [vmem:[#allocation27_spill] sm:$0xff] }
 0x305   : > { %16738 = vmatprep.subr.bf16.mxu0 %v19543_v37 }
 0x399   : > { %v15266_v46 = vpop.f32.mrb[6].mxu1 }
 0x39a   : > { %v17325_v6 = vadd.f32 %v15266_v46, %v22265_v56  ;;  %v4235_v8 = vpop.f32.mrb[7].mxu1  ;;  %v22276_v56 = vld [vmem:[#allocation28_spill] sm:$0xff] }
 0x39b   : > { %v17326_v60 = vadd.f32 %v4235_v8, %v22266_v59 }
 0x39c   : > { %v4434_v2 = vadd.f32 %v17325_v6, %v19549_v54 }
 0x39d   : > { %v4433_v3 = vadd.f32 %v17326_v60, %v19549_v54  ;;  %v15269_v4 = vpop.f32.mrb[8].mxu1 }
 0x39e   : > { %v4466_v7 = vmax.f32 %v4434_v2, 0.0  ;;  %v17327_v10 = vadd.f32 %v15269_v4, %v22267_v9  ;;  %v4245_v12 = vpop.f32.mrb[9].mxu1 }
 0x39f   : > { %v4465_v14 = vmax.f32 %v4433_v3, 0.0  ;;  %v17328_v52 = vadd.f32 %v4245_v12, %v22268_v22 }
 0x3a0   : > { %4553 = vst.msk [vmem:[#allocation3 + $0x21] sm:$0xff] %vm891_vm4, %v4466_v7  ;;  %v4436_v23 = vadd.f32 %v17327_v10, %v19549_v54  ;;  %v22277_v7 = vld [vmem:[#allocation29_spill] sm:$0xff] }
 0x3a1   : > { %4552 = vst.msk [vmem:[#allocation3 + $0x19] sm:$0xff] %vm891_vm4, %v4465_v14  ;;  %v4435_v32 = vadd.f32 %v17328_v52, %v19549_v54  ;;  %v15272_v33 = vpop.f32.mrb[10].mxu1  ;;  %v22278_v14 = vld [vmem:[#allocation30_spill] sm:$0xff] }
 0x3a2   : > { %v4468_v34 = vmax.f32 %v4436_v23, 0.0  ;;  %v17329_v42 = vadd.f32 %v15272_v33, %v22269_v36  ;;  %v4255_v45 = vpop.f32.mrb[11].mxu1 }
 0x3a3   : > { %v4467_v47 = vmax.f32 %v4435_v32, 0.0  ;;  %v17330_v24 = vadd.f32 %v4255_v45, %v22270_v53 }
 0x3a4   : > { %4555 = vst.msk [vmem:[#allocation3 + $0x39] sm:$0xff] %vm891_vm4, %v4468_v34  ;;  %v4438_v0 = vadd.f32 %v17329_v42, %v19549_v54  ;;  %v22279_v42 = vld [vmem:[#allocation31_spill] sm:$0xff] }
 0x3a5   : > { %4554 = vst.msk [vmem:[#allocation3 + $0x31] sm:$0xff] %vm891_vm4, %v4467_v47  ;;  %v4437_v61 = vadd.f32 %v17330_v24, %v19549_v54  ;;  %v15275_v43 = vpop.f32.mrb[12].mxu1  ;;  %v22280_v24 = vld [vmem:[#allocation32_spill] sm:$0xff] }
 0x3a6   : > { %v4470_v55 = vmax.f32 %v4438_v0, 0.0  ;;  %v17331_v38 = vadd.f32 %v15275_v43, %v22271_v57  ;;  %v4265_v63 = vpop.f32.mrb[13].mxu1 }
 0x3a7   : > { %v4469_v1 = vmax.f32 %v4437_v61, 0.0  ;;  %v17332_v20 = vadd.f32 %v4265_v63, %v22272_v17  ;;  %v19577_v26 = vld [vmem:[#allocation3 + $0x21] sm:$0xff] }
 0x3a8   : > { %4557 = vst.msk [vmem:[#allocation3 + $0x51] sm:$0xff] %vm891_vm4, %v4470_v55  ;;  %v4440_v25 = vadd.f32 %v17331_v38, %v19549_v54  ;;  %v19571_v28 = vld [vmem:[#allocation3 + $0x19] sm:$0xff] }
 0x3a9   : > { %4556 = vst.msk [vmem:[#allocation3 + $0x49] sm:$0xff] %vm891_vm4, %v4469_v1  ;;  %v4439_v21 = vadd.f32 %v17332_v20, %v19549_v54  ;;  %v15278_v27 = vpop.f32.mrb[14].mxu1  ;;  %15323 = vmatprep.mubr.msk.f32.mxu0 %vm891_vm4, %v19571_v28  ;;  %v22281_v1 = vld [vmem:[#allocation33_spill] sm:$0xff] }
 0x3aa   : > { %v4472_v18 = vmax.f32 %v4440_v25, 0.0  ;;  %v17333_v39 = vadd.f32 %v15278_v27, %v22273_v30  ;;  %v4275_v41 = vpop.f32.mrb[15].mxu1  ;;  %15324 = vmatmul.mubr.msk.f32.gmra.mrb[66].mxu0 %vm891_vm4, %v19577_v26 }
 0x3ab   : > { %v4471_v49 = vmax.f32 %v4439_v21, 0.0  ;;  %v17334_v5 = vadd.f32 %v4275_v41, %v22274_v51  ;;  %v19591_v48 = vld [vmem:[#allocation3 + $0x39] sm:$0xff]  ;;  %v22282_v21 = vld [vmem:[#allocation34_spill] sm:$0xff] }
 0x3ac   : > { %4559 = vst.msk [vmem:[#allocation3 + $0x69] sm:$0xff] %vm891_vm4, %v4472_v18  ;;  %v4442_v16 = vadd.f32 %v17333_v39, %v19549_v54  ;;  %v19585_v15 = vld [vmem:[#allocation3 + $0x31] sm:$0xff] }
 0x3ad   : > { %4558 = vst.msk [vmem:[#allocation3 + $0x61] sm:$0xff] %vm891_vm4, %v4471_v49  ;;  %v4441_v58 = vadd.f32 %v17334_v5, %v19549_v54  ;;  %v15281_v40 = vpop.f32.mrb[16].mxu1  ;;  %15326 = vmatprep.mubr.msk.f32.mxu0 %vm891_vm4, %v19585_v15  ;;  %v22283_v5 = vld [vmem:[#allocation35_spill] sm:$0xff] }
 0x3ae   : > { %v4474_v11 = vmax.f32 %v4442_v16, 0.0  ;;  %v17335_v29 = vadd.f32 %v15281_v40, %v22275_v13  ;;  %v4285_v35 = vpop.f32.mrb[17].mxu1  ;;  %15327 = vmatmul.mubr.msk.f32.gmra.mrb[68].mxu0 %vm891_vm4, %v19591_v48 }
 0x3af   : > { %v4473_v46 = vmax.f32 %v4441_v58, 0.0  ;;  %v17336_v6 = vadd.f32 %v4285_v35, %v22276_v56  ;;  %v19605_v3 = vld [vmem:[#allocation3 + $0x51] sm:$0xff] }
 0x3b0   : > { %4561 = vst.msk [vmem:[#allocation3 + $0x81] sm:$0xff] %vm891_vm4, %v4474_v11  ;;  %v4444_v8 = vadd.f32 %v17335_v29, %v19549_v54  ;;  %v19599_v59 = vld [vmem:[#allocation3 + $0x49] sm:$0xff]  ;;  %v22284_v11 = vld [vmem:[#allocation36_spill] sm:$0xff] }
 0x3b1   : > { %4560 = vst.msk [vmem:[#allocation3 + $0x79] sm:$0xff] %vm891_vm4, %v4473_v46  ;;  %v4443_v60 = vadd.f32 %v17336_v6, %v19549_v54  ;;  %v15284_v2 = vpop.f32.mrb[18].mxu1  ;;  %15329 = vmatprep.mubr.msk.f32.mxu0 %vm891_vm4, %v19599_v59 }
 0x3b2   : > { %v4476_v4 = vmax.f32 %v4444_v8, 0.0  ;;  %v17337_v9 = vadd.f32 %v15284_v2, %v22277_v7  ;;  %v4295_v10 = vpop.f32.mrb[19].mxu1  ;;  %15330 = vmatmul.mubr.msk.f32.gmra.mrb[70].mxu0 %vm891_vm4, %v19605_v3 }
 0x3b3   : > { %v4475_v12 = vmax.f32 %v4443_v60, 0.0  ;;  %v17338_v22 = vadd.f32 %v4295_v10, %v22278_v14  ;;  %v19619_v34 = vld [vmem:[#allocation3 + $0x69] sm:$0xff] }
 0x3b4   : > { %4563 = vst.msk [vmem:[#allocation3 + $0x99] sm:$0xff] %vm891_vm4, %v4476_v4  ;;  %v4446_v52 = vadd.f32 %v17337_v9, %v19549_v54  ;;  %v19613_v23 = vld [vmem:[#allocation3 + $0x61] sm:$0xff]  ;;  %v22285_v60 = vld [vmem:[#allocation38_spill] sm:$0xff] }
 0x3b5   : > { %4562 = vst.msk [vmem:[#allocation3 + $0x91] sm:$0xff] %vm891_vm4, %v4475_v12  ;;  %v4445_v32 = vadd.f32 %v17338_v22, %v19549_v54  ;;  %v15287_v33 = vpop.f32.mrb[20].mxu1  ;;  %15332 = vmatprep.mubr.msk.f32.mxu0 %vm891_vm4, %v19613_v23 }
 0x3b6   : > { %v4478_v36 = vmax.f32 %v4446_v52, 0.0  ;;  %v17339_v45 = vadd.f32 %v15287_v33, %v22279_v42  ;;  %v4305_v47 = vpop.f32.mrb[21].mxu1  ;;  %15333 = vmatmul.mubr.msk.f32.gmra.mrb[72].mxu0 %vm891_vm4, %v19619_v34 }
 0x3b7   : > { %v4477_v53 = vmax.f32 %v4445_v32, 0.0  ;;  %v17340_v0 = vadd.f32 %v4305_v47, %v22280_v24  ;;  %v19633_v38 = vld [vmem:[#allocation3 + $0x81] sm:$0xff] }
 0x3b8   : > { %4565 = vst.msk [vmem:[#allocation3 + $0xb1] sm:$0xff] %vm891_vm4, %v4478_v36  ;;  %v4448_v61 = vadd.f32 %v17339_v45, %v19549_v54  ;;  %v19627_v43 = vld [vmem:[#allocation3 + $0x79] sm:$0xff] }
 0x3b9   : > { %4564 = vst.msk [vmem:[#allocation3 + $0xa9] sm:$0xff] %vm891_vm4, %v4477_v53  ;;  %v4447_v55 = vadd.f32 %v17340_v0, %v19549_v54  ;;  %v15290_v57 = vpop.f32.mrb[22].mxu1  ;;  %15335 = vmatprep.mubr.msk.f32.mxu0 %vm891_vm4, %v19627_v43 }
 0x3ba   : > { %v4480_v63 = vmax.f32 %v4448_v61, 0.0  ;;  %v17341_v17 = vadd.f32 %v15290_v57, %v22281_v1  ;;  %v4315_v20 = vpop.f32.mrb[23].mxu1  ;;  %15336 = vmatmul.mubr.msk.f32.gmra.mrb[74].mxu0 %vm891_vm4, %v19633_v38 }
 0x3bb   : > { %v4479_v25 = vmax.f32 %v4447_v55, 0.0  ;;  %v17342_v27 = vadd.f32 %v4315_v20, %v22282_v21  ;;  %v19647_v49 = vld [vmem:[#allocation3 + $0x99] sm:$0xff] }
 0x3bc   : > { %4567 = vst.msk [vmem:[#allocation3 + $0xc9] sm:$0xff] %vm891_vm4, %v4480_v63  ;;  %v4450_v18 = vadd.f32 %v17341_v17, %v19549_v54  ;;  %v19641_v30 = vld [vmem:[#allocation3 + $0x91] sm:$0xff] }
 0x3bd   : > { %4566 = vst.msk [vmem:[#allocation3 + $0xc1] sm:$0xff] %vm891_vm4, %v4479_v25  ;;  %v4449_v39 = vadd.f32 %v17342_v27, %v19549_v54  ;;  %v15293_v41 = vpop.f32.mrb[24].mxu1  ;;  %15338 = vmatprep.mubr.msk.f32.mxu0 %vm891_vm4, %v19641_v30  ;;  %v22286_v21 = vld [vmem:[#allocation11_spill] sm:$0xff] }
 0x3be   : > { %v4482_v51 = vmax.f32 %v4450_v18, 0.0  ;;  %v17343_v16 = vadd.f32 %v15293_v41, %v22283_v5  ;;  %v4325_v58 = vpop.f32.mrb[25].mxu1  ;;  %15339 = vmatmul.mubr.msk.f32.gmra.mrb[76].mxu0 %vm891_vm4, %v19647_v49 }
 0x3bf   : > { %v4481_v40 = vmax.f32 %v4449_v39, 0.0  ;;  %v17344_v13 = vadd.f32 %v4325_v58, %v22284_v11  ;;  %v19661_v6 = vld [vmem:[#allocation3 + $0xb1] sm:$0xff]  ;;  %v22287_v39 = vld [vmem:[#allocation12_spill] sm:$0xff] }
 0x3c0   : > { %4569 = vst.msk [vmem:[#allocation3 + $0xe1] sm:$0xff] %vm891_vm4, %v4482_v51  ;;  %v4452_v29 = vadd.f32 %v17343_v16, %v19549_v54  ;;  %v19655_v35 = vld [vmem:[#allocation3 + $0xa9] sm:$0xff] }
 0x3c1   : > { %4568 = vst.msk [vmem:[#allocation3 + $0xd9] sm:$0xff] %vm891_vm4, %v4481_v40  ;;  %v4451_v46 = vadd.f32 %v17344_v13, %v19549_v54  ;;  %v15296_v56 = vpop.f32.mrb[26].mxu1  ;;  %15341 = vmatprep.mubr.msk.f32.mxu0 %vm891_vm4, %v19655_v35  ;;  %v22288_v13 = vld [vmem:[#allocation13_spill] sm:$0xff] }
 0x3c2   : > { %v4484_v8 = vmax.f32 %v4452_v29, 0.0  ;;  %v17345_v2 = vadd.f32 %v15296_v56, %v22285_v60  ;;  %v4335_v4 = vpop.f32.mrb[27].mxu1  ;;  %15342 = vmatmul.mubr.msk.f32.gmra.mrb[78].mxu0 %vm891_vm4, %v19661_v6 }
 0x3c3   : > { %v4483_v7 = vmax.f32 %v4451_v46, 0.0  ;;  %v17346_v9 = vadd.f32 %v4335_v4, %v19331_v50  ;;  %v19675_v52 = vld [vmem:[#allocation3 + $0xc9] sm:$0xff] }
 0x3c4   : > { %4571 = vst.msk [vmem:[#allocation3 + $0xf9] sm:$0xff] %vm891_vm4, %v4484_v8  ;;  %v4454_v10 = vadd.f32 %v17345_v2, %v19549_v54  ;;  %v19669_v12 = vld [vmem:[#allocation3 + $0xc1] sm:$0xff]  ;;  %v22289_v8 = vld [vmem:[#allocation14_spill] sm:$0xff] }
 0x3c5   : > { %4570 = vst.msk [vmem:[#allocation3 + $0xf1] sm:$0xff] %vm891_vm4, %v4483_v7  ;;  %v4453_v14 = vadd.f32 %v17346_v9, %v19549_v54  ;;  %v15299_v22 = vpop.f32.mrb[28].mxu1  ;;  %15344 = vmatprep.mubr.msk.f32.mxu0 %vm891_vm4, %v19669_v12 }
 0x3c6   : > { %v4486_v32 = vmax.f32 %v4454_v10, 0.0  ;;  %v17347_v33 = vadd.f32 %v15299_v22, %v19337_v19  ;;  %v4345_v50 = vpop.f32.mrb[29].mxu1  ;;  %15345 = vmatmul.mubr.msk.f32.gmra.mrb[80].mxu0 %vm891_vm4, %v19675_v52  ;;  %v22290_v22 = vld [vmem:[#allocation15_spill] sm:$0xff] }
 0x3c7   : > { %v4485_v36 = vmax.f32 %v4453_v14, 0.0  ;;  %v17348_v42 = vadd.f32 %v4345_v50, %v19345_v62  ;;  %v19689_v19 = vld [vmem:[#allocation3 + $0xe1] sm:$0xff] }
 0x3c8   : > { %4573 = vst.msk [vmem:[#allocation3 + $0x111] sm:$0xff] %vm891_vm4, %v4486_v32  ;;  %v4456_v45 = vadd.f32 %v17347_v33, %v19549_v54  ;;  %v19683_v47 = vld [vmem:[#allocation3 + $0xd9] sm:$0xff] }
 0x3c9   : > { %4572 = vst.msk [vmem:[#allocation3 + $0x109] sm:$0xff] %vm891_vm4, %v4485_v36  ;;  %v4455_v53 = vadd.f32 %v17348_v42, %v19549_v54  ;;  %v15302_v24 = vpop.f32.mrb[30].mxu1  ;;  %15347 = vmatprep.mubr.msk.f32.mxu0 %vm891_vm4, %v19683_v47  ;;  %v22291_v36 = vld [vmem:[#allocation16_spill] sm:$0xff] }
 0x3ca   : > { %v4488_v0 = vmax.f32 %v4456_v45, 0.0  ;;  %v17349_v61 = vadd.f32 %v15302_v24, %v19352_v31  ;;  %v4355_v62 = vpop.f32.mrb[31].mxu1  ;;  %15348 = vmatmul.mubr.msk.f32.gmra.mrb[82].mxu0 %vm891_vm4, %v19689_v19 }
 0x3cb   : > { %v4487_v55 = vmax.f32 %v4455_v53, 0.0  ;;  %v17350_v57 = vadd.f32 %v4355_v62, %v19354_v44  ;;  %v19703_v31 = vld [vmem:[#allocation3 + $0xf9] sm:$0xff] }
 0x3cc   : > { %4575 = vst.msk [vmem:[#allocation3 + $0x129] sm:$0xff] %vm891_vm4, %v4488_v0  ;;  %v4458_v63 = vadd.f32 %v17349_v61, %v19549_v54  ;;  %v19697_v1 = vld [vmem:[#allocation3 + $0xf1] sm:$0xff] }
 0x3cd   : > { %4574 = vst.msk [vmem:[#allocation3 + $0x121] sm:$0xff] %vm891_vm4, %v4487_v55  ;;  %v4457_v17 = vadd.f32 %v17350_v57, %v19549_v54  ;;  %v15305_v20 = vpop.f32.mrb[0].mxu1  ;;  %15350 = vmatprep.mubr.msk.f32.mxu0 %vm891_vm4, %v19697_v1 }
 0x3ce   : > { %v4490_v25 = vmax.f32 %v4458_v63, 0.0  ;;  %v17351_v27 = vadd.f32 %v15305_v20, %v22286_v21  ;;  %v4365_v44 = vpop.f32.mrb[1].mxu1  ;;  %15351 = vmatmul.mubr.msk.f32.gmra.mrb[84].mxu0 %vm891_vm4, %v19703_v31  ;;  %v4584_v63 = vld [vmem:[#allocation3] sm:$0xff]  ;;  %v4585_v21 = vld [vmem:[#allocation3 + $0x8] sm:$0xff] }
 0x3cf   : > { %v4489_v18 = vmax.f32 %v4457_v17, 0.0  ;;  %v17352_v41 = vadd.f32 %v4365_v44, %v22287_v39  ;;  %v19717_v40 = vld [vmem:[#allocation3 + $0x111] sm:$0xff]  ;;  %v12909_v20 = vld [vmem:[%s22016_s5 + $0x50] sm:$0xff] }
 0x3d0   : > { %4577 = vst.msk [vmem:[#allocation3 + $0x141] sm:$0xff] %vm891_vm4, %v4490_v25  ;;  %v4460_v51 = vadd.f32 %v17351_v27, %v19549_v54  ;;  %v19711_v5 = vld [vmem:[#allocation3 + $0x109] sm:$0xff]  ;;  %v19781_v39 = vld [vmem:[#allocation3 + $0x18] sm:$0xff] }
 0x3d1   : > { %4576 = vst.msk [vmem:[#allocation3 + $0x139] sm:$0xff] %vm891_vm4, %v4489_v18  ;;  %v4459_v16 = vadd.f32 %v17352_v41, %v19549_v54  ;;  %v15308_v58 = vpop.f32.mrb[2].mxu1  ;;  %15353 = vmatprep.mubr.msk.f32.mxu0 %vm891_vm4, %v19711_v5  ;;  %v12910_v25 = vld [vmem:[%s22016_s5 + $0x58] sm:$0xff]  ;;  %v12943_v44 = vld [vmem:[%s22016_s5 + $0x60] sm:$0xff]  ;;  %v12944_v18 = vld [vmem:[%s22016_s5 + $0x68] sm:$0xff] }
 0x3d2   : > { %v4492_v11 = vmax.f32 %v4460_v51, 0.0  ;;  %v17353_v29 = vadd.f32 %v15308_v58, %v22288_v13  ;;  %v4375_v46 = vpop.f32.mrb[3].mxu1  ;;  %15354 = vmatmul.mubr.msk.f32.gmra.mrb[86].mxu0 %vm891_vm4, %v19717_v40  ;;  %v16741_v27 = vpack.c.bf16 %v12910_v25, %v12909_v20  ;;  %v19786_v41 = vpack.c.bf16 %v12944_v18, %v12943_v44  ;;  %v19788_v51 = vld [vmem:[#allocation3 + $0x20] sm:$0xff]  ;;  %v19797_v58 = vld [vmem:[#allocation3 + $0x38] sm:$0xff]  ;;  %v12946_v18 = vld [vmem:[%s22016_s5 + $0x78] sm:$0xff] }
 0x3d3   : > { %v4491_v56 = vmax.f32 %v4459_v16, 0.0  ;;  %v17354_v60 = vadd.f32 %v4375_v46, %v22289_v8  ;;  %v19731_v10 = vld [vmem:[#allocation3 + $0x129] sm:$0xff]  ;;  %v19809_v13 = vld [vmem:[#allocation3 + $0x60] sm:$0xff]  ;;  %v19817_v46 = vld [vmem:[#allocation3 + $0x78] sm:$0xff] }
 0x3d4   : > { %4579 = vst.msk [vmem:[#allocation3 + $0x159] sm:$0xff] %vm891_vm4, %v4492_v11  ;;  %v4462_v2 = vadd.f32 %v17353_v29, %v19549_v54  ;;  %v19725_v4 = vld [vmem:[#allocation3 + $0x121] sm:$0xff]  ;;  %v19792_v16 = vld [vmem:[#allocation3 + $0x30] sm:$0xff] }
 0x3d5   : > { %4578 = vst.msk [vmem:[#allocation3 + $0x151] sm:$0xff] %vm891_vm4, %v4491_v56  ;;  %v4461_v7 = vadd.f32 %v17354_v60, %v19549_v54  ;;  %v15311_v9 = vpop.f32.mrb[4].mxu1  ;;  %15356 = vmatprep.mubr.msk.f32.mxu0 %vm891_vm4, %v19725_v4  ;;  %v19805_v11 = vld [vmem:[#allocation3 + $0x50] sm:$0xff]  ;;  %v19813_v29 = vld [vmem:[#allocation3 + $0x68] sm:$0xff]  ;;  %v19821_v56 = vld [vmem:[#allocation3 + $0x80] sm:$0xff] }
 0x3d6   : > { %v4494_v14 = vmax.f32 %v4462_v2, 0.0  ;;  %v17355_v32 = vadd.f32 %v15311_v9, %v22290_v22  ;;  %v4385_v33 = vpop.f32.mrb[5].mxu1  ;;  %15357 = vmatmul.mubr.msk.f32.gmra.mrb[88].mxu0 %vm891_vm4, %v19731_v10  ;;  %v19825_v8 = vld [vmem:[#allocation3 + $0x90] sm:$0xff]  ;;  %v19829_v60 = vld [vmem:[#allocation3 + $0x98] sm:$0xff]  ;;  %v19833_v2 = vld [vmem:[#allocation3 + $0xa8] sm:$0xff] }
 0x3d7   : > { %v4493_v50 = vmax.f32 %v4461_v7, 0.0  ;;  %v17356_v42 = vadd.f32 %v4385_v33, %v22291_v36  ;;  %v19745_v0 = vld [vmem:[#allocation3 + $0x141] sm:$0xff]  ;;  %v19837_v7 = vld [vmem:[#allocation3 + $0xb0] sm:$0xff]  ;;  %v19849_v22 = vld [vmem:[#allocation3 + $0xd8] sm:$0xff] }
 0x3d8   : > { %4581 = vst.msk [vmem:[#allocation3 + $0x171] sm:$0xff] %vm891_vm4, %v4494_v14  ;;  %v4464_v45 = vadd.f32 %v17355_v32, %v19549_v54  ;;  %v19739_v53 = vld [vmem:[#allocation3 + $0x139] sm:$0xff]  ;;  %22292 = vst [vmem:[#allocation39_spill] sm:$0xff] %v19745_v0  ;;  %v19845_v14 = vld [vmem:[#allocation3 + $0xc8] sm:$0xff] }
 0x3d9   : > { %4580 = vst.msk [vmem:[#allocation3 + $0x169] sm:$0xff] %vm891_vm4, %v4493_v50  ;;  %v4463_v24 = vadd.f32 %v17356_v42, %v19549_v54  ;;  %15359 = vmatprep.mubr.msk.f32.mxu0 %vm891_vm4, %v19739_v53  ;;  %v19841_v9 = vld [vmem:[#allocation3 + $0xc0] sm:$0xff]  ;;  %v19857_v33 = vld [vmem:[#allocation3 + $0xf0] sm:$0xff]  ;;  %v19861_v50 = vld [vmem:[#allocation3 + $0xf8] sm:$0xff] }
 0x3da   : > { %v4496_v61 = vmax.f32 %v4464_v45, 0.0  ;;  %15360 = vmatmul.mubr.msk.f32.gmra.mrb[90].mxu0 %vm891_vm4, %v19745_v0  ;;  %v19853_v32 = vld [vmem:[#allocation3 + $0xe0] sm:$0xff]  ;;  %v19865_v36 = vld [vmem:[#allocation3 + $0x108] sm:$0xff]  ;;  %v19869_v42 = vld [vmem:[#allocation3 + $0x110] sm:$0xff] }
 0x3db   : > { %v4495_v62 = vmax.f32 %v4463_v24, 0.0  ;;  %v19755_v54 = vld [vmem:[#allocation3 + $0x159] sm:$0xff]  ;;  %v19877_v24 = vld [vmem:[#allocation3 + $0x128] sm:$0xff] }
 0x3dc   : > { %4583 = vst.msk [vmem:[#allocation3 + $0x189] sm:$0xff] %vm891_vm4, %v4496_v61  ;;  %v19750_v55 = vld [vmem:[#allocation3 + $0x151] sm:$0xff]  ;;  %22294 = vst [vmem:[#allocation41_spill] sm:$0xff] %v19755_v54  ;;  %v19873_v45 = vld [vmem:[#allocation3 + $0x120] sm:$0xff] }
 0x3dd   : > { %22293 = vst [vmem:[#allocation40_spill] sm:$0xff] %v19750_v55  ;;  %4582 = vst.msk [vmem:[#allocation3 + $0x181] sm:$0xff] %vm891_vm4, %v4495_v62  ;;  %15362 = vmatprep.mubr.msk.f32.mxu0 %vm891_vm4, %v19750_v55  ;;  %v19881_v61 = vld [vmem:[#allocation3 + $0x138] sm:$0xff]  ;;  %v19885_v62 = vld [vmem:[#allocation3 + $0x140] sm:$0xff] }
 0x3de   : > { %15363 = vmatmul.mubr.msk.f32.gmra.mrb[92].mxu0 %vm891_vm4, %v19755_v54  ;;  %v19893_v20 = vld [vmem:[#allocation3 + $0x158] sm:$0xff]  ;;  %v12945_v44 = vld [vmem:[%s22016_s5 + $0x70] sm:$0xff]  ;;  %v12979_v54 = vld [vmem:[%s22016_s5 + $0x80] sm:$0xff] }
 0x3df   : > { %v19763_v17 = vld [vmem:[#allocation3 + $0x171] sm:$0xff]  ;;  %v19919_v0 = vld [vmem:[#allocation3 + $0x1a] sm:$0xff] }
 0x3e0   : > { %v19759_v57 = vld [vmem:[#allocation3 + $0x169] sm:$0xff]  ;;  %22296 = vst [vmem:[#allocation43_spill] sm:$0xff] %v19763_v17  ;;  %v12980_v55 = vld [vmem:[%s22016_s5 + $0x88] sm:$0xff] }
 0x3e1   : > { %22295 = vst [vmem:[#allocation42_spill] sm:$0xff] %v19759_v57  ;;  %15365 = vmatprep.mubr.msk.f32.mxu0 %vm891_vm4, %v19759_v57  ;;  %v19897_v25 = vld [vmem:[#allocation3 + $0x168] sm:$0xff]  ;;  %v16749_v57 = vpack.c.bf16 %v12946_v18, %v12945_v44  ;;  %v19930_v18 = vld [vmem:[#allocation3 + $0x32] sm:$0xff] }
 0x3e2   : > { %15366 = vmatmul.mubr.msk.f32.gmra.mrb[94].mxu0 %vm891_vm4, %v19763_v17  ;;  %v5300_v17 = vld [vmem:[#allocation3 + $0xa] sm:$0xff]  ;;  %v19926_v44 = vld [vmem:[#allocation3 + $0x22] sm:$0xff]  ;;  %22297 = vst [vmem:[#allocation37_spill] sm:$0xff] %v19930_v18 }
 0x3e3   : > { %15376 = vmatprep.mubr.msk.f32.mxu0 %vm891_vm4, %v4584_v63  ;;  %v19889_v63 = vld [vmem:[#allocation3 + $0x150] sm:$0xff] }
 0x3e6   : > { %15377 = vmatmul.mubr.msk.f32.vlgmr.msra.gmra.mrb[64].mxu0 %vm891_vm4, %v4585_v21  ;;  %v5299_v21 = vld [vmem:[#allocation3 + $0x2] sm:$0xff] }
 0x3e7   : > { %15379 = vmatprep.mubr.msk.f32.mxu0 %vm891_vm4, %v19781_v39  ;;  %16740 = vmatpush3.bf16.msra.mxu0 %v19543_v37  ;;  %v19801_v37 = vld [vmem:[#allocation3 + $0x48] sm:$0xff] }
 0x3e8   : > { %16742 = vmatprep.subr.bf16.mxu0 %v16741_v27 }
 0x3ea   : > { %15380 = vmatmul.mubr.msk.f32.gmra.mrb[66].mxu0 %vm891_vm4, %v19788_v51 }
 0x3eb   : > { %15382 = vmatprep.mubr.msk.f32.mxu0 %vm891_vm4, %v19792_v16  ;;  %16744 = vmatpush3.bf16.msra.mxu0 %v16741_v27  ;;  %v19901_v27 = vld [vmem:[#allocation3 + $0x170] sm:$0xff] }
 0x3ec   : > { %16746 = vmatprep.subr.bf16.mxu0 %v19786_v41 }
 0x3ee   : > { %15383 = vmatmul.mubr.msk.f32.gmra.mrb[68].mxu0 %vm891_vm4, %v19797_v58 }
 0x3ef   : > { %15385 = vmatprep.mubr.msk.f32.mxu0 %vm891_vm4, %v19801_v37 }
 0x3f2   : > { %15386 = vmatmul.mubr.msk.f32.gmra.mrb[70].mxu0 %vm891_vm4, %v19805_v11 }
 0x3f3   : > { %15388 = vmatprep.mubr.msk.f32.mxu0 %vm891_vm4, %v19809_v13 }
 0x3f6   : > { %15389 = vmatmul.mubr.msk.f32.gmra.mrb[72].mxu0 %vm891_vm4, %v19813_v29 }
 0x3f7   : > { %15391 = vmatprep.mubr.msk.f32.mxu0 %vm891_vm4, %v19817_v46 }
 0x3fa   : > { %15392 = vmatmul.mubr.msk.f32.gmra.mrb[74].mxu0 %vm891_vm4, %v19821_v56 }
 0x3fb   : > { %15394 = vmatprep.mubr.msk.f32.mxu0 %vm891_vm4, %v19825_v8 }
 0x3fe   : > { %15395 = vmatmul.mubr.msk.f32.gmra.mrb[76].mxu0 %vm891_vm4, %v19829_v60 }
 0x3ff   : > { %15397 = vmatprep.mubr.msk.f32.mxu0 %vm891_vm4, %v19833_v2 }
 0x402   : > { %15398 = vmatmul.mubr.msk.f32.gmra.mrb[78].mxu0 %vm891_vm4, %v19837_v7 }
 0x403   : > { %15400 = vmatprep.mubr.msk.f32.mxu0 %vm891_vm4, %v19841_v9 }
 0x406   : > { %15401 = vmatmul.mubr.msk.f32.gmra.mrb[80].mxu0 %vm891_vm4, %v19845_v14 }
 0x407   : > { %15403 = vmatprep.mubr.msk.f32.mxu0 %vm891_vm4, %v19849_v22 }
 0x40a   : > { %15404 = vmatmul.mubr.msk.f32.gmra.mrb[82].mxu0 %vm891_vm4, %v19853_v32 }
 0x40b   : > { %15406 = vmatprep.mubr.msk.f32.mxu0 %vm891_vm4, %v19857_v33 }
 0x40e   : > { %15407 = vmatmul.mubr.msk.f32.gmra.mrb[84].mxu0 %vm891_vm4, %v19861_v50 }
 0x40f   : > { %15409 = vmatprep.mubr.msk.f32.mxu0 %vm891_vm4, %v19865_v36 }
 0x412   : > { %15410 = vmatmul.mubr.msk.f32.gmra.mrb[86].mxu0 %vm891_vm4, %v19869_v42 }
 0x413   : > { %15412 = vmatprep.mubr.msk.f32.mxu0 %vm891_vm4, %v19873_v45 }
 0x416   : > { %15413 = vmatmul.mubr.msk.f32.gmra.mrb[88].mxu0 %vm891_vm4, %v19877_v24 }
 0x417   : > { %15415 = vmatprep.mubr.msk.f32.mxu0 %vm891_vm4, %v19881_v61 }
 0x41a   : > { %15416 = vmatmul.mubr.msk.f32.gmra.mrb[90].mxu0 %vm891_vm4, %v19885_v62 }
 0x41b   : > { %15418 = vmatprep.mubr.msk.f32.mxu0 %vm891_vm4, %v19889_v63 }
 0x41e   : > { %15419 = vmatmul.mubr.msk.f32.gmra.mrb[92].mxu0 %vm891_vm4, %v19893_v20 }
 0x41f   : > { %15421 = vmatprep.mubr.msk.f32.mxu0 %vm891_vm4, %v19897_v25 }
 0x422   : > { %15422 = vmatmul.mubr.msk.f32.gmra.mrb[94].mxu0 %vm891_vm4, %v19901_v27 }
 0x423   : > { %15432 = vmatprep.mubr.msk.f32.mxu0 %vm891_vm4, %v5299_v21  ;;  %v19924_v21 = vpack.c.bf16 %v12980_v55, %v12979_v54  ;;  %v19939_v55 = vld [vmem:[#allocation3 + $0x4a] sm:$0xff]  ;;  %v19943_v54 = vld [vmem:[#allocation3 + $0x52] sm:$0xff] }
 0x424   : > { %22299 = vst [vmem:[#allocation18_spill] sm:$0xff] %v19939_v55  ;;  %22300 = vst [vmem:[#allocation19_spill] sm:$0xff] %v19943_v54 }
 0x426   : > { %15433 = vmatmul.mubr.msk.f32.vlgmr.msra.gmra.mrb[64].mxu0 %vm891_vm4, %v5300_v17  ;;  %v19935_v17 = vld [vmem:[#allocation3 + $0x3a] sm:$0xff] }
 0x427   : > { %15435 = vmatprep.mubr.msk.f32.mxu0 %vm891_vm4, %v19919_v0  ;;  %16748 = vmatpush3.bf16.msra.mxu0 %v19786_v41  ;;  %22298 = vst [vmem:[#allocation17_spill] sm:$0xff] %v19935_v17  ;;  %v19947_v41 = vld [vmem:[#allocation3 + $0x62] sm:$0xff] }
 0x428   : > { %16750 = vmatprep.subr.bf16.mxu0 %v16749_v57  ;;  %22301 = vst [vmem:[#allocation20_spill] sm:$0xff] %v19947_v41 }
 0x42a   : > { %15436 = vmatmul.mubr.msk.f32.gmra.mrb[66].mxu0 %vm891_vm4, %v19926_v44 }
 0x42b   : > { %15438 = vmatprep.mubr.msk.f32.mxu0 %vm891_vm4, %v19930_v18  ;;  %16752 = vmatpush3.bf16.msra.mxu0 %v16749_v57  ;;  %v19951_v57 = vld [vmem:[#allocation3 + $0x6a] sm:$0xff]  ;;  %v13016_v18 = vld [vmem:[%s22016_s5 + $0xa8] sm:$0xff] }
 0x42c   : > { %16754 = vmatprep.subr.bf16.mxu0 %v19924_v21  ;;  %22302 = vst [vmem:[#allocation21_spill] sm:$0xff] %v19951_v57 }
 0x42e   : > { %15439 = vmatmul.mubr.msk.f32.gmra.mrb[68].mxu0 %vm891_vm4, %v19935_v17  ;;  %v19955_v17 = vld [vmem:[#allocation3 + $0x7a] sm:$0xff] }
 0x42f   : > { %15441 = vmatprep.mubr.msk.f32.mxu0 %vm891_vm4, %v19939_v55  ;;  %22303 = vst [vmem:[#allocation22_spill] sm:$0xff] %v19955_v17  ;;  %v19959_v55 = vld [vmem:[#allocation3 + $0x82] sm:$0xff] }
 0x430   : > { %22304 = vst [vmem:[#allocation23_spill] sm:$0xff] %v19959_v55 }
 0x432   : > { %15442 = vmatmul.mubr.msk.f32.gmra.mrb[70].mxu0 %vm891_vm4, %v19943_v54  ;;  %v19963_v54 = vld [vmem:[#allocation3 + $0x92] sm:$0xff] }
 0x433   : > { %15444 = vmatprep.mubr.msk.f32.mxu0 %vm891_vm4, %v19947_v41  ;;  %22305 = vst [vmem:[#allocation24_spill] sm:$0xff] %v19963_v54  ;;  %v19967_v41 = vld [vmem:[#allocation3 + $0x9a] sm:$0xff] }
 0x434   : > { %22306 = vst [vmem:[#allocation25_spill] sm:$0xff] %v19967_v41 }
 0x436   : > { %15445 = vmatmul.mubr.msk.f32.gmra.mrb[72].mxu0 %vm891_vm4, %v19951_v57  ;;  %v19971_v57 = vld [vmem:[#allocation3 + $0xaa] sm:$0xff] }
 0x437   : > { %15447 = vmatprep.mubr.msk.f32.mxu0 %vm891_vm4, %v19955_v17  ;;  %22307 = vst [vmem:[#allocation26_spill] sm:$0xff] %v19971_v57  ;;  %v19975_v17 = vld [vmem:[#allocation3 + $0xb2] sm:$0xff] }
 0x438   : > { %22308 = vst [vmem:[#allocation27_spill] sm:$0xff] %v19975_v17 }
 0x43a   : > { %15448 = vmatmul.mubr.msk.f32.gmra.mrb[74].mxu0 %vm891_vm4, %v19959_v55  ;;  %v19979_v55 = vld [vmem:[#allocation3 + $0xc2] sm:$0xff] }
 0x43b   : > { %15450 = vmatprep.mubr.msk.f32.mxu0 %vm891_vm4, %v19963_v54  ;;  %22309 = vst [vmem:[#allocation28_spill] sm:$0xff] %v19979_v55  ;;  %v19983_v54 = vld [vmem:[#allocation3 + $0xca] sm:$0xff] }
 0x43c   : > { %22310 = vst [vmem:[#allocation29_spill] sm:$0xff] %v19983_v54 }
 0x43e   : > { %15451 = vmatmul.mubr.msk.f32.gmra.mrb[76].mxu0 %vm891_vm4, %v19967_v41  ;;  %v19987_v41 = vld [vmem:[#allocation3 + $0xda] sm:$0xff] }
 0x43f   : > { %15453 = vmatprep.mubr.msk.f32.mxu0 %vm891_vm4, %v19971_v57  ;;  %22311 = vst [vmem:[#allocation30_spill] sm:$0xff] %v19987_v41  ;;  %v19991_v57 = vld [vmem:[#allocation3 + $0xe2] sm:$0xff] }
 0x440   : > { %22312 = vst [vmem:[#allocation31_spill] sm:$0xff] %v19991_v57 }
 0x442   : > { %15454 = vmatmul.mubr.msk.f32.gmra.mrb[78].mxu0 %vm891_vm4, %v19975_v17  ;;  %v19995_v17 = vld [vmem:[#allocation3 + $0xf2] sm:$0xff] }
 0x443   : > { %15456 = vmatprep.mubr.msk.f32.mxu0 %vm891_vm4, %v19979_v55  ;;  %22313 = vst [vmem:[#allocation32_spill] sm:$0xff] %v19995_v17  ;;  %v19999_v55 = vld [vmem:[#allocation3 + $0xfa] sm:$0xff] }
 0x444   : > { %22314 = vst [vmem:[#allocation33_spill] sm:$0xff] %v19999_v55 }
 0x446   : > { %15457 = vmatmul.mubr.msk.f32.gmra.mrb[80].mxu0 %vm891_vm4, %v19983_v54  ;;  %v20003_v54 = vld [vmem:[#allocation3 + $0x10a] sm:$0xff] }
 0x447   : > { %15459 = vmatprep.mubr.msk.f32.mxu0 %vm891_vm4, %v19987_v41  ;;  %22315 = vst [vmem:[#allocation34_spill] sm:$0xff] %v20003_v54  ;;  %v20007_v41 = vld [vmem:[#allocation3 + $0x112] sm:$0xff] }
 0x448   : > { %22316 = vst [vmem:[#allocation35_spill] sm:$0xff] %v20007_v41 }
 0x44a   : > { %15460 = vmatmul.mubr.msk.f32.gmra.mrb[82].mxu0 %vm891_vm4, %v19991_v57  ;;  %v20011_v57 = vld [vmem:[#allocation3 + $0x122] sm:$0xff] }
 0x44b   : > { %15462 = vmatprep.mubr.msk.f32.mxu0 %vm891_vm4, %v19995_v17  ;;  %22317 = vst [vmem:[#allocation36_spill] sm:$0xff] %v20011_v57  ;;  %v20015_v17 = vld [vmem:[#allocation3 + $0x12a] sm:$0xff] }
 0x44c   : > { %22318 = vst [vmem:[#allocation38_spill] sm:$0xff] %v20015_v17 }
 0x44e   : > { %15463 = vmatmul.mubr.msk.f32.gmra.mrb[84].mxu0 %vm891_vm4, %v19999_v55  ;;  %v20019_v55 = vld [vmem:[#allocation3 + $0x13a] sm:$0xff] }
 0x44f   : > { %15465 = vmatprep.mubr.msk.f32.mxu0 %vm891_vm4, %v20003_v54  ;;  %22319 = vst [vmem:[#allocation11_spill] sm:$0xff] %v20019_v55  ;;  %v20023_v54 = vld [vmem:[#allocation3 + $0x142] sm:$0xff] }
 0x450   : > { %22320 = vst [vmem:[#allocation12_spill] sm:$0xff] %v20023_v54 }
 0x452   : > { %15466 = vmatmul.mubr.msk.f32.gmra.mrb[86].mxu0 %vm891_vm4, %v20007_v41  ;;  %v20027_v41 = vld [vmem:[#allocation3 + $0x152] sm:$0xff] }
 0x453   : > { %15468 = vmatprep.mubr.msk.f32.mxu0 %vm891_vm4, %v20011_v57  ;;  %22321 = vst [vmem:[#allocation13_spill] sm:$0xff] %v20027_v41  ;;  %v20031_v57 = vld [vmem:[#allocation3 + $0x15a] sm:$0xff] }
 0x454   : > { %22322 = vst [vmem:[#allocation14_spill] sm:$0xff] %v20031_v57 }
 0x456   : > { %15469 = vmatmul.mubr.msk.f32.gmra.mrb[88].mxu0 %vm891_vm4, %v20015_v17  ;;  %v20035_v17 = vld [vmem:[#allocation3 + $0x16a] sm:$0xff] }
 0x457   : > { %15471 = vmatprep.mubr.msk.f32.mxu0 %vm891_vm4, %v20019_v55  ;;  %22323 = vst [vmem:[#allocation15_spill] sm:$0xff] %v20035_v17  ;;  %v20039_v55 = vld [vmem:[#allocation3 + $0x172] sm:$0xff] }
 0x458   : > { %22324 = vst [vmem:[#allocation16_spill] sm:$0xff] %v20039_v55 }
 0x45a   : > { %15472 = vmatmul.mubr.msk.f32.gmra.mrb[90].mxu0 %vm891_vm4, %v20023_v54  ;;  %v12981_v54 = vld [vmem:[%s22016_s5 + $0x90] sm:$0xff] }
 0x45b   : > { %15474 = vmatprep.mubr.msk.f32.mxu0 %vm891_vm4, %v20027_v41  ;;  %v12982_v41 = vld [vmem:[%s22016_s5 + $0x98] sm:$0xff] }
 0x45e   : > { %15475 = vmatmul.mubr.msk.f32.gmra.mrb[92].mxu0 %vm891_vm4, %v20031_v57  ;;  %v16757_v57 = vpack.c.bf16 %v12982_v41, %v12981_v54  ;;  %v13051_v54 = vld [vmem:[%s22016_s5 + $0xc0] sm:$0xff]  ;;  %v13052_v41 = vld [vmem:[%s22016_s5 + $0xc8] sm:$0xff] }
 0x45f   : > { %15477 = vmatprep.mubr.msk.f32.mxu0 %vm891_vm4, %v20035_v17  ;;  %v13015_v17 = vld [vmem:[%s22016_s5 + $0xa0] sm:$0xff] }
 0x462   : > { %15478 = vmatmul.mubr.msk.f32.gmra.mrb[94].mxu0 %vm891_vm4, %v20039_v55  ;;  %v16761_v55 = vpack.c.bf16 %v13016_v18, %v13015_v17  ;;  %v13018_v18 = vld [vmem:[%s22016_s5 + $0xb8] sm:$0xff] }
 0x463   : > { %15488 = vmatprep.mubr.msk.f32.mxu0 %vm891_vm4, %v19781_v39  ;;  %v20116_v39 = vld [vmem:[#allocation3 + $0x180] sm:$0xff] }
 0x466   : > { %15489 = vmatmul.mubr.msk.f32.vlgmr.msra.gmra.mrb[64].mxu0 %vm891_vm4, %v19788_v51  ;;  %v20120_v51 = vld [vmem:[#allocation3 + $0x188] sm:$0xff] }
 0x467   : > { %15491 = vmatprep.mubr.msk.f32.mxu0 %vm891_vm4, %v19792_v16  ;;  %16756 = vmatpush3.bf16.msra.mxu0 %v19924_v21  ;;  %v13017_v21 = vld [vmem:[%s22016_s5 + $0xb0] sm:$0xff] }
 0x468   : > { %16758 = vmatprep.subr.bf16.mxu0 %v16757_v57  ;;  %v16765_v17 = vpack.c.bf16 %v13018_v18, %v13017_v21  ;;  %v22343_v21 = vld [vmem:[#allocation29_spill] sm:$0xff]  ;;  %v22344_v18 = vld [vmem:[#allocation30_spill] sm:$0xff] }
 0x46a   : > { %15492 = vmatmul.mubr.msk.f32.gmra.mrb[66].mxu0 %vm891_vm4, %v19797_v58 }
 0x46b   : > { %15494 = vmatprep.mubr.msk.f32.mxu0 %vm891_vm4, %v19801_v37  ;;  %16760 = vmatpush3.bf16.msra.mxu0 %v16757_v57  ;;  %v16769_v57 = vpack.c.bf16 %v13052_v41, %v13051_v54  ;;  %v22346_v54 = vld [vmem:[#allocation32_spill] sm:$0xff]  ;;  %v22347_v41 = vld [vmem:[#allocation33_spill] sm:$0xff] }
 0x46c   : > { %16762 = vmatprep.subr.bf16.mxu0 %v16761_v55 }
 0x46e   : > { %15495 = vmatmul.mubr.msk.f32.gmra.mrb[68].mxu0 %vm891_vm4, %v19805_v11 }
 0x46f   : > { %15497 = vmatprep.mubr.msk.f32.mxu0 %vm891_vm4, %v19809_v13 }
 0x472   : > { %15498 = vmatmul.mubr.msk.f32.gmra.mrb[70].mxu0 %vm891_vm4, %v19813_v29 }
 0x473   : > { %15500 = vmatprep.mubr.msk.f32.mxu0 %vm891_vm4, %v19817_v46 }
 0x476   : > { %15501 = vmatmul.mubr.msk.f32.gmra.mrb[72].mxu0 %vm891_vm4, %v19821_v56 }
 0x477   : > { %15503 = vmatprep.mubr.msk.f32.mxu0 %vm891_vm4, %v19825_v8 }
 0x47a   : > { %15504 = vmatmul.mubr.msk.f32.gmra.mrb[74].mxu0 %vm891_vm4, %v19829_v60 }
 0x47b   : > { %15506 = vmatprep.mubr.msk.f32.mxu0 %vm891_vm4, %v19833_v2 }
 0x47e   : > { %15507 = vmatmul.mubr.msk.f32.gmra.mrb[76].mxu0 %vm891_vm4, %v19837_v7 }
 0x47f   : > { %15509 = vmatprep.mubr.msk.f32.mxu0 %vm891_vm4, %v19841_v9 }
 0x482   : > { %15510 = vmatmul.mubr.msk.f32.gmra.mrb[78].mxu0 %vm891_vm4, %v19845_v14 }
 0x483   : > { %15512 = vmatprep.mubr.msk.f32.mxu0 %vm891_vm4, %v19849_v22 }
 0x486   : > { %15513 = vmatmul.mubr.msk.f32.gmra.mrb[80].mxu0 %vm891_vm4, %v19853_v32 }
 0x487   : > { %15515 = vmatprep.mubr.msk.f32.mxu0 %vm891_vm4, %v19857_v33 }
 0x48a   : > { %15516 = vmatmul.mubr.msk.f32.gmra.mrb[82].mxu0 %vm891_vm4, %v19861_v50 }
 0x48b   : > { %15518 = vmatprep.mubr.msk.f32.mxu0 %vm891_vm4, %v19865_v36 }
 0x48e   : > { %15519 = vmatmul.mubr.msk.f32.gmra.mrb[84].mxu0 %vm891_vm4, %v19869_v42 }
 0x48f   : > { %15521 = vmatprep.mubr.msk.f32.mxu0 %vm891_vm4, %v19873_v45 }
 0x492   : > { %15522 = vmatmul.mubr.msk.f32.gmra.mrb[86].mxu0 %vm891_vm4, %v19877_v24 }
 0x493   : > { %15524 = vmatprep.mubr.msk.f32.mxu0 %vm891_vm4, %v19881_v61 }
 0x496   : > { %15525 = vmatmul.mubr.msk.f32.gmra.mrb[88].mxu0 %vm891_vm4, %v19885_v62 }
 0x497   : > { %15527 = vmatprep.mubr.msk.f32.mxu0 %vm891_vm4, %v19889_v63 }
 0x49a   : > { %15528 = vmatmul.mubr.msk.f32.gmra.mrb[90].mxu0 %vm891_vm4, %v19893_v20 }
 0x49b   : > { %15530 = vmatprep.mubr.msk.f32.mxu0 %vm891_vm4, %v19897_v25 }
 0x49e   : > { %15531 = vmatmul.mubr.msk.f32.gmra.mrb[92].mxu0 %vm891_vm4, %v19901_v27 }
 0x49f   : > { %15533 = vmatprep.mubr.msk.f32.mxu0 %vm891_vm4, %v20116_v39 }
 0x4a2   : > { %15534 = vmatmul.mubr.msk.f32.gmra.mrb[94].mxu0 %vm891_vm4, %v20120_v51 }
 0x4a3   : > { %15544 = vmatprep.mubr.msk.f32.mxu0 %vm891_vm4, %v19571_v28  ;;  %v22325_v28 = vld [vmem:[#allocation39_spill] sm:$0xff] }
 0x4a6   : > { %15545 = vmatmul.mubr.msk.f32.vlgmr.msra.gmra.mrb[64].mxu0 %vm891_vm4, %v19577_v26  ;;  %v22326_v26 = vld [vmem:[#allocation40_spill] sm:$0xff] }
 0x4a7   : > { %15547 = vmatprep.mubr.msk.f32.mxu0 %vm891_vm4, %v19585_v15  ;;  %16764 = vmatpush3.bf16.msra.mxu0 %v16761_v55  ;;  %v22327_v15 = vld [vmem:[#allocation41_spill] sm:$0xff]  ;;  %v22342_v55 = vld [vmem:[#allocation28_spill] sm:$0xff] }
 0x4a8   : > { %16766 = vmatprep.subr.bf16.mxu0 %v16765_v17 }
 0x4aa   : > { %15548 = vmatmul.mubr.msk.f32.gmra.mrb[66].mxu0 %vm891_vm4, %v19591_v48  ;;  %v22328_v48 = vld [vmem:[#allocation42_spill] sm:$0xff] }
 0x4ab   : > { %15550 = vmatprep.mubr.msk.f32.mxu0 %vm891_vm4, %v19599_v59  ;;  %16768 = vmatpush3.bf16.msra.mxu0 %v16765_v17  ;;  %v22329_v59 = vld [vmem:[#allocation43_spill] sm:$0xff] }
 0x4ac   : > { %16770 = vmatprep.subr.bf16.mxu0 %v16769_v57  ;;  %v22345_v17 = vld [vmem:[#allocation31_spill] sm:$0xff] }
 0x4ae   : > { %15551 = vmatmul.mubr.msk.f32.gmra.mrb[68].mxu0 %vm891_vm4, %v19605_v3  ;;  %v20196_v3 = vld [vmem:[#allocation3 + $0x181] sm:$0xff] }
 0x4af   : > { %15553 = vmatprep.mubr.msk.f32.mxu0 %vm891_vm4, %v19613_v23  ;;  %v20200_v23 = vld [vmem:[#allocation3 + $0x189] sm:$0xff] }
 0x4b2   : > { %15554 = vmatmul.mubr.msk.f32.gmra.mrb[70].mxu0 %vm891_vm4, %v19619_v34  ;;  %v13053_v34 = vld [vmem:[%s22016_s5 + $0xd0] sm:$0xff] }
 0x4b3   : > { %15556 = vmatprep.mubr.msk.f32.mxu0 %vm891_vm4, %v19627_v43  ;;  %v13054_v43 = vld [vmem:[%s22016_s5 + $0xd8] sm:$0xff] }
 0x4b6   : > { %15557 = vmatmul.mubr.msk.f32.gmra.mrb[72].mxu0 %vm891_vm4, %v19633_v38  ;;  %v16773_v38 = vpack.c.bf16 %v13054_v43, %v13053_v34  ;;  %v22349_v34 = vld [vmem:[#allocation35_spill] sm:$0xff]  ;;  %v22350_v43 = vld [vmem:[#allocation36_spill] sm:$0xff] }
 0x4b7   : > { %15559 = vmatprep.mubr.msk.f32.mxu0 %vm891_vm4, %v19641_v30  ;;  %v13087_v30 = vld [vmem:[%s22016_s5 + $0xe0] sm:$0xff] }
 0x4ba   : > { %15560 = vmatmul.mubr.msk.f32.gmra.mrb[74].mxu0 %vm891_vm4, %v19647_v49  ;;  %v13088_v49 = vld [vmem:[%s22016_s5 + $0xe8] sm:$0xff] }
 0x4bb   : > { %15562 = vmatprep.mubr.msk.f32.mxu0 %vm891_vm4, %v19655_v35  ;;  %v22330_v35 = vld [vmem:[#allocation37_spill] sm:$0xff] }
 0x4be   : > { %15563 = vmatmul.mubr.msk.f32.gmra.mrb[76].mxu0 %vm891_vm4, %v19661_v6  ;;  %v16777_v6 = vpack.c.bf16 %v13088_v49, %v13087_v30  ;;  %v22352_v30 = vld [vmem:[#allocation11_spill] sm:$0xff]  ;;  %v22353_v49 = vld [vmem:[#allocation12_spill] sm:$0xff] }
 0x4bf   : > { %15565 = vmatprep.mubr.msk.f32.mxu0 %vm891_vm4, %v19669_v12  ;;  %v22331_v12 = vld [vmem:[#allocation17_spill] sm:$0xff] }
 0x4c2   : > { %15566 = vmatmul.mubr.msk.f32.gmra.mrb[78].mxu0 %vm891_vm4, %v19675_v52  ;;  %v22332_v52 = vld [vmem:[#allocation18_spill] sm:$0xff] }
 0x4c3   : > { %15568 = vmatprep.mubr.msk.f32.mxu0 %vm891_vm4, %v19683_v47  ;;  %v22333_v47 = vld [vmem:[#allocation19_spill] sm:$0xff] }
 0x4c6   : > { %15569 = vmatmul.mubr.msk.f32.gmra.mrb[80].mxu0 %vm891_vm4, %v19689_v19  ;;  %v22334_v19 = vld [vmem:[#allocation20_spill] sm:$0xff] }
 0x4c7   : > { %15571 = vmatprep.mubr.msk.f32.mxu0 %vm891_vm4, %v19697_v1  ;;  %v22335_v1 = vld [vmem:[#allocation21_spill] sm:$0xff] }
 0x4ca   : > { %15572 = vmatmul.mubr.msk.f32.gmra.mrb[82].mxu0 %vm891_vm4, %v19703_v31  ;;  %v22336_v31 = vld [vmem:[#allocation22_spill] sm:$0xff] }
 0x4cb   : > { %15574 = vmatprep.mubr.msk.f32.mxu0 %vm891_vm4, %v19711_v5  ;;  %v22337_v5 = vld [vmem:[#allocation23_spill] sm:$0xff] }
 0x4ce   : > { %15575 = vmatmul.mubr.msk.f32.gmra.mrb[84].mxu0 %vm891_vm4, %v19717_v40  ;;  %v22338_v40 = vld [vmem:[#allocation24_spill] sm:$0xff] }
 0x4cf   : > { %15577 = vmatprep.mubr.msk.f32.mxu0 %vm891_vm4, %v19725_v4  ;;  %v22339_v4 = vld [vmem:[#allocation25_spill] sm:$0xff] }
 0x4d2   : > { %15578 = vmatmul.mubr.msk.f32.gmra.mrb[86].mxu0 %vm891_vm4, %v19731_v10 }
 0x4d3   : > { %15580 = vmatprep.mubr.msk.f32.mxu0 %vm891_vm4, %v19739_v53 }
 0x4d6   : > { %15581 = vmatmul.mubr.msk.f32.gmra.mrb[88].mxu0 %vm891_vm4, %v22325_v28 }
 0x4d7   : > { %15583 = vmatprep.mubr.msk.f32.mxu0 %vm891_vm4, %v22326_v26 }
 0x4da   : > { %15584 = vmatmul.mubr.msk.f32.gmra.mrb[90].mxu0 %vm891_vm4, %v22327_v15 }
 0x4db   : > { %15586 = vmatprep.mubr.msk.f32.mxu0 %vm891_vm4, %v22328_v48 }
 0x4de   : > { %15587 = vmatmul.mubr.msk.f32.gmra.mrb[92].mxu0 %vm891_vm4, %v22329_v59 }
 0x4df   : > { %15589 = vmatprep.mubr.msk.f32.mxu0 %vm891_vm4, %v20196_v3 }
 0x4e2   : > { %15590 = vmatmul.mubr.msk.f32.gmra.mrb[94].mxu0 %vm891_vm4, %v20200_v23 }
 0x4e3   : > { %15600 = vmatprep.mubr.msk.f32.mxu0 %vm891_vm4, %v19919_v0  ;;  %v22340_v0 = vld [vmem:[#allocation26_spill] sm:$0xff] }
 0x4e6   : > { %15601 = vmatmul.mubr.msk.f32.vlgmr.msra.gmra.mrb[64].mxu0 %vm891_vm4, %v19926_v44  ;;  %v22341_v44 = vld [vmem:[#allocation27_spill] sm:$0xff] }
 0x4e7   : > { %15603 = vmatprep.mubr.msk.f32.mxu0 %vm891_vm4, %v22330_v35  ;;  %16772 = vmatpush3.bf16.msra.mxu0 %v16769_v57  ;;  %v22348_v57 = vld [vmem:[#allocation34_spill] sm:$0xff] }
 0x4e8   : > { %16774 = vmatprep.subr.bf16.mxu0 %v16773_v38 }
 0x4ea   : > { %15604 = vmatmul.mubr.msk.f32.gmra.mrb[66].mxu0 %vm891_vm4, %v22331_v12 }
 0x4eb   : > { %15606 = vmatprep.mubr.msk.f32.mxu0 %vm891_vm4, %v22332_v52  ;;  %16776 = vmatpush3.bf16.msra.mxu0 %v16773_v38  ;;  %v22351_v38 = vld [vmem:[#allocation38_spill] sm:$0xff] }
 0x4ec   : > { %16778 = vmatprep.subr.bf16.mxu0 %v16777_v6 }
 0x4ee   : > { %15607 = vmatmul.mubr.msk.f32.gmra.mrb[68].mxu0 %vm891_vm4, %v22333_v47 }
 0x4ef   : > { %15609 = vmatprep.mubr.msk.f32.mxu0 %vm891_vm4, %v22334_v19 }
 0x4f2   : > { %15610 = vmatmul.mubr.msk.f32.gmra.mrb[70].mxu0 %vm891_vm4, %v22335_v1 }
 0x4f3   : > { %15612 = vmatprep.mubr.msk.f32.mxu0 %vm891_vm4, %v22336_v31 }
 0x4f6   : > { %15613 = vmatmul.mubr.msk.f32.gmra.mrb[72].mxu0 %vm891_vm4, %v22337_v5 }
 0x4f7   : > { %15615 = vmatprep.mubr.msk.f32.mxu0 %vm891_vm4, %v22338_v40 }
 0x4fa   : > { %15616 = vmatmul.mubr.msk.f32.gmra.mrb[74].mxu0 %vm891_vm4, %v22339_v4 }
 0x4fb   : > { %15618 = vmatprep.mubr.msk.f32.mxu0 %vm891_vm4, %v22340_v0 }
 0x4fe   : > { %15619 = vmatmul.mubr.msk.f32.gmra.mrb[76].mxu0 %vm891_vm4, %v22341_v44 }
 0x4ff   : > { %15621 = vmatprep.mubr.msk.f32.mxu0 %vm891_vm4, %v22342_v55 }
 0x502   : > { %15622 = vmatmul.mubr.msk.f32.gmra.mrb[78].mxu0 %vm891_vm4, %v22343_v21 }
 0x503   : > { %15624 = vmatprep.mubr.msk.f32.mxu0 %vm891_vm4, %v22344_v18 }
 0x506   : > { %15625 = vmatmul.mubr.msk.f32.gmra.mrb[80].mxu0 %vm891_vm4, %v22345_v17 }
 0x507   : > { %15627 = vmatprep.mubr.msk.f32.mxu0 %vm891_vm4, %v22346_v54  ;;  %v22354_v54 = vld [vmem:[#allocation13_spill] sm:$0xff] }
 0x50a   : > { %15628 = vmatmul.mubr.msk.f32.gmra.mrb[82].mxu0 %vm891_vm4, %v22347_v41  ;;  %v22355_v41 = vld [vmem:[#allocation14_spill] sm:$0xff] }
 0x50b   : > { %15630 = vmatprep.mubr.msk.f32.mxu0 %vm891_vm4, %v22348_v57  ;;  %v22356_v57 = vld [vmem:[#allocation15_spill] sm:$0xff] }
 0x50e   : > { %15631 = vmatmul.mubr.msk.f32.gmra.mrb[84].mxu0 %vm891_vm4, %v22349_v34  ;;  %v22357_v34 = vld [vmem:[#allocation16_spill] sm:$0xff] }
 0x50f   : > { %15633 = vmatprep.mubr.msk.f32.mxu0 %vm891_vm4, %v22350_v43  ;;  %v20276_v43 = vld [vmem:[#allocation3 + $0x182] sm:$0xff] }
 0x510   : > { %22358 = vst [vmem:[#allocation39_spill] sm:$0xff] %v20276_v43 }
 0x512   : > { %15634 = vmatmul.mubr.msk.f32.gmra.mrb[86].mxu0 %vm891_vm4, %v22351_v38 }
 0x513   : > { %15636 = vmatprep.mubr.msk.f32.mxu0 %vm891_vm4, %v22352_v30  ;;  %v20280_v30 = vld [vmem:[#allocation3 + $0x18a] sm:$0xff] }
 0x514   : > { %22359 = vst [vmem:[#allocation40_spill] sm:$0xff] %v20280_v30 }
 0x516   : > { %15637 = vmatmul.mubr.msk.f32.gmra.mrb[88].mxu0 %vm891_vm4, %v22353_v49 }
 0x517   : > { %15639 = vmatprep.mubr.msk.f32.mxu0 %vm891_vm4, %v22354_v54  ;;  %v13089_v54 = vld [vmem:[%s22016_s5 + $0xf0] sm:$0xff] }
 0x51a   : > { %15640 = vmatmul.mubr.msk.f32.gmra.mrb[90].mxu0 %vm891_vm4, %v22355_v41  ;;  %v13090_v41 = vld [vmem:[%s22016_s5 + $0xf8] sm:$0xff] }
 0x51b   : > { %15642 = vmatprep.mubr.msk.f32.mxu0 %vm891_vm4, %v22356_v57  ;;  %v13124_v57 = vld [vmem:[%s22016_s5 + $0x108] sm:$0xff] }
 0x51e   : > { %15643 = vmatmul.mubr.msk.f32.gmra.mrb[92].mxu0 %vm891_vm4, %v22357_v34  ;;  %v16781_v34 = vpack.c.bf16 %v13090_v41, %v13089_v54 }
 0x51f   : > { %15645 = vmatprep.mubr.msk.f32.mxu0 %vm891_vm4, %v20276_v43  ;;  %v13123_v43 = vld [vmem:[%s22016_s5 + $0x100] sm:$0xff] }
 0x522   : > { %15646 = vmatmul.mubr.msk.f32.gmra.mrb[94].mxu0 %vm891_vm4, %v20280_v30  ;;  %v16785_v30 = vpack.c.bf16 %v13124_v57, %v13123_v43 }
 0x523   : > { %15656 = vmatprep.mubr.msk.f32.mxu0 %vm891_vm4, %v19792_v16  ;;  %v6890_v16 = vld [vmem:[#allocation3 + $0x198] sm:$0xff] }
 0x526   : > { %15657 = vmatmul.mubr.msk.f32.vlgmr.msra.gmra.mrb[64].mxu0 %vm891_vm4, %v19797_v58  ;;  %v6891_v58 = vld [vmem:[#allocation3 + $0x1a0] sm:$0xff] }
 0x527   : > { %15659 = vmatprep.mubr.msk.f32.mxu0 %vm891_vm4, %v19801_v37  ;;  %16780 = vmatpush3.bf16.msra.mxu0 %v16777_v6  ;;  %v13125_v37 = vld [vmem:[%s22016_s5 + $0x110] sm:$0xff] }
 0x528   : > { %16782 = vmatprep.subr.bf16.mxu0 %v16781_v34  ;;  %v22371_v6 = vld [vmem:[#allocation40_spill] sm:$0xff] }
 0x52a   : > { %15660 = vmatmul.mubr.msk.f32.gmra.mrb[66].mxu0 %vm891_vm4, %v19805_v11  ;;  %v13126_v11 = vld [vmem:[%s22016_s5 + $0x118] sm:$0xff] }
 0x52b   : > { %15662 = vmatprep.mubr.msk.f32.mxu0 %vm891_vm4, %v19809_v13  ;;  %16784 = vmatpush3.bf16.msra.mxu0 %v16781_v34  ;;  %v7250_v13 = vld [vmem:[#allocation3 + $0x31] sm:$0xff] }
 0x52c   : > { %16786 = vmatprep.subr.bf16.mxu0 %v16785_v30 }
 0x52e   : > { %15663 = vmatmul.mubr.msk.f32.gmra.mrb[68].mxu0 %vm891_vm4, %v19813_v29  ;;  %v16789_v29 = vpack.c.bf16 %v13126_v11, %v13125_v37 }
 0x52f   : > { %15665 = vmatprep.mubr.msk.f32.mxu0 %vm891_vm4, %v19817_v46  ;;  %v7251_v46 = vld [vmem:[#allocation3 + $0x39] sm:$0xff] }
 0x532   : > { %15666 = vmatmul.mubr.msk.f32.gmra.mrb[70].mxu0 %vm891_vm4, %v19821_v56  ;;  %v7252_v56 = vld [vmem:[#allocation3 + $0x49] sm:$0xff] }
 0x533   : > { %15668 = vmatprep.mubr.msk.f32.mxu0 %vm891_vm4, %v19825_v8  ;;  %v7253_v8 = vld [vmem:[#allocation3 + $0x51] sm:$0xff] }
 0x536   : > { %15669 = vmatmul.mubr.msk.f32.gmra.mrb[72].mxu0 %vm891_vm4, %v19829_v60  ;;  %v7254_v60 = vld [vmem:[#allocation3 + $0x61] sm:$0xff] }
 0x537   : > { %15671 = vmatprep.mubr.msk.f32.mxu0 %vm891_vm4, %v19833_v2  ;;  %v7255_v2 = vld [vmem:[#allocation3 + $0x69] sm:$0xff] }
 0x53a   : > { %15672 = vmatmul.mubr.msk.f32.gmra.mrb[74].mxu0 %vm891_vm4, %v19837_v7  ;;  %v7256_v7 = vld [vmem:[#allocation3 + $0x79] sm:$0xff] }
 0x53b   : > { %15674 = vmatprep.mubr.msk.f32.mxu0 %vm891_vm4, %v19841_v9  ;;  %v7257_v9 = vld [vmem:[#allocation3 + $0x81] sm:$0xff] }
 0x53e   : > { %15675 = vmatmul.mubr.msk.f32.gmra.mrb[76].mxu0 %vm891_vm4, %v19845_v14  ;;  %v7258_v14 = vld [vmem:[#allocation3 + $0x91] sm:$0xff] }
 0x53f   : > { %15677 = vmatprep.mubr.msk.f32.mxu0 %vm891_vm4, %v19849_v22  ;;  %v7259_v22 = vld [vmem:[#allocation3 + $0x99] sm:$0xff] }
 0x542   : > { %15678 = vmatmul.mubr.msk.f32.gmra.mrb[78].mxu0 %vm891_vm4, %v19853_v32  ;;  %v7260_v32 = vld [vmem:[#allocation3 + $0xa9] sm:$0xff] }
 0x543   : > { %15680 = vmatprep.mubr.msk.f32.mxu0 %vm891_vm4, %v19857_v33  ;;  %v7261_v33 = vld [vmem:[#allocation3 + $0xb1] sm:$0xff] }
 0x546   : > { %15681 = vmatmul.mubr.msk.f32.gmra.mrb[80].mxu0 %vm891_vm4, %v19861_v50  ;;  %v7262_v50 = vld [vmem:[#allocation3 + $0xc1] sm:$0xff] }
 0x547   : > { %15683 = vmatprep.mubr.msk.f32.mxu0 %vm891_vm4, %v19865_v36  ;;  %v7263_v36 = vld [vmem:[#allocation3 + $0xc9] sm:$0xff] }
 0x54a   : > { %15684 = vmatmul.mubr.msk.f32.gmra.mrb[82].mxu0 %vm891_vm4, %v19869_v42  ;;  %v7264_v42 = vld [vmem:[#allocation3 + $0xd9] sm:$0xff] }
 0x54b   : > { %15686 = vmatprep.mubr.msk.f32.mxu0 %vm891_vm4, %v19873_v45  ;;  %v7265_v45 = vld [vmem:[#allocation3 + $0xe1] sm:$0xff] }
 0x54e   : > { %15687 = vmatmul.mubr.msk.f32.gmra.mrb[84].mxu0 %vm891_vm4, %v19877_v24  ;;  %v7266_v24 = vld [vmem:[#allocation3 + $0xf1] sm:$0xff] }
 0x54f   : > { %15689 = vmatprep.mubr.msk.f32.mxu0 %vm891_vm4, %v19881_v61  ;;  %v7267_v61 = vld [vmem:[#allocation3 + $0xf9] sm:$0xff] }
 0x552   : > { %15690 = vmatmul.mubr.msk.f32.gmra.mrb[86].mxu0 %vm891_vm4, %v19885_v62  ;;  %v7268_v62 = vld [vmem:[#allocation3 + $0x109] sm:$0xff] }
 0x553   : > { %15692 = vmatprep.mubr.msk.f32.mxu0 %vm891_vm4, %v19889_v63  ;;  %v7269_v63 = vld [vmem:[#allocation3 + $0x111] sm:$0xff] }
 0x556   : > { %15693 = vmatmul.mubr.msk.f32.gmra.mrb[88].mxu0 %vm891_vm4, %v19893_v20  ;;  %v7270_v20 = vld [vmem:[#allocation3 + $0x121] sm:$0xff] }
 0x557   : > { %15695 = vmatprep.mubr.msk.f32.mxu0 %vm891_vm4, %v19897_v25  ;;  %v22360_v25 = vld [vmem:[#allocation32_spill] sm:$0xff] }
 0x55a   : > { %15696 = vmatmul.mubr.msk.f32.gmra.mrb[90].mxu0 %vm891_vm4, %v19901_v27  ;;  %v22361_v27 = vld [vmem:[#allocation33_spill] sm:$0xff] }
 0x55b   : > { %15698 = vmatprep.mubr.msk.f32.mxu0 %vm891_vm4, %v20116_v39  ;;  %v22362_v39 = vld [vmem:[#allocation34_spill] sm:$0xff] }
 0x55e   : > { %15699 = vmatmul.mubr.msk.f32.gmra.mrb[92].mxu0 %vm891_vm4, %v20120_v51  ;;  %v22363_v51 = vld [vmem:[#allocation35_spill] sm:$0xff] }
 0x55f   : > { %15701 = vmatprep.mubr.msk.f32.mxu0 %vm891_vm4, %v6890_v16 }
 0x562   : > { %15702 = vmatmul.mubr.msk.f32.gmra.mrb[94].mxu0 %vm891_vm4, %v6891_v58 }
 0x563   : > { %15712 = vmatprep.mubr.msk.f32.mxu0 %vm891_vm4, %v7250_v13 }
 0x566   : > { %15713 = vmatmul.mubr.msk.f32.vlgmr.msra.gmra.mrb[64].mxu0 %vm891_vm4, %v7251_v46 }
 0x567   : > { %15715 = vmatprep.mubr.msk.f32.mxu0 %vm891_vm4, %v7252_v56  ;;  %16788 = vmatpush3.bf16.msra.mxu0 %v16785_v30 }
 0x568   : > { %16790 = vmatprep.subr.bf16.mxu0 %v16789_v29 }
 0x56a   : > { %15716 = vmatmul.mubr.msk.f32.gmra.mrb[66].mxu0 %vm891_vm4, %v7253_v8 }
 0x56b   : > { %15718 = vmatprep.mubr.msk.f32.mxu0 %vm891_vm4, %v7254_v60  ;;  %16792 = vmatpush3.bf16.msra.mxu0 %v16789_v29 }
 0x56e   : > { %15719 = vmatmul.mubr.msk.f32.gmra.mrb[68].mxu0 %vm891_vm4, %v7255_v2 }
 0x56f   : > { %15721 = vmatprep.mubr.msk.f32.mxu0 %vm891_vm4, %v7256_v7 }
 0x572   : > { %15722 = vmatmul.mubr.msk.f32.gmra.mrb[70].mxu0 %vm891_vm4, %v7257_v9 }
 0x573   : > { %15724 = vmatprep.mubr.msk.f32.mxu0 %vm891_vm4, %v7258_v14 }
 0x576   : > { %15725 = vmatmul.mubr.msk.f32.gmra.mrb[72].mxu0 %vm891_vm4, %v7259_v22 }
 0x577   : > { %15727 = vmatprep.mubr.msk.f32.mxu0 %vm891_vm4, %v7260_v32 }
 0x57a   : > { %15728 = vmatmul.mubr.msk.f32.gmra.mrb[74].mxu0 %vm891_vm4, %v7261_v33 }
 0x57b   : > { %15730 = vmatprep.mubr.msk.f32.mxu0 %vm891_vm4, %v7262_v50 }
 0x57e   : > { %15731 = vmatmul.mubr.msk.f32.gmra.mrb[76].mxu0 %vm891_vm4, %v7263_v36 }
 0x57f   : > { %15733 = vmatprep.mubr.msk.f32.mxu0 %vm891_vm4, %v7264_v42 }
 0x582   : > { %15734 = vmatmul.mubr.msk.f32.gmra.mrb[78].mxu0 %vm891_vm4, %v7265_v45 }
 0x583   : > { %15736 = vmatprep.mubr.msk.f32.mxu0 %vm891_vm4, %v7266_v24 }
 0x586   : > { %15737 = vmatmul.mubr.msk.f32.gmra.mrb[80].mxu0 %vm891_vm4, %v7267_v61 }
 0x587   : > { %15739 = vmatprep.mubr.msk.f32.mxu0 %vm891_vm4, %v7268_v62 }
 0x58a   : > { %15740 = vmatmul.mubr.msk.f32.gmra.mrb[82].mxu0 %vm891_vm4, %v7269_v63 }
 0x58b   : > { %15742 = vmatprep.mubr.msk.f32.mxu0 %vm891_vm4, %v7270_v20 }
 0x58e   : > { %15743 = vmatmul.mubr.msk.f32.gmra.mrb[84].mxu0 %vm891_vm4, %v19731_v10  ;;  %v7280_v10 = vld [vmem:[#allocation3 + $0x199] sm:$0xff] }
 0x58f   : > { %15745 = vmatprep.mubr.msk.f32.mxu0 %vm891_vm4, %v19739_v53  ;;  %v7281_v53 = vld [vmem:[#allocation3 + $0x1a1] sm:$0xff] }
 0x592   : > { %15746 = vmatmul.mubr.msk.f32.gmra.mrb[86].mxu0 %vm891_vm4, %v22325_v28  ;;  %v22364_v28 = vld [vmem:[#allocation36_spill] sm:$0xff] }
 0x593   : > { %15748 = vmatprep.mubr.msk.f32.mxu0 %vm891_vm4, %v22326_v26  ;;  %v22365_v26 = vld [vmem:[#allocation11_spill] sm:$0xff] }
 0x596   : > { %15749 = vmatmul.mubr.msk.f32.gmra.mrb[88].mxu0 %vm891_vm4, %v22327_v15  ;;  %v22366_v15 = vld [vmem:[#allocation13_spill] sm:$0xff] }
 0x597   : > { %15751 = vmatprep.mubr.msk.f32.mxu0 %vm891_vm4, %v22328_v48  ;;  %v22367_v48 = vld [vmem:[#allocation14_spill] sm:$0xff] }
 0x59a   : > { %15752 = vmatmul.mubr.msk.f32.gmra.mrb[90].mxu0 %vm891_vm4, %v22329_v59  ;;  %v22368_v59 = vld [vmem:[#allocation15_spill] sm:$0xff] }
 0x59b   : > { %15754 = vmatprep.mubr.msk.f32.mxu0 %vm891_vm4, %v20196_v3  ;;  %v22369_v3 = vld [vmem:[#allocation16_spill] sm:$0xff] }
 0x59e   : > { %15755 = vmatmul.mubr.msk.f32.gmra.mrb[92].mxu0 %vm891_vm4, %v20200_v23  ;;  %v22370_v23 = vld [vmem:[#allocation39_spill] sm:$0xff] }
 0x59f   : > { %15757 = vmatprep.mubr.msk.f32.mxu0 %vm891_vm4, %v7280_v10 }
 0x5a2   : > { %15758 = vmatmul.mubr.msk.f32.gmra.mrb[94].mxu0 %vm891_vm4, %v7281_v53  ;;  %v8030_v53 = vld [vmem:[%s22022_s11] sm:$0xff] }
 0x5a3   : > { %15768 = vmatprep.mubr.msk.f32.mxu0 %vm891_vm4, %v22330_v35  ;;  %v7670_v35 = vld [vmem:[#allocation3 + $0x19a] sm:$0xff] }
 0x5a6   : > { %15769 = vmatmul.mubr.msk.f32.vlgmr.msra.gmra.mrb[64].mxu0 %vm891_vm4, %v22331_v12  ;;  %v7671_v12 = vld [vmem:[#allocation3 + $0x1a2] sm:$0xff] }
 0x5a7   : > { %15771 = vmatprep.mubr.msk.f32.mxu0 %vm891_vm4, %v22332_v52  ;;  %v8031_v52 = vld [vmem:[%s22022_s11 + $0x8] sm:$0xff] }
 0x5a8   : > { %8117 = vmatprep.mubr.f32.mxu1 %v8031_v52  ;;  %v13160_v52 = vld [vmem:[%s22018_s7 + $0x40] sm:$0xff] }
 0x5aa   : > { %15772 = vmatmul.mubr.msk.f32.gmra.mrb[66].mxu0 %vm891_vm4, %v22333_v47 }
 0x5ab   : > { %15774 = vmatprep.mubr.msk.f32.mxu0 %vm891_vm4, %v22334_v19 }
 0x5ae   : > { %15775 = vmatmul.mubr.msk.f32.gmra.mrb[68].mxu0 %vm891_vm4, %v22335_v1 }
 0x5af   : > { %15777 = vmatprep.mubr.msk.f32.mxu0 %vm891_vm4, %v22336_v31 }
 0x5b2   : > { %15778 = vmatmul.mubr.msk.f32.gmra.mrb[70].mxu0 %vm891_vm4, %v22337_v5 }
 0x5b3   : > { %15780 = vmatprep.mubr.msk.f32.mxu0 %vm891_vm4, %v22338_v40 }
 0x5b6   : > { %15781 = vmatmul.mubr.msk.f32.gmra.mrb[72].mxu0 %vm891_vm4, %v22339_v4 }
 0x5b7   : > { %15783 = vmatprep.mubr.msk.f32.mxu0 %vm891_vm4, %v22340_v0 }
 0x5ba   : > { %15784 = vmatmul.mubr.msk.f32.gmra.mrb[74].mxu0 %vm891_vm4, %v22341_v44 }
 0x5bb   : > { %15786 = vmatprep.mubr.msk.f32.mxu0 %vm891_vm4, %v22342_v55 }
 0x5be   : > { %15787 = vmatmul.mubr.msk.f32.gmra.mrb[76].mxu0 %vm891_vm4, %v22343_v21 }
 0x5bf   : > { %15789 = vmatprep.mubr.msk.f32.mxu0 %vm891_vm4, %v22344_v18 }
 0x5c2   : > { %15790 = vmatmul.mubr.msk.f32.gmra.mrb[78].mxu0 %vm891_vm4, %v22345_v17 }
 0x5c3   : > { %15792 = vmatprep.mubr.msk.f32.mxu0 %vm891_vm4, %v22360_v25  ;;  %v8033_v25 = vld [vmem:[%s22022_s11 + $0x18] sm:$0xff] }
 0x5c6   : > { %15793 = vmatmul.mubr.msk.f32.gmra.mrb[80].mxu0 %vm891_vm4, %v22361_v27  ;;  %v8032_v27 = vld [vmem:[%s22022_s11 + $0x10] sm:$0xff] }
 0x5c7   : > { %15795 = vmatprep.mubr.msk.f32.mxu0 %vm891_vm4, %v22362_v39  ;;  %v8035_v39 = vld [vmem:[%s22022_s11 + $0x28] sm:$0xff] }
 0x5ca   : > { %15796 = vmatmul.mubr.msk.f32.gmra.mrb[82].mxu0 %vm891_vm4, %v22363_v51  ;;  %v8034_v51 = vld [vmem:[%s22022_s11 + $0x20] sm:$0xff] }
 0x5cb   : > { %15798 = vmatprep.mubr.msk.f32.mxu0 %vm891_vm4, %v22364_v28  ;;  %v8037_v28 = vld [vmem:[%s22022_s11 + $0x38] sm:$0xff] }
 0x5ce   : > { %15799 = vmatmul.mubr.msk.f32.gmra.mrb[84].mxu0 %vm891_vm4, %v22351_v38 }
 0x5cf   : > { %15801 = vmatprep.mubr.msk.f32.mxu0 %vm891_vm4, %v22365_v26  ;;  %v8036_v26 = vld [vmem:[%s22022_s11 + $0x30] sm:$0xff] }
 0x5d2   : > { %15802 = vmatmul.mubr.msk.f32.gmra.mrb[86].mxu0 %vm891_vm4, %v22353_v49 }
 0x5d3   : > { %15804 = vmatprep.mubr.msk.f32.mxu0 %vm891_vm4, %v22366_v15  ;;  %v8039_v15 = vld [vmem:[%s22022_s11 + $0x48] sm:$0xff] }
 0x5d6   : > { %15805 = vmatmul.mubr.msk.f32.gmra.mrb[88].mxu0 %vm891_vm4, %v22367_v48  ;;  %v8038_v48 = vld [vmem:[%s22022_s11 + $0x40] sm:$0xff] }
 0x5d7   : > { %15807 = vmatprep.mubr.msk.f32.mxu0 %vm891_vm4, %v22368_v59  ;;  %v8041_v59 = vld [vmem:[%s22022_s11 + $0x58] sm:$0xff] }
 0x5da   : > { %15808 = vmatmul.mubr.msk.f32.gmra.mrb[90].mxu0 %vm891_vm4, %v22369_v3  ;;  %v8040_v3 = vld [vmem:[%s22022_s11 + $0x50] sm:$0xff] }
 0x5db   : > { %15810 = vmatprep.mubr.msk.f32.mxu0 %vm891_vm4, %v22370_v23  ;;  %v8043_v23 = vld [vmem:[%s22022_s11 + $0x68] sm:$0xff] }
 0x5de   : > { %15811 = vmatmul.mubr.msk.f32.gmra.mrb[92].mxu0 %vm891_vm4, %v22371_v6  ;;  %v8045_v6 = vld [vmem:[%s22022_s11 + $0x78] sm:$0xff] }
 0x5df   : > { %15813 = vmatprep.mubr.msk.f32.mxu0 %vm891_vm4, %v7670_v35  ;;  %v8042_v35 = vld [vmem:[%s22022_s11 + $0x60] sm:$0xff] }
 0x5e2   : > { %15814 = vmatmul.mubr.msk.f32.gmra.mrb[94].mxu0 %vm891_vm4, %v7671_v12  ;;  %v8044_v12 = vld [vmem:[%s22022_s11 + $0x70] sm:$0xff] }
 0x679   : > { %v15770_v47 = vpop.f32.mrb[64].mxu0 }
 0x67a   : > { %v7839_v19 = vpop.f32.mrb[65].mxu0 }
 0x67b   : > { %v16795_v1 = vpack.c.bf16 %v15770_v47, %v7839_v19  ;;  %v13161_v47 = vld [vmem:[%s22018_s7 + $0x48] sm:$0xff] }
 0x67c   : > { %v16825_v19 = vpack.c.bf16 %v13161_v47, %v13160_v52 }
 0x67d   : > { %v15773_v31 = vpop.f32.mrb[66].mxu0 }
 0x67e   : > { %v7849_v5 = vpop.f32.mrb[67].mxu0 }
 0x67f   : > { %v16799_v40 = vpack.c.bf16 %v15773_v31, %v7849_v5  ;;  %v13163_v31 = vld [vmem:[%s22018_s7 + $0x58] sm:$0xff] }
 0x681   : > { %v15776_v4 = vpop.f32.mrb[68].mxu0 }
 0x682   : > { %v7859_v0 = vpop.f32.mrb[69].mxu0 }
 0x683   : > { %v16803_v44 = vpack.c.bf16 %v15776_v4, %v7859_v0  ;;  %v13164_v4 = vld [vmem:[%s22018_s7 + $0x60] sm:$0xff]  ;;  %v13165_v0 = vld [vmem:[%s22018_s7 + $0x68] sm:$0xff] }
 0x685   : > { %v15779_v55 = vpop.f32.mrb[70].mxu0 }
 0x686   : > { %v7869_v21 = vpop.f32.mrb[71].mxu0 }
 0x687   : > { %v16807_v18 = vpack.c.bf16 %v15779_v55, %v7869_v21  ;;  %v13166_v55 = vld [vmem:[%s22018_s7 + $0x70] sm:$0xff]  ;;  %v13167_v21 = vld [vmem:[%s22018_s7 + $0x78] sm:$0xff] }
 0x689   : > { %v15782_v17 = vpop.f32.mrb[72].mxu0 }
 0x68a   : > { %v7879_v54 = vpop.f32.mrb[73].mxu0 }
 0x68b   : > { %v16811_v41 = vpack.c.bf16 %v15782_v17, %v7879_v54  ;;  %v8205_v54 = vld [vmem:[%s22018_s7] sm:$0xff] }
 0x68d   : > { %v15785_v57 = vpop.f32.mrb[74].mxu0 }
 0x68e   : > { %v7889_v34 = vpop.f32.mrb[75].mxu0 }
 0x68f   : > { %v16815_v43 = vpack.c.bf16 %v15785_v57, %v7889_v34 }
 0x691   : > { %v15788_v38 = vpop.f32.mrb[76].mxu0 }
 0x692   : > { %v7899_v30 = vpop.f32.mrb[77].mxu0 }
 0x693   : > { %v16819_v49 = vpack.c.bf16 %v15788_v38, %v7899_v30 }
 0x695   : > { %v15791_v16 = vpop.f32.mrb[78].mxu0 }
 0x696   : > { %v7909_v58 = vpop.f32.mrb[79].mxu0 }
 0x697   : > { %v16823_v37 = vpack.c.bf16 %v15791_v16, %v7909_v58 }
 0x699   : > { %v15794_v11 = vpop.f32.mrb[80].mxu0 }
 0x69a   : > { %v7919_v13 = vpop.f32.mrb[81].mxu0 }
 0x69b   : > { %v16793_v29 = vpack.c.bf16 %v15794_v11, %v7919_v13 }
 0x69d   : > { %v15797_v46 = vpop.f32.mrb[82].mxu0  ;;  %16794 = vmatprep.subr.bf16.mxu1 %v16793_v29 }
 0x69e   : > { %v7929_v56 = vpop.f32.mrb[83].mxu0  ;;  %16796 = vmatpush3.bf16.msra.mxu1 %v16795_v1  ;;  %v13162_v1 = vld [vmem:[%s22018_s7 + $0x50] sm:$0xff] }
 0x69f   : > { %v16797_v8 = vpack.c.bf16 %v15797_v46, %v7929_v56  ;;  %v16829_v5 = vpack.c.bf16 %v13163_v31, %v13162_v1 }
 0x6a1   : > { %v15800_v60 = vpop.f32.mrb[84].mxu0  ;;  %16798 = vmatprep.subr.bf16.mxu1 %v16797_v8 }
 0x6a2   : > { %v7939_v2 = vpop.f32.mrb[85].mxu0  ;;  %16800 = vmatpush3.bf16.msra.mxu1 %v16799_v40  ;;  %v22372_v40 = vmov 0.0  }
 0x6a3   : > { %v16801_v7 = vpack.c.bf16 %v15800_v60, %v7939_v2  ;;  %8170 = vst.msk [vmem:[#allocation4 + $0x10] sm:$0xff] %vm8166_vm6, %v22372_v40  ;;  %8167 = vst.msk [vmem:[#allocation4] sm:$0xff] %vm8166_vm6, %v22372_v40  ;;  %v8207_v60 = vld [vmem:[%s22018_s7 + $0x10] sm:$0xff]  ;;  %v8208_v2 = vld [vmem:[%s22018_s7 + $0x18] sm:$0xff] }
 0x6a4   : > { %8171 = vst.msk [vmem:[#allocation4 + $0x18] sm:$0x3] %vm8168_vm7, %v22372_v40  ;;  %8169 = vst.msk [vmem:[#allocation4 + $0x8] sm:$0x3] %vm8168_vm7, %v22372_v40 }
 0x6a5   : > { %v15803_v9 = vpop.f32.mrb[86].mxu0  ;;  %16802 = vmatprep.subr.bf16.mxu1 %v16801_v7  ;;  %8172 = vst.msk [vmem:[#allocation4 + $0x20] sm:$0xff] %vm8166_vm6, %v22372_v40  ;;  %8174 = vst.msk [vmem:[#allocation4 + $0x30] sm:$0xff] %vm8166_vm6, %v22372_v40 }
 0x6a6   : > { %v7949_v14 = vpop.f32.mrb[87].mxu0  ;;  %16804 = vmatpush3.bf16.msra.mxu1 %v16803_v44  ;;  %8173 = vst.msk [vmem:[#allocation4 + $0x28] sm:$0x3] %vm8168_vm7, %v22372_v40  ;;  %8175 = vst.msk [vmem:[#allocation4 + $0x38] sm:$0x3] %vm8168_vm7, %v22372_v40  ;;  %v16833_v44 = vpack.c.bf16 %v13165_v0, %v13164_v4 }
 0x6a7   : > { %v16805_v22 = vpack.c.bf16 %v15803_v9, %v7949_v14  ;;  %8176 = vst.msk [vmem:[#allocation4 + $0x40] sm:$0xff] %vm8166_vm6, %v22372_v40  ;;  %8178 = vst.msk [vmem:[#allocation4 + $0x50] sm:$0xff] %vm8166_vm6, %v22372_v40 }
 0x6a8   : > { %8177 = vst.msk [vmem:[#allocation4 + $0x48] sm:$0x3] %vm8168_vm7, %v22372_v40  ;;  %8179 = vst.msk [vmem:[#allocation4 + $0x58] sm:$0x3] %vm8168_vm7, %v22372_v40 }
 0x6a9   : > { %v15806_v32 = vpop.f32.mrb[88].mxu0  ;;  %16806 = vmatprep.subr.bf16.mxu1 %v16805_v22  ;;  %8180 = vst.msk [vmem:[#allocation4 + $0x60] sm:$0xff] %vm8166_vm6, %v22372_v40  ;;  %8182 = vst.msk [vmem:[#allocation4 + $0x70] sm:$0xff] %vm8166_vm6, %v22372_v40 }
 0x6aa   : > { %v7959_v33 = vpop.f32.mrb[89].mxu0  ;;  %16808 = vmatpush3.bf16.msra.mxu1 %v16807_v18  ;;  %8181 = vst.msk [vmem:[#allocation4 + $0x68] sm:$0x3] %vm8168_vm7, %v22372_v40  ;;  %8183 = vst.msk [vmem:[#allocation4 + $0x78] sm:$0x3] %vm8168_vm7, %v22372_v40  ;;  %v16837_v18 = vpack.c.bf16 %v13167_v21, %v13166_v55 }
 0x6ab   : > { %v16809_v50 = vpack.c.bf16 %v15806_v32, %v7959_v33  ;;  %8184 = vst.msk [vmem:[#allocation4 + $0x80] sm:$0xff] %vm8166_vm6, %v22372_v40  ;;  %8186 = vst.msk [vmem:[#allocation4 + $0x90] sm:$0xff] %vm8166_vm6, %v22372_v40  ;;  %v8213_v17 = vld [vmem:[#allocation4 + $0x1] sm:$0xff]  ;;  %v16845_v33 = vpack.c.bf16 %v8208_v2, %v8207_v60  ;;  %v13191_v60 = vld [vmem:[%s22018_s7 + $0xb8] sm:$0xff] }
 0x6ac   : > { %8185 = vst.msk [vmem:[#allocation4 + $0x88] sm:$0x3] %vm8168_vm7, %v22372_v40  ;;  %8187 = vst.msk [vmem:[#allocation4 + $0x98] sm:$0x3] %vm8168_vm7, %v22372_v40 }
 0x6ad   : > { %v15809_v36 = vpop.f32.mrb[90].mxu0  ;;  %16810 = vmatprep.subr.bf16.mxu1 %v16809_v50  ;;  %9590 = vst.msk [vmem:[#allocation5] sm:$0xff] %vm8166_vm6, %v22372_v40  ;;  %9592 = vst.msk [vmem:[#allocation5 + $0x10] sm:$0xff] %vm8166_vm6, %v22372_v40 }
 0x6ae   : > { %v7969_v42 = vpop.f32.mrb[91].mxu0  ;;  %16812 = vmatpush3.bf16.msra.mxu1 %v16811_v41  ;;  %9591 = vst.msk [vmem:[#allocation5 + $0x8] sm:$0x3] %vm8168_vm7, %v22372_v40  ;;  %9593 = vst.msk [vmem:[#allocation5 + $0x18] sm:$0x3] %vm8168_vm7, %v22372_v40  ;;  %v8206_v41 = vld [vmem:[%s22018_s7 + $0x8] sm:$0xff] }
 0x6af   : > { %v16813_v45 = vpack.c.bf16 %v15809_v36, %v7969_v42  ;;  %9594 = vst.msk [vmem:[#allocation5 + $0x20] sm:$0xff] %vm8166_vm6, %v22372_v40  ;;  %9596 = vst.msk [vmem:[#allocation5 + $0x30] sm:$0xff] %vm8166_vm6, %v22372_v40  ;;  %v16841_v57 = vpack.c.bf16 %v8206_v41, %v8205_v54  ;;  %v8209_v36 = vld [vmem:[%s22018_s7 + $0x20] sm:$0xff]  ;;  %v8210_v42 = vld [vmem:[%s22018_s7 + $0x28] sm:$0xff] }
 0x6b0   : > { %9595 = vst.msk [vmem:[#allocation5 + $0x28] sm:$0x3] %vm8168_vm7, %v22372_v40  ;;  %9597 = vst.msk [vmem:[#allocation5 + $0x38] sm:$0x3] %vm8168_vm7, %v22372_v40  ;;  %v13186_v41 = vld [vmem:[%s22018_s7 + $0x90] sm:$0xff] }
 0x6b1   : > { %v15812_v24 = vpop.f32.mrb[92].mxu0  ;;  %16814 = vmatprep.subr.bf16.mxu1 %v16813_v45  ;;  %9598 = vst.msk [vmem:[#allocation5 + $0x40] sm:$0xff] %vm8166_vm6, %v22372_v40  ;;  %9600 = vst.msk [vmem:[#allocation5 + $0x50] sm:$0xff] %vm8166_vm6, %v22372_v40 }
 0x6b2   : > { %v7979_v61 = vpop.f32.mrb[93].mxu0  ;;  %16816 = vmatpush3.bf16.msra.mxu1 %v16815_v43  ;;  %9599 = vst.msk [vmem:[#allocation5 + $0x48] sm:$0x3] %vm8168_vm7, %v22372_v40  ;;  %9601 = vst.msk [vmem:[#allocation5 + $0x58] sm:$0x3] %vm8168_vm7, %v22372_v40 }
 0x6b3   : > { %v16817_v62 = vpack.c.bf16 %v15812_v24, %v7979_v61  ;;  %9602 = vst.msk [vmem:[#allocation5 + $0x60] sm:$0xff] %vm8166_vm6, %v22372_v40  ;;  %9604 = vst.msk [vmem:[#allocation5 + $0x70] sm:$0xff] %vm8166_vm6, %v22372_v40  ;;  %v20629_v43 = vld [vmem:[%s22017_s6] ss:$0 sm:$0xff] }
 0x6b4   : > { %9603 = vst.msk [vmem:[#allocation5 + $0x68] sm:$0x3] %vm8168_vm7, %v22372_v40  ;;  %9605 = vst.msk [vmem:[#allocation5 + $0x78] sm:$0x3] %vm8168_vm7, %v22372_v40 }
 0x6b5   : > { %v15815_v63 = vpop.f32.mrb[94].mxu0  ;;  %16818 = vmatprep.subr.bf16.mxu1 %v16817_v62  ;;  %9606 = vst.msk [vmem:[#allocation5 + $0x80] sm:$0xff] %vm8166_vm6, %v22372_v40  ;;  %9608 = vst.msk [vmem:[#allocation5 + $0x90] sm:$0xff] %vm8166_vm6, %v22372_v40 }
 0x6b6   : > { %v7989_v20 = vpop.f32.mrb[95].mxu0  ;;  %16820 = vmatpush3.bf16.msra.mxu1 %v16819_v49  ;;  %9607 = vst.msk [vmem:[#allocation5 + $0x88] sm:$0x3] %vm8168_vm7, %v22372_v40  ;;  %9609 = vst.msk [vmem:[#allocation5 + $0x98] sm:$0x3] %vm8168_vm7, %v22372_v40 }
 0x6b7   : > { %v16821_v10 = vpack.c.bf16 %v15815_v63, %v7989_v20  ;;  %v16849_v20 = vpack.c.bf16 %v8210_v42, %v8209_v36 }
 0x6b9   : > { %16822 = vmatprep.subr.bf16.mxu1 %v16821_v10 }
 0x6ba   : > { %16824 = vmatpush3.bf16.msra.mxu1 %v16823_v37 }
 0x6bb   : > { %16826 = vmatprep.subr.bf16.mxu1 %v16825_v19 }
 0x6bd   : > { %8118 = vmatmul.mubr.f32.vlgmr.msra.gmra.mrb[32].mxu1 %v8030_v53  ;;  %v8211_v53 = vld [vmem:[%s22018_s7 + $0x30] sm:$0xff] }
 0x6be   : > { %8122 = vmatprep.mubr.f32.mxu1 %v8033_v25  ;;  %16828 = vmatpush3.bf16.msra.mxu1 %v16825_v19  ;;  %v8212_v25 = vld [vmem:[%s22018_s7 + $0x38] sm:$0xff] }
 0x6bf   : > { %16830 = vmatprep.subr.bf16.mxu1 %v16829_v5 }
 0x6c1   : > { %8123 = vmatmul.mubr.f32.gmra.mrb[34].mxu1 %v8032_v27 }
 0x6c2   : > { %8127 = vmatprep.mubr.f32.mxu1 %v8035_v39  ;;  %16832 = vmatpush3.bf16.msra.mxu1 %v16829_v5 }
 0x6c3   : > { %16834 = vmatprep.subr.bf16.mxu1 %v16833_v44 }
 0x6c5   : > { %8128 = vmatmul.mubr.f32.gmra.mrb[36].mxu1 %v8034_v51 }
 0x6c6   : > { %8132 = vmatprep.mubr.f32.mxu1 %v8037_v28  ;;  %16836 = vmatpush3.bf16.msra.mxu1 %v16833_v44 }
 0x6c7   : > { %16838 = vmatprep.subr.bf16.mxu1 %v16837_v18 }
 0x6c9   : > { %8133 = vmatmul.mubr.f32.gmra.mrb[38].mxu1 %v8036_v26 }
 0x6ca   : > { %8137 = vmatprep.mubr.f32.mxu1 %v8039_v15  ;;  %16840 = vmatpush3.bf16.msra.mxu1 %v16837_v18  ;;  %v16853_v15 = vpack.c.bf16 %v8212_v25, %v8211_v53 }
 0x6cb   : > { %16842 = vmatprep.subr.bf16.mxu1 %v16841_v57 }
 0x6cd   : > { %8138 = vmatmul.mubr.f32.gmra.mrb[40].mxu1 %v8038_v48 }
 0x6ce   : > { %8142 = vmatprep.mubr.f32.mxu1 %v8041_v59  ;;  %v13184_v59 = vld [vmem:[%s22018_s7 + $0x80] sm:$0xff] }
 0x6d1   : > { %8143 = vmatmul.mubr.f32.gmra.mrb[42].mxu1 %v8040_v3  ;;  %v13185_v3 = vld [vmem:[%s22018_s7 + $0x88] sm:$0xff] }
 0x6d2   : > { %8147 = vmatprep.mubr.f32.mxu1 %v8043_v23  ;;  %v16857_v47 = vpack.c.bf16 %v13185_v3, %v13184_v59  ;;  %v13216_v59 = vld [vmem:[%s22018_s7 + $0x100] sm:$0xff]  ;;  %v13217_v3 = vld [vmem:[%s22018_s7 + $0x108] sm:$0xff] }
 0x6d5   : > { %8148 = vmatmul.mubr.f32.gmra.mrb[44].mxu1 %v8042_v35 }
 0x6d6   : > { %8152 = vmatprep.mubr.f32.mxu1 %v8045_v6 }
 0x6d9   : > { %8153 = vmatmul.mubr.f32.gmra.mrb[46].mxu1 %v8044_v12 }
 0x6da   : > { %15832 = vmatprep.mubr.msk.f32.mxu1 %vm8166_vm6, %v8213_v17  ;;  %v8197_v17 = vld [vmem:[#allocation4] sm:$0xff] }
 0x790   : > { %v14290_v34 = vpop.f32.mrb[32].mxu1 }
 0x791   : > { %v14291_v38 = vpop.f32.mrb[33].mxu1 }
 0x792   : > { %v14292_v30 = vadd.f32 %v14291_v38, %v14290_v34  ;;  %v13297_v34 = vld [vmem:[%s22020_s9 + $0x40] sm:$0xff]  ;;  %v13299_v38 = vld [vmem:[%s22020_s9 + $0x50] sm:$0xff] }
 0x794   : > { %v8120_v49 = vadd.f32 %v14292_v30, %v20629_v43  ;;  %v14293_v16 = vpop.f32.mrb[34].mxu1 }
 0x795   : > { %v14294_v58 = vpop.f32.mrb[35].mxu1 }
 0x796   : > { %v8158_v37 = vmax.f32 %v8120_v49, 0.0  ;;  %v14295_v11 = vadd.f32 %v14294_v58, %v14293_v16  ;;  %v13300_v49 = vld [vmem:[%s22020_s9 + $0x58] sm:$0xff] }
 0x797   : > { %v16973_v58 = vpack.c.bf16 %v13300_v49, %v13299_v38  ;;  %v13237_v49 = vld [vmem:[%s22018_s7 + $0x168] sm:$0xff] }
 0x798   : > { %8189 = vst.msk [vmem:[#allocation4 + $0x11] sm:$0xff] %vm8166_vm6, %v8158_v37  ;;  %v8125_v13 = vadd.f32 %v14295_v11, %v20629_v43  ;;  %v14296_v29 = vpop.f32.mrb[36].mxu1  ;;  %v13188_v11 = vld [vmem:[%s22018_s7 + $0xa0] sm:$0xff] }
 0x799   : > { %v14297_v46 = vpop.f32.mrb[37].mxu1 }
 0x79a   : > { %v8159_v56 = vmax.f32 %v8125_v13, 0.0  ;;  %v14298_v8 = vadd.f32 %v14297_v46, %v14296_v29  ;;  %v13189_v13 = vld [vmem:[%s22018_s7 + $0xa8] sm:$0xff] }
 0x79b   : > { %v16865_v46 = vpack.c.bf16 %v13189_v13, %v13188_v11  ;;  %v13248_v11 = vld [vmem:[%s22018_s7 + $0x180] sm:$0xff]  ;;  %v13249_v13 = vld [vmem:[%s22018_s7 + $0x188] sm:$0xff] }
 0x79c   : > { %8190 = vst.msk [vmem:[#allocation4 + $0x21] sm:$0xff] %vm8166_vm6, %v8159_v56  ;;  %v8130_v7 = vadd.f32 %v14298_v8, %v20629_v43  ;;  %v14299_v9 = vpop.f32.mrb[38].mxu1  ;;  %v13190_v8 = vld [vmem:[%s22018_s7 + $0xb0] sm:$0xff] }
 0x79d   : > { %v14300_v14 = vpop.f32.mrb[39].mxu1 }
 0x79e   : > { %v8160_v22 = vmax.f32 %v8130_v7, 0.0  ;;  %v14301_v32 = vadd.f32 %v14300_v14, %v14299_v9  ;;  %v16869_v7 = vpack.c.bf16 %v13191_v60, %v13190_v8  ;;  %v13200_v14 = vld [vmem:[%s22018_s7 + $0xc0] sm:$0xff]  ;;  %v13250_v60 = vld [vmem:[%s22018_s7 + $0x190] sm:$0xff] }
 0x79f   : > { %v20642_v50 = vld [vmem:[#allocation4 + $0x11] sm:$0xff] }
 0x7a0   : > { %8191 = vst.msk [vmem:[#allocation4 + $0x31] sm:$0xff] %vm8166_vm6, %v8160_v22  ;;  %v8135_v45 = vadd.f32 %v14301_v32, %v20629_v43  ;;  %v14302_v24 = vpop.f32.mrb[40].mxu1  ;;  %15833 = vmatmul.mubr.msk.f32.vlgmr.msra.gmra.mrb[48].mxu1 %vm8166_vm6, %v20642_v50  ;;  %v20718_v37 = vld [vmem:[#allocation4 + $0x10] sm:$0xff]  ;;  %v13201_v22 = vld [vmem:[%s22018_s7 + $0xc8] sm:$0xff] }
 0x7a1   : > { %v14303_v61 = vpop.f32.mrb[41].mxu1  ;;  %16844 = vmatpush3.bf16.msra.mxu1 %v16841_v57  ;;  %v13187_v57 = vld [vmem:[%s22018_s7 + $0x98] sm:$0xff]  ;;  %v16873_v36 = vpack.c.bf16 %v13201_v22, %v13200_v14  ;;  %v13252_v22 = vld [vmem:[%s22018_s7 + $0x1a0] sm:$0xff] }
 0x7a2   : > { %v8161_v62 = vmax.f32 %v8135_v45, 0.0  ;;  %v14304_v63 = vadd.f32 %v14303_v61, %v14302_v24  ;;  %16846 = vmatprep.subr.bf16.mxu1 %v16845_v33  ;;  %v16861_v16 = vpack.c.bf16 %v13187_v57, %v13186_v41  ;;  %v13202_v45 = vld [vmem:[%s22018_s7 + $0xd0] sm:$0xff]  ;;  %v13203_v24 = vld [vmem:[%s22018_s7 + $0xd8] sm:$0xff] }
 0x7a3   : > { %v20654_v10 = vld [vmem:[#allocation4 + $0x21] sm:$0xff]  ;;  %v16877_v61 = vpack.c.bf16 %v13203_v24, %v13202_v45  ;;  %v13254_v45 = vld [vmem:[%s22018_s7 + $0x1b0] sm:$0xff]  ;;  %v13255_v24 = vld [vmem:[%s22018_s7 + $0x1b8] sm:$0xff] }
 0x7a4   : > { %8192 = vst.msk [vmem:[#allocation4 + $0x41] sm:$0xff] %vm8166_vm6, %v8161_v62  ;;  %v8140_v27 = vadd.f32 %v14304_v63, %v20629_v43  ;;  %v14305_v39 = vpop.f32.mrb[42].mxu1  ;;  %15835 = vmatprep.mubr.msk.f32.mxu1 %vm8166_vm6, %v20654_v10  ;;  %v20728_v29 = vld [vmem:[#allocation4 + $0x20] sm:$0xff]  ;;  %v20771_v62 = vld [vmem:[#allocation4 + $0x12] sm:$0xff] }
 0x7a5   : > { %v14306_v51 = vpop.f32.mrb[43].mxu1  ;;  %16848 = vmatpush3.bf16.msra.mxu1 %v16845_v33  ;;  %v8488_v33 = vld [vmem:[#allocation4 + $0x2] sm:$0xff] }
 0x7a6   : > { %v8162_v28 = vmax.f32 %v8140_v27, 0.0  ;;  %v14307_v26 = vadd.f32 %v14306_v51, %v14305_v39  ;;  %16850 = vmatprep.subr.bf16.mxu1 %v16849_v20  ;;  %v13204_v63 = vld [vmem:[%s22018_s7 + $0xe0] sm:$0xff]  ;;  %v13206_v39 = vld [vmem:[%s22018_s7 + $0xf0] sm:$0xff]  ;;  %v13207_v51 = vld [vmem:[%s22018_s7 + $0xf8] sm:$0xff] }
 0x7a7   : > { %v20666_v48 = vld [vmem:[#allocation4 + $0x31] sm:$0xff]  ;;  %v20781_v53 = vld [vmem:[#allocation4 + $0x22] sm:$0xff] }
 0x7a8   : > { %8193 = vst.msk [vmem:[#allocation4 + $0x51] sm:$0xff] %vm8166_vm6, %v8162_v28  ;;  %v8145_v23 = vadd.f32 %v14307_v26, %v20629_v43  ;;  %v14308_v35 = vpop.f32.mrb[44].mxu1  ;;  %15836 = vmatmul.mubr.msk.f32.gmra.mrb[50].mxu1 %vm8166_vm6, %v20666_v48  ;;  %v20732_v56 = vld [vmem:[#allocation4 + $0x30] sm:$0xff]  ;;  %v16885_v26 = vpack.c.bf16 %v13207_v51, %v13206_v39  ;;  %v13267_v51 = vld [vmem:[%s22018_s7 + $0x1d8] sm:$0xff] }
 0x7a9   : > { %v14309_v6 = vpop.f32.mrb[45].mxu1  ;;  %16852 = vmatpush3.bf16.msra.mxu1 %v16849_v20  ;;  %v13205_v20 = vld [vmem:[%s22018_s7 + $0xe8] sm:$0xff]  ;;  %v20785_v27 = vld [vmem:[#allocation4 + $0x32] sm:$0xff] }
 0x7aa   : > { %v8163_v12 = vmax.f32 %v8145_v23, 0.0  ;;  %v14310_v52 = vadd.f32 %v14309_v6, %v14308_v35  ;;  %16854 = vmatprep.subr.bf16.mxu1 %v16853_v15  ;;  %v16881_v25 = vpack.c.bf16 %v13205_v20, %v13204_v63  ;;  %v16889_v35 = vpack.c.bf16 %v13217_v3, %v13216_v59  ;;  %v13265_v63 = vld [vmem:[%s22018_s7 + $0x1c8] sm:$0xff]  ;;  %v13266_v39 = vld [vmem:[%s22018_s7 + $0x1d0] sm:$0xff]  ;;  %v13268_v59 = vld [vmem:[%s22018_s7 + $0x1e0] sm:$0xff] }
 0x7ab   : > { %v20678_v19 = vld [vmem:[#allocation4 + $0x41] sm:$0xff] }
 0x7ac   : > { %8194 = vst.msk [vmem:[#allocation4 + $0x61] sm:$0xff] %vm8166_vm6, %v8163_v12  ;;  %v8150_v1 = vadd.f32 %v14310_v52, %v20629_v43  ;;  %15838 = vmatprep.mubr.msk.f32.mxu1 %vm8166_vm6, %v20678_v19  ;;  %v14311_v31 = vpop.f32.mrb[46].mxu1  ;;  %v20742_v2 = vld [vmem:[#allocation4 + $0x40] sm:$0xff]  ;;  %v13218_v12 = vld [vmem:[%s22018_s7 + $0x110] sm:$0xff]  ;;  %v13219_v52 = vld [vmem:[%s22018_s7 + $0x118] sm:$0xff] }
 0x7ad   : > { %16856 = vmatpush3.bf16.msra.mxu1 %v16853_v15  ;;  %v14312_v5 = vpop.f32.mrb[47].mxu1  ;;  %v20795_v28 = vld [vmem:[#allocation4 + $0x42] sm:$0xff] }
 0x7ae   : > { %v8164_v4 = vmax.f32 %v8150_v1, 0.0  ;;  %16858 = vmatprep.subr.bf16.mxu1 %v16857_v47  ;;  %v14313_v0 = vadd.f32 %v14312_v5, %v14311_v31  ;;  %v13220_v1 = vld [vmem:[%s22018_s7 + $0x120] sm:$0xff]  ;;  %v13221_v31 = vld [vmem:[%s22018_s7 + $0x128] sm:$0xff] }
 0x7af   : > { %v20684_v44 = vld [vmem:[#allocation4 + $0x51] sm:$0xff]  ;;  %v16897_v5 = vpack.c.bf16 %v13221_v31, %v13220_v1  ;;  %v13269_v3 = vld [vmem:[%s22018_s7 + $0x1e8] sm:$0xff]  ;;  %v13284_v31 = vld [vmem:[%s22018_s7 + $0x220] sm:$0xff] }
 0x7b0   : > { %8195 = vst.msk [vmem:[#allocation4 + $0x71] sm:$0xff] %vm8166_vm6, %v8164_v4  ;;  %15839 = vmatmul.mubr.msk.f32.gmra.mrb[52].mxu1 %vm8166_vm6, %v20684_v44  ;;  %v8155_v55 = vadd.f32 %v14313_v0, %v20629_v43  ;;  %v13298_v43 = vld [vmem:[%s22020_s9 + $0x48] sm:$0xff]  ;;  %v20746_v9 = vld [vmem:[#allocation4 + $0x50] sm:$0xff]  ;;  %v13223_v0 = vld [vmem:[%s22018_s7 + $0x138] sm:$0xff] }
 0x7b1   : > { %v16969_v30 = vpack.c.bf16 %v13298_v43, %v13297_v34  ;;  %v20799_v15 = vld [vmem:[#allocation4 + $0x52] sm:$0xff] }
 0x7b2   : > { %v8165_v21 = vmax.f32 %v8155_v55, 0.0  ;;  %v13222_v4 = vld [vmem:[%s22018_s7 + $0x130] sm:$0xff]  ;;  %v13235_v43 = vld [vmem:[%s22018_s7 + $0x158] sm:$0xff] }
 0x7b3   : > { %v20690_v18 = vld [vmem:[#allocation4 + $0x61] sm:$0xff]  ;;  %16970 = vmatprep.subr.bf16.mxu0 %v16969_v30  ;;  %v16901_v55 = vpack.c.bf16 %v13223_v0, %v13222_v4  ;;  %v13234_v34 = vld [vmem:[%s22018_s7 + $0x150] sm:$0xff]  ;;  %v13283_v1 = vld [vmem:[%s22018_s7 + $0x218] sm:$0xff] }
 0x7b4   : > { %15841 = vmatprep.mubr.msk.f32.mxu1 %vm8166_vm6, %v20690_v18  ;;  %8196 = vst.msk [vmem:[#allocation4 + $0x81] sm:$0xff] %vm8166_vm6, %v8165_v21  ;;  %16972 = vmatpush3.bf16.msra.mxu0 %v16969_v30  ;;  %v20756_v32 = vld [vmem:[#allocation4 + $0x60] sm:$0xff]  ;;  %v16909_v38 = vpack.c.bf16 %v13235_v43, %v13234_v34  ;;  %v13287_v0 = vld [vmem:[%s22018_s7 + $0x238] sm:$0xff] }
 0x7b5   : > { %16974 = vmatprep.subr.bf16.mxu0 %v16973_v58  ;;  %v20809_v23 = vld [vmem:[#allocation4 + $0x62] sm:$0xff] }
 0x7b6   : > { %v13232_v21 = vld [vmem:[%s22018_s7 + $0x140] sm:$0xff] }
 0x7b7   : > { %v20695_v54 = vld [vmem:[#allocation4 + $0x71] sm:$0xff]  ;;  %v13236_v30 = vld [vmem:[%s22018_s7 + $0x160] sm:$0xff] }
 0x7b8   : > { %15842 = vmatmul.mubr.msk.f32.gmra.mrb[54].mxu1 %vm8166_vm6, %v20695_v54  ;;  %16976 = vmatpush3.bf16.msra.mxu0 %v16973_v58  ;;  %v20760_v42 = vld [vmem:[#allocation4 + $0x70] sm:$0xff]  ;;  %v13239_v58 = vld [vmem:[%s22018_s7 + $0x178] sm:$0xff] }
 0x7b9   : > { %15860 = vmatprep.mubr.msk.f32.mxu1 %vm8166_vm6, %v8197_v17  ;;  %v20813_v6 = vld [vmem:[#allocation4 + $0x72] sm:$0xff]  ;;  %v13233_v17 = vld [vmem:[%s22018_s7 + $0x148] sm:$0xff] }
 0x7ba   : > { %v16905_v57 = vpack.c.bf16 %v13233_v17, %v13232_v21  ;;  %v13296_v17 = vld [vmem:[%s22019_s8] ss:$0 sm:$0xff] }
 0x7bb   : > { %v20855_v41 = vld [vmem:[#allocation4 + $0x80] sm:$0xff] }
 0x7bc   : > { %15861 = vmatmul.mubr.msk.f32.vlgmr.msra.gmra.mrb[48].mxu1 %vm8166_vm6, %v20718_v37  ;;  %v20897_v8 = vld [vmem:[#allocation4 + $0x81] sm:$0xff] }
 0x7bd   : > { %16860 = vmatpush3.bf16.msra.mxu1 %v16857_v47  ;;  %15863 = vmatprep.mubr.msk.f32.mxu1 %vm8166_vm6, %v20728_v29  ;;  %v16893_v47 = vpack.c.bf16 %v13219_v52, %v13218_v12  ;;  %v13271_v12 = vld [vmem:[%s22018_s7 + $0x1f8] sm:$0xff]  ;;  %v13281_v52 = vld [vmem:[%s22018_s7 + $0x208] sm:$0xff] }
 0x7be   : > { %16862 = vmatprep.subr.bf16.mxu1 %v16861_v16 }
 0x7c0   : > { %15864 = vmatmul.mubr.msk.f32.gmra.mrb[50].mxu1 %vm8166_vm6, %v20732_v56 }
 0x7c1   : > { %16864 = vmatpush3.bf16.msra.mxu1 %v16861_v16  ;;  %15866 = vmatprep.mubr.msk.f32.mxu1 %vm8166_vm6, %v20742_v2  ;;  %v16913_v16 = vpack.c.bf16 %v13237_v49, %v13236_v30 }
 0x7c2   : > { %16866 = vmatprep.subr.bf16.mxu1 %v16865_v46 }
 0x7c4   : > { %15867 = vmatmul.mubr.msk.f32.gmra.mrb[52].mxu1 %vm8166_vm6, %v20746_v9 }
 0x7c5   : > { %16868 = vmatpush3.bf16.msra.mxu1 %v16865_v46  ;;  %15869 = vmatprep.mubr.msk.f32.mxu1 %vm8166_vm6, %v20756_v32  ;;  %v16921_v46 = vpack.c.bf16 %v13249_v13, %v13248_v11 }
 0x7c6   : > { %16870 = vmatprep.subr.bf16.mxu1 %v16869_v7 }
 0x7c8   : > { %15870 = vmatmul.mubr.msk.f32.gmra.mrb[54].mxu1 %vm8166_vm6, %v20760_v42 }
 0x7c9   : > { %16872 = vmatpush3.bf16.msra.mxu1 %v16869_v7  ;;  %15888 = vmatprep.mubr.msk.f32.mxu1 %vm8166_vm6, %v8488_v33  ;;  %v13251_v7 = vld [vmem:[%s22018_s7 + $0x198] sm:$0xff]  ;;  %v13253_v33 = vld [vmem:[%s22018_s7 + $0x1a8] sm:$0xff] }
 0x7ca   : > { %16874 = vmatprep.subr.bf16.mxu1 %v16873_v36  ;;  %v16925_v14 = vpack.c.bf16 %v13251_v7, %v13250_v60  ;;  %v9629_v60 = vld [vmem:[%s22020_s9 + $0x10] sm:$0xff]  ;;  %v9630_v7 = vld [vmem:[%s22020_s9 + $0x18] sm:$0xff] }
 0x7cc   : > { %15889 = vmatmul.mubr.msk.f32.vlgmr.msra.gmra.mrb[48].mxu1 %vm8166_vm6, %v20771_v62 }
 0x7cd   : > { %15891 = vmatprep.mubr.msk.f32.mxu1 %vm8166_vm6, %v20781_v53  ;;  %16876 = vmatpush3.bf16.msra.mxu1 %v16873_v36  ;;  %v16929_v36 = vpack.c.bf16 %v13253_v33, %v13252_v22 }
 0x7ce   : > { %16878 = vmatprep.subr.bf16.mxu1 %v16877_v61 }
 0x7d0   : > { %15892 = vmatmul.mubr.msk.f32.gmra.mrb[50].mxu1 %vm8166_vm6, %v20785_v27 }
 0x7d1   : > { %15894 = vmatprep.mubr.msk.f32.mxu1 %vm8166_vm6, %v20795_v28  ;;  %16880 = vmatpush3.bf16.msra.mxu1 %v16877_v61  ;;  %v16933_v61 = vpack.c.bf16 %v13255_v24, %v13254_v45  ;;  %v16989_v45 = vpack.c.bf16 %v9630_v7, %v9629_v60  ;;  %v13353_v60 = vld [vmem:[%s22020_s9 + $0x100] sm:$0xff]  ;;  %v13354_v7 = vld [vmem:[%s22020_s9 + $0x108] sm:$0xff] }
 0x7d2   : > { %16882 = vmatprep.subr.bf16.mxu1 %v16881_v25 }
 0x7d4   : > { %15895 = vmatmul.mubr.msk.f32.gmra.mrb[52].mxu1 %vm8166_vm6, %v20799_v15 }
 0x7d5   : > { %15897 = vmatprep.mubr.msk.f32.mxu1 %vm8166_vm6, %v20809_v23  ;;  %16884 = vmatpush3.bf16.msra.mxu1 %v16881_v25  ;;  %v20939_v25 = vld [vmem:[#allocation4 + $0x82] sm:$0xff] }
 0x7d6   : > { %16886 = vmatprep.subr.bf16.mxu1 %v16885_v26 }
 0x7d8   : > { %15898 = vmatmul.mubr.msk.f32.gmra.mrb[54].mxu1 %vm8166_vm6, %v20813_v6 }
 0x7d9   : > { %16888 = vmatpush3.bf16.msra.mxu1 %v16885_v26  ;;  %15916 = vmatprep.mubr.msk.f32.mxu1 %vm8166_vm6, %v20718_v37  ;;  %v16941_v26 = vpack.c.bf16 %v13267_v51, %v13266_v39 }
 0x7da   : > { %16890 = vmatprep.subr.bf16.mxu1 %v16889_v35 }
 0x7dc   : > { %15917 = vmatmul.mubr.msk.f32.vlgmr.msra.gmra.mrb[48].mxu1 %vm8166_vm6, %v20728_v29 }
 0x7dd   : > { %15919 = vmatprep.mubr.msk.f32.mxu1 %vm8166_vm6, %v20732_v56  ;;  %16892 = vmatpush3.bf16.msra.mxu1 %v16889_v35  ;;  %v16945_v35 = vpack.c.bf16 %v13269_v3, %v13268_v59 }
 0x7de   : > { %16894 = vmatprep.subr.bf16.mxu1 %v16893_v47 }
 0x7e0   : > { %15920 = vmatmul.mubr.msk.f32.gmra.mrb[50].mxu1 %vm8166_vm6, %v20742_v2 }
 0x7e1   : > { %15922 = vmatprep.mubr.msk.f32.mxu1 %vm8166_vm6, %v20746_v9  ;;  %16896 = vmatpush3.bf16.msra.mxu1 %v16893_v47  ;;  %v13282_v47 = vld [vmem:[%s22018_s7 + $0x210] sm:$0xff] }
 0x7e2   : > { %16898 = vmatprep.subr.bf16.mxu1 %v16897_v5 }
 0x7e4   : > { %15923 = vmatmul.mubr.msk.f32.gmra.mrb[52].mxu1 %vm8166_vm6, %v20756_v32 }
 0x7e5   : > { %15925 = vmatprep.mubr.msk.f32.mxu1 %vm8166_vm6, %v20760_v42  ;;  %16900 = vmatpush3.bf16.msra.mxu1 %v16897_v5  ;;  %v13285_v5 = vld [vmem:[%s22018_s7 + $0x228] sm:$0xff] }
 0x7e6   : > { %16902 = vmatprep.subr.bf16.mxu1 %v16901_v55  ;;  %v16961_v4 = vpack.c.bf16 %v13285_v5, %v13284_v31  ;;  %v13323_v31 = vld [vmem:[%s22020_s9 + $0x90] sm:$0xff]  ;;  %v13324_v5 = vld [vmem:[%s22020_s9 + $0x98] sm:$0xff] }
 0x7e8   : > { %15926 = vmatmul.mubr.msk.f32.gmra.mrb[54].mxu1 %vm8166_vm6, %v20855_v41 }
 0x7e9   : > { %16904 = vmatpush3.bf16.msra.mxu1 %v16901_v55  ;;  %15944 = vmatprep.mubr.msk.f32.mxu1 %vm8166_vm6, %v20642_v50  ;;  %v13238_v50 = vld [vmem:[%s22018_s7 + $0x170] sm:$0xff]  ;;  %v9635_v55 = vld [vmem:[#allocation5 + $0x1] sm:$0xff] }
 0x7ea   : > { %16906 = vmatprep.subr.bf16.mxu1 %v16905_v57  ;;  %v16917_v37 = vpack.c.bf16 %v13239_v58, %v13238_v50  ;;  %16084 = vmatprep.mubr.msk.f32.mxu0 %vm8166_vm6, %v9635_v55 }
 0x7ec   : > { %15945 = vmatmul.mubr.msk.f32.vlgmr.msra.gmra.mrb[48].mxu1 %vm8166_vm6, %v20654_v10 }
 0x7ed   : > { %15947 = vmatprep.mubr.msk.f32.mxu1 %vm8166_vm6, %v20666_v48  ;;  %16908 = vmatpush3.bf16.msra.mxu1 %v16905_v57 }
 0x7ee   : > { %16910 = vmatprep.subr.bf16.mxu1 %v16909_v38 }
 0x7f0   : > { %15948 = vmatmul.mubr.msk.f32.gmra.mrb[50].mxu1 %vm8166_vm6, %v20678_v19 }
 0x7f1   : > { %15950 = vmatprep.mubr.msk.f32.mxu1 %vm8166_vm6, %v20684_v44  ;;  %16912 = vmatpush3.bf16.msra.mxu1 %v16909_v38 }
 0x7f2   : > { %16914 = vmatprep.subr.bf16.mxu1 %v16913_v16 }
 0x7f4   : > { %15951 = vmatmul.mubr.msk.f32.gmra.mrb[52].mxu1 %vm8166_vm6, %v20690_v18 }
 0x7f5   : > { %15953 = vmatprep.mubr.msk.f32.mxu1 %vm8166_vm6, %v20695_v54  ;;  %16916 = vmatpush3.bf16.msra.mxu1 %v16913_v16 }
 0x7f6   : > { %16918 = vmatprep.subr.bf16.mxu1 %v16917_v37 }
 0x7f8   : > { %15954 = vmatmul.mubr.msk.f32.gmra.mrb[54].mxu1 %vm8166_vm6, %v20897_v8 }
 0x7f9   : > { %16920 = vmatpush3.bf16.msra.mxu1 %v16917_v37  ;;  %15972 = vmatprep.mubr.msk.f32.mxu1 %vm8166_vm6, %v20771_v62  ;;  %v13264_v62 = vld [vmem:[%s22018_s7 + $0x1c0] sm:$0xff] }
 0x7fa   : > { %16922 = vmatprep.subr.bf16.mxu1 %v16921_v46  ;;  %v16937_v20 = vpack.c.bf16 %v13265_v63, %v13264_v62  ;;  %v9631_v63 = vld [vmem:[%s22020_s9 + $0x20] sm:$0xff] }
 0x7fc   : > { %15973 = vmatmul.mubr.msk.f32.vlgmr.msra.gmra.mrb[48].mxu1 %vm8166_vm6, %v20781_v53 }
 0x7fd   : > { %15975 = vmatprep.mubr.msk.f32.mxu1 %vm8166_vm6, %v20785_v27  ;;  %16924 = vmatpush3.bf16.msra.mxu1 %v16921_v46 }
 0x7fe   : > { %16926 = vmatprep.subr.bf16.mxu1 %v16925_v14 }
 0x800   : > { %15976 = vmatmul.mubr.msk.f32.gmra.mrb[50].mxu1 %vm8166_vm6, %v20795_v28 }
 0x801   : > { %15978 = vmatprep.mubr.msk.f32.mxu1 %vm8166_vm6, %v20799_v15  ;;  %16928 = vmatpush3.bf16.msra.mxu1 %v16925_v14 }
 0x802   : > { %16930 = vmatprep.subr.bf16.mxu1 %v16929_v36 }
 0x804   : > { %15979 = vmatmul.mubr.msk.f32.gmra.mrb[52].mxu1 %vm8166_vm6, %v20809_v23 }
 0x805   : > { %15981 = vmatprep.mubr.msk.f32.mxu1 %vm8166_vm6, %v20813_v6  ;;  %16932 = vmatpush3.bf16.msra.mxu1 %v16929_v36 }
 0x806   : > { %16934 = vmatprep.subr.bf16.mxu1 %v16933_v61 }
 0x808   : > { %15982 = vmatmul.mubr.msk.f32.gmra.mrb[54].mxu1 %vm8166_vm6, %v20939_v25 }
 0x809   : > { %16936 = vmatpush3.bf16.msra.mxu1 %v16933_v61  ;;  %16000 = vmatprep.mubr.msk.f32.mxu1 %vm8166_vm6, %v20728_v29  ;;  %v13270_v29 = vld [vmem:[%s22018_s7 + $0x1f0] sm:$0xff] }
 0x80a   : > { %16938 = vmatprep.subr.bf16.mxu1 %v16937_v20 }
 0x80c   : > { %16001 = vmatmul.mubr.msk.f32.vlgmr.msra.gmra.mrb[48].mxu1 %vm8166_vm6, %v20732_v56  ;;  %v16949_v56 = vpack.c.bf16 %v13271_v12, %v13270_v29  ;;  %v9634_v29 = vld [vmem:[%s22020_s9 + $0x38] sm:$0xff] }
 0x80d   : > { %16003 = vmatprep.mubr.msk.f32.mxu1 %vm8166_vm6, %v20742_v2  ;;  %16940 = vmatpush3.bf16.msra.mxu1 %v16937_v20  ;;  %v13280_v2 = vld [vmem:[%s22018_s7 + $0x200] sm:$0xff]  ;;  %v9632_v20 = vld [vmem:[%s22020_s9 + $0x28] sm:$0xff] }
 0x80e   : > { %16942 = vmatprep.subr.bf16.mxu1 %v16941_v26  ;;  %v16993_v59 = vpack.c.bf16 %v9632_v20, %v9631_v63  ;;  %v13358_v63 = vld [vmem:[%s22020_s9 + $0x128] sm:$0xff] }
 0x810   : > { %16004 = vmatmul.mubr.msk.f32.gmra.mrb[50].mxu1 %vm8166_vm6, %v20746_v9  ;;  %v9112_v9 = vld [vmem:[#allocation4 + $0x90] sm:$0xff] }
 0x811   : > { %16006 = vmatprep.mubr.msk.f32.mxu1 %vm8166_vm6, %v20756_v32  ;;  %16944 = vmatpush3.bf16.msra.mxu1 %v16941_v26  ;;  %v16953_v32 = vpack.c.bf16 %v13281_v52, %v13280_v2  ;;  %v13321_v52 = vld [vmem:[%s22020_s9 + $0x80] sm:$0xff] }
 0x812   : > { %16946 = vmatprep.subr.bf16.mxu1 %v16945_v35 }
 0x814   : > { %16007 = vmatmul.mubr.msk.f32.gmra.mrb[52].mxu1 %vm8166_vm6, %v20760_v42  ;;  %v16957_v42 = vpack.c.bf16 %v13283_v1, %v13282_v47  ;;  %v9619_v47 = vld [vmem:[#allocation5] sm:$0xff] }
 0x815   : > { %16009 = vmatprep.mubr.msk.f32.mxu1 %vm8166_vm6, %v20855_v41  ;;  %16948 = vmatpush3.bf16.msra.mxu1 %v16945_v35  ;;  %v9633_v35 = vld [vmem:[%s22020_s9 + $0x30] sm:$0xff] }
 0x816   : > { %16950 = vmatprep.subr.bf16.mxu1 %v16949_v56 }
 0x818   : > { %16010 = vmatmul.mubr.msk.f32.gmra.mrb[54].mxu1 %vm8166_vm6, %v9112_v9  ;;  %v13322_v9 = vld [vmem:[%s22020_s9 + $0x88] sm:$0xff] }
 0x819   : > { %16952 = vmatpush3.bf16.msra.mxu1 %v16949_v56  ;;  %16028 = vmatprep.mubr.msk.f32.mxu1 %vm8166_vm6, %v20654_v10  ;;  %v13286_v10 = vld [vmem:[%s22018_s7 + $0x230] sm:$0xff]  ;;  %v16997_v56 = vpack.c.bf16 %v9634_v29, %v9633_v35  ;;  %v17001_v1 = vpack.c.bf16 %v13322_v9, %v13321_v52  ;;  %v13370_v35 = vld [vmem:[%s22020_s9 + $0x148] sm:$0xff]  ;;  %v13372_v9 = vld [vmem:[%s22020_s9 + $0x158] sm:$0xff] }
 0x81a   : > { %16954 = vmatprep.subr.bf16.mxu1 %v16953_v32  ;;  %v13371_v52 = vld [vmem:[%s22020_s9 + $0x150] sm:$0xff] }
 0x81c   : > { %16029 = vmatmul.mubr.msk.f32.vlgmr.msra.gmra.mrb[48].mxu1 %vm8166_vm6, %v20666_v48  ;;  %v16965_v48 = vpack.c.bf16 %v13287_v0, %v13286_v10  ;;  %v13325_v0 = vld [vmem:[%s22020_s9 + $0xa0] sm:$0xff] }
 0x81d   : > { %16031 = vmatprep.mubr.msk.f32.mxu1 %vm8166_vm6, %v20678_v19  ;;  %16956 = vmatpush3.bf16.msra.mxu1 %v16953_v32  ;;  %v9266_v19 = vld [vmem:[#allocation4 + $0x91] sm:$0xff] }
 0x81e   : > { %16958 = vmatprep.subr.bf16.mxu1 %v16957_v42 }
 0x820   : > { %16032 = vmatmul.mubr.msk.f32.gmra.mrb[50].mxu1 %vm8166_vm6, %v20684_v44  ;;  %v9420_v44 = vld [vmem:[#allocation4 + $0x92] sm:$0xff] }
 0x821   : > { %16034 = vmatprep.mubr.msk.f32.mxu1 %vm8166_vm6, %v20690_v18  ;;  %16960 = vmatpush3.bf16.msra.mxu1 %v16957_v42  ;;  %v13301_v18 = vld [vmem:[%s22020_s9 + $0x60] sm:$0xff] }
 0x822   : > { %16962 = vmatprep.subr.bf16.mxu1 %v16961_v4 }
 0x824   : > { %16035 = vmatmul.mubr.msk.f32.gmra.mrb[52].mxu1 %vm8166_vm6, %v20695_v54  ;;  %v13302_v54 = vld [vmem:[%s22020_s9 + $0x68] sm:$0xff] }
 0x825   : > { %16037 = vmatprep.mubr.msk.f32.mxu1 %vm8166_vm6, %v20897_v8  ;;  %16964 = vmatpush3.bf16.msra.mxu1 %v16961_v4  ;;  %v17005_v4 = vpack.c.bf16 %v13324_v5, %v13323_v31  ;;  %v13374_v31 = vld [vmem:[%s22020_s9 + $0x168] sm:$0xff] }
 0x826   : > { %16966 = vmatprep.subr.bf16.mxu1 %v16965_v48 }
 0x828   : > { %16038 = vmatmul.mubr.msk.f32.gmra.mrb[54].mxu1 %vm8166_vm6, %v9266_v19 }
 0x829   : > { %16968 = vmatpush3.bf16.msra.mxu1 %v16965_v48  ;;  %16056 = vmatprep.mubr.msk.f32.mxu1 %vm8166_vm6, %v20781_v53  ;;  %v16977_v53 = vpack.c.bf16 %v13302_v54, %v13301_v18  ;;  %v13326_v48 = vld [vmem:[%s22020_s9 + $0xa8] sm:$0xff]  ;;  %v13327_v54 = vld [vmem:[%s22020_s9 + $0xb0] sm:$0xff] }
 0x82b   : > { %16978 = vmatprep.subr.bf16.mxu0 %v16977_v53 }
 0x82c   : > { %16057 = vmatmul.mubr.msk.f32.vlgmr.msra.gmra.mrb[48].mxu1 %vm8166_vm6, %v20785_v27  ;;  %16980 = vmatpush3.bf16.msra.mxu0 %v16977_v53  ;;  %v13303_v27 = vld [vmem:[%s22020_s9 + $0x70] sm:$0xff]  ;;  %v13328_v53 = vld [vmem:[%s22020_s9 + $0xb8] sm:$0xff] }
 0x82d   : > { %16059 = vmatprep.mubr.msk.f32.mxu1 %vm8166_vm6, %v20795_v28  ;;  %v13304_v28 = vld [vmem:[%s22020_s9 + $0x78] sm:$0xff] }
 0x830   : > { %16060 = vmatmul.mubr.msk.f32.gmra.mrb[50].mxu1 %vm8166_vm6, %v20799_v15  ;;  %v16981_v15 = vpack.c.bf16 %v13304_v28, %v13303_v27  ;;  %v17013_v28 = vpack.c.bf16 %v13328_v53, %v13327_v54  ;;  %v13387_v53 = vld [vmem:[%s22020_s9 + $0x190] sm:$0xff] }
 0x831   : > { %16062 = vmatprep.mubr.msk.f32.mxu1 %vm8166_vm6, %v20809_v23  ;;  %v9627_v23 = vld [vmem:[%s22020_s9] sm:$0xff] }
 0x832   : > { %16982 = vmatprep.subr.bf16.mxu0 %v16981_v15 }
 0x833   : > { %16984 = vmatpush3.bf16.msra.mxu0 %v16981_v15 }
 0x834   : > { %16063 = vmatmul.mubr.msk.f32.gmra.mrb[52].mxu1 %vm8166_vm6, %v20813_v6  ;;  %v9628_v6 = vld [vmem:[%s22020_s9 + $0x8] sm:$0xff] }
 0x835   : > { %16065 = vmatprep.mubr.msk.f32.mxu1 %vm8166_vm6, %v20939_v25  ;;  %v16985_v21 = vpack.c.bf16 %v9628_v6, %v9627_v23  ;;  %v13337_v23 = vld [vmem:[%s22020_s9 + $0xc0] sm:$0xff]  ;;  %v13338_v6 = vld [vmem:[%s22020_s9 + $0xc8] sm:$0xff] }
 0x837   : > { %16986 = vmatprep.subr.bf16.mxu0 %v16985_v21 }
 0x838   : > { %16066 = vmatmul.mubr.msk.f32.gmra.mrb[54].mxu1 %vm8166_vm6, %v9420_v44  ;;  %v17009_v44 = vpack.c.bf16 %v13326_v48, %v13325_v0  ;;  %v13385_v0 = vld [vmem:[%s22020_s9 + $0x180] sm:$0xff]  ;;  %v13386_v48 = vld [vmem:[%s22020_s9 + $0x188] sm:$0xff] }
 0x8ff   : > { %v16058_v41 = vpop.f32.mrb[48].mxu1 }
 0x900   : > { %v9575_v57 = vadd.f32 %v16058_v41, %v13296_v17  ;;  %v9520_v34 = vpop.f32.mrb[49].mxu1 }
 0x901   : > { %v9574_v43 = vadd.f32 %v13296_v17, %v9520_v34  ;;  %v13340_v34 = vld [vmem:[%s22020_s9 + $0xd8] sm:$0xff] }
 0x902   : > { %v9583_v38 = vmax.f32 %v9575_v57, 0.0  ;;  %v13339_v57 = vld [vmem:[%s22020_s9 + $0xd0] sm:$0xff] }
 0x903   : > { %v9582_v30 = vmax.f32 %v9574_v43, 0.0  ;;  %v16061_v49 = vpop.f32.mrb[50].mxu1  ;;  %v17021_v43 = vpack.c.bf16 %v13340_v34, %v13339_v57  ;;  %v13391_v57 = vld [vmem:[%s22020_s9 + $0x1b0] sm:$0xff]  ;;  %v13392_v34 = vld [vmem:[%s22020_s9 + $0x1b8] sm:$0xff] }
 0x904   : > { %9612 = vst.msk [vmem:[#allocation5 + $0x21] sm:$0xff] %vm8166_vm6, %v9583_v38  ;;  %v9577_v16 = vadd.f32 %v16061_v49, %v13296_v17  ;;  %v9530_v50 = vpop.f32.mrb[51].mxu1  ;;  %v13342_v49 = vld [vmem:[%s22020_s9 + $0xe8] sm:$0xff] }
 0x905   : > { %9611 = vst.msk [vmem:[#allocation5 + $0x11] sm:$0xff] %vm8166_vm6, %v9582_v30  ;;  %v9576_v58 = vadd.f32 %v13296_v17, %v9530_v50  ;;  %v13341_v30 = vld [vmem:[%s22020_s9 + $0xe0] sm:$0xff] }
 0x906   : > { %v9585_v37 = vmax.f32 %v9577_v16, 0.0  ;;  %v17025_v50 = vpack.c.bf16 %v13342_v49, %v13341_v30  ;;  %v13402_v30 = vld [vmem:[%s22020_s9 + $0x1c8] sm:$0xff] }
 0x907   : > { %v9584_v11 = vmax.f32 %v9576_v58, 0.0  ;;  %v16064_v13 = vpop.f32.mrb[52].mxu1 }
 0x908   : > { %9614 = vst.msk [vmem:[#allocation5 + $0x41] sm:$0xff] %vm8166_vm6, %v9585_v37  ;;  %v9579_v46 = vadd.f32 %v16064_v13, %v13296_v17  ;;  %v9540_v8 = vpop.f32.mrb[53].mxu1  ;;  %v13343_v37 = vld [vmem:[%s22020_s9 + $0xf0] sm:$0xff] }
 0x909   : > { %9613 = vst.msk [vmem:[#allocation5 + $0x31] sm:$0xff] %vm8166_vm6, %v9584_v11  ;;  %v9578_v14 = vadd.f32 %v13296_v17, %v9540_v8  ;;  %v13344_v11 = vld [vmem:[%s22020_s9 + $0xf8] sm:$0xff] }
 0x90a   : > { %v9587_v22 = vmax.f32 %v9579_v46, 0.0  ;;  %v17029_v46 = vpack.c.bf16 %v13344_v11, %v13343_v37  ;;  %v13403_v37 = vld [vmem:[%s22020_s9 + $0x1d0] sm:$0xff]  ;;  %v13404_v11 = vld [vmem:[%s22020_s9 + $0x1d8] sm:$0xff] }
 0x90b   : > { %v9586_v33 = vmax.f32 %v9578_v14, 0.0  ;;  %v16067_v36 = vpop.f32.mrb[54].mxu1  ;;  %v21074_v39 = vld [vmem:[#allocation5 + $0x21] sm:$0xff] }
 0x90c   : > { %9616 = vst.msk [vmem:[#allocation5 + $0x61] sm:$0xff] %vm8166_vm6, %v9587_v22  ;;  %v9581_v24 = vadd.f32 %v16067_v36, %v13296_v17  ;;  %v9550_v61 = vpop.f32.mrb[55].mxu1  ;;  %v21063_v62 = vld [vmem:[#allocation5 + $0x11] sm:$0xff]  ;;  %v21129_v19 = vld [vmem:[#allocation5 + $0x20] sm:$0xff]  ;;  %v17033_v22 = vpack.c.bf16 %v13354_v7, %v13353_v60  ;;  %v13406_v7 = vld [vmem:[%s22020_s9 + $0x1e8] sm:$0xff] }
 0x90d   : > { %9615 = vst.msk [vmem:[#allocation5 + $0x51] sm:$0xff] %vm8166_vm6, %v9586_v33  ;;  %v9580_v25 = vadd.f32 %v13296_v17, %v9550_v61  ;;  %16085 = vmatmul.mubr.msk.f32.vlgmr.msra.gmra.mrb[96].mxu0 %vm8166_vm6, %v21063_v62  ;;  %v21119_v10 = vld [vmem:[#allocation5 + $0x10] sm:$0xff]  ;;  %v17017_v17 = vpack.c.bf16 %v13338_v6, %v13337_v23  ;;  %v21182_v16 = vld [vmem:[#allocation5 + $0x22] sm:$0xff] }
 0x90e   : > { %v9589_v51 = vmax.f32 %v9581_v24, 0.0  ;;  %16087 = vmatprep.mubr.msk.f32.mxu0 %vm8166_vm6, %v21074_v39  ;;  %16988 = vmatpush3.bf16.msra.mxu0 %v16985_v21  ;;  %v9910_v21 = vld [vmem:[#allocation5 + $0x2] sm:$0xff]  ;;  %v21172_v38 = vld [vmem:[#allocation5 + $0x12] sm:$0xff] }
 0x90f   : > { %v9588_v26 = vmax.f32 %v9580_v25, 0.0  ;;  %16990 = vmatprep.subr.bf16.mxu0 %v16989_v45  ;;  %v21090_v12 = vld [vmem:[#allocation5 + $0x41] sm:$0xff]  ;;  %v13355_v36 = vld [vmem:[%s22020_s9 + $0x110] sm:$0xff] }
 0x910   : > { %9618 = vst.msk [vmem:[#allocation5 + $0x81] sm:$0xff] %vm8166_vm6, %v9589_v51  ;;  %v21079_v3 = vld [vmem:[#allocation5 + $0x31] sm:$0xff]  ;;  %v21143_v27 = vld [vmem:[#allocation5 + $0x40] sm:$0xff] }
 0x911   : > { %9617 = vst.msk [vmem:[#allocation5 + $0x71] sm:$0xff] %vm8166_vm6, %v9588_v26  ;;  %16088 = vmatmul.mubr.msk.f32.gmra.mrb[98].mxu0 %vm8166_vm6, %v21079_v3  ;;  %v21133_v18 = vld [vmem:[#allocation5 + $0x30] sm:$0xff]  ;;  %v21196_v13 = vld [vmem:[#allocation5 + $0x42] sm:$0xff]  ;;  %v13360_v51 = vld [vmem:[%s22020_s9 + $0x138] sm:$0xff] }
 0x912   : > { %16090 = vmatprep.mubr.msk.f32.mxu0 %vm8166_vm6, %v21090_v12  ;;  %16992 = vmatpush3.bf16.msra.mxu0 %v16989_v45  ;;  %v21186_v58 = vld [vmem:[#allocation5 + $0x32] sm:$0xff]  ;;  %v13357_v61 = vld [vmem:[%s22020_s9 + $0x120] sm:$0xff] }
 0x913   : > { %16994 = vmatprep.subr.bf16.mxu0 %v16993_v59  ;;  %v21104_v32 = vld [vmem:[#allocation5 + $0x61] sm:$0xff]  ;;  %v13356_v45 = vld [vmem:[%s22020_s9 + $0x118] sm:$0xff]  ;;  %v17041_v20 = vpack.c.bf16 %v13358_v63, %v13357_v61  ;;  %v13359_v25 = vld [vmem:[%s22020_s9 + $0x130] sm:$0xff] }
 0x914   : > { %v21094_v2 = vld [vmem:[#allocation5 + $0x51] sm:$0xff]  ;;  %v21157_v55 = vld [vmem:[#allocation5 + $0x60] sm:$0xff]  ;;  %v17037_v24 = vpack.c.bf16 %v13356_v45, %v13355_v36  ;;  %v17045_v26 = vpack.c.bf16 %v13360_v51, %v13359_v25  ;;  %v13418_v45 = vld [vmem:[%s22020_s9 + $0x208] sm:$0xff] }
 0x915   : > { %16091 = vmatmul.mubr.msk.f32.gmra.mrb[100].mxu0 %vm8166_vm6, %v21094_v2  ;;  %v21147_v15 = vld [vmem:[#allocation5 + $0x50] sm:$0xff]  ;;  %v21210_v14 = vld [vmem:[#allocation5 + $0x62] sm:$0xff]  ;;  %v13408_v36 = vld [vmem:[%s22020_s9 + $0x1f8] sm:$0xff] }
 0x916   : > { %16093 = vmatprep.mubr.msk.f32.mxu0 %vm8166_vm6, %v21104_v32  ;;  %16996 = vmatpush3.bf16.msra.mxu0 %v16993_v59  ;;  %v21200_v8 = vld [vmem:[#allocation5 + $0x52] sm:$0xff]  ;;  %v13369_v59 = vld [vmem:[%s22020_s9 + $0x140] sm:$0xff] }
 0x917   : > { %16998 = vmatprep.subr.bf16.mxu0 %v16997_v56  ;;  %v17049_v29 = vpack.c.bf16 %v13370_v35, %v13369_v59  ;;  %v21298_v54 = vld [vmem:[#allocation5 + $0x81] sm:$0xff]  ;;  %v13420_v61 = vld [vmem:[%s22020_s9 + $0x218] sm:$0xff] }
 0x918   : > { %v21108_v42 = vld [vmem:[#allocation5 + $0x71] sm:$0xff]  ;;  %v13389_v6 = vld [vmem:[%s22020_s9 + $0x1a0] sm:$0xff] }
 0x919   : > { %16094 = vmatmul.mubr.msk.f32.gmra.mrb[102].mxu0 %vm8166_vm6, %v21108_v42  ;;  %v21161_v41 = vld [vmem:[#allocation5 + $0x70] sm:$0xff]  ;;  %v13405_v60 = vld [vmem:[%s22020_s9 + $0x1e0] sm:$0xff]  ;;  %v13424_v51 = vld [vmem:[%s22020_s9 + $0x238] sm:$0xff] }
 0x91a   : > { %17000 = vmatpush3.bf16.msra.mxu0 %v16997_v56  ;;  %16112 = vmatprep.mubr.msk.f32.mxu0 %vm8166_vm6, %v9619_v47  ;;  %v21214_v33 = vld [vmem:[#allocation5 + $0x72] sm:$0xff]  ;;  %v21256_v56 = vld [vmem:[#allocation5 + $0x80] sm:$0xff]  ;;  %v17053_v47 = vpack.c.bf16 %v13372_v9, %v13371_v52  ;;  %v11083_v9 = vld [vmem:[%s22024_s13 + $0x8] sm:$0xff] }
 0x91b   : > { %17002 = vmatprep.subr.bf16.mxu0 %v17001_v1  ;;  %v13421_v63 = vld [vmem:[%s22020_s9 + $0x220] sm:$0xff] }
 0x91c   : > { %v11082_v52 = vld [vmem:[%s22024_s13] sm:$0xff] }
 0x91d   : > { %16113 = vmatmul.mubr.msk.f32.vlgmr.msra.gmra.mrb[96].mxu0 %vm8166_vm6, %v21119_v10 }
 0x91e   : > { %16115 = vmatprep.mubr.msk.f32.mxu0 %vm8166_vm6, %v21129_v19  ;;  %17004 = vmatpush3.bf16.msra.mxu0 %v17001_v1  ;;  %v13373_v1 = vld [vmem:[%s22020_s9 + $0x160] sm:$0xff] }
 0x91f   : > { %17006 = vmatprep.subr.bf16.mxu0 %v17005_v4  ;;  %v17057_v5 = vpack.c.bf16 %v13374_v31, %v13373_v1  ;;  %v17130_v1 = vpack.c.bf16 %v11083_v9, %v11082_v52  ;;  %v18105_v31 = vmov 0.0|0.0   ;;  %v13467_v52 = vld [vmem:[%s22024_s13 + $0x118] sm:$0xff] }
 0x921   : > { %16116 = vmatmul.mubr.msk.f32.gmra.mrb[98].mxu0 %vm8166_vm6, %v21133_v18 }
 0x922   : > { %16118 = vmatprep.mubr.msk.f32.mxu0 %vm8166_vm6, %v21143_v27  ;;  %17008 = vmatpush3.bf16.msra.mxu0 %v17005_v4  ;;  %v13376_v4 = vld [vmem:[%s22020_s9 + $0x178] sm:$0xff] }
 0x923   : > { %17010 = vmatprep.subr.bf16.mxu0 %v17009_v44 }
 0x925   : > { %16119 = vmatmul.mubr.msk.f32.gmra.mrb[100].mxu0 %vm8166_vm6, %v21147_v15 }
 0x926   : > { %16121 = vmatprep.mubr.msk.f32.mxu0 %vm8166_vm6, %v21157_v55  ;;  %17012 = vmatpush3.bf16.msra.mxu0 %v17009_v44  ;;  %v17065_v44 = vpack.c.bf16 %v13386_v48, %v13385_v0  ;;  %v11087_v0 = vld [vmem:[%s22024_s13 + $0x28] sm:$0xff] }
 0x927   : > { %17014 = vmatprep.subr.bf16.mxu0 %v17013_v28 }
 0x929   : > { %16122 = vmatmul.mubr.msk.f32.gmra.mrb[102].mxu0 %vm8166_vm6, %v21161_v41 }
 0x92a   : > { %17016 = vmatpush3.bf16.msra.mxu0 %v17013_v28  ;;  %16140 = vmatprep.mubr.msk.f32.mxu0 %vm8166_vm6, %v9910_v21  ;;  %v13388_v28 = vld [vmem:[%s22020_s9 + $0x198] sm:$0xff]  ;;  %v13390_v21 = vld [vmem:[%s22020_s9 + $0x1a8] sm:$0xff] }
 0x92b   : > { %17018 = vmatprep.subr.bf16.mxu0 %v17017_v17  ;;  %v17069_v23 = vpack.c.bf16 %v13388_v28, %v13387_v53  ;;  %v13433_v28 = vld [vmem:[%s22021_s10] ss:$0 sm:$0xff] }
 0x92d   : > { %16141 = vmatmul.mubr.msk.f32.vlgmr.msra.gmra.mrb[96].mxu0 %vm8166_vm6, %v21172_v38 }
 0x92e   : > { %16143 = vmatprep.mubr.msk.f32.mxu0 %vm8166_vm6, %v21182_v16  ;;  %17020 = vmatpush3.bf16.msra.mxu0 %v17017_v17  ;;  %v17073_v17 = vpack.c.bf16 %v13390_v21, %v13389_v6  ;;  %v13437_v6 = vld [vmem:[%s22024_s13 + $0x40] sm:$0xff]  ;;  %v13438_v21 = vld [vmem:[%s22024_s13 + $0x48] sm:$0xff] }
 0x92f   : > { %17022 = vmatprep.subr.bf16.mxu0 %v17021_v43 }
 0x931   : > { %16144 = vmatmul.mubr.msk.f32.gmra.mrb[98].mxu0 %vm8166_vm6, %v21186_v58 }
 0x932   : > { %16146 = vmatprep.mubr.msk.f32.mxu0 %vm8166_vm6, %v21196_v13  ;;  %17024 = vmatpush3.bf16.msra.mxu0 %v17021_v43  ;;  %v17077_v43 = vpack.c.bf16 %v13392_v34, %v13391_v57 }
 0x933   : > { %17026 = vmatprep.subr.bf16.mxu0 %v17025_v50 }
 0x935   : > { %16147 = vmatmul.mubr.msk.f32.gmra.mrb[100].mxu0 %vm8166_vm6, %v21200_v8 }
 0x936   : > { %16149 = vmatprep.mubr.msk.f32.mxu0 %vm8166_vm6, %v21210_v14  ;;  %17028 = vmatpush3.bf16.msra.mxu0 %v17025_v50  ;;  %v21340_v50 = vld [vmem:[#allocation5 + $0x82] sm:$0xff] }
 0x937   : > { %17030 = vmatprep.subr.bf16.mxu0 %v17029_v46 }
 0x939   : > { %16150 = vmatmul.mubr.msk.f32.gmra.mrb[102].mxu0 %vm8166_vm6, %v21214_v33 }
 0x93a   : > { %17032 = vmatpush3.bf16.msra.mxu0 %v17029_v46  ;;  %16168 = vmatprep.mubr.msk.f32.mxu0 %vm8166_vm6, %v21119_v10  ;;  %v17085_v46 = vpack.c.bf16 %v13404_v11, %v13403_v37  ;;  %v13441_v37 = vld [vmem:[%s22024_s13 + $0x60] sm:$0xff]  ;;  %v13442_v11 = vld [vmem:[%s22024_s13 + $0x68] sm:$0xff] }
 0x93b   : > { %17034 = vmatprep.subr.bf16.mxu0 %v17033_v22 }
 0x93d   : > { %16169 = vmatmul.mubr.msk.f32.vlgmr.msra.gmra.mrb[96].mxu0 %vm8166_vm6, %v21129_v19 }
 0x93e   : > { %16171 = vmatprep.mubr.msk.f32.mxu0 %vm8166_vm6, %v21133_v18  ;;  %17036 = vmatpush3.bf16.msra.mxu0 %v17033_v22  ;;  %v17089_v22 = vpack.c.bf16 %v13406_v7, %v13405_v60  ;;  %v13443_v60 = vld [vmem:[%s22024_s13 + $0x70] sm:$0xff]  ;;  %v13444_v7 = vld [vmem:[%s22024_s13 + $0x78] sm:$0xff] }
 0x93f   : > { %17038 = vmatprep.subr.bf16.mxu0 %v17037_v24 }
 0x941   : > { %16172 = vmatmul.mubr.msk.f32.gmra.mrb[98].mxu0 %vm8166_vm6, %v21143_v27 }
 0x942   : > { %16174 = vmatprep.mubr.msk.f32.mxu0 %vm8166_vm6, %v21147_v15  ;;  %17040 = vmatpush3.bf16.msra.mxu0 %v17037_v24  ;;  %v13419_v24 = vld [vmem:[%s22020_s9 + $0x210] sm:$0xff] }
 0x943   : > { %17042 = vmatprep.subr.bf16.mxu0 %v17041_v20 }
 0x945   : > { %16175 = vmatmul.mubr.msk.f32.gmra.mrb[100].mxu0 %vm8166_vm6, %v21157_v55 }
 0x946   : > { %16177 = vmatprep.mubr.msk.f32.mxu0 %vm8166_vm6, %v21161_v41  ;;  %17044 = vmatpush3.bf16.msra.mxu0 %v17041_v20  ;;  %v13422_v20 = vld [vmem:[%s22020_s9 + $0x228] sm:$0xff] }
 0x947   : > { %17046 = vmatprep.subr.bf16.mxu0 %v17045_v26  ;;  %v17105_v25 = vpack.c.bf16 %v13422_v20, %v13421_v63  ;;  %v13452_v63 = vld [vmem:[%s22024_s13 + $0xb0] sm:$0xff]  ;;  %v13453_v20 = vld [vmem:[%s22024_s13 + $0xb8] sm:$0xff] }
 0x949   : > { %16178 = vmatmul.mubr.msk.f32.gmra.mrb[102].mxu0 %vm8166_vm6, %v21256_v56 }
 0x94a   : > { %17048 = vmatpush3.bf16.msra.mxu0 %v17045_v26  ;;  %16196 = vmatprep.mubr.msk.f32.mxu0 %vm8166_vm6, %v21063_v62  ;;  %v13375_v62 = vld [vmem:[%s22020_s9 + $0x170] sm:$0xff] }
 0x94b   : > { %17050 = vmatprep.subr.bf16.mxu0 %v17049_v29  ;;  %v17061_v10 = vpack.c.bf16 %v13376_v4, %v13375_v62  ;;  %v11085_v62 = vld [vmem:[%s22024_s13 + $0x18] sm:$0xff] }
 0x94d   : > { %16197 = vmatmul.mubr.msk.f32.vlgmr.msra.gmra.mrb[96].mxu0 %vm8166_vm6, %v21074_v39 }
 0x94e   : > { %16199 = vmatprep.mubr.msk.f32.mxu0 %vm8166_vm6, %v21079_v3  ;;  %17052 = vmatpush3.bf16.msra.mxu0 %v17049_v29 }
 0x94f   : > { %17054 = vmatprep.subr.bf16.mxu0 %v17053_v47 }
 0x951   : > { %16200 = vmatmul.mubr.msk.f32.gmra.mrb[98].mxu0 %vm8166_vm6, %v21090_v12 }
 0x952   : > { %16202 = vmatprep.mubr.msk.f32.mxu0 %vm8166_vm6, %v21094_v2  ;;  %17056 = vmatpush3.bf16.msra.mxu0 %v17053_v47  ;;  %v10990_v47 = vld [vmem:[%s22023_s12 + $0x8] sm:$0xff] }
 0x953   : > { %17058 = vmatprep.subr.bf16.mxu0 %v17057_v5 }
 0x955   : > { %16203 = vmatmul.mubr.msk.f32.gmra.mrb[100].mxu0 %vm8166_vm6, %v21104_v32 }
 0x956   : > { %16205 = vmatprep.mubr.msk.f32.mxu0 %vm8166_vm6, %v21108_v42  ;;  %17060 = vmatpush3.bf16.msra.mxu0 %v17057_v5  ;;  %v11084_v5 = vld [vmem:[%s22024_s13 + $0x10] sm:$0xff] }
 0x957   : > { %17062 = vmatprep.subr.bf16.mxu0 %v17061_v10  ;;  %v17133_v4 = vpack.c.bf16 %v11085_v62, %v11084_v5  ;;  %v13470_v62 = vld [vmem:[%s22024_s13 + $0x130] sm:$0xff] }
 0x959   : > { %16206 = vmatmul.mubr.msk.f32.gmra.mrb[102].mxu0 %vm8166_vm6, %v21298_v54 }
 0x95a   : > { %17064 = vmatpush3.bf16.msra.mxu0 %v17061_v10  ;;  %16224 = vmatprep.mubr.msk.f32.mxu0 %vm8166_vm6, %v21172_v38  ;;  %v13401_v38 = vld [vmem:[%s22020_s9 + $0x1c0] sm:$0xff] }
 0x95b   : > { %17066 = vmatprep.subr.bf16.mxu0 %v17065_v44  ;;  %v17081_v49 = vpack.c.bf16 %v13402_v30, %v13401_v38  ;;  %v11086_v10 = vld [vmem:[%s22024_s13 + $0x20] sm:$0xff]  ;;  %v13439_v30 = vld [vmem:[%s22024_s13 + $0x50] sm:$0xff] }
 0x95c   : > { %v17136_v48 = vpack.c.bf16 %v11087_v0, %v11086_v10  ;;  %v13473_v0 = vld [vmem:[%s22024_s13 + $0x140] sm:$0xff] }
 0x95d   : > { %16225 = vmatmul.mubr.msk.f32.vlgmr.msra.gmra.mrb[96].mxu0 %vm8166_vm6, %v21182_v16 }
 0x95e   : > { %16227 = vmatprep.mubr.msk.f32.mxu0 %vm8166_vm6, %v21186_v58  ;;  %17068 = vmatpush3.bf16.msra.mxu0 %v17065_v44  ;;  %v11088_v44 = vld [vmem:[%s22024_s13 + $0x30] sm:$0xff] }
 0x95f   : > { %17070 = vmatprep.subr.bf16.mxu0 %v17069_v23 }
 0x961   : > { %16228 = vmatmul.mubr.msk.f32.gmra.mrb[98].mxu0 %vm8166_vm6, %v21196_v13 }
 0x962   : > { %16230 = vmatprep.mubr.msk.f32.mxu0 %vm8166_vm6, %v21200_v8  ;;  %17072 = vmatpush3.bf16.msra.mxu0 %v17069_v23 }
 0x963   : > { %17074 = vmatprep.subr.bf16.mxu0 %v17073_v17 }
 0x965   : > { %16231 = vmatmul.mubr.msk.f32.gmra.mrb[100].mxu0 %vm8166_vm6, %v21210_v14 }
 0x966   : > { %16233 = vmatprep.mubr.msk.f32.mxu0 %vm8166_vm6, %v21214_v33  ;;  %17076 = vmatpush3.bf16.msra.mxu0 %v17073_v17 }
 0x967   : > { %17078 = vmatprep.subr.bf16.mxu0 %v17077_v43 }
 0x969   : > { %16234 = vmatmul.mubr.msk.f32.gmra.mrb[102].mxu0 %vm8166_vm6, %v21340_v50 }
 0x96a   : > { %17080 = vmatpush3.bf16.msra.mxu0 %v17077_v43  ;;  %16252 = vmatprep.mubr.msk.f32.mxu0 %vm8166_vm6, %v21129_v19  ;;  %v13407_v19 = vld [vmem:[%s22020_s9 + $0x1f0] sm:$0xff]  ;;  %v17142_v43 = vpack.c.bf16 %v13438_v21, %v13437_v6  ;;  %v13477_v6 = vld [vmem:[%s22024_s13 + $0x160] sm:$0xff]  ;;  %v13478_v21 = vld [vmem:[%s22024_s13 + $0x168] sm:$0xff] }
 0x96b   : > { %17082 = vmatprep.subr.bf16.mxu0 %v17081_v49 }
 0x96d   : > { %16253 = vmatmul.mubr.msk.f32.vlgmr.msra.gmra.mrb[96].mxu0 %vm8166_vm6, %v21133_v18  ;;  %v17093_v18 = vpack.c.bf16 %v13408_v36, %v13407_v19  ;;  %v13446_v19 = vld [vmem:[%s22024_s13 + $0x80] sm:$0xff]  ;;  %v13447_v36 = vld [vmem:[%s22024_s13 + $0x88] sm:$0xff] }
 0x96e   : > { %16255 = vmatprep.mubr.msk.f32.mxu0 %vm8166_vm6, %v21143_v27  ;;  %17084 = vmatpush3.bf16.msra.mxu0 %v17081_v49  ;;  %v13417_v27 = vld [vmem:[%s22020_s9 + $0x200] sm:$0xff]  ;;  %v13440_v49 = vld [vmem:[%s22024_s13 + $0x58] sm:$0xff] }
 0x96f   : > { %17086 = vmatprep.subr.bf16.mxu0 %v17085_v46 }
 0x971   : > { %16256 = vmatmul.mubr.msk.f32.gmra.mrb[98].mxu0 %vm8166_vm6, %v21147_v15  ;;  %v10534_v15 = vld [vmem:[#allocation5 + $0x90] sm:$0xff] }
 0x972   : > { %16258 = vmatprep.mubr.msk.f32.mxu0 %vm8166_vm6, %v21157_v55  ;;  %17088 = vmatpush3.bf16.msra.mxu0 %v17085_v46  ;;  %v17097_v55 = vpack.c.bf16 %v13418_v45, %v13417_v27  ;;  %v17148_v46 = vpack.c.bf16 %v13442_v11, %v13441_v37  ;;  %v13448_v45 = vld [vmem:[%s22024_s13 + $0x90] sm:$0xff] }
 0x973   : > { %17090 = vmatprep.subr.bf16.mxu0 %v17089_v22 }
 0x975   : > { %16259 = vmatmul.mubr.msk.f32.gmra.mrb[100].mxu0 %vm8166_vm6, %v21161_v41  ;;  %v17101_v41 = vpack.c.bf16 %v13420_v61, %v13419_v24  ;;  %v13450_v24 = vld [vmem:[%s22024_s13 + $0xa0] sm:$0xff]  ;;  %v13451_v61 = vld [vmem:[%s22024_s13 + $0xa8] sm:$0xff] }
 0x976   : > { %16261 = vmatprep.mubr.msk.f32.mxu0 %vm8166_vm6, %v21256_v56  ;;  %17092 = vmatpush3.bf16.msra.mxu0 %v17089_v22  ;;  %v17151_v22 = vpack.c.bf16 %v13444_v7, %v13443_v60  ;;  %v13485_v60 = vld [vmem:[%s22024_s13 + $0x198] sm:$0xff] }
 0x977   : > { %17094 = vmatprep.subr.bf16.mxu0 %v17093_v18 }
 0x979   : > { %16262 = vmatmul.mubr.msk.f32.gmra.mrb[102].mxu0 %vm8166_vm6, %v10534_v15  ;;  %v13449_v15 = vld [vmem:[%s22024_s13 + $0x98] sm:$0xff] }
 0x97a   : > { %17096 = vmatpush3.bf16.msra.mxu0 %v17093_v18  ;;  %16280 = vmatprep.mubr.msk.f32.mxu0 %vm8166_vm6, %v21074_v39  ;;  %v13423_v39 = vld [vmem:[%s22020_s9 + $0x230] sm:$0xff]  ;;  %v17154_v18 = vpack.c.bf16 %v13447_v36, %v13446_v19  ;;  %v13487_v19 = vld [vmem:[%s22024_s13 + $0x1a8] sm:$0xff] }
 0x97b   : > { %17098 = vmatprep.subr.bf16.mxu0 %v17097_v55 }
 0x97d   : > { %16281 = vmatmul.mubr.msk.f32.vlgmr.msra.gmra.mrb[96].mxu0 %vm8166_vm6, %v21079_v3  ;;  %v17109_v3 = vpack.c.bf16 %v13424_v51, %v13423_v39  ;;  %v13455_v39 = vld [vmem:[%s22024_s13 + $0xc0] sm:$0xff]  ;;  %v13456_v51 = vld [vmem:[%s22024_s13 + $0xc8] sm:$0xff] }
 0x97e   : > { %16283 = vmatprep.mubr.msk.f32.mxu0 %vm8166_vm6, %v21090_v12  ;;  %17100 = vmatpush3.bf16.msra.mxu0 %v17097_v55  ;;  %v10688_v12 = vld [vmem:[#allocation5 + $0x91] sm:$0xff]  ;;  %v17157_v55 = vpack.c.bf16 %v13449_v15, %v13448_v45  ;;  %v13491_v15 = vld [vmem:[%s22024_s13 + $0x1c0] sm:$0xff] }
 0x97f   : > { %17102 = vmatprep.subr.bf16.mxu0 %v17101_v41 }
 0x981   : > { %16284 = vmatmul.mubr.msk.f32.gmra.mrb[98].mxu0 %vm8166_vm6, %v21094_v2  ;;  %v10842_v2 = vld [vmem:[#allocation5 + $0x92] sm:$0xff] }
 0x982   : > { %16286 = vmatprep.mubr.msk.f32.mxu0 %vm8166_vm6, %v21104_v32  ;;  %17104 = vmatpush3.bf16.msra.mxu0 %v17101_v41  ;;  %v10989_v32 = vld [vmem:[%s22023_s12] sm:$0xff]  ;;  %v17160_v41 = vpack.c.bf16 %v13451_v61, %v13450_v24 }
 0x983   : > { %17106 = vmatprep.subr.bf16.mxu0 %v17105_v25  ;;  %16336 = vmatprep.mubr.msk.f32.mxu1 %vm8166_vm6, %v10989_v32  ;;  %v13458_v32 = vld [vmem:[%s22024_s13 + $0xd8] sm:$0xff] }
 0x985   : > { %16287 = vmatmul.mubr.msk.f32.gmra.mrb[100].mxu0 %vm8166_vm6, %v21108_v42 }
 0x986   : > { %16289 = vmatprep.mubr.msk.f32.mxu0 %vm8166_vm6, %v21298_v54  ;;  %17108 = vmatpush3.bf16.msra.mxu0 %v17105_v25  ;;  %v11089_v54 = vld [vmem:[%s22024_s13 + $0x38] sm:$0xff]  ;;  %v17163_v25 = vpack.c.bf16 %v13453_v20, %v13452_v63 }
 0x987   : > { %17110 = vmatprep.subr.bf16.mxu0 %v17109_v3  ;;  %v17139_v53 = vpack.c.bf16 %v11089_v54, %v11088_v44  ;;  %v13494_v63 = vld [vmem:[%s22024_s13 + $0x1d8] sm:$0xff] }
 0x989   : > { %16290 = vmatmul.mubr.msk.f32.gmra.mrb[102].mxu0 %vm8166_vm6, %v10688_v12 }
 0x98a   : > { %17112 = vmatpush3.bf16.msra.mxu0 %v17109_v3  ;;  %16308 = vmatprep.mubr.msk.f32.mxu0 %vm8166_vm6, %v21182_v16  ;;  %v17166_v3 = vpack.c.bf16 %v13456_v51, %v13455_v39  ;;  %v13496_v39 = vld [vmem:[%s22024_s13 + $0x1e8] sm:$0xff] }
 0x98d   : > { %16309 = vmatmul.mubr.msk.f32.vlgmr.msra.gmra.mrb[96].mxu0 %vm8166_vm6, %v21186_v58 }
 0x98e   : > { %16311 = vmatprep.mubr.msk.f32.mxu0 %vm8166_vm6, %v21196_v13 }
 0x991   : > { %16312 = vmatmul.mubr.msk.f32.gmra.mrb[98].mxu0 %vm8166_vm6, %v21200_v8 }
 0x992   : > { %16314 = vmatprep.mubr.msk.f32.mxu0 %vm8166_vm6, %v21210_v14 }
 0x995   : > { %16315 = vmatmul.mubr.msk.f32.gmra.mrb[100].mxu0 %vm8166_vm6, %v21214_v33 }
 0x996   : > { %16317 = vmatprep.mubr.msk.f32.mxu0 %vm8166_vm6, %v21340_v50  ;;  %v17145_v50 = vpack.c.bf16 %v13440_v49, %v13439_v30  ;;  %v13482_v49 = vld [vmem:[%s22024_s13 + $0x180] sm:$0xff] }
 0x999   : > { %16318 = vmatmul.mubr.msk.f32.gmra.mrb[102].mxu0 %vm8166_vm6, %v10842_v2  ;;  %v13457_v2 = vld [vmem:[%s22024_s13 + $0xd0] sm:$0xff] }
 0xa60   : > { %v16310_v42 = vpop.f32.mrb[96].mxu0 }
 0xa61   : > { %v10942_v16 = vpop.f32.mrb[97].mxu0 }
 0xa62   : > { %v17113_v58 = vpack.c.bf16 %v16310_v42, %v10942_v16  ;;  %v17169_v42 = vpack.c.bf16 %v13458_v32, %v13457_v2  ;;  %v13459_v16 = vld [vmem:[%s22024_s13 + $0xe0] sm:$0xff] }
 0xa63   : > { %v13500_v32 = vld [vmem:[%s22024_s13 + $0x200] sm:$0xff] }
 0xa64   : > { %v16313_v13 = vpop.f32.mrb[98].mxu0  ;;  %17114 = vmatprep.subr.bf16.mxu1 %v17113_v58 }
 0xa65   : > { %v10952_v8 = vpop.f32.mrb[99].mxu0  ;;  %17116 = vmatpush3.bf16.msra.mxu1 %v17113_v58  ;;  %v13460_v58 = vld [vmem:[%s22024_s13 + $0xe8] sm:$0xff] }
 0xa66   : > { %v17117_v14 = vpack.c.bf16 %v16313_v13, %v10952_v8  ;;  %v17172_v13 = vpack.c.bf16 %v13460_v58, %v13459_v16  ;;  %v13461_v8 = vld [vmem:[%s22024_s13 + $0xf0] sm:$0xff] }
 0xa68   : > { %v16316_v33 = vpop.f32.mrb[100].mxu0  ;;  %17118 = vmatprep.subr.bf16.mxu1 %v17117_v14 }
 0xa69   : > { %v10962_v26 = vpop.f32.mrb[101].mxu0  ;;  %17120 = vmatpush3.bf16.msra.mxu1 %v17117_v14  ;;  %v13462_v14 = vld [vmem:[%s22024_s13 + $0xf8] sm:$0xff] }
 0xa6a   : > { %v17121_v59 = vpack.c.bf16 %v16316_v33, %v10962_v26  ;;  %v17175_v33 = vpack.c.bf16 %v13462_v14, %v13461_v8  ;;  %v13464_v26 = vld [vmem:[%s22024_s13 + $0x100] sm:$0xff]  ;;  %v13503_v8 = vld [vmem:[%s22024_s13 + $0x218] sm:$0xff] }
 0xa6c   : > { %v16319_v35 = vpop.f32.mrb[102].mxu0  ;;  %17122 = vmatprep.subr.bf16.mxu1 %v17121_v59 }
 0xa6d   : > { %v10972_v29 = vpop.f32.mrb[103].mxu0  ;;  %17124 = vmatpush3.bf16.msra.mxu1 %v17121_v59  ;;  %v13465_v59 = vld [vmem:[%s22024_s13 + $0x108] sm:$0xff] }
 0xa6e   : > { %v17125_v56 = vpack.c.bf16 %v16319_v35, %v10972_v29  ;;  %v17178_v35 = vpack.c.bf16 %v13465_v59, %v13464_v26  ;;  %v13506_v59 = vld [vmem:[%s22024_s13 + $0x230] sm:$0xff] }
 0xa70   : > { %17126 = vmatprep.subr.bf16.mxu1 %v17125_v56 }
 0xa71   : > { %17128 = vmatpush3.bf16.msra.mxu1 %v17125_v56  ;;  %v13466_v56 = vld [vmem:[%s22024_s13 + $0x110] sm:$0xff] }
 0xa72   : > { %17129 = vmatprep.subr.bf16.mxu1 %v18105_v31  ;;  %v17181_v9 = vpack.c.bf16 %v13467_v52, %v13466_v56  ;;  %v13509_v56 = vld [vmem:[%s22024_s13 + $0x240] sm:$0xff]  ;;  %v13510_v52 = vld [vmem:[%s22024_s13 + $0x248] sm:$0xff] }
 0xa74   : > { %16337 = vmatmul.mubr.msk.f32.vlgmr.msra.gmra.mrb[56].mxu1 %vm8166_vm6, %v10990_v47  ;;  %v13468_v47 = vld [vmem:[%s22024_s13 + $0x120] sm:$0xff] }
 0xa75   : > { %17131 = vmatpush3.bf16.msra.mxu1 %v17130_v1  ;;  %16355 = vmatprep.mubr.msk.f32.mxu1 %vm18106_vm8, %v22372_v40  ;;  %v13469_v1 = vld [vmem:[%s22024_s13 + $0x128] sm:$0xff] }
 0xa76   : > { %17132 = vmatprep.subr.bf16.mxu1 %v18105_v31  ;;  %v17184_v5 = vpack.c.bf16 %v13469_v1, %v13468_v47  ;;  %v13511_v1 = vld [vmem:[%s22024_s13 + $0x250] sm:$0xff] }
 0xa79   : > { %17134 = vmatpush3.bf16.msra.mxu1 %v17133_v4  ;;  %v13471_v4 = vld [vmem:[%s22024_s13 + $0x138] sm:$0xff] }
 0xa7a   : > { %17135 = vmatprep.subr.bf16.mxu1 %v18105_v31  ;;  %v17187_v10 = vpack.c.bf16 %v13471_v4, %v13470_v62  ;;  %v13514_v4 = vld [vmem:[%s22024_s13 + $0x268] sm:$0xff] }
 0xa7d   : > { %17137 = vmatpush3.bf16.msra.mxu1 %v17136_v48  ;;  %v13474_v48 = vld [vmem:[%s22024_s13 + $0x148] sm:$0xff] }
 0xa7e   : > { %17138 = vmatprep.subr.bf16.mxu1 %v18105_v31  ;;  %v17190_v44 = vpack.c.bf16 %v13474_v48, %v13473_v0  ;;  %v13515_v0 = vld [vmem:[%s22024_s13 + $0x270] sm:$0xff]  ;;  %v13516_v48 = vld [vmem:[%s22024_s13 + $0x278] sm:$0xff] }
 0xa81   : > { %17140 = vmatpush3.bf16.msra.mxu1 %v17139_v53  ;;  %v13475_v53 = vld [vmem:[%s22024_s13 + $0x150] sm:$0xff] }
 0xa82   : > { %17141 = vmatprep.subr.bf16.mxu1 %v18105_v31 }
 0xb47   : > { %v16338_v23 = vpop.f32.mrb[56].mxu1 }
 0xb48   : > { %v21479_v17 = vadd.f32 %v16338_v23, %v13433_v28  ;;  %v11070_v57 = vpop.f32.mrb[57].mxu1 }
 0xb49   : > { %v11071_v34 = vadd.f32 %v13433_v28, %v11070_v57  ;;  %v13476_v28 = vld [vmem:[%s22024_s13 + $0x158] sm:$0xff]  ;;  %v17196_v57 = vpack.c.bf16 %v13478_v21, %v13477_v6  ;;  %v13520_v6 = vld [vmem:[%s22024_s13 + $0x290] sm:$0xff] }
 0xb4a   : > { %v17193_v23 = vpack.c.bf16 %v13476_v28, %v13475_v53  ;;  %v21739_v47 = vmax.f32 %v21479_v17, 0.0  ;;  %v13513_v17 = vld [vmem:[%s22024_s13 + $0x260] sm:$0xff]  ;;  %v13519_v53 = vld [vmem:[%s22024_s13 + $0x288] sm:$0xff]  ;;  %v13521_v21 = vld [vmem:[%s22024_s13 + $0x298] sm:$0xff] }
 0xb4b   : > { %v21481_v38 = vmax.f32 %v11071_v34, 0.0  ;;  %v13479_v34 = vld [vmem:[%s22024_s13 + $0x170] sm:$0xff] }
 0xb4d   : > { %16356 = vmatmul.mubr.msk.f32.vlgmr.msra.gmra.mrb[58].mxu1 %vm8166_vm6, %v21481_v38  ;;  %v11173_v27 = vrot.slane %v21481_v38, 1  ;;  %v11256_v12 = vrot.slane %v21481_v38, 2  ;;  %v11339_v29 = vrot.slane %v21481_v38, 3  ;;  %v11422_v54 = vrot.slane %v21481_v38, 4 }
 0xb4e   : > { %17143 = vmatpush3.bf16.msra.mxu1 %v17142_v43  ;;  %16374 = vmatprep.mubr.msk.f32.mxu1 %vm18106_vm8, %v22372_v40  ;;  %v13480_v43 = vld [vmem:[%s22024_s13 + $0x178] sm:$0xff]  ;;  %v11505_v11 = vrot.slane %v21481_v38, 5  ;;  %v11588_v61 = vrot.slane %v21481_v38, 6  ;;  %v11671_v58 = vrot.slane %v21481_v38, 7  ;;  %v13504_v38 = vld [vmem:[%s22024_s13 + $0x220] sm:$0xff] }
 0xb4f   : > { %17144 = vmatprep.subr.bf16.mxu1 %v18105_v31  ;;  %v17199_v30 = vpack.c.bf16 %v13480_v43, %v13479_v34  ;;  %v13522_v34 = vld [vmem:[%s22024_s13 + $0x2a0] sm:$0xff]  ;;  %v13523_v43 = vld [vmem:[%s22024_s13 + $0x2a8] sm:$0xff] }
 0xb52   : > { %17146 = vmatpush3.bf16.msra.mxu1 %v17145_v50  ;;  %v13483_v50 = vld [vmem:[%s22024_s13 + $0x188] sm:$0xff] }
 0xb53   : > { %17147 = vmatprep.subr.bf16.mxu1 %v18105_v31  ;;  %v17202_v37 = vpack.c.bf16 %v13483_v50, %v13482_v49  ;;  %v13524_v49 = vld [vmem:[%s22024_s13 + $0x2b0] sm:$0xff]  ;;  %v13525_v50 = vld [vmem:[%s22024_s13 + $0x2b8] sm:$0xff] }
 0xb56   : > { %17149 = vmatpush3.bf16.msra.mxu1 %v17148_v46  ;;  %v13484_v46 = vld [vmem:[%s22024_s13 + $0x190] sm:$0xff] }
 0xb57   : > { %17150 = vmatprep.subr.bf16.mxu1 %v18105_v31  ;;  %v17205_v7 = vpack.c.bf16 %v13485_v60, %v13484_v46  ;;  %v13528_v46 = vld [vmem:[%s22024_s13 + $0x2c8] sm:$0xff] }
 0xb5a   : > { %17152 = vmatpush3.bf16.msra.mxu1 %v17151_v22  ;;  %v13486_v22 = vld [vmem:[%s22024_s13 + $0x1a0] sm:$0xff] }
 0xb5b   : > { %17153 = vmatprep.subr.bf16.mxu1 %v18105_v31  ;;  %v17208_v36 = vpack.c.bf16 %v13487_v19, %v13486_v22  ;;  %v13529_v22 = vld [vmem:[%s22024_s13 + $0x2d0] sm:$0xff]  ;;  %v13530_v19 = vld [vmem:[%s22024_s13 + $0x2d8] sm:$0xff] }
 0xb5d   : > { %16375 = vmatmul.mubr.msk.f32.vlgmr.msra.gmra.mrb[58].mxu1 %vm8166_vm6, %v11173_v27  ;;  %v13489_v27 = vld [vmem:[%s22024_s13 + $0x1b8] sm:$0xff] }
 0xb5e   : > { %17155 = vmatpush3.bf16.msra.mxu1 %v17154_v18  ;;  %16393 = vmatprep.mubr.msk.f32.mxu1 %vm18106_vm8, %v22372_v40  ;;  %v13488_v18 = vld [vmem:[%s22024_s13 + $0x1b0] sm:$0xff] }
 0xb5f   : > { %17156 = vmatprep.subr.bf16.mxu1 %v18105_v31  ;;  %v17211_v45 = vpack.c.bf16 %v13489_v27, %v13488_v18  ;;  %v13531_v18 = vld [vmem:[%s22024_s13 + $0x2e0] sm:$0xff]  ;;  %v13532_v27 = vld [vmem:[%s22024_s13 + $0x2e8] sm:$0xff] }
 0xb62   : > { %17158 = vmatpush3.bf16.msra.mxu1 %v17157_v55  ;;  %v13492_v55 = vld [vmem:[%s22024_s13 + $0x1c8] sm:$0xff] }
 0xb63   : > { %17159 = vmatprep.subr.bf16.mxu1 %v18105_v31  ;;  %v17214_v24 = vpack.c.bf16 %v13492_v55, %v13491_v15  ;;  %v13533_v15 = vld [vmem:[%s22024_s13 + $0x2f0] sm:$0xff]  ;;  %v13534_v55 = vld [vmem:[%s22024_s13 + $0x2f8] sm:$0xff] }
 0xb66   : > { %17161 = vmatpush3.bf16.msra.mxu1 %v17160_v41  ;;  %v13493_v41 = vld [vmem:[%s22024_s13 + $0x1d0] sm:$0xff] }
 0xb67   : > { %17162 = vmatprep.subr.bf16.mxu1 %v18105_v31  ;;  %v17217_v20 = vpack.c.bf16 %v13494_v63, %v13493_v41  ;;  %v13537_v41 = vld [vmem:[%s22024_s13 + $0x308] sm:$0xff] }
 0xb6a   : > { %17164 = vmatpush3.bf16.msra.mxu1 %v17163_v25  ;;  %v13495_v25 = vld [vmem:[%s22024_s13 + $0x1e0] sm:$0xff] }
 0xb6b   : > { %17165 = vmatprep.subr.bf16.mxu1 %v18105_v31  ;;  %v17220_v51 = vpack.c.bf16 %v13496_v39, %v13495_v25  ;;  %v13538_v25 = vld [vmem:[%s22024_s13 + $0x310] sm:$0xff]  ;;  %v13539_v39 = vld [vmem:[%s22024_s13 + $0x318] sm:$0xff] }
 0xb6d   : > { %16394 = vmatmul.mubr.msk.f32.vlgmr.msra.gmra.mrb[58].mxu1 %vm8166_vm6, %v11256_v12  ;;  %v13498_v12 = vld [vmem:[%s22024_s13 + $0x1f8] sm:$0xff] }
 0xb6e   : > { %17167 = vmatpush3.bf16.msra.mxu1 %v17166_v3  ;;  %16412 = vmatprep.mubr.msk.f32.mxu1 %vm18106_vm8, %v22372_v40  ;;  %v13497_v3 = vld [vmem:[%s22024_s13 + $0x1f0] sm:$0xff] }
 0xb6f   : > { %17168 = vmatprep.subr.bf16.mxu1 %v18105_v31  ;;  %v17223_v2 = vpack.c.bf16 %v13498_v12, %v13497_v3  ;;  %v13540_v3 = vld [vmem:[%s22024_s13 + $0x320] sm:$0xff]  ;;  %v13541_v12 = vld [vmem:[%s22024_s13 + $0x328] sm:$0xff] }
 0xb72   : > { %17170 = vmatpush3.bf16.msra.mxu1 %v17169_v42  ;;  %v13501_v42 = vld [vmem:[%s22024_s13 + $0x208] sm:$0xff] }
 0xb73   : > { %17171 = vmatprep.subr.bf16.mxu1 %v18105_v31  ;;  %v17226_v16 = vpack.c.bf16 %v13501_v42, %v13500_v32  ;;  %v13542_v32 = vld [vmem:[%s22024_s13 + $0x330] sm:$0xff]  ;;  %v13543_v42 = vld [vmem:[%s22024_s13 + $0x338] sm:$0xff] }
 0xb76   : > { %17173 = vmatpush3.bf16.msra.mxu1 %v17172_v13  ;;  %v13502_v13 = vld [vmem:[%s22024_s13 + $0x210] sm:$0xff] }
 0xb77   : > { %17174 = vmatprep.subr.bf16.mxu1 %v18105_v31  ;;  %v17229_v14 = vpack.c.bf16 %v13503_v8, %v13502_v13  ;;  %v13546_v13 = vld [vmem:[%s22024_s13 + $0x348] sm:$0xff] }
 0xb7a   : > { %17176 = vmatpush3.bf16.msra.mxu1 %v17175_v33  ;;  %v13505_v33 = vld [vmem:[%s22024_s13 + $0x228] sm:$0xff] }
 0xb7b   : > { %17177 = vmatprep.subr.bf16.mxu1 %v18105_v31  ;;  %v17232_v26 = vpack.c.bf16 %v13505_v33, %v13504_v38  ;;  %v13547_v38 = vld [vmem:[%s22024_s13 + $0x350] sm:$0xff]  ;;  %v13548_v33 = vld [vmem:[%s22024_s13 + $0x358] sm:$0xff] }
 0xb7d   : > { %16413 = vmatmul.mubr.msk.f32.vlgmr.msra.gmra.mrb[58].mxu1 %vm8166_vm6, %v11339_v29 }
 0xb7e   : > { %17179 = vmatpush3.bf16.msra.mxu1 %v17178_v35  ;;  %16431 = vmatprep.mubr.msk.f32.mxu1 %vm18106_vm8, %v22372_v40  ;;  %v13507_v35 = vld [vmem:[%s22024_s13 + $0x238] sm:$0xff] }
 0xb7f   : > { %17180 = vmatprep.subr.bf16.mxu1 %v18105_v31  ;;  %v17235_v29 = vpack.c.bf16 %v13507_v35, %v13506_v59  ;;  %v13549_v59 = vld [vmem:[%s22024_s13 + $0x360] sm:$0xff]  ;;  %v13550_v35 = vld [vmem:[%s22024_s13 + $0x368] sm:$0xff] }
 0xb82   : > { %17182 = vmatpush3.bf16.msra.mxu1 %v17181_v9  ;;  %v17238_v9 = vpack.c.bf16 %v13510_v52, %v13509_v56  ;;  %v13551_v56 = vld [vmem:[%s22024_s13 + $0x370] sm:$0xff]  ;;  %v13552_v52 = vld [vmem:[%s22024_s13 + $0x378] sm:$0xff] }
 0xb83   : > { %17183 = vmatprep.subr.bf16.mxu1 %v18105_v31 }
 0xb86   : > { %17185 = vmatpush3.bf16.msra.mxu1 %v17184_v5  ;;  %v13512_v5 = vld [vmem:[%s22024_s13 + $0x258] sm:$0xff] }
 0xb87   : > { %17186 = vmatprep.subr.bf16.mxu1 %v18105_v31  ;;  %v17241_v62 = vpack.c.bf16 %v13512_v5, %v13511_v1  ;;  %v13554_v1 = vld [vmem:[%s22024_s13 + $0x380] sm:$0xff]  ;;  %v13555_v5 = vld [vmem:[%s22024_s13 + $0x388] sm:$0xff] }
 0xb8a   : > { %17188 = vmatpush3.bf16.msra.mxu1 %v17187_v10  ;;  %v17244_v10 = vpack.c.bf16 %v13514_v4, %v13513_v17  ;;  %v12169_v17 = vrot.slane %v21739_v47, 5  ;;  %v13556_v4 = vld [vmem:[%s22024_s13 + $0x390] sm:$0xff] }
 0xb8b   : > { %17189 = vmatprep.subr.bf16.mxu1 %v18105_v31 }
 0xb8d   : > { %16432 = vmatmul.mubr.msk.f32.vlgmr.msra.gmra.mrb[58].mxu1 %vm8166_vm6, %v11422_v54  ;;  %v13518_v54 = vld [vmem:[%s22024_s13 + $0x280] sm:$0xff] }
 0xb8e   : > { %17191 = vmatpush3.bf16.msra.mxu1 %v17190_v44  ;;  %16450 = vmatprep.mubr.msk.f32.mxu1 %vm18106_vm8, %v22372_v40  ;;  %v17247_v44 = vpack.c.bf16 %v13516_v48, %v13515_v0  ;;  %v17250_v28 = vpack.c.bf16 %v13519_v53, %v13518_v54  ;;  %v13558_v48 = vld [vmem:[%s22024_s13 + $0x3a0] sm:$0xff]  ;;  %v13560_v53 = vld [vmem:[%s22024_s13 + $0x3b0] sm:$0xff] }
 0xb8f   : > { %17192 = vmatprep.subr.bf16.mxu1 %v18105_v31 }
 0xb92   : > { %17194 = vmatpush3.bf16.msra.mxu1 %v17193_v23  ;;  %v11837_v23 = vrot.slane %v21739_v47, 1 }
 0xb93   : > { %17195 = vmatprep.subr.bf16.mxu1 %v18105_v31 }
 0xb96   : > { %17197 = vmatpush3.bf16.msra.mxu1 %v17196_v57  ;;  %v17253_v57 = vpack.c.bf16 %v13521_v21, %v13520_v6  ;;  %v13563_v6 = vld [vmem:[%s22024_s13 + $0x3c0] sm:$0xff]  ;;  %v13564_v21 = vld [vmem:[%s22024_s13 + $0x3c8] sm:$0xff] }
 0xb97   : > { %17198 = vmatprep.subr.bf16.mxu1 %v18105_v31 }
 0xb9a   : > { %17200 = vmatpush3.bf16.msra.mxu1 %v17199_v30  ;;  %v17256_v30 = vpack.c.bf16 %v13523_v43, %v13522_v34  ;;  %v12252_v34 = vrot.slane %v21739_v47, 6  ;;  %v13565_v43 = vld [vmem:[%s22024_s13 + $0x3d0] sm:$0xff] }
 0xb9b   : > { %17201 = vmatprep.subr.bf16.mxu1 %v18105_v31 }
 0xb9d   : > { %16451 = vmatmul.mubr.msk.f32.vlgmr.msra.gmra.mrb[58].mxu1 %vm8166_vm6, %v11505_v11  ;;  %v13527_v11 = vld [vmem:[%s22024_s13 + $0x2c0] sm:$0xff] }
 0xb9e   : > { %17203 = vmatpush3.bf16.msra.mxu1 %v17202_v37  ;;  %16469 = vmatprep.mubr.msk.f32.mxu1 %vm18106_vm8, %v22372_v40  ;;  %v17259_v37 = vpack.c.bf16 %v13525_v50, %v13524_v49  ;;  %v17262_v60 = vpack.c.bf16 %v13528_v46, %v13527_v11  ;;  %v13567_v50 = vld [vmem:[%s22024_s13 + $0x3e0] sm:$0xff]  ;;  %v13569_v46 = vld [vmem:[%s22024_s13 + $0x3f0] sm:$0xff] }
 0xb9f   : > { %17204 = vmatprep.subr.bf16.mxu1 %v18105_v31 }
 0xba2   : > { %17206 = vmatpush3.bf16.msra.mxu1 %v17205_v7  ;;  %v11920_v7 = vrot.slane %v21739_v47, 2 }
 0xba3   : > { %17207 = vmatprep.subr.bf16.mxu1 %v18105_v31 }
 0xba6   : > { %17209 = vmatpush3.bf16.msra.mxu1 %v17208_v36  ;;  %v17265_v36 = vpack.c.bf16 %v13530_v19, %v13529_v22  ;;  %v11081_v22 = vld [vmem:[%s22025_s14] sm:$0x1] }
 0xba7   : > { %17210 = vmatprep.subr.bf16.mxu1 %v18105_v31 }
 0xbaa   : > { %17212 = vmatpush3.bf16.msra.mxu1 %v17211_v45  ;;  %v17268_v45 = vpack.c.bf16 %v13532_v27, %v13531_v18 }
 0xbab   : > { %17213 = vmatprep.subr.bf16.mxu1 %v18105_v31 }
 0xbad   : > { %16470 = vmatmul.mubr.msk.f32.vlgmr.msra.gmra.mrb[58].mxu1 %vm8166_vm6, %v11588_v61  ;;  %v13536_v61 = vld [vmem:[%s22024_s13 + $0x300] sm:$0xff] }
 0xbae   : > { %17215 = vmatpush3.bf16.msra.mxu1 %v17214_v24  ;;  %16488 = vmatprep.mubr.msk.f32.mxu1 %vm18106_vm8, %v22372_v40  ;;  %v17271_v24 = vpack.c.bf16 %v13534_v55, %v13533_v15  ;;  %v17274_v63 = vpack.c.bf16 %v13537_v41, %v13536_v61 }
 0xbaf   : > { %17216 = vmatprep.subr.bf16.mxu1 %v18105_v31 }
 0xbb2   : > { %17218 = vmatpush3.bf16.msra.mxu1 %v17217_v20  ;;  %v12003_v20 = vrot.slane %v21739_v47, 3 }
 0xbb3   : > { %17219 = vmatprep.subr.bf16.mxu1 %v18105_v31 }
 0xbb6   : > { %17221 = vmatpush3.bf16.msra.mxu1 %v17220_v51  ;;  %v17277_v51 = vpack.c.bf16 %v13539_v39, %v13538_v25 }
 0xbb7   : > { %17222 = vmatprep.subr.bf16.mxu1 %v18105_v31 }
 0xbba   : > { %17224 = vmatpush3.bf16.msra.mxu1 %v17223_v2  ;;  %v17280_v2 = vpack.c.bf16 %v13541_v12, %v13540_v3 }
 0xbbb   : > { %17225 = vmatprep.subr.bf16.mxu1 %v18105_v31 }
 0xbbd   : > { %16489 = vmatmul.mubr.msk.f32.vlgmr.msra.gmra.mrb[58].mxu1 %vm8166_vm6, %v11671_v58  ;;  %v13545_v58 = vld [vmem:[%s22024_s13 + $0x340] sm:$0xff] }
 0xbbe   : > { %17227 = vmatpush3.bf16.msra.mxu1 %v17226_v16  ;;  %16507 = vmatprep.mubr.msk.f32.mxu1 %vm18106_vm8, %v22372_v40  ;;  %v17283_v16 = vpack.c.bf16 %v13543_v42, %v13542_v32  ;;  %v17286_v8 = vpack.c.bf16 %v13546_v13, %v13545_v58 }
 0xbbf   : > { %17228 = vmatprep.subr.bf16.mxu1 %v18105_v31 }
 0xbc2   : > { %17230 = vmatpush3.bf16.msra.mxu1 %v17229_v14  ;;  %v12086_v14 = vrot.slane %v21739_v47, 4 }
 0xbc3   : > { %17231 = vmatprep.subr.bf16.mxu1 %v18105_v31 }
 0xbc6   : > { %17233 = vmatpush3.bf16.msra.mxu1 %v17232_v26  ;;  %v17289_v26 = vpack.c.bf16 %v13548_v33, %v13547_v38 }
 0xbc7   : > { %17234 = vmatprep.subr.bf16.mxu1 %v18105_v31 }
 0xbca   : > { %17236 = vmatpush3.bf16.msra.mxu1 %v17235_v29  ;;  %v17292_v29 = vpack.c.bf16 %v13550_v35, %v13549_v59 }
 0xbcb   : > { %17237 = vmatprep.subr.bf16.mxu1 %v18105_v31 }
 0xbcd   : > { %16508 = vmatmul.mubr.msk.f32.vlgmr.msra.gmra.mrb[58].mxu1 %vm8166_vm6, %v21739_v47 }
 0xbce   : > { %17239 = vmatpush3.bf16.msra.mxu1 %v17238_v9  ;;  %16526 = vmatprep.mubr.msk.f32.mxu1 %vm18106_vm8, %v22372_v40  ;;  %v17295_v9 = vpack.c.bf16 %v13552_v52, %v13551_v56 }
 0xbcf   : > { %17240 = vmatprep.subr.bf16.mxu1 %v18105_v31 }
 0xbd2   : > { %17242 = vmatpush3.bf16.msra.mxu1 %v17241_v62  ;;  %v17298_v62 = vpack.c.bf16 %v13555_v5, %v13554_v1 }
 0xbd3   : > { %17243 = vmatprep.subr.bf16.mxu1 %v18105_v31 }
 0xbd6   : > { %17245 = vmatpush3.bf16.msra.mxu1 %v17244_v10  ;;  %v13557_v10 = vld [vmem:[%s22024_s13 + $0x398] sm:$0xff] }
 0xbd7   : > { %17246 = vmatprep.subr.bf16.mxu1 %v18105_v31  ;;  %v17301_v0 = vpack.c.bf16 %v13557_v10, %v13556_v4 }
 0xbda   : > { %17248 = vmatpush3.bf16.msra.mxu1 %v17247_v44  ;;  %v13559_v44 = vld [vmem:[%s22024_s13 + $0x3a8] sm:$0xff] }
 0xbdb   : > { %17249 = vmatprep.subr.bf16.mxu1 %v18105_v31  ;;  %v17304_v54 = vpack.c.bf16 %v13559_v44, %v13558_v48 }
 0xbdd   : > { %16527 = vmatmul.mubr.msk.f32.vlgmr.msra.gmra.mrb[58].mxu1 %vm8166_vm6, %v11837_v23 }
 0xbde   : > { %17251 = vmatpush3.bf16.msra.mxu1 %v17250_v28  ;;  %16545 = vmatprep.mubr.msk.f32.mxu1 %vm18106_vm8, %v22372_v40  ;;  %v13561_v28 = vld [vmem:[%s22024_s13 + $0x3b8] sm:$0xff] }
 0xbdf   : > { %17252 = vmatprep.subr.bf16.mxu1 %v18105_v31  ;;  %v17307_v23 = vpack.c.bf16 %v13561_v28, %v13560_v53 }
 0xbe2   : > { %17254 = vmatpush3.bf16.msra.mxu1 %v17253_v57  ;;  %v17310_v57 = vpack.c.bf16 %v13564_v21, %v13563_v6 }
 0xbe3   : > { %17255 = vmatprep.subr.bf16.mxu1 %v18105_v31 }
 0xbe6   : > { %17257 = vmatpush3.bf16.msra.mxu1 %v17256_v30  ;;  %v13566_v30 = vld [vmem:[%s22024_s13 + $0x3d8] sm:$0xff] }
 0xbe7   : > { %17258 = vmatprep.subr.bf16.mxu1 %v18105_v31  ;;  %v17313_v49 = vpack.c.bf16 %v13566_v30, %v13565_v43 }
 0xbea   : > { %17260 = vmatpush3.bf16.msra.mxu1 %v17259_v37  ;;  %v13568_v37 = vld [vmem:[%s22024_s13 + $0x3e8] sm:$0xff] }
 0xbeb   : > { %17261 = vmatprep.subr.bf16.mxu1 %v18105_v31  ;;  %v17316_v11 = vpack.c.bf16 %v13568_v37, %v13567_v50 }
 0xbed   : > { %16546 = vmatmul.mubr.msk.f32.vlgmr.msra.gmra.mrb[58].mxu1 %vm8166_vm6, %v11920_v7  ;;  %v12335_v7 = vrot.slane %v21739_v47, 7 }
 0xbee   : > { %17263 = vmatpush3.bf16.msra.mxu1 %v17262_v60  ;;  %16564 = vmatprep.mubr.msk.f32.mxu1 %vm18106_vm8, %v22372_v40 }
 0xbef   : > { %17264 = vmatprep.subr.bf16.mxu1 %v18105_v31 }
 0xbf2   : > { %17266 = vmatpush3.bf16.msra.mxu1 %v17265_v36 }
 0xbf3   : > { %17267 = vmatprep.subr.bf16.mxu1 %v18105_v31 }
 0xbf6   : > { %17269 = vmatpush3.bf16.msra.mxu1 %v17268_v45 }
 0xbf7   : > { %17270 = vmatprep.subr.bf16.mxu1 %v18105_v31 }
 0xbfa   : > { %17272 = vmatpush3.bf16.msra.mxu1 %v17271_v24 }
 0xbfb   : > { %17273 = vmatprep.subr.bf16.mxu1 %v18105_v31 }
 0xbfd   : > { %16565 = vmatmul.mubr.msk.f32.vlgmr.msra.gmra.mrb[58].mxu1 %vm8166_vm6, %v12003_v20 }
 0xbfe   : > { %17275 = vmatpush3.bf16.msra.mxu1 %v17274_v63  ;;  %16583 = vmatprep.mubr.msk.f32.mxu1 %vm18106_vm8, %v22372_v40 }
 0xbff   : > { %17276 = vmatprep.subr.bf16.mxu1 %v18105_v31 }
 0xc02   : > { %17278 = vmatpush3.bf16.msra.mxu1 %v17277_v51 }
 0xc03   : > { %17279 = vmatprep.subr.bf16.mxu1 %v18105_v31 }
 0xc06   : > { %17281 = vmatpush3.bf16.msra.mxu1 %v17280_v2 }
 0xc07   : > { %17282 = vmatprep.subr.bf16.mxu1 %v18105_v31 }
 0xc0a   : > { %17284 = vmatpush3.bf16.msra.mxu1 %v17283_v16 }
 0xc0b   : > { %17285 = vmatprep.subr.bf16.mxu1 %v18105_v31 }
 0xc0d   : > { %16584 = vmatmul.mubr.msk.f32.vlgmr.msra.gmra.mrb[58].mxu1 %vm8166_vm6, %v12086_v14 }
 0xc0e   : > { %17287 = vmatpush3.bf16.msra.mxu1 %v17286_v8  ;;  %16602 = vmatprep.mubr.msk.f32.mxu1 %vm18106_vm8, %v22372_v40 }
 0xc0f   : > { %17288 = vmatprep.subr.bf16.mxu1 %v18105_v31 }
 0xc12   : > { %17290 = vmatpush3.bf16.msra.mxu1 %v17289_v26 }
 0xc13   : > { %17291 = vmatprep.subr.bf16.mxu1 %v18105_v31 }
 0xc16   : > { %17293 = vmatpush3.bf16.msra.mxu1 %v17292_v29 }
 0xc17   : > { %17294 = vmatprep.subr.bf16.mxu1 %v18105_v31 }
 0xc1a   : > { %17296 = vmatpush3.bf16.msra.mxu1 %v17295_v9 }
 0xc1b   : > { %17297 = vmatprep.subr.bf16.mxu1 %v18105_v31 }
 0xc1d   : > { %16603 = vmatmul.mubr.msk.f32.vlgmr.msra.gmra.mrb[58].mxu1 %vm8166_vm6, %v12169_v17 }
 0xc1e   : > { %17299 = vmatpush3.bf16.msra.mxu1 %v17298_v62  ;;  %16621 = vmatprep.mubr.msk.f32.mxu1 %vm18106_vm8, %v22372_v40 }
 0xc1f   : > { %17300 = vmatprep.subr.bf16.mxu1 %v18105_v31 }
 0xc22   : > { %17302 = vmatpush3.bf16.msra.mxu1 %v17301_v0 }
 0xc23   : > { %17303 = vmatprep.subr.bf16.mxu1 %v18105_v31 }
 0xc26   : > { %17305 = vmatpush3.bf16.msra.mxu1 %v17304_v54 }
 0xc27   : > { %17306 = vmatprep.subr.bf16.mxu1 %v18105_v31 }
 0xc2a   : > { %17308 = vmatpush3.bf16.msra.mxu1 %v17307_v23 }
 0xc2b   : > { %17309 = vmatprep.subr.bf16.mxu1 %v18105_v31 }
 0xc2d   : > { %16622 = vmatmul.mubr.msk.f32.vlgmr.msra.gmra.mrb[58].mxu1 %vm8166_vm6, %v12252_v34 }
 0xc2e   : > { %17311 = vmatpush3.bf16.msra.mxu1 %v17310_v57  ;;  %16640 = vmatprep.mubr.msk.f32.mxu1 %vm18106_vm8, %v22372_v40  ;;  %v13570_v40 = vld [vmem:[%s22024_s13 + $0x3f8] sm:$0xff] }
 0xc2f   : > { %17312 = vmatprep.subr.bf16.mxu1 %v18105_v31  ;;  %v17319_v60 = vpack.c.bf16 %v13570_v40, %v13569_v46 }
 0xc32   : > { %17314 = vmatpush3.bf16.msra.mxu1 %v17313_v49 }
 0xc33   : > { %17315 = vmatprep.subr.bf16.mxu1 %v18105_v31 }
 0xc36   : > { %17317 = vmatpush3.bf16.msra.mxu1 %v17316_v11 }
 0xc37   : > { %17318 = vmatprep.subr.bf16.mxu1 %v18105_v31 }
 0xc3a   : > { %17320 = vmatpush3.bf16.msra.mxu1 %v17319_v60 }
 0xc3d   : > { %16641 = vmatmul.mubr.msk.f32.vlgmr.msra.gmra.mrb[58].mxu1 %vm8166_vm6, %v12335_v7 }
 0xd10   : > { %v12404_v19 = vpop.f32.mrb[58].mxu1 }
 0xd11   : > { %v17357_v36 = vadd.f32 %v12404_v19, %v11081_v22  ;;  %v16642_v18 = vpop.f32.mrb[59].mxu1 }
 0xd13   : > { %12409 = vst [vmem:[%s486_s0] sm:$0x1] %v17357_v36 }
 0xd14   : > { %18052 = shalt.err (!%p18049_p3)
}
 0xd15   : > { %s18053_s16 = scalar_lea.hbm %s21969_s20, 16  ;;  %s18057_s26 = scalar_lea.hbm %s22026_s15, 32 }
 0xd16   : > { %p18054_p4 = scmp.ne.s32.totalorder %s21969_s20, %s18053_s16  ;;  %p18058_p9 = scmp.lt.u32.totalorder %s21969_s20, %s22026_s15 }
 0xd17   : > { %p18059_p10 = scmp.lt.u32.totalorder %s18057_s26, %s18053_s16  ;;  %p18061_p12 = scmp.lt.u32.totalorder %s18053_s16, %s21969_s20 }
 0xd18   : > { %p18055_p7 = pnand %p18054_p4, %p18226_p5 }
 0xd19   : > { %p18060_p11 = por %p18059_p10, %p18058_p9 }
 0xd1a   : > { %p18056_p8 = pneg %p18055_p7 }
 0xd1b   : > { %p18062_p13 = por %p18061_p12, %p18060_p11 }
 0xd1d   : > { %p18063_p0 = pnand %p18062_p13, %p18056_p8 }
 0xd1f   : > { %18066 = shalt.err (!%p18063_p0)
}
 0xd20   : > { %17996 = dma.vmem_to_hbm [thread:$0]  (%p18226_p5), %s21971_s1, 16, %s21969_s20, %s12411_s27  }
 0xd21 PF: > { %p18002_p1 = scmp.ge.s32.totalorder %s18101_s21, 2  ;;  %s12435_s2 = sand.u32 1, %s18089_s18  }
 0xd22   : > { %s12436_s17 = scalar_lea.sflag [#allocation7], %s12435_s2 }
 0xd23   : > { %p17999_p2 = pnand %p18002_p1, %p18230_p6 }
 0xd25   : > { %18084 = dma.done.wait (!%p17999_p2), %s12436_s17, 16  }
 0xd26   : > { %18086 = vsyncadd (!%p17999_p2), %s12436_s17, 4294967280  ;;  %s22373_s23 = sld [smem:[#allocation9_spill]]  ;;  %s22374_s20 = sld [smem:[#allocation10_spill]] }
 0xd27   : > { %p25_p3 = scmp.ge.s32.totalorder %s18213_s24, 4   ;;  %s22375_s18 = smov %s18093_s19 }
 0xd28   : > { %s22377_s21 = smov %s18213_s24 }
 0xd29   :  { %27 = sbr.rel (!%p25_p3) target bundleno = 7 (0x7), region = 170 }
 0xd2c   : > { %s22376_s19 = smov %s22373_s23 }
 0xd30   :  { %12440 = vsyncpa [#allocation7], 1 }
 0xd31   :  { %12442 = vsyncpa [#allocation7 + $0x1], 1 }

</bundles_post_ra>
